<compile_context>
chip_gen: v5e
topology: v5e:2x2
jax: 0.10.0
libtpu: 0.0.40
codegen_flags: <defaults>
</compile_context>

<pallas_src>
import functools

import jax
import jax.numpy as jnp
from jax import lax
from jax.experimental import pallas as pl
from jax.experimental.pallas import tpu as pltpu

DILATIONS = [(1, 6), (1, 1), (6, 21), (18, 15), (6, 3)]


# ---------------------------------------------------------------------------
# Fused DPC kernel: 5 x DepthwiseSeparableConvModule + concat + final 1x1 conv
# ---------------------------------------------------------------------------
def _dpc_kernel(x_ref, wdw_ref, dwb_ref, wpw_ref, pwb_ref, wf_ref, fb_ref,
                out_ref, hpad_ref, acc_ref, *, H, W, C, Cout, dhp):
    # Zero only the halo border rows; the centre rows are fully rewritten
    # before every read, so per-step border zeroing keeps the "parallel"
    # batch axis safe while storing ~2*dhp rows instead of the whole buffer.
    if dhp > 0:
        zrows = jnp.zeros((dhp, W, C), jnp.float32)
        hpad_ref[0:dhp, :, :] = zrows
        hpad_ref[dhp + H:dhp + 2 * dhp + H, :, :] = zrows

    # Column index used to mask the wrap-around of the W-shift rolls
    # (reproduces the conv zero padding in W).
    col = lax.broadcasted_iota(jnp.int32, (W, C), 0).reshape(1, W, C)

    def dsconv(i):
        """DepthwiseSeparableConvModule branch i applied to the hpad centre.

        Returns the branch output as (H*W, C) float32."""
        dh, dw = DILATIONS[i]
        wdw_i = wdw_ref[i]                       # (9, C); BN scale pre-folded
        acc = jnp.zeros((H, W, C), jnp.float32)
        for kx in range(3):
            ox = (kx - 1) * dw
            if abs(ox) >= W:                     # tap column fully off-image
                continue
            part = None
            for ky in range(3):
                oy = (ky - 1) * dh
                if abs(oy) >= H:                 # tap row fully off-image
                    continue
                # Leading-dim slice (cheap): in(y+oy, x); zero rows via halo.
                slab = hpad_ref[dhp + oy:dhp + oy + H, :, :]
                t = slab * wdw_i[ky * 3 + kx].reshape(1, 1, C)
                part = t if part is None else part + t
            if part is None:
                continue
            if ox == 0:
                acc = acc + part
            else:
                # W shift as an XLU roll of the flattened (H*W, C) view
                # instead of a misaligned sublane slice; columns that would
                # read outside the image are masked to zero.
                rolled = pltpu.roll(part.reshape(H * W, C),
                                    (-ox) % (H * W), 0).reshape(H, W, C)
                mask = (col < (W - ox)) if ox > 0 else (col >= (-ox))
                acc = acc + jnp.where(mask, rolled, 0.0)
        # depthwise bias (BN scale already folded into the tap weights) + ReLU
        y = jnp.maximum(acc + dwb_ref[i].reshape(1, 1, C), 0.0)
        # pointwise 1x1 conv: bf16 operands on the MXU, f32 accumulate,
        # BN scale folded into the weight columns, bias + ReLU here.
        y = jnp.dot(y.reshape(H * W, C).astype(jnp.bfloat16), wpw_ref[i],
                    preferred_element_type=jnp.float32)
        return jnp.maximum(y + pwb_ref[i], 0.0)   # (H*W, C) f32

    def contrib(b_flat, i):
        # Branch i slice of the final 1x1 conv; the channel concat is never
        # materialized (acc += b_i @ wf[i]).
        return jnp.dot(b_flat.astype(jnp.bfloat16), wf_ref[i],
                       preferred_element_type=jnp.float32)

    # x0 = convs[0](x)
    hpad_ref[dhp:dhp + H, :, :] = x_ref[0].astype(jnp.float32)
    b0 = dsconv(0)
    acc_ref[...] = contrib(b0, 0)

    # b0 stays resident in the halo scratch for branches 1-3.
    hpad_ref[dhp:dhp + H, :, :] = b0.reshape(H, W, C)
    acc_ref[...] += contrib(dsconv(1), 1)          # x1 = convs[1](x0)
    acc_ref[...] += contrib(dsconv(2), 2)          # x2 = convs[2](x0)
    b3 = dsconv(3)                                 # x3 = convs[3](x0)
    acc_ref[...] += contrib(b3, 3)

    hpad_ref[dhp:dhp + H, :, :] = b3.reshape(H, W, C)
    acc_ref[...] += contrib(dsconv(4), 4)          # x4 = convs[4](x3)

    # final ConvModule: BN scale folded into wf, bias + ReLU here.
    y = jnp.maximum(acc_ref[...] + fb_ref[...], 0.0)
    out_ref[0] = y.reshape(H, W, Cout).astype(out_ref.dtype)


# ---------------------------------------------------------------------------
# Wrapper
# ---------------------------------------------------------------------------
def dpc_forward(x, branch_params, final_params):
    """x: (N, H, W, C) NHWC.
       branch_params: 5 tuples (wdw(9,C), dw_s(1,C), dw_b(1,C), wpw(C,C), pw_s(1,C), pw_b(1,C)).
       final_params: (wf(5C,Cout), f_s(1,Cout), f_b(1,Cout))."""
    N, H, W, C = x.shape
    wf, fs, fb = final_params
    Cout = wf.shape[1]
    assert wf.shape[0] == 5 * C
    for p in branch_params:
        assert p[3].shape == (C, C), "DPC branches require Cin == Cout == C"

    # Fold inference-mode BN scales into the conv weights; ship matmul weights
    # to the kernel in bf16 (MXU operands), keep biases in f32.
    wdw = jnp.stack([p[0] * p[1] for p in branch_params])                  # (5,9,C)
    dwb = jnp.stack([p[2] for p in branch_params])                         # (5,1,C)
    wpw = jnp.stack([(p[3] * p[4]).astype(jnp.bfloat16)
                     for p in branch_params])                              # (5,C,C)
    pwb = jnp.stack([p[5] for p in branch_params])                         # (5,1,C)
    wf5 = (wf * fs).reshape(5, C, Cout).astype(jnp.bfloat16)               # (5,C,Cout)
    fb = fb.astype(jnp.float32)                                            # (1,Cout)

    # H halo = largest dilated row offset that still overlaps the image.
    # No W halo: column shifts are done with XLU rolls + masks in-kernel.
    dhp = max([d[0] for d in DILATIONS if d[0] < H] + [0])

    kern = functools.partial(_dpc_kernel, H=H, W=W, C=C, Cout=Cout, dhp=dhp)

    def full(shape):
        return pl.BlockSpec(shape, lambda n: (0,) * len(shape))

    # NOTE: the demo C=8/Cout=16 shapes under-fill the 128-lane vregs; the
    # layout is tuned for production C=Cout=256 where channels fill the lanes.
    return pl.pallas_call(
        kern,
        out_shape=jax.ShapeDtypeStruct((N, H, W, Cout), x.dtype),
        grid=(N,),
        in_specs=[
            pl.BlockSpec((1, H, W, C), lambda n: (n, 0, 0, 0)),
            full((5, 9, C)),
            full((5, 1, C)),
            full((5, C, C)),
            full((5, 1, C)),
            full((5, C, Cout)),
            full((1, Cout)),
        ],
        out_specs=pl.BlockSpec((1, H, W, Cout), lambda n: (n, 0, 0, 0)),
        scratch_shapes=[
            pltpu.VMEM((H + 2 * dhp, W, C), jnp.float32),   # H-halo image scratch
            pltpu.VMEM((H * W, Cout), jnp.float32),         # final-1x1 accumulator
        ],
        compiler_params=pltpu.CompilerParams(
            dimension_semantics=("parallel",),
            vmem_limit_bytes=64 * 1024 * 1024),
    )(x, wdw, dwb, wpw, pwb, wf5, fb)


# ---------------------------------------------------------------------------
# Deterministic parameter construction (inference BN folded to scale/bias)
# ---------------------------------------------------------------------------
def make_bn(key, c):
    k1, k2, k3, k4 = jax.random.split(key, 4)
    gamma = 1.0 + 0.1 * jax.random.normal(k1, (c,), jnp.float32)
    beta = 0.1 * jax.random.normal(k2, (c,), jnp.float32)
    mean = 0.1 * jax.random.normal(k3, (c,), jnp.float32)
    var = jnp.abs(1.0 + 0.1 * jax.random.normal(k4, (c,), jnp.float32))
    scale = gamma / jnp.sqrt(var + 1e-5)
    bias = beta - mean * scale
    return scale.reshape(1, c), bias.reshape(1, c)


def make_branch_params(key, c):
    k = jax.random.split(key, 4)
    wdw = 0.1 * jax.random.normal(k[0], (9, c), jnp.float32)      # depthwise 3x3
    dws, dwb = make_bn(k[1], c)
    wpw = 0.1 * jax.random.normal(k[2], (c, c), jnp.float32)      # pointwise 1x1
    pws, pwb = make_bn(k[3], c)
    return wdw, dws, dwb, wpw, pws, pwb


# ---------------------------------------------------------------------------
# Pure-JAX reference (for correctness check)
# ---------------------------------------------------------------------------
def ref_dsconv(x, wdw, dws, dwb, wpw, pws, pwb, dil):
    N, H, W, C = x.shape
    dh, dw = dil
    wd = wdw.reshape(3, 3, 1, C)
    y = jax.lax.conv_general_dilated(
        x, wd, window_strides=(1, 1), padding=((dh, dh), (dw, dw)),
        rhs_dilation=(dh, dw), dimension_numbers=('NHWC', 'HWIO', 'NHWC'),
        feature_group_count=C)
    y = jnp.maximum(y * dws.reshape(1, 1, 1, C) + dwb.reshape(1, 1, 1, C), 0.0)
    y = jnp.einsum('nhwc,cd->nhwd', y, wpw)
    y = jnp.maximum(y * pws.reshape(1, 1, 1, -1) + pwb.reshape(1, 1, 1, -1), 0.0)
    return y


def ref_dpc(x, branch_params, final_params):
    b0 = ref_dsconv(x,  *branch_params[0], DILATIONS[0])
    b1 = ref_dsconv(b0, *branch_params[1], DILATIONS[1])
    b2 = ref_dsconv(b0, *branch_params[2], DILATIONS[2])
    b3 = ref_dsconv(b0, *branch_params[3], DILATIONS[3])
    b4 = ref_dsconv(b3, *branch_params[4], DILATIONS[4])
    cat = jnp.concatenate([b0, b1, b2, b3, b4], axis=-1)
    wf, fs, fb = final_params
    y = jnp.einsum('nhwc,cd->nhwd', cat, wf)
    return jnp.maximum(y * fs.reshape(1, 1, 1, -1) + fb.reshape(1, 1, 1, -1), 0.0)


# ---------------------------------------------------------------------------
if __name__ == "__main__":
    key = jax.random.PRNGKey(0)
    N, C, H, W = 2, 8, 16, 16      # in_channels=8
    Cout = 16                      # out_channels=16

    keys = jax.random.split(key, 8)
    x = jax.random.normal(keys[0], (N, H, W, C), jnp.float32)

    branch_params = [make_branch_params(keys[1 + i], C) for i in range(5)]
    kf = jax.random.split(keys[6], 2)
    wf = 0.1 * jax.random.normal(kf[0], (5 * C, Cout), jnp.float32)
    fs, fb = make_bn(kf[1], Cout)
    final_params = (wf, fs, fb)

    out = jax.block_until_ready(dpc_forward(x, branch_params, final_params))
    ref = jax.block_until_ready(ref_dpc(x, branch_params, final_params))

    assert out.shape == (N, H, W, Cout)
    # Tolerance relaxed vs the all-f32 version: the pointwise and final 1x1
    # matmuls now run with bf16 operands (f32 accumulate) on the MXU.
    err = jnp.max(jnp.abs(out - ref))
    assert jnp.allclose(out, ref, atol=5e-2, rtol=5e-2), f"max abs err = {err}"

    print("KERNEL_OK")
</pallas_src>

<mosaic_0001>
module attributes {stable_mosaic.version = 11 : i64} {
  func.func @_dpc_kernel(%arg0: i32, %arg1: memref<1x16x16x8xf32, #tpu.memory_space<vmem>>, %arg2: memref<5x9x8xf32, #tpu.memory_space<vmem>>, %arg3: memref<5x1x8xf32, #tpu.memory_space<vmem>>, %arg4: memref<5x8x8xbf16, #tpu.memory_space<vmem>>, %arg5: memref<5x1x8xf32, #tpu.memory_space<vmem>>, %arg6: memref<5x8x16xbf16, #tpu.memory_space<vmem>>, %arg7: memref<1x16xf32, #tpu.memory_space<vmem>>, %arg8: memref<1x16x16x16xf32, #tpu.memory_space<vmem>>, %arg9: memref<28x16x8xf32, #tpu.memory_space<vmem>>, %arg10: memref<256x16xf32, #tpu.memory_space<vmem>>) attributes {dimension_semantics = [#tpu.dimension_semantics<parallel>], iteration_bounds = array<i64: 2>, scalar_prefetch = 0 : i64, scratch_operands = 2 : i64, tpu.core_type = #tpu.core_type<tc>, window_params = [{transform_indices = @transform_0, window_bounds = array<i64: 1, 16, 16, 8>}, {pipeline_mode = #tpu.pipeline_mode<synchronous>, transform_indices = @transform_1, window_bounds = array<i64: 5, 9, 8>}, {pipeline_mode = #tpu.pipeline_mode<synchronous>, transform_indices = @transform_2, window_bounds = array<i64: 5, 1, 8>}, {pipeline_mode = #tpu.pipeline_mode<synchronous>, transform_indices = @transform_3, window_bounds = array<i64: 5, 8, 8>}, {pipeline_mode = #tpu.pipeline_mode<synchronous>, transform_indices = @transform_4, window_bounds = array<i64: 5, 1, 8>}, {pipeline_mode = #tpu.pipeline_mode<synchronous>, transform_indices = @transform_5, window_bounds = array<i64: 5, 8, 16>}, {pipeline_mode = #tpu.pipeline_mode<synchronous>, transform_indices = @transform_6, window_bounds = array<i64: 1, 16>}, {transform_indices = @transform_7, window_bounds = array<i64: 1, 16, 16, 16>}]} {
    %cst = arith.constant 0.000000e+00 : f32
    %0 = vector.broadcast %cst : f32 to vector<6x16x8xf32>
    %c0 = arith.constant 0 : index
    %c0_0 = arith.constant 0 : index
    %c0_1 = arith.constant 0 : index
    %1 = vector.load %arg9[%c0, %c0_0, %c0_1] : memref<28x16x8xf32, #tpu.memory_space<vmem>>, vector<6x16x8xf32>
    tpu.vector_store %arg9[%c0, %c0_0, %c0_1], %0 {strides = array<i32>} : memref<28x16x8xf32, #tpu.memory_space<vmem>>, vector<6x16x8xf32>,
    %c22 = arith.constant 22 : index
    %c0_2 = arith.constant 0 : index
    %c0_3 = arith.constant 0 : index
    %2 = vector.load %arg9[%c22, %c0_2, %c0_3] : memref<28x16x8xf32, #tpu.memory_space<vmem>>, vector<6x16x8xf32>
    tpu.vector_store %arg9[%c22, %c0_2, %c0_3], %0 {strides = array<i32>} : memref<28x16x8xf32, #tpu.memory_space<vmem>>, vector<6x16x8xf32>,
    %3 = tpu.iota {dimensions = array<i32: 0>} : vector<16x8xi32>
    %4 = vector.shape_cast %3 : vector<16x8xi32> to vector<1x16x8xi32>
    %c0_4 = arith.constant 0 : index
    %c0_5 = arith.constant 0 : index
    %c0_6 = arith.constant 0 : index
    %c0_7 = arith.constant 0 : index
    %5 = vector.load %arg1[%c0_4, %c0_5, %c0_6, %c0_7] : memref<1x16x16x8xf32, #tpu.memory_space<vmem>>, vector<1x16x16x8xf32>
    %6 = vector.shape_cast %5 : vector<1x16x16x8xf32> to vector<16x16x8xf32>
    %c6 = arith.constant 6 : index
    %c0_8 = arith.constant 0 : index
    %c0_9 = arith.constant 0 : index
    %7 = vector.load %arg9[%c6, %c0_8, %c0_9] : memref<28x16x8xf32, #tpu.memory_space<vmem>>, vector<16x16x8xf32>
    tpu.vector_store %arg9[%c6, %c0_8, %c0_9], %6 {strides = array<i32>} : memref<28x16x8xf32, #tpu.memory_space<vmem>>, vector<16x16x8xf32>,
    %c0_10 = arith.constant 0 : index
    %c0_11 = arith.constant 0 : index
    %c0_12 = arith.constant 0 : index
    %8 = vector.load %arg2[%c0_10, %c0_11, %c0_12] : memref<5x9x8xf32, #tpu.memory_space<vmem>>, vector<1x9x8xf32>
    %9 = vector.shape_cast %8 : vector<1x9x8xf32> to vector<9x8xf32>
    %cst_13 = arith.constant 0.000000e+00 : f32
    %10 = vector.broadcast %cst_13 : f32 to vector<16x16x8xf32>
    %c5 = arith.constant 5 : index
    %c0_14 = arith.constant 0 : index
    %c0_15 = arith.constant 0 : index
    %11 = vector.load %arg9[%c5, %c0_14, %c0_15] : memref<28x16x8xf32, #tpu.memory_space<vmem>>, vector<16x16x8xf32>
    %12 = vector.extract_strided_slice %9 {offsets = [0, 0], sizes = [1, 8], strides = [1, 1]} : vector<9x8xf32> to vector<1x8xf32>
    %13 = vector.shape_cast %12 : vector<1x8xf32> to vector<8xf32>
    %14 = vector.shape_cast %13 : vector<8xf32> to vector<1x1x8xf32>
    %15 = vector.broadcast %14 : vector<1x1x8xf32> to vector<16x16x8xf32>
    %16 = arith.mulf %11, %15 : vector<16x16x8xf32>
    %c6_16 = arith.constant 6 : index
    %c0_17 = arith.constant 0 : index
    %c0_18 = arith.constant 0 : index
    %17 = vector.load %arg9[%c6_16, %c0_17, %c0_18] : memref<28x16x8xf32, #tpu.memory_space<vmem>>, vector<16x16x8xf32>
    %18 = vector.extract_strided_slice %9 {offsets = [3, 0], sizes = [1, 8], strides = [1, 1]} : vector<9x8xf32> to vector<1x8xf32>
    %19 = vector.shape_cast %18 : vector<1x8xf32> to vector<8xf32>
    %20 = vector.shape_cast %19 : vector<8xf32> to vector<1x1x8xf32>
    %21 = vector.broadcast %20 : vector<1x1x8xf32> to vector<16x16x8xf32>
    %22 = arith.mulf %17, %21 : vector<16x16x8xf32>
    %23 = arith.addf %16, %22 : vector<16x16x8xf32>
    %c7 = arith.constant 7 : index
    %c0_19 = arith.constant 0 : index
    %c0_20 = arith.constant 0 : index
    %24 = vector.load %arg9[%c7, %c0_19, %c0_20] : memref<28x16x8xf32, #tpu.memory_space<vmem>>, vector<16x16x8xf32>
    %25 = vector.extract_strided_slice %9 {offsets = [6, 0], sizes = [1, 8], strides = [1, 1]} : vector<9x8xf32> to vector<1x8xf32>
    %26 = vector.shape_cast %25 : vector<1x8xf32> to vector<8xf32>
    %27 = vector.shape_cast %26 : vector<8xf32> to vector<1x1x8xf32>
    %28 = vector.broadcast %27 : vector<1x1x8xf32> to vector<16x16x8xf32>
    %29 = arith.mulf %24, %28 : vector<16x16x8xf32>
    %30 = arith.addf %23, %29 : vector<16x16x8xf32>
    %31 = vector.shape_cast %30 : vector<16x16x8xf32> to vector<256x8xf32>
    %c6_i32 = arith.constant 6 : i32
    %32 = tpu.dynamic_rotate %31 by %c6_i32 dim 0 : vector<256x8xf32>, i32 -> vector<256x8xf32>
    %33 = vector.shape_cast %32 : vector<256x8xf32> to vector<16x16x8xf32>
    %c6_i32_21 = arith.constant 6 : i32
    %34 = vector.broadcast %c6_i32_21 : i32 to vector<1x16x8xi32>
    %35 = arith.cmpi sge, %4, %34 : vector<1x16x8xi32>
    %cst_22 = arith.constant 0.000000e+00 : f32
    %36 = vector.shape_cast %35 : vector<1x16x8xi1> to vector<1x16x8xi1>
    %37 = vector.broadcast %36 : vector<1x16x8xi1> to vector<16x16x8xi1>
    %38 = vector.broadcast %cst_22 : f32 to vector<16x16x8xf32>
    %39 = arith.select %37, %33, %38 : vector<16x16x8xi1>, vector<16x16x8xf32>
    %40 = arith.addf %10, %39 : vector<16x16x8xf32>
    %c5_23 = arith.constant 5 : index
    %c0_24 = arith.constant 0 : index
    %c0_25 = arith.constant 0 : index
    %41 = vector.load %arg9[%c5_23, %c0_24, %c0_25] : memref<28x16x8xf32, #tpu.memory_space<vmem>>, vector<16x16x8xf32>
    %42 = vector.extract_strided_slice %9 {offsets = [1, 0], sizes = [1, 8], strides = [1, 1]} : vector<9x8xf32> to vector<1x8xf32>
    %43 = vector.shape_cast %42 : vector<1x8xf32> to vector<8xf32>
    %44 = vector.shape_cast %43 : vector<8xf32> to vector<1x1x8xf32>
    %45 = vector.broadcast %44 : vector<1x1x8xf32> to vector<16x16x8xf32>
    %46 = arith.mulf %41, %45 : vector<16x16x8xf32>
    %c6_26 = arith.constant 6 : index
    %c0_27 = arith.constant 0 : index
    %c0_28 = arith.constant 0 : index
    %47 = vector.load %arg9[%c6_26, %c0_27, %c0_28] : memref<28x16x8xf32, #tpu.memory_space<vmem>>, vector<16x16x8xf32>
    %48 = vector.extract_strided_slice %9 {offsets = [4, 0], sizes = [1, 8], strides = [1, 1]} : vector<9x8xf32> to vector<1x8xf32>
    %49 = vector.shape_cast %48 : vector<1x8xf32> to vector<8xf32>
    %50 = vector.shape_cast %49 : vector<8xf32> to vector<1x1x8xf32>
    %51 = vector.broadcast %50 : vector<1x1x8xf32> to vector<16x16x8xf32>
    %52 = arith.mulf %47, %51 : vector<16x16x8xf32>
    %53 = arith.addf %46, %52 : vector<16x16x8xf32>
    %c7_29 = arith.constant 7 : index
    %c0_30 = arith.constant 0 : index
    %c0_31 = arith.constant 0 : index
    %54 = vector.load %arg9[%c7_29, %c0_30, %c0_31] : memref<28x16x8xf32, #tpu.memory_space<vmem>>, vector<16x16x8xf32>
    %55 = vector.extract_strided_slice %9 {offsets = [7, 0], sizes = [1, 8], strides = [1, 1]} : vector<9x8xf32> to vector<1x8xf32>
    %56 = vector.shape_cast %55 : vector<1x8xf32> to vector<8xf32>
    %57 = vector.shape_cast %56 : vector<8xf32> to vector<1x1x8xf32>
    %58 = vector.broadcast %57 : vector<1x1x8xf32> to vector<16x16x8xf32>
    %59 = arith.mulf %54, %58 : vector<16x16x8xf32>
    %60 = arith.addf %53, %59 : vector<16x16x8xf32>
    %61 = arith.addf %40, %60 : vector<16x16x8xf32>
    %c5_32 = arith.constant 5 : index
    %c0_33 = arith.constant 0 : index
    %c0_34 = arith.constant 0 : index
    %62 = vector.load %arg9[%c5_32, %c0_33, %c0_34] : memref<28x16x8xf32, #tpu.memory_space<vmem>>, vector<16x16x8xf32>
    %63 = vector.extract_strided_slice %9 {offsets = [2, 0], sizes = [1, 8], strides = [1, 1]} : vector<9x8xf32> to vector<1x8xf32>
    %64 = vector.shape_cast %63 : vector<1x8xf32> to vector<8xf32>
    %65 = vector.shape_cast %64 : vector<8xf32> to vector<1x1x8xf32>
    %66 = vector.broadcast %65 : vector<1x1x8xf32> to vector<16x16x8xf32>
    %67 = arith.mulf %62, %66 : vector<16x16x8xf32>
    %c6_35 = arith.constant 6 : index
    %c0_36 = arith.constant 0 : index
    %c0_37 = arith.constant 0 : index
    %68 = vector.load %arg9[%c6_35, %c0_36, %c0_37] : memref<28x16x8xf32, #tpu.memory_space<vmem>>, vector<16x16x8xf32>
    %69 = vector.extract_strided_slice %9 {offsets = [5, 0], sizes = [1, 8], strides = [1, 1]} : vector<9x8xf32> to vector<1x8xf32>
    %70 = vector.shape_cast %69 : vector<1x8xf32> to vector<8xf32>
    %71 = vector.shape_cast %70 : vector<8xf32> to vector<1x1x8xf32>
    %72 = vector.broadcast %71 : vector<1x1x8xf32> to vector<16x16x8xf32>
    %73 = arith.mulf %68, %72 : vector<16x16x8xf32>
    %74 = arith.addf %67, %73 : vector<16x16x8xf32>
    %c7_38 = arith.constant 7 : index
    %c0_39 = arith.constant 0 : index
    %c0_40 = arith.constant 0 : index
    %75 = vector.load %arg9[%c7_38, %c0_39, %c0_40] : memref<28x16x8xf32, #tpu.memory_space<vmem>>, vector<16x16x8xf32>
    %76 = vector.extract_strided_slice %9 {offsets = [8, 0], sizes = [1, 8], strides = [1, 1]} : vector<9x8xf32> to vector<1x8xf32>
    %77 = vector.shape_cast %76 : vector<1x8xf32> to vector<8xf32>
    %78 = vector.shape_cast %77 : vector<8xf32> to vector<1x1x8xf32>
    %79 = vector.broadcast %78 : vector<1x1x8xf32> to vector<16x16x8xf32>
    %80 = arith.mulf %75, %79 : vector<16x16x8xf32>
    %81 = arith.addf %74, %80 : vector<16x16x8xf32>
    %82 = vector.shape_cast %81 : vector<16x16x8xf32> to vector<256x8xf32>
    %c250_i32 = arith.constant 250 : i32
    %83 = tpu.dynamic_rotate %82 by %c250_i32 dim 0 : vector<256x8xf32>, i32 -> vector<256x8xf32>
    %84 = vector.shape_cast %83 : vector<256x8xf32> to vector<16x16x8xf32>
    %c10_i32 = arith.constant 10 : i32
    %85 = vector.broadcast %c10_i32 : i32 to vector<1x16x8xi32>
    %86 = arith.cmpi slt, %4, %85 : vector<1x16x8xi32>
    %cst_41 = arith.constant 0.000000e+00 : f32
    %87 = vector.shape_cast %86 : vector<1x16x8xi1> to vector<1x16x8xi1>
    %88 = vector.broadcast %87 : vector<1x16x8xi1> to vector<16x16x8xi1>
    %89 = vector.broadcast %cst_41 : f32 to vector<16x16x8xf32>
    %90 = arith.select %88, %84, %89 : vector<16x16x8xi1>, vector<16x16x8xf32>
    %91 = arith.addf %61, %90 : vector<16x16x8xf32>
    %c0_42 = arith.constant 0 : index
    %c0_43 = arith.constant 0 : index
    %c0_44 = arith.constant 0 : index
    %92 = vector.load %arg3[%c0_42, %c0_43, %c0_44] : memref<5x1x8xf32, #tpu.memory_space<vmem>>, vector<1x1x8xf32>
    %93 = vector.shape_cast %92 : vector<1x1x8xf32> to vector<1x8xf32>
    %94 = vector.shape_cast %93 : vector<1x8xf32> to vector<1x1x8xf32>
    %95 = vector.broadcast %94 : vector<1x1x8xf32> to vector<16x16x8xf32>
    %96 = arith.addf %91, %95 : vector<16x16x8xf32>
    %cst_45 = arith.constant 0.000000e+00 : f32
    %97 = vector.broadcast %cst_45 : f32 to vector<16x16x8xf32>
    %98 = arith.maximumf %96, %97 : vector<16x16x8xf32>
    %99 = vector.shape_cast %98 : vector<16x16x8xf32> to vector<256x8xf32>
    %100 = arith.truncf %99 : vector<256x8xf32> to vector<256x8xbf16>
    %c0_46 = arith.constant 0 : index
    %c0_47 = arith.constant 0 : index
    %c0_48 = arith.constant 0 : index
    %101 = vector.load %arg4[%c0_46, %c0_47, %c0_48] : memref<5x8x8xbf16, #tpu.memory_space<vmem>>, vector<1x8x8xbf16>
    %102 = vector.shape_cast %101 : vector<1x8x8xbf16> to vector<8x8xbf16>
    %cst_49 = arith.constant dense<0.000000e+00> : vector<256x8xf32>
    %103 = tpu.matmul %100, %102, %cst_49 {dimension_numbers = #tpu.dot_dimension_numbers<[1], [0], [0], [1], [0, 0, 1, 1], [], []>} : vector<256x8xbf16>, vector<8x8xbf16>, vector<256x8xf32> -> vector<256x8xf32>
    %c0_50 = arith.constant 0 : index
    %c0_51 = arith.constant 0 : index
    %c0_52 = arith.constant 0 : index
    %104 = vector.load %arg5[%c0_50, %c0_51, %c0_52] : memref<5x1x8xf32, #tpu.memory_space<vmem>>, vector<1x1x8xf32>
    %105 = vector.shape_cast %104 : vector<1x1x8xf32> to vector<1x8xf32>
    %106 = vector.broadcast %105 : vector<1x8xf32> to vector<256x8xf32>
    %107 = arith.addf %103, %106 : vector<256x8xf32>
    %cst_53 = arith.constant 0.000000e+00 : f32
    %108 = vector.broadcast %cst_53 : f32 to vector<256x8xf32>
    %109 = arith.maximumf %107, %108 : vector<256x8xf32>
    %110 = arith.truncf %109 : vector<256x8xf32> to vector<256x8xbf16>
    %c0_54 = arith.constant 0 : index
    %c0_55 = arith.constant 0 : index
    %c0_56 = arith.constant 0 : index
    %111 = vector.load %arg6[%c0_54, %c0_55, %c0_56] : memref<5x8x16xbf16, #tpu.memory_space<vmem>>, vector<1x8x16xbf16>
    %112 = vector.shape_cast %111 : vector<1x8x16xbf16> to vector<8x16xbf16>
    %cst_57 = arith.constant dense<0.000000e+00> : vector<256x16xf32>
    %113 = tpu.matmul %110, %112, %cst_57 {dimension_numbers = #tpu.dot_dimension_numbers<[1], [0], [0], [1], [0, 0, 1, 1], [], []>} : vector<256x8xbf16>, vector<8x16xbf16>, vector<256x16xf32> -> vector<256x16xf32>
    %c0_58 = arith.constant 0 : index
    %c0_59 = arith.constant 0 : index
    %114 = vector.load %arg10[%c0_58, %c0_59] : memref<256x16xf32, #tpu.memory_space<vmem>>, vector<256x16xf32>
    tpu.vector_store %arg10[%c0_58, %c0_59], %113 {strides = array<i32>} : memref<256x16xf32, #tpu.memory_space<vmem>>, vector<256x16xf32>,
    %115 = vector.shape_cast %109 : vector<256x8xf32> to vector<16x16x8xf32>
    %c6_60 = arith.constant 6 : index
    %c0_61 = arith.constant 0 : index
    %c0_62 = arith.constant 0 : index
    %116 = vector.load %arg9[%c6_60, %c0_61, %c0_62] : memref<28x16x8xf32, #tpu.memory_space<vmem>>, vector<16x16x8xf32>
    tpu.vector_store %arg9[%c6_60, %c0_61, %c0_62], %115 {strides = array<i32>} : memref<28x16x8xf32, #tpu.memory_space<vmem>>, vector<16x16x8xf32>,
    %c0_63 = arith.constant 0 : index
    %c0_64 = arith.constant 0 : index
    %117 = vector.load %arg10[%c0_63, %c0_64] : memref<256x16xf32, #tpu.memory_space<vmem>>, vector<256x16xf32>
    %c1 = arith.constant 1 : index
    %c0_65 = arith.constant 0 : index
    %c0_66 = arith.constant 0 : index
    %118 = vector.load %arg2[%c1, %c0_65, %c0_66] : memref<5x9x8xf32, #tpu.memory_space<vmem>>, vector<1x9x8xf32>
    %119 = vector.shape_cast %118 : vector<1x9x8xf32> to vector<9x8xf32>
    %cst_67 = arith.constant 0.000000e+00 : f32
    %120 = vector.broadcast %cst_67 : f32 to vector<16x16x8xf32>
    %c5_68 = arith.constant 5 : index
    %c0_69 = arith.constant 0 : index
    %c0_70 = arith.constant 0 : index
    %121 = vector.load %arg9[%c5_68, %c0_69, %c0_70] : memref<28x16x8xf32, #tpu.memory_space<vmem>>, vector<16x16x8xf32>
    %122 = vector.extract_strided_slice %119 {offsets = [0, 0], sizes = [1, 8], strides = [1, 1]} : vector<9x8xf32> to vector<1x8xf32>
    %123 = vector.shape_cast %122 : vector<1x8xf32> to vector<8xf32>
    %124 = vector.shape_cast %123 : vector<8xf32> to vector<1x1x8xf32>
    %125 = vector.broadcast %124 : vector<1x1x8xf32> to vector<16x16x8xf32>
    %126 = arith.mulf %121, %125 : vector<16x16x8xf32>
    %c6_71 = arith.constant 6 : index
    %c0_72 = arith.constant 0 : index
    %c0_73 = arith.constant 0 : index
    %127 = vector.load %arg9[%c6_71, %c0_72, %c0_73] : memref<28x16x8xf32, #tpu.memory_space<vmem>>, vector<16x16x8xf32>
    %128 = vector.extract_strided_slice %119 {offsets = [3, 0], sizes = [1, 8], strides = [1, 1]} : vector<9x8xf32> to vector<1x8xf32>
    %129 = vector.shape_cast %128 : vector<1x8xf32> to vector<8xf32>
    %130 = vector.shape_cast %129 : vector<8xf32> to vector<1x1x8xf32>
    %131 = vector.broadcast %130 : vector<1x1x8xf32> to vector<16x16x8xf32>
    %132 = arith.mulf %127, %131 : vector<16x16x8xf32>
    %133 = arith.addf %126, %132 : vector<16x16x8xf32>
    %c7_74 = arith.constant 7 : index
    %c0_75 = arith.constant 0 : index
    %c0_76 = arith.constant 0 : index
    %134 = vector.load %arg9[%c7_74, %c0_75, %c0_76] : memref<28x16x8xf32, #tpu.memory_space<vmem>>, vector<16x16x8xf32>
    %135 = vector.extract_strided_slice %119 {offsets = [6, 0], sizes = [1, 8], strides = [1, 1]} : vector<9x8xf32> to vector<1x8xf32>
    %136 = vector.shape_cast %135 : vector<1x8xf32> to vector<8xf32>
    %137 = vector.shape_cast %136 : vector<8xf32> to vector<1x1x8xf32>
    %138 = vector.broadcast %137 : vector<1x1x8xf32> to vector<16x16x8xf32>
    %139 = arith.mulf %134, %138 : vector<16x16x8xf32>
    %140 = arith.addf %133, %139 : vector<16x16x8xf32>
    %141 = vector.shape_cast %140 : vector<16x16x8xf32> to vector<256x8xf32>
    %c1_i32 = arith.constant 1 : i32
    %142 = tpu.dynamic_rotate %141 by %c1_i32 dim 0 : vector<256x8xf32>, i32 -> vector<256x8xf32>
    %143 = vector.shape_cast %142 : vector<256x8xf32> to vector<16x16x8xf32>
    %c1_i32_77 = arith.constant 1 : i32
    %144 = vector.broadcast %c1_i32_77 : i32 to vector<1x16x8xi32>
    %145 = arith.cmpi sge, %4, %144 : vector<1x16x8xi32>
    %cst_78 = arith.constant 0.000000e+00 : f32
    %146 = vector.shape_cast %145 : vector<1x16x8xi1> to vector<1x16x8xi1>
    %147 = vector.broadcast %146 : vector<1x16x8xi1> to vector<16x16x8xi1>
    %148 = vector.broadcast %cst_78 : f32 to vector<16x16x8xf32>
    %149 = arith.select %147, %143, %148 : vector<16x16x8xi1>, vector<16x16x8xf32>
    %150 = arith.addf %120, %149 : vector<16x16x8xf32>
    %c5_79 = arith.constant 5 : index
    %c0_80 = arith.constant 0 : index
    %c0_81 = arith.constant 0 : index
    %151 = vector.load %arg9[%c5_79, %c0_80, %c0_81] : memref<28x16x8xf32, #tpu.memory_space<vmem>>, vector<16x16x8xf32>
    %152 = vector.extract_strided_slice %119 {offsets = [1, 0], sizes = [1, 8], strides = [1, 1]} : vector<9x8xf32> to vector<1x8xf32>
    %153 = vector.shape_cast %152 : vector<1x8xf32> to vector<8xf32>
    %154 = vector.shape_cast %153 : vector<8xf32> to vector<1x1x8xf32>
    %155 = vector.broadcast %154 : vector<1x1x8xf32> to vector<16x16x8xf32>
    %156 = arith.mulf %151, %155 : vector<16x16x8xf32>
    %c6_82 = arith.constant 6 : index
    %c0_83 = arith.constant 0 : index
    %c0_84 = arith.constant 0 : index
    %157 = vector.load %arg9[%c6_82, %c0_83, %c0_84] : memref<28x16x8xf32, #tpu.memory_space<vmem>>, vector<16x16x8xf32>
    %158 = vector.extract_strided_slice %119 {offsets = [4, 0], sizes = [1, 8], strides = [1, 1]} : vector<9x8xf32> to vector<1x8xf32>
    %159 = vector.shape_cast %158 : vector<1x8xf32> to vector<8xf32>
    %160 = vector.shape_cast %159 : vector<8xf32> to vector<1x1x8xf32>
    %161 = vector.broadcast %160 : vector<1x1x8xf32> to vector<16x16x8xf32>
    %162 = arith.mulf %157, %161 : vector<16x16x8xf32>
    %163 = arith.addf %156, %162 : vector<16x16x8xf32>
    %c7_85 = arith.constant 7 : index
    %c0_86 = arith.constant 0 : index
    %c0_87 = arith.constant 0 : index
    %164 = vector.load %arg9[%c7_85, %c0_86, %c0_87] : memref<28x16x8xf32, #tpu.memory_space<vmem>>, vector<16x16x8xf32>
    %165 = vector.extract_strided_slice %119 {offsets = [7, 0], sizes = [1, 8], strides = [1, 1]} : vector<9x8xf32> to vector<1x8xf32>
    %166 = vector.shape_cast %165 : vector<1x8xf32> to vector<8xf32>
    %167 = vector.shape_cast %166 : vector<8xf32> to vector<1x1x8xf32>
    %168 = vector.broadcast %167 : vector<1x1x8xf32> to vector<16x16x8xf32>
    %169 = arith.mulf %164, %168 : vector<16x16x8xf32>
    %170 = arith.addf %163, %169 : vector<16x16x8xf32>
    %171 = arith.addf %150, %170 : vector<16x16x8xf32>
    %c5_88 = arith.constant 5 : index
    %c0_89 = arith.constant 0 : index
    %c0_90 = arith.constant 0 : index
    %172 = vector.load %arg9[%c5_88, %c0_89, %c0_90] : memref<28x16x8xf32, #tpu.memory_space<vmem>>, vector<16x16x8xf32>
    %173 = vector.extract_strided_slice %119 {offsets = [2, 0], sizes = [1, 8], strides = [1, 1]} : vector<9x8xf32> to vector<1x8xf32>
    %174 = vector.shape_cast %173 : vector<1x8xf32> to vector<8xf32>
    %175 = vector.shape_cast %174 : vector<8xf32> to vector<1x1x8xf32>
    %176 = vector.broadcast %175 : vector<1x1x8xf32> to vector<16x16x8xf32>
    %177 = arith.mulf %172, %176 : vector<16x16x8xf32>
    %c6_91 = arith.constant 6 : index
    %c0_92 = arith.constant 0 : index
    %c0_93 = arith.constant 0 : index
    %178 = vector.load %arg9[%c6_91, %c0_92, %c0_93] : memref<28x16x8xf32, #tpu.memory_space<vmem>>, vector<16x16x8xf32>
    %179 = vector.extract_strided_slice %119 {offsets = [5, 0], sizes = [1, 8], strides = [1, 1]} : vector<9x8xf32> to vector<1x8xf32>
    %180 = vector.shape_cast %179 : vector<1x8xf32> to vector<8xf32>
    %181 = vector.shape_cast %180 : vector<8xf32> to vector<1x1x8xf32>
    %182 = vector.broadcast %181 : vector<1x1x8xf32> to vector<16x16x8xf32>
    %183 = arith.mulf %178, %182 : vector<16x16x8xf32>
    %184 = arith.addf %177, %183 : vector<16x16x8xf32>
    %c7_94 = arith.constant 7 : index
    %c0_95 = arith.constant 0 : index
    %c0_96 = arith.constant 0 : index
    %185 = vector.load %arg9[%c7_94, %c0_95, %c0_96] : memref<28x16x8xf32, #tpu.memory_space<vmem>>, vector<16x16x8xf32>
    %186 = vector.extract_strided_slice %119 {offsets = [8, 0], sizes = [1, 8], strides = [1, 1]} : vector<9x8xf32> to vector<1x8xf32>
    %187 = vector.shape_cast %186 : vector<1x8xf32> to vector<8xf32>
    %188 = vector.shape_cast %187 : vector<8xf32> to vector<1x1x8xf32>
    %189 = vector.broadcast %188 : vector<1x1x8xf32> to vector<16x16x8xf32>
    %190 = arith.mulf %185, %189 : vector<16x16x8xf32>
    %191 = arith.addf %184, %190 : vector<16x16x8xf32>
    %192 = vector.shape_cast %191 : vector<16x16x8xf32> to vector<256x8xf32>
    %c255_i32 = arith.constant 255 : i32
    %193 = tpu.dynamic_rotate %192 by %c255_i32 dim 0 : vector<256x8xf32>, i32 -> vector<256x8xf32>
    %194 = vector.shape_cast %193 : vector<256x8xf32> to vector<16x16x8xf32>
    %c15_i32 = arith.constant 15 : i32
    %195 = vector.broadcast %c15_i32 : i32 to vector<1x16x8xi32>
    %196 = arith.cmpi slt, %4, %195 : vector<1x16x8xi32>
    %cst_97 = arith.constant 0.000000e+00 : f32
    %197 = vector.shape_cast %196 : vector<1x16x8xi1> to vector<1x16x8xi1>
    %198 = vector.broadcast %197 : vector<1x16x8xi1> to vector<16x16x8xi1>
    %199 = vector.broadcast %cst_97 : f32 to vector<16x16x8xf32>
    %200 = arith.select %198, %194, %199 : vector<16x16x8xi1>, vector<16x16x8xf32>
    %201 = arith.addf %171, %200 : vector<16x16x8xf32>
    %c1_98 = arith.constant 1 : index
    %c0_99 = arith.constant 0 : index
    %c0_100 = arith.constant 0 : index
    %202 = vector.load %arg3[%c1_98, %c0_99, %c0_100] : memref<5x1x8xf32, #tpu.memory_space<vmem>>, vector<1x1x8xf32>
    %203 = vector.shape_cast %202 : vector<1x1x8xf32> to vector<1x8xf32>
    %204 = vector.shape_cast %203 : vector<1x8xf32> to vector<1x1x8xf32>
    %205 = vector.broadcast %204 : vector<1x1x8xf32> to vector<16x16x8xf32>
    %206 = arith.addf %201, %205 : vector<16x16x8xf32>
    %cst_101 = arith.constant 0.000000e+00 : f32
    %207 = vector.broadcast %cst_101 : f32 to vector<16x16x8xf32>
    %208 = arith.maximumf %206, %207 : vector<16x16x8xf32>
    %209 = vector.shape_cast %208 : vector<16x16x8xf32> to vector<256x8xf32>
    %210 = arith.truncf %209 : vector<256x8xf32> to vector<256x8xbf16>
    %c1_102 = arith.constant 1 : index
    %c0_103 = arith.constant 0 : index
    %c0_104 = arith.constant 0 : index
    %211 = vector.load %arg4[%c1_102, %c0_103, %c0_104] : memref<5x8x8xbf16, #tpu.memory_space<vmem>>, vector<1x8x8xbf16>
    %212 = vector.shape_cast %211 : vector<1x8x8xbf16> to vector<8x8xbf16>
    %cst_105 = arith.constant dense<0.000000e+00> : vector<256x8xf32>
    %213 = tpu.matmul %210, %212, %cst_105 {dimension_numbers = #tpu.dot_dimension_numbers<[1], [0], [0], [1], [0, 0, 1, 1], [], []>} : vector<256x8xbf16>, vector<8x8xbf16>, vector<256x8xf32> -> vector<256x8xf32>
    %c1_106 = arith.constant 1 : index
    %c0_107 = arith.constant 0 : index
    %c0_108 = arith.constant 0 : index
    %214 = vector.load %arg5[%c1_106, %c0_107, %c0_108] : memref<5x1x8xf32, #tpu.memory_space<vmem>>, vector<1x1x8xf32>
    %215 = vector.shape_cast %214 : vector<1x1x8xf32> to vector<1x8xf32>
    %216 = vector.broadcast %215 : vector<1x8xf32> to vector<256x8xf32>
    %217 = arith.addf %213, %216 : vector<256x8xf32>
    %cst_109 = arith.constant 0.000000e+00 : f32
    %218 = vector.broadcast %cst_109 : f32 to vector<256x8xf32>
    %219 = arith.maximumf %217, %218 : vector<256x8xf32>
    %220 = arith.truncf %219 : vector<256x8xf32> to vector<256x8xbf16>
    %c1_110 = arith.constant 1 : index
    %c0_111 = arith.constant 0 : index
    %c0_112 = arith.constant 0 : index
    %221 = vector.load %arg6[%c1_110, %c0_111, %c0_112] : memref<5x8x16xbf16, #tpu.memory_space<vmem>>, vector<1x8x16xbf16>
    %222 = vector.shape_cast %221 : vector<1x8x16xbf16> to vector<8x16xbf16>
    %cst_113 = arith.constant dense<0.000000e+00> : vector<256x16xf32>
    %223 = tpu.matmul %220, %222, %cst_113 {dimension_numbers = #tpu.dot_dimension_numbers<[1], [0], [0], [1], [0, 0, 1, 1], [], []>} : vector<256x8xbf16>, vector<8x16xbf16>, vector<256x16xf32> -> vector<256x16xf32>
    %224 = arith.addf %117, %223 : vector<256x16xf32>
    %c0_114 = arith.constant 0 : index
    %c0_115 = arith.constant 0 : index
    %225 = vector.load %arg10[%c0_114, %c0_115] : memref<256x16xf32, #tpu.memory_space<vmem>>, vector<256x16xf32>
    tpu.vector_store %arg10[%c0_114, %c0_115], %224 {strides = array<i32>} : memref<256x16xf32, #tpu.memory_space<vmem>>, vector<256x16xf32>,
    %c0_116 = arith.constant 0 : index
    %c0_117 = arith.constant 0 : index
    %226 = vector.load %arg10[%c0_116, %c0_117] : memref<256x16xf32, #tpu.memory_space<vmem>>, vector<256x16xf32>
    %c2 = arith.constant 2 : index
    %c0_118 = arith.constant 0 : index
    %c0_119 = arith.constant 0 : index
    %227 = vector.load %arg2[%c2, %c0_118, %c0_119] : memref<5x9x8xf32, #tpu.memory_space<vmem>>, vector<1x9x8xf32>
    %228 = vector.shape_cast %227 : vector<1x9x8xf32> to vector<9x8xf32>
    %cst_120 = arith.constant 0.000000e+00 : f32
    %229 = vector.broadcast %cst_120 : f32 to vector<16x16x8xf32>
    %c0_121 = arith.constant 0 : index
    %c0_122 = arith.constant 0 : index
    %c0_123 = arith.constant 0 : index
    %230 = vector.load %arg9[%c0_121, %c0_122, %c0_123] : memref<28x16x8xf32, #tpu.memory_space<vmem>>, vector<16x16x8xf32>
    %231 = vector.extract_strided_slice %228 {offsets = [1, 0], sizes = [1, 8], strides = [1, 1]} : vector<9x8xf32> to vector<1x8xf32>
    %232 = vector.shape_cast %231 : vector<1x8xf32> to vector<8xf32>
    %233 = vector.shape_cast %232 : vector<8xf32> to vector<1x1x8xf32>
    %234 = vector.broadcast %233 : vector<1x1x8xf32> to vector<16x16x8xf32>
    %235 = arith.mulf %230, %234 : vector<16x16x8xf32>
    %c6_124 = arith.constant 6 : index
    %c0_125 = arith.constant 0 : index
    %c0_126 = arith.constant 0 : index
    %236 = vector.load %arg9[%c6_124, %c0_125, %c0_126] : memref<28x16x8xf32, #tpu.memory_space<vmem>>, vector<16x16x8xf32>
    %237 = vector.extract_strided_slice %228 {offsets = [4, 0], sizes = [1, 8], strides = [1, 1]} : vector<9x8xf32> to vector<1x8xf32>
    %238 = vector.shape_cast %237 : vector<1x8xf32> to vector<8xf32>
    %239 = vector.shape_cast %238 : vector<8xf32> to vector<1x1x8xf32>
    %240 = vector.broadcast %239 : vector<1x1x8xf32> to vector<16x16x8xf32>
    %241 = arith.mulf %236, %240 : vector<16x16x8xf32>
    %242 = arith.addf %235, %241 : vector<16x16x8xf32>
    %c12 = arith.constant 12 : index
    %c0_127 = arith.constant 0 : index
    %c0_128 = arith.constant 0 : index
    %243 = vector.load %arg9[%c12, %c0_127, %c0_128] : memref<28x16x8xf32, #tpu.memory_space<vmem>>, vector<16x16x8xf32>
    %244 = vector.extract_strided_slice %228 {offsets = [7, 0], sizes = [1, 8], strides = [1, 1]} : vector<9x8xf32> to vector<1x8xf32>
    %245 = vector.shape_cast %244 : vector<1x8xf32> to vector<8xf32>
    %246 = vector.shape_cast %245 : vector<8xf32> to vector<1x1x8xf32>
    %247 = vector.broadcast %246 : vector<1x1x8xf32> to vector<16x16x8xf32>
    %248 = arith.mulf %243, %247 : vector<16x16x8xf32>
    %249 = arith.addf %242, %248 : vector<16x16x8xf32>
    %250 = arith.addf %229, %249 : vector<16x16x8xf32>
    %c2_129 = arith.constant 2 : index
    %c0_130 = arith.constant 0 : index
    %c0_131 = arith.constant 0 : index
    %251 = vector.load %arg3[%c2_129, %c0_130, %c0_131] : memref<5x1x8xf32, #tpu.memory_space<vmem>>, vector<1x1x8xf32>
    %252 = vector.shape_cast %251 : vector<1x1x8xf32> to vector<1x8xf32>
    %253 = vector.shape_cast %252 : vector<1x8xf32> to vector<1x1x8xf32>
    %254 = vector.broadcast %253 : vector<1x1x8xf32> to vector<16x16x8xf32>
    %255 = arith.addf %250, %254 : vector<16x16x8xf32>
    %cst_132 = arith.constant 0.000000e+00 : f32
    %256 = vector.broadcast %cst_132 : f32 to vector<16x16x8xf32>
    %257 = arith.maximumf %255, %256 : vector<16x16x8xf32>
    %258 = vector.shape_cast %257 : vector<16x16x8xf32> to vector<256x8xf32>
    %259 = arith.truncf %258 : vector<256x8xf32> to vector<256x8xbf16>
    %c2_133 = arith.constant 2 : index
    %c0_134 = arith.constant 0 : index
    %c0_135 = arith.constant 0 : index
    %260 = vector.load %arg4[%c2_133, %c0_134, %c0_135] : memref<5x8x8xbf16, #tpu.memory_space<vmem>>, vector<1x8x8xbf16>
    %261 = vector.shape_cast %260 : vector<1x8x8xbf16> to vector<8x8xbf16>
    %cst_136 = arith.constant dense<0.000000e+00> : vector<256x8xf32>
    %262 = tpu.matmul %259, %261, %cst_136 {dimension_numbers = #tpu.dot_dimension_numbers<[1], [0], [0], [1], [0, 0, 1, 1], [], []>} : vector<256x8xbf16>, vector<8x8xbf16>, vector<256x8xf32> -> vector<256x8xf32>
    %c2_137 = arith.constant 2 : index
    %c0_138 = arith.constant 0 : index
    %c0_139 = arith.constant 0 : index
    %263 = vector.load %arg5[%c2_137, %c0_138, %c0_139] : memref<5x1x8xf32, #tpu.memory_space<vmem>>, vector<1x1x8xf32>
    %264 = vector.shape_cast %263 : vector<1x1x8xf32> to vector<1x8xf32>
    %265 = vector.broadcast %264 : vector<1x8xf32> to vector<256x8xf32>
    %266 = arith.addf %262, %265 : vector<256x8xf32>
    %cst_140 = arith.constant 0.000000e+00 : f32
    %267 = vector.broadcast %cst_140 : f32 to vector<256x8xf32>
    %268 = arith.maximumf %266, %267 : vector<256x8xf32>
    %269 = arith.truncf %268 : vector<256x8xf32> to vector<256x8xbf16>
    %c2_141 = arith.constant 2 : index
    %c0_142 = arith.constant 0 : index
    %c0_143 = arith.constant 0 : index
    %270 = vector.load %arg6[%c2_141, %c0_142, %c0_143] : memref<5x8x16xbf16, #tpu.memory_space<vmem>>, vector<1x8x16xbf16>
    %271 = vector.shape_cast %270 : vector<1x8x16xbf16> to vector<8x16xbf16>
    %cst_144 = arith.constant dense<0.000000e+00> : vector<256x16xf32>
    %272 = tpu.matmul %269, %271, %cst_144 {dimension_numbers = #tpu.dot_dimension_numbers<[1], [0], [0], [1], [0, 0, 1, 1], [], []>} : vector<256x8xbf16>, vector<8x16xbf16>, vector<256x16xf32> -> vector<256x16xf32>
    %273 = arith.addf %226, %272 : vector<256x16xf32>
    %c0_145 = arith.constant 0 : index
    %c0_146 = arith.constant 0 : index
    %274 = vector.load %arg10[%c0_145, %c0_146] : memref<256x16xf32, #tpu.memory_space<vmem>>, vector<256x16xf32>
    tpu.vector_store %arg10[%c0_145, %c0_146], %273 {strides = array<i32>} : memref<256x16xf32, #tpu.memory_space<vmem>>, vector<256x16xf32>,
    %c3 = arith.constant 3 : index
    %c0_147 = arith.constant 0 : index
    %c0_148 = arith.constant 0 : index
    %275 = vector.load %arg2[%c3, %c0_147, %c0_148] : memref<5x9x8xf32, #tpu.memory_space<vmem>>, vector<1x9x8xf32>
    %276 = vector.shape_cast %275 : vector<1x9x8xf32> to vector<9x8xf32>
    %cst_149 = arith.constant 0.000000e+00 : f32
    %277 = vector.broadcast %cst_149 : f32 to vector<16x16x8xf32>
    %c6_150 = arith.constant 6 : index
    %c0_151 = arith.constant 0 : index
    %c0_152 = arith.constant 0 : index
    %278 = vector.load %arg9[%c6_150, %c0_151, %c0_152] : memref<28x16x8xf32, #tpu.memory_space<vmem>>, vector<16x16x8xf32>
    %279 = vector.extract_strided_slice %276 {offsets = [3, 0], sizes = [1, 8], strides = [1, 1]} : vector<9x8xf32> to vector<1x8xf32>
    %280 = vector.shape_cast %279 : vector<1x8xf32> to vector<8xf32>
    %281 = vector.shape_cast %280 : vector<8xf32> to vector<1x1x8xf32>
    %282 = vector.broadcast %281 : vector<1x1x8xf32> to vector<16x16x8xf32>
    %283 = arith.mulf %278, %282 : vector<16x16x8xf32>
    %284 = vector.shape_cast %283 : vector<16x16x8xf32> to vector<256x8xf32>
    %c15_i32_153 = arith.constant 15 : i32
    %285 = tpu.dynamic_rotate %284 by %c15_i32_153 dim 0 : vector<256x8xf32>, i32 -> vector<256x8xf32>
    %286 = vector.shape_cast %285 : vector<256x8xf32> to vector<16x16x8xf32>
    %c15_i32_154 = arith.constant 15 : i32
    %287 = vector.broadcast %c15_i32_154 : i32 to vector<1x16x8xi32>
    %288 = arith.cmpi sge, %4, %287 : vector<1x16x8xi32>
    %cst_155 = arith.constant 0.000000e+00 : f32
    %289 = vector.shape_cast %288 : vector<1x16x8xi1> to vector<1x16x8xi1>
    %290 = vector.broadcast %289 : vector<1x16x8xi1> to vector<16x16x8xi1>
    %291 = vector.broadcast %cst_155 : f32 to vector<16x16x8xf32>
    %292 = arith.select %290, %286, %291 : vector<16x16x8xi1>, vector<16x16x8xf32>
    %293 = arith.addf %277, %292 : vector<16x16x8xf32>
    %c6_156 = arith.constant 6 : index
    %c0_157 = arith.constant 0 : index
    %c0_158 = arith.constant 0 : index
    %294 = vector.load %arg9[%c6_156, %c0_157, %c0_158] : memref<28x16x8xf32, #tpu.memory_space<vmem>>, vector<16x16x8xf32>
    %295 = vector.extract_strided_slice %276 {offsets = [4, 0], sizes = [1, 8], strides = [1, 1]} : vector<9x8xf32> to vector<1x8xf32>
    %296 = vector.shape_cast %295 : vector<1x8xf32> to vector<8xf32>
    %297 = vector.shape_cast %296 : vector<8xf32> to vector<1x1x8xf32>
    %298 = vector.broadcast %297 : vector<1x1x8xf32> to vector<16x16x8xf32>
    %299 = arith.mulf %294, %298 : vector<16x16x8xf32>
    %300 = arith.addf %293, %299 : vector<16x16x8xf32>
    %c6_159 = arith.constant 6 : index
    %c0_160 = arith.constant 0 : index
    %c0_161 = arith.constant 0 : index
    %301 = vector.load %arg9[%c6_159, %c0_160, %c0_161] : memref<28x16x8xf32, #tpu.memory_space<vmem>>, vector<16x16x8xf32>
    %302 = vector.extract_strided_slice %276 {offsets = [5, 0], sizes = [1, 8], strides = [1, 1]} : vector<9x8xf32> to vector<1x8xf32>
    %303 = vector.shape_cast %302 : vector<1x8xf32> to vector<8xf32>
    %304 = vector.shape_cast %303 : vector<8xf32> to vector<1x1x8xf32>
    %305 = vector.broadcast %304 : vector<1x1x8xf32> to vector<16x16x8xf32>
    %306 = arith.mulf %301, %305 : vector<16x16x8xf32>
    %307 = vector.shape_cast %306 : vector<16x16x8xf32> to vector<256x8xf32>
    %c241_i32 = arith.constant 241 : i32
    %308 = tpu.dynamic_rotate %307 by %c241_i32 dim 0 : vector<256x8xf32>, i32 -> vector<256x8xf32>
    %309 = vector.shape_cast %308 : vector<256x8xf32> to vector<16x16x8xf32>
    %c1_i32_162 = arith.constant 1 : i32
    %310 = vector.broadcast %c1_i32_162 : i32 to vector<1x16x8xi32>
    %311 = arith.cmpi slt, %4, %310 : vector<1x16x8xi32>
    %cst_163 = arith.constant 0.000000e+00 : f32
    %312 = vector.shape_cast %311 : vector<1x16x8xi1> to vector<1x16x8xi1>
    %313 = vector.broadcast %312 : vector<1x16x8xi1> to vector<16x16x8xi1>
    %314 = vector.broadcast %cst_163 : f32 to vector<16x16x8xf32>
    %315 = arith.select %313, %309, %314 : vector<16x16x8xi1>, vector<16x16x8xf32>
    %316 = arith.addf %300, %315 : vector<16x16x8xf32>
    %c3_164 = arith.constant 3 : index
    %c0_165 = arith.constant 0 : index
    %c0_166 = arith.constant 0 : index
    %317 = vector.load %arg3[%c3_164, %c0_165, %c0_166] : memref<5x1x8xf32, #tpu.memory_space<vmem>>, vector<1x1x8xf32>
    %318 = vector.shape_cast %317 : vector<1x1x8xf32> to vector<1x8xf32>
    %319 = vector.shape_cast %318 : vector<1x8xf32> to vector<1x1x8xf32>
    %320 = vector.broadcast %319 : vector<1x1x8xf32> to vector<16x16x8xf32>
    %321 = arith.addf %316, %320 : vector<16x16x8xf32>
    %cst_167 = arith.constant 0.000000e+00 : f32
    %322 = vector.broadcast %cst_167 : f32 to vector<16x16x8xf32>
    %323 = arith.maximumf %321, %322 : vector<16x16x8xf32>
    %324 = vector.shape_cast %323 : vector<16x16x8xf32> to vector<256x8xf32>
    %325 = arith.truncf %324 : vector<256x8xf32> to vector<256x8xbf16>
    %c3_168 = arith.constant 3 : index
    %c0_169 = arith.constant 0 : index
    %c0_170 = arith.constant 0 : index
    %326 = vector.load %arg4[%c3_168, %c0_169, %c0_170] : memref<5x8x8xbf16, #tpu.memory_space<vmem>>, vector<1x8x8xbf16>
    %327 = vector.shape_cast %326 : vector<1x8x8xbf16> to vector<8x8xbf16>
    %cst_171 = arith.constant dense<0.000000e+00> : vector<256x8xf32>
    %328 = tpu.matmul %325, %327, %cst_171 {dimension_numbers = #tpu.dot_dimension_numbers<[1], [0], [0], [1], [0, 0, 1, 1], [], []>} : vector<256x8xbf16>, vector<8x8xbf16>, vector<256x8xf32> -> vector<256x8xf32>
    %c3_172 = arith.constant 3 : index
    %c0_173 = arith.constant 0 : index
    %c0_174 = arith.constant 0 : index
    %329 = vector.load %arg5[%c3_172, %c0_173, %c0_174] : memref<5x1x8xf32, #tpu.memory_space<vmem>>, vector<1x1x8xf32>
    %330 = vector.shape_cast %329 : vector<1x1x8xf32> to vector<1x8xf32>
    %331 = vector.broadcast %330 : vector<1x8xf32> to vector<256x8xf32>
    %332 = arith.addf %328, %331 : vector<256x8xf32>
    %cst_175 = arith.constant 0.000000e+00 : f32
    %333 = vector.broadcast %cst_175 : f32 to vector<256x8xf32>
    %334 = arith.maximumf %332, %333 : vector<256x8xf32>
    %c0_176 = arith.constant 0 : index
    %c0_177 = arith.constant 0 : index
    %335 = vector.load %arg10[%c0_176, %c0_177] : memref<256x16xf32, #tpu.memory_space<vmem>>, vector<256x16xf32>
    %336 = arith.truncf %334 : vector<256x8xf32> to vector<256x8xbf16>
    %c3_178 = arith.constant 3 : index
    %c0_179 = arith.constant 0 : index
    %c0_180 = arith.constant 0 : index
    %337 = vector.load %arg6[%c3_178, %c0_179, %c0_180] : memref<5x8x16xbf16, #tpu.memory_space<vmem>>, vector<1x8x16xbf16>
    %338 = vector.shape_cast %337 : vector<1x8x16xbf16> to vector<8x16xbf16>
    %cst_181 = arith.constant dense<0.000000e+00> : vector<256x16xf32>
    %339 = tpu.matmul %336, %338, %cst_181 {dimension_numbers = #tpu.dot_dimension_numbers<[1], [0], [0], [1], [0, 0, 1, 1], [], []>} : vector<256x8xbf16>, vector<8x16xbf16>, vector<256x16xf32> -> vector<256x16xf32>
    %340 = arith.addf %335, %339 : vector<256x16xf32>
    %c0_182 = arith.constant 0 : index
    %c0_183 = arith.constant 0 : index
    %341 = vector.load %arg10[%c0_182, %c0_183] : memref<256x16xf32, #tpu.memory_space<vmem>>, vector<256x16xf32>
    tpu.vector_store %arg10[%c0_182, %c0_183], %340 {strides = array<i32>} : memref<256x16xf32, #tpu.memory_space<vmem>>, vector<256x16xf32>,
    %342 = vector.shape_cast %334 : vector<256x8xf32> to vector<16x16x8xf32>
    %c6_184 = arith.constant 6 : index
    %c0_185 = arith.constant 0 : index
    %c0_186 = arith.constant 0 : index
    %343 = vector.load %arg9[%c6_184, %c0_185, %c0_186] : memref<28x16x8xf32, #tpu.memory_space<vmem>>, vector<16x16x8xf32>
    tpu.vector_store %arg9[%c6_184, %c0_185, %c0_186], %342 {strides = array<i32>} : memref<28x16x8xf32, #tpu.memory_space<vmem>>, vector<16x16x8xf32>,
    %c0_187 = arith.constant 0 : index
    %c0_188 = arith.constant 0 : index
    %344 = vector.load %arg10[%c0_187, %c0_188] : memref<256x16xf32, #tpu.memory_space<vmem>>, vector<256x16xf32>
    %c4 = arith.constant 4 : index
    %c0_189 = arith.constant 0 : index
    %c0_190 = arith.constant 0 : index
    %345 = vector.load %arg2[%c4, %c0_189, %c0_190] : memref<5x9x8xf32, #tpu.memory_space<vmem>>, vector<1x9x8xf32>
    %346 = vector.shape_cast %345 : vector<1x9x8xf32> to vector<9x8xf32>
    %cst_191 = arith.constant 0.000000e+00 : f32
    %347 = vector.broadcast %cst_191 : f32 to vector<16x16x8xf32>
    %c0_192 = arith.constant 0 : index
    %c0_193 = arith.constant 0 : index
    %c0_194 = arith.constant 0 : index
    %348 = vector.load %arg9[%c0_192, %c0_193, %c0_194] : memref<28x16x8xf32, #tpu.memory_space<vmem>>, vector<16x16x8xf32>
    %349 = vector.extract_strided_slice %346 {offsets = [0, 0], sizes = [1, 8], strides = [1, 1]} : vector<9x8xf32> to vector<1x8xf32>
    %350 = vector.shape_cast %349 : vector<1x8xf32> to vector<8xf32>
    %351 = vector.shape_cast %350 : vector<8xf32> to vector<1x1x8xf32>
    %352 = vector.broadcast %351 : vector<1x1x8xf32> to vector<16x16x8xf32>
    %353 = arith.mulf %348, %352 : vector<16x16x8xf32>
    %c6_195 = arith.constant 6 : index
    %c0_196 = arith.constant 0 : index
    %c0_197 = arith.constant 0 : index
    %354 = vector.load %arg9[%c6_195, %c0_196, %c0_197] : memref<28x16x8xf32, #tpu.memory_space<vmem>>, vector<16x16x8xf32>
    %355 = vector.extract_strided_slice %346 {offsets = [3, 0], sizes = [1, 8], strides = [1, 1]} : vector<9x8xf32> to vector<1x8xf32>
    %356 = vector.shape_cast %355 : vector<1x8xf32> to vector<8xf32>
    %357 = vector.shape_cast %356 : vector<8xf32> to vector<1x1x8xf32>
    %358 = vector.broadcast %357 : vector<1x1x8xf32> to vector<16x16x8xf32>
    %359 = arith.mulf %354, %358 : vector<16x16x8xf32>
    %360 = arith.addf %353, %359 : vector<16x16x8xf32>
    %c12_198 = arith.constant 12 : index
    %c0_199 = arith.constant 0 : index
    %c0_200 = arith.constant 0 : index
    %361 = vector.load %arg9[%c12_198, %c0_199, %c0_200] : memref<28x16x8xf32, #tpu.memory_space<vmem>>, vector<16x16x8xf32>
    %362 = vector.extract_strided_slice %346 {offsets = [6, 0], sizes = [1, 8], strides = [1, 1]} : vector<9x8xf32> to vector<1x8xf32>
    %363 = vector.shape_cast %362 : vector<1x8xf32> to vector<8xf32>
    %364 = vector.shape_cast %363 : vector<8xf32> to vector<1x1x8xf32>
    %365 = vector.broadcast %364 : vector<1x1x8xf32> to vector<16x16x8xf32>
    %366 = arith.mulf %361, %365 : vector<16x16x8xf32>
    %367 = arith.addf %360, %366 : vector<16x16x8xf32>
    %368 = vector.shape_cast %367 : vector<16x16x8xf32> to vector<256x8xf32>
    %c3_i32 = arith.constant 3 : i32
    %369 = tpu.dynamic_rotate %368 by %c3_i32 dim 0 : vector<256x8xf32>, i32 -> vector<256x8xf32>
    %370 = vector.shape_cast %369 : vector<256x8xf32> to vector<16x16x8xf32>
    %c3_i32_201 = arith.constant 3 : i32
    %371 = vector.broadcast %c3_i32_201 : i32 to vector<1x16x8xi32>
    %372 = arith.cmpi sge, %4, %371 : vector<1x16x8xi32>
    %cst_202 = arith.constant 0.000000e+00 : f32
    %373 = vector.shape_cast %372 : vector<1x16x8xi1> to vector<1x16x8xi1>
    %374 = vector.broadcast %373 : vector<1x16x8xi1> to vector<16x16x8xi1>
    %375 = vector.broadcast %cst_202 : f32 to vector<16x16x8xf32>
    %376 = arith.select %374, %370, %375 : vector<16x16x8xi1>, vector<16x16x8xf32>
    %377 = arith.addf %347, %376 : vector<16x16x8xf32>
    %c0_203 = arith.constant 0 : index
    %c0_204 = arith.constant 0 : index
    %c0_205 = arith.constant 0 : index
    %378 = vector.load %arg9[%c0_203, %c0_204, %c0_205] : memref<28x16x8xf32, #tpu.memory_space<vmem>>, vector<16x16x8xf32>
    %379 = vector.extract_strided_slice %346 {offsets = [1, 0], sizes = [1, 8], strides = [1, 1]} : vector<9x8xf32> to vector<1x8xf32>
    %380 = vector.shape_cast %379 : vector<1x8xf32> to vector<8xf32>
    %381 = vector.shape_cast %380 : vector<8xf32> to vector<1x1x8xf32>
    %382 = vector.broadcast %381 : vector<1x1x8xf32> to vector<16x16x8xf32>
    %383 = arith.mulf %378, %382 : vector<16x16x8xf32>
    %c6_206 = arith.constant 6 : index
    %c0_207 = arith.constant 0 : index
    %c0_208 = arith.constant 0 : index
    %384 = vector.load %arg9[%c6_206, %c0_207, %c0_208] : memref<28x16x8xf32, #tpu.memory_space<vmem>>, vector<16x16x8xf32>
    %385 = vector.extract_strided_slice %346 {offsets = [4, 0], sizes = [1, 8], strides = [1, 1]} : vector<9x8xf32> to vector<1x8xf32>
    %386 = vector.shape_cast %385 : vector<1x8xf32> to vector<8xf32>
    %387 = vector.shape_cast %386 : vector<8xf32> to vector<1x1x8xf32>
    %388 = vector.broadcast %387 : vector<1x1x8xf32> to vector<16x16x8xf32>
    %389 = arith.mulf %384, %388 : vector<16x16x8xf32>
    %390 = arith.addf %383, %389 : vector<16x16x8xf32>
    %c12_209 = arith.constant 12 : index
    %c0_210 = arith.constant 0 : index
    %c0_211 = arith.constant 0 : index
    %391 = vector.load %arg9[%c12_209, %c0_210, %c0_211] : memref<28x16x8xf32, #tpu.memory_space<vmem>>, vector<16x16x8xf32>
    %392 = vector.extract_strided_slice %346 {offsets = [7, 0], sizes = [1, 8], strides = [1, 1]} : vector<9x8xf32> to vector<1x8xf32>
    %393 = vector.shape_cast %392 : vector<1x8xf32> to vector<8xf32>
    %394 = vector.shape_cast %393 : vector<8xf32> to vector<1x1x8xf32>
    %395 = vector.broadcast %394 : vector<1x1x8xf32> to vector<16x16x8xf32>
    %396 = arith.mulf %391, %395 : vector<16x16x8xf32>
    %397 = arith.addf %390, %396 : vector<16x16x8xf32>
    %398 = arith.addf %377, %397 : vector<16x16x8xf32>
    %c0_212 = arith.constant 0 : index
    %c0_213 = arith.constant 0 : index
    %c0_214 = arith.constant 0 : index
    %399 = vector.load %arg9[%c0_212, %c0_213, %c0_214] : memref<28x16x8xf32, #tpu.memory_space<vmem>>, vector<16x16x8xf32>
    %400 = vector.extract_strided_slice %346 {offsets = [2, 0], sizes = [1, 8], strides = [1, 1]} : vector<9x8xf32> to vector<1x8xf32>
    %401 = vector.shape_cast %400 : vector<1x8xf32> to vector<8xf32>
    %402 = vector.shape_cast %401 : vector<8xf32> to vector<1x1x8xf32>
    %403 = vector.broadcast %402 : vector<1x1x8xf32> to vector<16x16x8xf32>
    %404 = arith.mulf %399, %403 : vector<16x16x8xf32>
    %c6_215 = arith.constant 6 : index
    %c0_216 = arith.constant 0 : index
    %c0_217 = arith.constant 0 : index
    %405 = vector.load %arg9[%c6_215, %c0_216, %c0_217] : memref<28x16x8xf32, #tpu.memory_space<vmem>>, vector<16x16x8xf32>
    %406 = vector.extract_strided_slice %346 {offsets = [5, 0], sizes = [1, 8], strides = [1, 1]} : vector<9x8xf32> to vector<1x8xf32>
    %407 = vector.shape_cast %406 : vector<1x8xf32> to vector<8xf32>
    %408 = vector.shape_cast %407 : vector<8xf32> to vector<1x1x8xf32>
    %409 = vector.broadcast %408 : vector<1x1x8xf32> to vector<16x16x8xf32>
    %410 = arith.mulf %405, %409 : vector<16x16x8xf32>
    %411 = arith.addf %404, %410 : vector<16x16x8xf32>
    %c12_218 = arith.constant 12 : index
    %c0_219 = arith.constant 0 : index
    %c0_220 = arith.constant 0 : index
    %412 = vector.load %arg9[%c12_218, %c0_219, %c0_220] : memref<28x16x8xf32, #tpu.memory_space<vmem>>, vector<16x16x8xf32>
    %413 = vector.extract_strided_slice %346 {offsets = [8, 0], sizes = [1, 8], strides = [1, 1]} : vector<9x8xf32> to vector<1x8xf32>
    %414 = vector.shape_cast %413 : vector<1x8xf32> to vector<8xf32>
    %415 = vector.shape_cast %414 : vector<8xf32> to vector<1x1x8xf32>
    %416 = vector.broadcast %415 : vector<1x1x8xf32> to vector<16x16x8xf32>
    %417 = arith.mulf %412, %416 : vector<16x16x8xf32>
    %418 = arith.addf %411, %417 : vector<16x16x8xf32>
    %419 = vector.shape_cast %418 : vector<16x16x8xf32> to vector<256x8xf32>
    %c253_i32 = arith.constant 253 : i32
    %420 = tpu.dynamic_rotate %419 by %c253_i32 dim 0 : vector<256x8xf32>, i32 -> vector<256x8xf32>
    %421 = vector.shape_cast %420 : vector<256x8xf32> to vector<16x16x8xf32>
    %c13_i32 = arith.constant 13 : i32
    %422 = vector.broadcast %c13_i32 : i32 to vector<1x16x8xi32>
    %423 = arith.cmpi slt, %4, %422 : vector<1x16x8xi32>
    %cst_221 = arith.constant 0.000000e+00 : f32
    %424 = vector.shape_cast %423 : vector<1x16x8xi1> to vector<1x16x8xi1>
    %425 = vector.broadcast %424 : vector<1x16x8xi1> to vector<16x16x8xi1>
    %426 = vector.broadcast %cst_221 : f32 to vector<16x16x8xf32>
    %427 = arith.select %425, %421, %426 : vector<16x16x8xi1>, vector<16x16x8xf32>
    %428 = arith.addf %398, %427 : vector<16x16x8xf32>
    %c4_222 = arith.constant 4 : index
    %c0_223 = arith.constant 0 : index
    %c0_224 = arith.constant 0 : index
    %429 = vector.load %arg3[%c4_222, %c0_223, %c0_224] : memref<5x1x8xf32, #tpu.memory_space<vmem>>, vector<1x1x8xf32>
    %430 = vector.shape_cast %429 : vector<1x1x8xf32> to vector<1x8xf32>
    %431 = vector.shape_cast %430 : vector<1x8xf32> to vector<1x1x8xf32>
    %432 = vector.broadcast %431 : vector<1x1x8xf32> to vector<16x16x8xf32>
    %433 = arith.addf %428, %432 : vector<16x16x8xf32>
    %cst_225 = arith.constant 0.000000e+00 : f32
    %434 = vector.broadcast %cst_225 : f32 to vector<16x16x8xf32>
    %435 = arith.maximumf %433, %434 : vector<16x16x8xf32>
    %436 = vector.shape_cast %435 : vector<16x16x8xf32> to vector<256x8xf32>
    %437 = arith.truncf %436 : vector<256x8xf32> to vector<256x8xbf16>
    %c4_226 = arith.constant 4 : index
    %c0_227 = arith.constant 0 : index
    %c0_228 = arith.constant 0 : index
    %438 = vector.load %arg4[%c4_226, %c0_227, %c0_228] : memref<5x8x8xbf16, #tpu.memory_space<vmem>>, vector<1x8x8xbf16>
    %439 = vector.shape_cast %438 : vector<1x8x8xbf16> to vector<8x8xbf16>
    %cst_229 = arith.constant dense<0.000000e+00> : vector<256x8xf32>
    %440 = tpu.matmul %437, %439, %cst_229 {dimension_numbers = #tpu.dot_dimension_numbers<[1], [0], [0], [1], [0, 0, 1, 1], [], []>} : vector<256x8xbf16>, vector<8x8xbf16>, vector<256x8xf32> -> vector<256x8xf32>
    %c4_230 = arith.constant 4 : index
    %c0_231 = arith.constant 0 : index
    %c0_232 = arith.constant 0 : index
    %441 = vector.load %arg5[%c4_230, %c0_231, %c0_232] : memref<5x1x8xf32, #tpu.memory_space<vmem>>, vector<1x1x8xf32>
    %442 = vector.shape_cast %441 : vector<1x1x8xf32> to vector<1x8xf32>
    %443 = vector.broadcast %442 : vector<1x8xf32> to vector<256x8xf32>
    %444 = arith.addf %440, %443 : vector<256x8xf32>
    %cst_233 = arith.constant 0.000000e+00 : f32
    %445 = vector.broadcast %cst_233 : f32 to vector<256x8xf32>
    %446 = arith.maximumf %444, %445 : vector<256x8xf32>
    %447 = arith.truncf %446 : vector<256x8xf32> to vector<256x8xbf16>
    %c4_234 = arith.constant 4 : index
    %c0_235 = arith.constant 0 : index
    %c0_236 = arith.constant 0 : index
    %448 = vector.load %arg6[%c4_234, %c0_235, %c0_236] : memref<5x8x16xbf16, #tpu.memory_space<vmem>>, vector<1x8x16xbf16>
    %449 = vector.shape_cast %448 : vector<1x8x16xbf16> to vector<8x16xbf16>
    %cst_237 = arith.constant dense<0.000000e+00> : vector<256x16xf32>
    %450 = tpu.matmul %447, %449, %cst_237 {dimension_numbers = #tpu.dot_dimension_numbers<[1], [0], [0], [1], [0, 0, 1, 1], [], []>} : vector<256x8xbf16>, vector<8x16xbf16>, vector<256x16xf32> -> vector<256x16xf32>
    %451 = arith.addf %344, %450 : vector<256x16xf32>
    %c0_238 = arith.constant 0 : index
    %c0_239 = arith.constant 0 : index
    %452 = vector.load %arg10[%c0_238, %c0_239] : memref<256x16xf32, #tpu.memory_space<vmem>>, vector<256x16xf32>
    tpu.vector_store %arg10[%c0_238, %c0_239], %451 {strides = array<i32>} : memref<256x16xf32, #tpu.memory_space<vmem>>, vector<256x16xf32>,
    %c0_240 = arith.constant 0 : index
    %c0_241 = arith.constant 0 : index
    %453 = vector.load %arg10[%c0_240, %c0_241] : memref<256x16xf32, #tpu.memory_space<vmem>>, vector<256x16xf32>
    %c0_242 = arith.constant 0 : index
    %c0_243 = arith.constant 0 : index
    %454 = vector.load %arg7[%c0_242, %c0_243] : memref<1x16xf32, #tpu.memory_space<vmem>>, vector<1x16xf32>
    %455 = vector.broadcast %454 : vector<1x16xf32> to vector<256x16xf32>
    %456 = arith.addf %453, %455 : vector<256x16xf32>
    %cst_244 = arith.constant 0.000000e+00 : f32
    %457 = vector.broadcast %cst_244 : f32 to vector<256x16xf32>
    %458 = arith.maximumf %456, %457 : vector<256x16xf32>
    %459 = vector.shape_cast %458 : vector<256x16xf32> to vector<16x16x16xf32>
    %c0_245 = arith.constant 0 : index
    %c0_246 = arith.constant 0 : index
    %c0_247 = arith.constant 0 : index
    %c0_248 = arith.constant 0 : index
    %460 = vector.load %arg8[%c0_245, %c0_246, %c0_247, %c0_248] : memref<1x16x16x16xf32, #tpu.memory_space<vmem>>, vector<1x16x16x16xf32>
    %461 = vector.shape_cast %460 : vector<1x16x16x16xf32> to vector<16x16x16xf32>
    %462 = vector.shape_cast %459 : vector<16x16x16xf32> to vector<1x16x16x16xf32>
    tpu.vector_store %arg8[%c0_245, %c0_246, %c0_247, %c0_248], %462 {strides = array<i32>} : memref<1x16x16x16xf32, #tpu.memory_space<vmem>>, vector<1x16x16x16xf32>,
    return
  }
  func.func @transform_0(%arg0: i32) -> (i32, i32, i32, i32) {
    %c0_i32 = arith.constant 0 : i32
    %c0_i32_0 = arith.constant 0 : i32
    %c0_i32_1 = arith.constant 0 : i32
    %c0_i32_2 = arith.constant 0 : i32
    return %arg0, %c0_i32, %c0_i32_0, %c0_i32_1 : i32, i32, i32, i32
  }
  func.func @transform_1(%arg0: i32) -> (i32, i32, i32) {
    %c0_i32 = arith.constant 0 : i32
    %c0_i32_0 = arith.constant 0 : i32
    %c0_i32_1 = arith.constant 0 : i32
    %c0_i32_2 = arith.constant 0 : i32
    return %c0_i32, %c0_i32_0, %c0_i32_1 : i32, i32, i32
  }
  func.func @transform_2(%arg0: i32) -> (i32, i32, i32) {
    %c0_i32 = arith.constant 0 : i32
    %c0_i32_0 = arith.constant 0 : i32
    %c0_i32_1 = arith.constant 0 : i32
    %c0_i32_2 = arith.constant 0 : i32
    return %c0_i32, %c0_i32_0, %c0_i32_1 : i32, i32, i32
  }
  func.func @transform_3(%arg0: i32) -> (i32, i32, i32) {
    %c0_i32 = arith.constant 0 : i32
    %c0_i32_0 = arith.constant 0 : i32
    %c0_i32_1 = arith.constant 0 : i32
    %c0_i32_2 = arith.constant 0 : i32
    return %c0_i32, %c0_i32_0, %c0_i32_1 : i32, i32, i32
  }
  func.func @transform_4(%arg0: i32) -> (i32, i32, i32) {
    %c0_i32 = arith.constant 0 : i32
    %c0_i32_0 = arith.constant 0 : i32
    %c0_i32_1 = arith.constant 0 : i32
    %c0_i32_2 = arith.constant 0 : i32
    return %c0_i32, %c0_i32_0, %c0_i32_1 : i32, i32, i32
  }
  func.func @transform_5(%arg0: i32) -> (i32, i32, i32) {
    %c0_i32 = arith.constant 0 : i32
    %c0_i32_0 = arith.constant 0 : i32
    %c0_i32_1 = arith.constant 0 : i32
    %c0_i32_2 = arith.constant 0 : i32
    return %c0_i32, %c0_i32_0, %c0_i32_1 : i32, i32, i32
  }
  func.func @transform_6(%arg0: i32) -> (i32, i32) {
    %c0_i32 = arith.constant 0 : i32
    %c0_i32_0 = arith.constant 0 : i32
    %c0_i32_1 = arith.constant 0 : i32
    return %c0_i32, %c0_i32_0 : i32, i32
  }
  func.func @transform_7(%arg0: i32) -> (i32, i32, i32, i32) {
    %c0_i32 = arith.constant 0 : i32
    %c0_i32_0 = arith.constant 0 : i32
    %c0_i32_1 = arith.constant 0 : i32
    %c0_i32_2 = arith.constant 0 : i32
    return %arg0, %c0_i32, %c0_i32_0, %c0_i32_1 : i32, i32, i32, i32
  }
}

</mosaic_0001>

<bundles_post_ra>
// kernel: tpu_custom_call.1
= control target key start
LH: loop header
LB: loop body
LE: loop exit
PB: predicated region body
PF: predicated region fallthrough
CT: control target
= control target key end

     0   :  { %12 = vsyncpa [#allocation5], 0  ;;  %s12282_s0 = inlined_call_operand.vmem [shape: f32[2,16,16,8], index: 0, kind: input, shape index: {}]   ;;  %s12283_s1 = inlined_call_operand.vmem [shape: f32[5,9,8], index: 1, kind: input, shape index: {}]   ;;  %s12284_s2 = inlined_call_operand.vmem [shape: f32[5,1,8], index: 2, kind: input, shape index: {}]   ;;  %s12285_s3 = inlined_call_operand.vmem [shape: bf16[5,8,8], index: 3, kind: input, shape index: {}]   ;;  %s12286_s4 = inlined_call_operand.vmem [shape: f32[5,1,8], index: 4, kind: input, shape index: {}]   ;;  %s12287_s5 = inlined_call_operand.vmem [shape: bf16[5,8,16], index: 5, kind: input, shape index: {}]   ;;  %s12288_s6 = inlined_call_operand.vmem [shape: f32[1,16], index: 6, kind: input, shape index: {}]   ;;  %s12289_s7 = inlined_call_operand.hbm [shape: f32[2,16,16,16], index: 7, kind: output, shape index: {}]  }
   0x1   :  { %14 = vsyncpa [#allocation5 + $0x1], 0  ;;  %s6963_s24 = smov 0   ;;  %s6965_s25 = smov 0  }
   0x2   :  { %s6967_s26 = smov 0   ;;  %s6969_s27 = smov 0  }
   0x3 LB: > { %s6984_s28 = sadd.s32 4294967295, %s6918_s27   ;;  %s6567_s29 = sadd.s32 4294967294, %s6918_s27   ;;  %s6918_s27 = sphi %s6969_s27, %s12562_s27   ;;  %s6914_s26 = sphi %s6967_s26, %s12561_s26   ;;  %s6910_s25 = sphi %s6965_s25, %s12560_s25   ;;  %s6906_s24 = sphi %s6963_s24, %s12559_s24  }
   0x4   : > { %s6988_s30 = sadd.s32 1, %s6918_s27   ;;  %s179_s8 = sadd.s32 1, %s6914_s26 }
   0x5   : > { %s176_s9 = ssub.s32 %s6918_s27, %s6988_s30  ;;  %p189_p0 = scmp.ne.s32.totalorder %s6914_s26, %s6910_s25 }
   0x6   : > { %p177_p1 = scmp.eq.s32.totalorder %s176_s9, 0  ;;  %p190_p2 = scmp.eq.s32.totalorder %s6984_s28, 1 }
   0x7   : > { %p195_p3 = scmp.ne.s32.totalorder %s6910_s25, %s6906_s24  ;;  %p196_p4 = scmp.eq.s32.totalorder %s6567_s29, 1 }
   0x8   : > { %s6999_s10 = scalar_select %p177_p1, %s6914_s26, %s179_s8  }
   0x9   : > { %p7001_p5 = por %p190_p2, %p189_p0  ;;  %p7005_p6 = por %p196_p4, %p195_p3 }
   0xa   : > { %p6570_p7 = scmp.ge.s32.totalorder %s6918_s27, 1  ;;  %p240_p8 = scmp.lt.s32.totalorder %s6918_s27, 3 }
   0xc   : > { %p241_p9 = pnand %p6570_p7, %p240_p8 }
   0xe   : > { %244 = sbr.rel (%p241_p9) target bundleno = 1628 (0x65c), region = 48 }
  0x13   : > { %v1347_v0 = vld [vmem:[%s12285_s3] sm:$0xf]  ;;  %vm1400_vm0 = vcmask 1043456   ;;  %p272_p10 = scmp.lt.s32.totalorder %s6984_s28, 1  ;;  %vm278_vm1 = vcmask 64512   ;;  %v6920_v2 = vmov 0.0   ;;  %v304_v3 = vlaneseq }
  0x14   : > { %v1402_v1 = vsel %vm1400_vm0, %v1347_v0, 0  ;;  %289 = vst.msk [vmem:[#allocation2 + $0x50] sm:$0xff] %vm278_vm1, %v6920_v2  ;;  %v372_v4 = vld [vmem:[%s12283_s1] sm:$0xff]  ;;  %v7090_v33 = vld [vmem:[%s12283_s1 + $0x8] ss:$0 sm:$0xff]  ;;  %vm1682_vm7 = vcmask 130048  }
  0x15   : > { %1411 = vmatpush.bf16.msra.mxu0 %v1402_v1  ;;  %6763 = vmatpush.bf16.msra.mxu2 %v1402_v1  ;;  %s273_s15 = scalar_select %p272_p10, %s6984_s28, 1  ;;  %290 = vst.msk [vmem:[#allocation2 + $0x58] sm:$0xff] %vm278_vm1, %v6920_v2  ;;  %v7042_v9 = vshrl.u32 %v304_v3, 7  ;;  %v7048_v12 = vperm.slane %v372_v4, 0  ;;  %v7052_v15 = vperm.slane %v372_v4, 3  ;;  %v7054_v16 = vperm.slane %v372_v4, 6 }
  0x16   : > { %293 = vst.msk [vmem:[#allocation2 + $0x168] sm:$0xff] %vm278_vm1, %v6920_v2  ;;  %v7056_v17 = vperm.slane %v372_v4, 1  ;;  %v7059_v19 = vperm.slane %v372_v4, 4  ;;  %v7061_v20 = vperm.slane %v372_v4, 7  ;;  %v7063_v21 = vperm.slane %v372_v4, 2  ;;  %s269_s18 = sand.u32 1, %s6910_s25  }
  0x17   : > { %s6761_s16 = sshll.u32 %s273_s15, 8  ;;  %279 = vst.msk [vmem:[#allocation2] sm:$0xff] %vm278_vm1, %v6920_v2  ;;  %v7065_v22 = vperm.slane %v372_v4, 5  ;;  %v7068_v23 = vadd.s32 8, %v7042_v9  ;;  %vm667_vm2 = vcmp.lt.s32.totalorder %v7042_v9, 6  ;;  %vm1160_vm3 = vcmp.lt.s32.totalorder %v7042_v9, 2 }
  0x18   : > { %s7028_s19 = scalar_lea.vmem %s12282_s0, %s6761_s16  ;;  %280 = vst.msk [vmem:[#allocation2 + $0x8] sm:$0xff] %vm278_vm1, %v6920_v2  ;;  %vm700_vm5 = vcmp.ge.s32.totalorder %v7042_v9, 6  ;;  %vm2073_vm6 = vcmp.lt.s32.totalorder %v7042_v9, 1  ;;  %vm2566_vm8 = vcmp.lt.s32.totalorder %v7042_v9, 7  ;;  %vm2106_vm10 = vcmp.ge.s32.totalorder %v7042_v9, 1  ;;  %s6571_s21 = sshll.u32 %s269_s18, 8 }
  0x19   : > { %v307_v5 = vld [vmem:[%s7028_s19] sm:$0xff]  ;;  %v308_v6 = vld [vmem:[%s7028_s19 + $0x8] sm:$0xff]  ;;  %v309_v7 = vld [vmem:[%s7028_s19 + $0x10] sm:$0xff]  ;;  %281 = vst.msk [vmem:[#allocation2 + $0x10] sm:$0xff] %vm278_vm1, %v6920_v2  ;;  %vm1194_vm4 = vcmp.lt.s32.totalorder %v7068_v23, 10  ;;  %vm2600_vm9 = vcmp.lt.s32.totalorder %v7068_v23, 15 }
  0x1a   : > { %v310_v8 = vld [vmem:[%s7028_s19 + $0x18] sm:$0xff]  ;;  %340 = vst.msk [vmem:[#allocation2 + $0x60] sm:$0xff] %vm278_vm1, %v307_v5  ;;  %v311_v10 = vld [vmem:[%s7028_s19 + $0x20] sm:$0xff]  ;;  %v336_v11 = vld [vmem:[%s7028_s19 + $0xe8] sm:$0xff]  ;;  %vm4099_vm11 = vcmp.ge.s32.totalorder %v7068_v23, 15  ;;  %vm5275_vm12 = vcmp.lt.s32.totalorder %v7042_v9, 3 }
  0x1b   : > { %341 = vst.msk [vmem:[#allocation2 + $0x68] sm:$0xff] %vm278_vm1, %v308_v6  ;;  %v338_v13 = vld [vmem:[%s7028_s19 + $0xf8] sm:$0xff]  ;;  %v375_v14 = vld [vmem:[#allocation2 + $0x50] sm:$0xff]  ;;  %vm5802_vm13 = vcmp.lt.s32.totalorder %v7068_v23, 13  ;;  %vm5768_vm14 = vcmp.lt.s32.totalorder %v7042_v9, 5  ;;  %vm5308_vm15 = vcmp.ge.s32.totalorder %v7042_v9, 3 }
  0x1c   : > { %342 = vst.msk [vmem:[#allocation2 + $0x70] sm:$0xff] %vm278_vm1, %v309_v7  ;;  %v376_v18 = vld [vmem:[#allocation2 + $0x58] sm:$0xff]  ;;  %v408_v24 = vmul.f32 %v7048_v12, %v375_v14  ;;  %v966_v31 = vmul.f32 %v7063_v21, %v375_v14  ;;  %v771_v42 = vmul.f32 %v7056_v17, %v375_v14  ;;  %s12103_s22 = scalar_lea.vmem [#allocation4], %s6571_s21  ;;  %s6762_s8 = sshll.u32 %s6984_s28, 8 }
  0x1d   : > { %343 = vst.msk [vmem:[#allocation2 + $0x78] sm:$0xff] %vm278_vm1, %v310_v8  ;;  %v409_v26 = vmul.f32 %v7048_v12, %v376_v18  ;;  %v772_v27 = vmul.f32 %v7056_v17, %v376_v18  ;;  %v569_v30 = vld [vmem:[#allocation2 + $0x168] sm:$0xff]  ;;  %v967_v37 = vmul.f32 %v7063_v21, %v376_v18  ;;  %s6501_s14 = scalar_lea.hbm %s12289_s7, %s6762_s8  ;;  %s6502_s15 = sshll.u32 %s12103_s22, 4  ;;  %s6503_s15 = int_to_ptr.vmem [resolvable:$true] %s6502_s15 }
  0x1e   : > { %344 = vst.msk [vmem:[#allocation2 + $0x80] sm:$0xff] %vm278_vm1, %v311_v10  ;;  %v602_v56 = vmul.f32 %v7054_v16, %v569_v30  ;;  %s6504_s16 = sshll.u32 %s6501_s14, 4  ;;  %s6490_s28 = scalar_lea.sflag [#allocation5], %s269_s18  ;;  %s6505_s16 = int_to_ptr.hbm [resolvable:$true] %s6504_s16 }
  0x1f   : > { %369 = vst.msk [vmem:[#allocation2 + $0x148] sm:$0xff] %vm278_vm1, %v336_v11  ;;  %s6870_s17 = sshra.s32 %s6505_s16, 4  ;;  %s6876_s23 = scalar_lea.hbm %s12289_s7, 512  ;;  %s6871_s17 = int_to_ptr.hbm [resolvable:$true] %s6870_s17 }
  0x20   : > { %371 = vst.msk [vmem:[#allocation2 + $0x158] sm:$0xff] %vm278_vm1, %v338_v13  ;;  %p6877_p0 = scmp.lt.s32.totalorder %s6871_s17, %s12289_s7 }
  0x21   : > { %v7074_v25 = vld [vmem:[#allocation2 + $0x60] sm:$0xff]  ;;  %282 = vst.msk [vmem:[#allocation2 + $0x18] sm:$0xff] %vm278_vm1, %v6920_v2 }
  0x22   : > { %v7080_v28 = vld [vmem:[#allocation2 + $0x68] sm:$0xff]  ;;  %v473_v29 = vmul.f32 %v7052_v15, %v7074_v25  ;;  %v999_v32 = vmul.f32 %v7065_v22, %v7074_v25  ;;  %283 = vst.msk [vmem:[#allocation2 + $0x20] sm:$0xff] %vm278_vm1, %v6920_v2  ;;  %v968_v43 = vmul.f32 %v7063_v21, %v7074_v25  ;;  %v804_v51 = vmul.f32 %v7059_v19, %v7074_v25 }
  0x23   : > { %v7094_v34 = vld [vmem:[#allocation2 + $0x70] sm:$0xff]  ;;  %v474_v35 = vmul.f32 %v7052_v15, %v7080_v28  ;;  %v805_v36 = vmul.f32 %v7059_v19, %v7080_v28  ;;  %v1000_v38 = vmul.f32 %v7065_v22, %v7080_v28  ;;  %284 = vst.msk [vmem:[#allocation2 + $0x28] sm:$0xff] %vm278_vm1, %v6920_v2 }
  0x24   : > { %v505_v39 = vadd.f32 %v473_v29, %v408_v24  ;;  %v7105_v40 = vld [vmem:[#allocation2 + $0x78] sm:$0xff]  ;;  %v571_v41 = vmul.f32 %v7054_v16, %v7094_v34  ;;  %285 = vst.msk [vmem:[#allocation2 + $0x30] sm:$0xff] %vm278_vm1, %v6920_v2  ;;  %v1001_v52 = vmul.f32 %v7065_v22, %v7094_v34  ;;  %v1031_v53 = vadd.f32 %v999_v32, %v966_v31  ;;  %v7181_v31 = vld [vmem:[%s12284_s2] ss:$0 sm:$0xff] }
  0x25   : > { %v506_v44 = vadd.f32 %v474_v35, %v409_v26  ;;  %v572_v45 = vmul.f32 %v7054_v16, %v7105_v40  ;;  %v837_v46 = vadd.f32 %v805_v36, %v772_v27  ;;  %v870_v47 = vmul.f32 %v7061_v20, %v7105_v40  ;;  %286 = vst.msk [vmem:[#allocation2 + $0x38] sm:$0xff] %vm278_vm1, %v6920_v2  ;;  %v7120_v49 = vld [vmem:[#allocation2 + $0x80] sm:$0xff] }
  0x26   : > { %v406_v48 = vld [vmem:[#allocation2 + $0x148] sm:$0xff]  ;;  %v603_v50 = vadd.f32 %v571_v41, %v505_v39  ;;  %287 = vst.msk [vmem:[#allocation2 + $0x40] sm:$0xff] %vm278_vm1, %v6920_v2  ;;  %v1032_v58 = vadd.f32 %v1000_v38, %v967_v37  ;;  %v1033_v61 = vadd.f32 %v1001_v52, %v968_v43  ;;  %v1064_v62 = vmul.f32 %v7090_v33, %v7094_v34  ;;  %v321_v41 = vld [vmem:[%s7028_s19 + $0x70] sm:$0xff] }
  0x27   : > { %v439_v54 = vmul.f32 %v7048_v12, %v406_v48  ;;  %v471_v55 = vld [vmem:[#allocation2 + $0x158] sm:$0xff]  ;;  %v7130_v57 = vadd.f32 %v572_v45, %v506_v44  ;;  %288 = vst.msk [vmem:[#allocation2 + $0x48] sm:$0xff] %vm278_vm1, %v6920_v2  ;;  %v902_v0 = vadd.f32 %v870_v47, %v837_v46  ;;  %v1065_v1 = vmul.f32 %v7090_v33, %v7105_v40  ;;  %v320_v37 = vld [vmem:[%s7028_s19 + $0x68] sm:$0xff]  ;;  %v323_v47 = vld [vmem:[%s7028_s19 + $0x80] sm:$0xff] }
  0x28   : > { %v504_v59 = vmul.f32 %v7052_v15, %v471_v55  ;;  %v635_v60 = vrot.slane %v603_v50, 2  ;;  %292 = vst.msk [vmem:[#allocation2 + $0x160] sm:$0xff] %vm278_vm1, %v6920_v2  ;;  %v1066_v3 = vmul.f32 %v7090_v33, %v7120_v49  ;;  %v836_v5 = vadd.f32 %v804_v51, %v771_v42  ;;  %v322_v45 = vld [vmem:[%s7028_s19 + $0x78] sm:$0xff]  ;;  %v324_v52 = vld [vmem:[%s7028_s19 + $0x88] sm:$0xff]  ;;  %v325_v55 = vld [vmem:[%s7028_s19 + $0x90] sm:$0xff] }
  0x29   : > { %v636_v63 = vrot.slane %v7130_v57, 2  ;;  %294 = vst.msk [vmem:[#allocation2 + $0x170] sm:$0xff] %vm278_vm1, %v6920_v2  ;;  %v869_v6 = vmul.f32 %v7061_v20, %v7094_v34  ;;  %v7148_v7 = vadd.f32 %v1064_v62, %v1031_v53  ;;  %v1097_v10 = vadd.f32 %v1065_v1, %v1032_v58 }
  0x2a   : > { %v536_v4 = vadd.f32 %v504_v59, %v439_v54  ;;  %295 = vst.msk [vmem:[#allocation2 + $0x178] sm:$0xff] %vm278_vm1, %v6920_v2  ;;  %v7156_v11 = vadd.f32 %v1066_v3, %v1033_v61  ;;  %v410_v42 = vmul.f32 %v7048_v12, %v7074_v25  ;;  %v475_v43 = vmul.f32 %v7052_v15, %v7094_v34  ;;  %v327_v3 = vld [vmem:[%s7028_s19 + $0xa0] sm:$0xff] }
  0x2b   : > { %v698_v8 = vsel %vm667_vm2, %v635_v60, %v636_v63  ;;  %296 = vst.msk [vmem:[#allocation2 + $0x180] sm:$0xff] %vm278_vm1, %v6920_v2  ;;  %v1128_v14 = vrot.slane %v7148_v7, 6  ;;  %v1129_v24 = vrot.slane %v1097_v10, 6  ;;  %v901_v29 = vadd.f32 %v869_v6, %v836_v5 }
  0x2c   : > { %v7160_v13 = vadd.f32 %v602_v56, %v536_v4  ;;  %297 = vst.msk [vmem:[#allocation2 + $0x188] sm:$0xff] %vm278_vm1, %v6920_v2  ;;  %v934_v18 = vadd.f32 %v902_v0, %v698_v8  ;;  %v1130_v26 = vrot.slane %v7156_v11, 6  ;;  %v507_v48 = vadd.f32 %v475_v43, %v410_v42  ;;  %v326_v0 = vld [vmem:[%s7028_s19 + $0x98] sm:$0xff] }
  0x2d   : > { %298 = vst.msk [vmem:[#allocation2 + $0x190] sm:$0xff] %vm278_vm1, %v6920_v2  ;;  %v1191_v35 = vsel %vm1160_vm3, %v1128_v14, %v1129_v24  ;;  %v573_v50 = vmul.f32 %v7054_v16, %v7120_v49  ;;  %v411_v53 = vmul.f32 %v7080_v28, %v7048_v12  ;;  %v969_v54 = vmul.f32 %v7063_v21, %v7080_v28 }
  0x2e   : > { %v666_v27 = vrot.slane %v7160_v13, 2  ;;  %299 = vst.msk [vmem:[#allocation2 + $0x198] sm:$0xff] %vm278_vm1, %v6920_v2  ;;  %v1190_v30 = vsel %vm1160_vm3, %v1129_v24, %v1130_v26  ;;  %v773_v58 = vmul.f32 %v7056_v17, %v7074_v25  ;;  %v970_v59 = vmul.f32 %v7063_v21, %v7094_v34  ;;  %v313_v24 = vld [vmem:[%s7028_s19 + $0x30] sm:$0xff] }
  0x2f   : > { %300 = vst.msk [vmem:[#allocation2 + $0x1a0] sm:$0xff] %vm278_vm1, %v6920_v2  ;;  %v1200_v36 = vsel %vm1194_vm4, %v1190_v30, 0.0  ;;  %v7225_v56 = vadd.f32 %v573_v50, %v507_v48  ;;  %v774_v1 = vmul.f32 %v7056_v17, %v7080_v28  ;;  %v806_v25 = vmul.f32 %v7059_v19, %v7094_v34  ;;  %v312_v28 = vld [vmem:[%s7028_s19 + $0x28] sm:$0xff] }
  0x30   : > { %v699_v32 = vsel %vm667_vm2, %v666_v27, %v635_v60  ;;  %301 = vst.msk [vmem:[#allocation2 + $0x1a8] sm:$0xff] %vm278_vm1, %v6920_v2  ;;  %v1232_v39 = vadd.f32 %v1200_v36, %v934_v18  ;;  %v1002_v60 = vmul.f32 %v7065_v22, %v7105_v40  ;;  %v807_v5 = vmul.f32 %v7059_v19, %v7105_v40 }
  0x31   : > { %v706_v38 = vsel %vm700_vm5, %v699_v32, 0.0  ;;  %302 = vst.msk [vmem:[#allocation2 + $0x1b0] sm:$0xff] %vm278_vm1, %v6920_v2  ;;  %v637_v4 = vrot.slane %v7225_v56, 2  ;;  %v871_v6 = vmul.f32 %v7061_v20, %v7120_v49  ;;  %v1003_v8 = vmul.f32 %v7065_v22, %v7120_v49 }
  0x32   : > { %v933_v44 = vadd.f32 %v901_v29, %v706_v38  ;;  %303 = vst.msk [vmem:[#allocation2 + $0x1b8] sm:$0xff] %vm278_vm1, %v6920_v2  ;;  %v1268_v46 = vadd.f32 %v7181_v31, %v1232_v39  ;;  %v476_v2 = vmul.f32 %v7105_v40, %v7052_v15  ;;  %v838_v18 = vadd.f32 %v806_v25, %v773_v58  ;;  %v314_v25 = vld [vmem:[%s7028_s19 + $0x38] sm:$0xff] }
  0x33   : > { %353 = vst.msk [vmem:[#allocation2 + $0xc8] sm:$0xff] %vm278_vm1, %v320_v37  ;;  %v697_v29 = vsel %vm667_vm2, %v636_v63, %v637_v4  ;;  %v7262_v36 = vadd.f32 %v1002_v60, %v969_v54  ;;  %v328_v37 = vld [vmem:[%s7028_s19 + $0xa8] sm:$0xff]  ;;  %v7271_v42 = vadd.f32 %v1003_v8, %v970_v59  ;;  %v329_v63 = vld [vmem:[%s7028_s19 + $0xb0] sm:$0xff] }
  0x34   : > { %v1231_v51 = vadd.f32 %v1191_v35, %v933_v44  ;;  %354 = vst.msk [vmem:[#allocation2 + $0xd0] sm:$0xff] %vm278_vm1, %v321_v41  ;;  %v1300_v62 = vmax.f32 %v1268_v46, 0.0  ;;  %v7260_v35 = vadd.f32 %v476_v2, %v411_v53  ;;  %v7267_v41 = vadd.f32 %v807_v5, %v774_v1 }
  0x35   : > { %355 = vst.msk [vmem:[#allocation2 + $0xd8] sm:$0xff] %vm278_vm1, %v322_v45  ;;  %v7269_v57 = vadd.f32 %v871_v6, %v838_v18  ;;  %v315_v18 = vld [vmem:[%s7028_s19 + $0x40] sm:$0xff] }
  0x36   : > { %v1267_v61 = vadd.f32 %v7181_v31, %v1231_v51  ;;  %356 = vst.msk [vmem:[#allocation2 + $0xe0] sm:$0xff] %vm278_vm1, %v323_v47  ;;  %v7281_v47 = vsel %vm700_vm5, %v697_v29, 0.0 }
  0x37   : > { %357 = vst.msk [vmem:[#allocation2 + $0xe8] sm:$0xff] %vm278_vm1, %v324_v52 }
  0x38   : > { %v1299_v10 = vmax.f32 %v1267_v61, 0.0  ;;  %358 = vst.msk [vmem:[#allocation2 + $0xf0] sm:$0xff] %vm278_vm1, %v325_v55 }
  0x39   : > { %359 = vst.msk [vmem:[#allocation2 + $0xf8] sm:$0xff] %vm278_vm1, %v326_v0 }
  0x3a   : > { %v1331_v30 = vpack.c.bf16 %v1300_v62, %v1299_v10  ;;  %360 = vst.msk [vmem:[#allocation2 + $0x100] sm:$0xff] %vm278_vm1, %v327_v3  ;;  %v390_v32 = vld [vmem:[#allocation2 + $0xc8] sm:$0xff]  ;;  %v330_v3 = vld [vmem:[%s7028_s19 + $0xb8] sm:$0xff] }
  0x3b   : > { %v391_v38 = vld [vmem:[#allocation2 + $0xd0] sm:$0xff]  ;;  %v423_v39 = vmul.f32 %v7048_v12, %v390_v32  ;;  %345 = vst.msk [vmem:[#allocation2 + $0x88] sm:$0xff] %vm278_vm1, %v312_v28 }
  0x3c   : > { %6574 = vmatmul.msk.bf16.vlgmr.msra.gmra.mxu0 %vm278_vm1, %v1331_v30  ;;  %v392_v43 = vld [vmem:[#allocation2 + $0xd8] sm:$0xff]  ;;  %v424_v44 = vmul.f32 %v7048_v12, %v391_v38  ;;  %v787_v45 = vmul.f32 %v7056_v17, %v391_v38  ;;  %v982_v46 = vmul.f32 %v7063_v21, %v391_v38  ;;  %346 = vst.msk [vmem:[#allocation2 + $0x90] sm:$0xff] %vm278_vm1, %v313_v24  ;;  %v331_v24 = vld [vmem:[%s7028_s19 + $0xc0] sm:$0xff] }
  0x3d   : > { %v7283_v48 = vld [vmem:[#allocation2 + $0xe0] sm:$0xff]  ;;  %v425_v50 = vmul.f32 %v7048_v12, %v392_v43  ;;  %v488_v51 = vmul.f32 %v7052_v15, %v392_v43  ;;  %v788_v52 = vmul.f32 %v7056_v17, %v392_v43  ;;  %v983_v53 = vmul.f32 %v7063_v21, %v392_v43  ;;  %361 = vst.msk [vmem:[#allocation2 + $0x108] sm:$0xff] %vm278_vm1, %v328_v37 }
  0x3e   : > { %v7290_v2 = vld [vmem:[#allocation2 + $0xe8] sm:$0xff]  ;;  %v489_v54 = vmul.f32 %v7052_v15, %v7283_v48  ;;  %v820_v55 = vmul.f32 %v7059_v19, %v7283_v48  ;;  %v984_v58 = vmul.f32 %v7063_v21, %v7283_v48  ;;  %v1015_v59 = vmul.f32 %v7065_v22, %v7283_v48  ;;  %362 = vst.msk [vmem:[#allocation2 + $0x110] sm:$0xff] %vm278_vm1, %v329_v63 }
  0x3f   : > { %v7301_v60 = vld [vmem:[#allocation2 + $0xf0] sm:$0xff]  ;;  %v490_v61 = vmul.f32 %v7052_v15, %v7290_v2  ;;  %v520_v62 = vadd.f32 %v488_v51, %v423_v39  ;;  %v586_v0 = vmul.f32 %v7054_v16, %v7290_v2  ;;  %v821_v1 = vmul.f32 %v7059_v19, %v7290_v2  ;;  %347 = vst.msk [vmem:[#allocation2 + $0x98] sm:$0xff] %vm278_vm1, %v314_v25 }
  0x40   : > { %v521_v5 = vadd.f32 %v489_v54, %v424_v44  ;;  %v7311_v6 = vld [vmem:[#allocation2 + $0xf8] sm:$0xff]  ;;  %v587_v8 = vmul.f32 %v7054_v16, %v7301_v60  ;;  %v852_v10 = vadd.f32 %v820_v55, %v787_v45  ;;  %v885_v28 = vmul.f32 %v7061_v20, %v7301_v60  ;;  %348 = vst.msk [vmem:[#allocation2 + $0xa0] sm:$0xff] %vm278_vm1, %v315_v18 }
  0x41   : > { %v522_v29 = vadd.f32 %v490_v61, %v425_v50  ;;  %v588_v30 = vmul.f32 %v7054_v16, %v7311_v6  ;;  %v7322_v32 = vadd.f32 %v586_v0, %v520_v62  ;;  %v853_v37 = vadd.f32 %v821_v1, %v788_v52  ;;  %v7325_v38 = vld [vmem:[#allocation2 + $0x100] sm:$0xff]  ;;  %363 = vst.msk [vmem:[#allocation2 + $0x118] sm:$0xff] %vm278_vm1, %v330_v3 }
  0x42   : > { %v619_v39 = vadd.f32 %v587_v8, %v521_v5  ;;  %v886_v63 = vmul.f32 %v7061_v20, %v7311_v6  ;;  %v917_v43 = vadd.f32 %v885_v28, %v852_v10  ;;  %v1016_v44 = vmul.f32 %v7065_v22, %v7290_v2  ;;  %v7337_v54 = vld [vmem:[#allocation2 + $0x88] sm:$0xff]  ;;  %364 = vst.msk [vmem:[#allocation2 + $0x120] sm:$0xff] %vm278_vm1, %v331_v24 }
  0x43   : > { %v7332_v45 = vadd.f32 %v588_v30, %v522_v29  ;;  %v650_v50 = vrot.slane %v7322_v32, 2  ;;  %v1017_v51 = vmul.f32 %v7065_v22, %v7301_v60  ;;  %v1047_v52 = vadd.f32 %v1015_v59, %v982_v46  ;;  %v7365_v24 = vld [vmem:[#allocation2 + $0x90] sm:$0xff] }
  0x44   : > { %v651_v55 = vrot.slane %v619_v39, 2  ;;  %v918_v61 = vadd.f32 %v886_v63, %v853_v37  ;;  %v1048_v62 = vadd.f32 %v1016_v44, %v983_v53  ;;  %v1080_v0 = vmul.f32 %v7090_v33, %v7301_v60 }
  0x45   : > { %v652_v1 = vrot.slane %v7332_v45, 2  ;;  %v1049_v25 = vadd.f32 %v1017_v51, %v984_v58  ;;  %v1081_v3 = vmul.f32 %v7090_v33, %v7311_v6  ;;  %v1082_v5 = vmul.f32 %v7090_v33, %v7325_v38 }
  0x46   : > { %v683_v46 = vsel %vm667_vm2, %v650_v50, %v651_v55  ;;  %v7351_v59 = vadd.f32 %v1080_v0, %v1047_v52  ;;  %v574_v53 = vmul.f32 %v7054_v16, %v7337_v54  ;;  %v872_v8 = vmul.f32 %v7061_v20, %v7337_v54 }
  0x47   : > { %v682_v58 = vsel %vm667_vm2, %v651_v55, %v652_v1  ;;  %v722_v10 = vsel %vm700_vm5, %v683_v46, 0.0  ;;  %v1113_v28 = vadd.f32 %v1081_v3, %v1048_v62  ;;  %v7363_v18 = vadd.f32 %v1082_v5, %v1049_v25  ;;  %v7403_v46 = vld [vmem:[#allocation2 + $0x108] sm:$0xff] }
  0x48   : > { %v949_v29 = vadd.f32 %v917_v43, %v722_v10  ;;  %v950_v30 = vadd.f32 %v918_v61, %v682_v58  ;;  %v1144_v37 = vrot.slane %v7351_v59, 6  ;;  %v7369_v39 = vadd.f32 %v574_v53, %v7260_v35 }
  0x49   : > { %v1145_v63 = vrot.slane %v1113_v28, 6  ;;  %v1146_v44 = vrot.slane %v7363_v18, 6  ;;  %v904_v51 = vadd.f32 %v872_v8, %v7267_v41  ;;  %v935_v52 = vadd.f32 %v7269_v57, %v7281_v47 }
  0x4a   : > { %v638_v55 = vrot.slane %v7369_v39, 2  ;;  %v1067_v62 = vmul.f32 %v7090_v33, %v7337_v54  ;;  %v1068_v43 = vmul.f32 %v7090_v33, %v7365_v24  ;;  %v426_v35 = vmul.f32 %v7048_v12, %v7283_v48 }
  0x4b   : > { %v1174_v61 = vsel %vm1160_vm3, %v1145_v63, %v1146_v44  ;;  %v1175_v41 = vsel %vm1160_vm3, %v1144_v37, %v1145_v63  ;;  %v427_v57 = vmul.f32 %v7290_v2, %v7048_v12  ;;  %v491_v47 = vmul.f32 %v7052_v15, %v7301_v60 }
  0x4c   : > { %v1216_v0 = vsel %vm1194_vm4, %v1174_v61, 0.0  ;;  %v1247_v25 = vadd.f32 %v1175_v41, %v949_v29  ;;  %v696_v3 = vsel %vm667_vm2, %v637_v4, %v638_v55  ;;  %v1099_v5 = vadd.f32 %v1067_v62, %v7262_v36 }
  0x4d   : > { %v1248_v53 = vadd.f32 %v1216_v0, %v950_v30  ;;  %v936_v8 = vadd.f32 %v904_v51, %v696_v3  ;;  %v7406_v58 = vadd.f32 %v1068_v43, %v7271_v42  ;;  %v492_v10 = vmul.f32 %v7311_v6, %v7052_v15 }
  0x4e   : > { %v1283_v28 = vadd.f32 %v7181_v31, %v1247_v25  ;;  %v1131_v29 = vrot.slane %v1099_v5, 6  ;;  %v523_v63 = vadd.f32 %v491_v47, %v426_v35  ;;  %v589_v56 = vmul.f32 %v7054_v16, %v7325_v38 }
  0x4f   : > { %v1284_v4 = vadd.f32 %v7181_v31, %v1248_v53  ;;  %v1132_v36 = vrot.slane %v7406_v58, 6  ;;  %v524_v62 = vadd.f32 %v492_v10, %v427_v57  ;;  %v590_v30 = vmul.f32 %v7054_v16, %v7403_v46 }
  0x50   : > { %v1315_v42 = vmax.f32 %v1283_v28, 0.0  ;;  %v1189_v51 = vsel %vm1160_vm3, %v1130_v26, %v1131_v29  ;;  %v621_v43 = vadd.f32 %v589_v56, %v523_v63  ;;  %v789_v35 = vmul.f32 %v7056_v17, %v7283_v48  ;;  %v7447_v56 = vld [vmem:[#allocation2 + $0x110] sm:$0xff] }
  0x51   : > { %v1316_v61 = vmax.f32 %v1284_v4, 0.0  ;;  %v1188_v41 = vsel %vm1160_vm3, %v1131_v29, %v1132_v36  ;;  %v1233_v57 = vadd.f32 %v1189_v51, %v935_v52  ;;  %v7427_v47 = vadd.f32 %v590_v30, %v524_v62 }
  0x52   : > { %v1202_v0 = vsel %vm1194_vm4, %v1188_v41, 0.0  ;;  %v653_v11 = vrot.slane %v621_v43, 2  ;;  %v790_v26 = vmul.f32 %v7056_v17, %v7290_v2  ;;  %v822_v25 = vmul.f32 %v7059_v19, %v7301_v60 }
  0x53   : > { %v1339_v48 = vpack.c.bf16 %v1316_v61, %v1315_v42  ;;  %v1234_v3 = vadd.f32 %v1202_v0, %v936_v8  ;;  %v1269_v5 = vadd.f32 %v7181_v31, %v1233_v57  ;;  %v654_v53 = vrot.slane %v7427_v47, 2 }
  0x54   : > { %v681_v52 = vsel %vm667_vm2, %v652_v1, %v653_v11  ;;  %v823_v10 = vmul.f32 %v7059_v19, %v7311_v6  ;;  %v854_v28 = vadd.f32 %v822_v25, %v789_v35  ;;  %v887_v29 = vmul.f32 %v7061_v20, %v7325_v38 }
  0x55   : > { %6582 = vmatmul.msk.bf16.vlgmr.msra.gmra.mxu2 %vm278_vm1, %v1339_v48  ;;  %v1270_v8 = vadd.f32 %v7181_v31, %v1234_v3  ;;  %v1301_v63 = vmax.f32 %v1269_v5, 0.0  ;;  %v680_v45 = vsel %vm667_vm2, %v653_v11, %v654_v53  ;;  %v724_v1 = vsel %vm700_vm5, %v681_v52, 0.0  ;;  %v7469_v11 = vld [vmem:[#allocation2 + $0x98] sm:$0xff]  ;;  %v317_v52 = vld [vmem:[%s7028_s19 + $0x50] sm:$0xff] }
  0x56   : > { %v855_v4 = vadd.f32 %v823_v10, %v790_v26  ;;  %v888_v62 = vmul.f32 %v7061_v20, %v7403_v46  ;;  %v919_v30 = vadd.f32 %v887_v29, %v854_v28  ;;  %v985_v42 = vmul.f32 %v7063_v21, %v7290_v2  ;;  %v316_v26 = vld [vmem:[%s7028_s19 + $0x48] sm:$0xff]  ;;  %350 = vst.msk [vmem:[#allocation2 + $0xb0] sm:$0xff] %vm278_vm1, %v317_v52 }
  0x57   : > { %v1302_v51 = vmax.f32 %v1270_v8, 0.0  ;;  %v986_v43 = vmul.f32 %v7063_v21, %v7301_v60  ;;  %v1018_v35 = vmul.f32 %v7065_v22, %v7311_v6  ;;  %v1019_v61 = vmul.f32 %v7065_v22, %v7325_v38  ;;  %349 = vst.msk [vmem:[#allocation2 + $0xa8] sm:$0xff] %vm278_vm1, %v316_v26  ;;  %v332_v10 = vld [vmem:[%s7028_s19 + $0xc8] sm:$0xff] }
  0x58   : > { %v920_v41 = vadd.f32 %v888_v62, %v855_v4  ;;  %v951_v57 = vadd.f32 %v919_v30, %v724_v1  ;;  %v1083_v0 = vmul.f32 %v7090_v33, %v7403_v46  ;;  %v1084_v2 = vmul.f32 %v7090_v33, %v7447_v56  ;;  %365 = vst.msk [vmem:[#allocation2 + $0x128] sm:$0xff] %vm278_vm1, %v332_v10 }
  0x59   : > { %v1332_v25 = vpack.c.bf16 %v1302_v51, %v1301_v63  ;;  %v1050_v48 = vadd.f32 %v1018_v35, %v985_v42  ;;  %v1051_v3 = vadd.f32 %v1019_v61, %v986_v43  ;;  %v412_v5 = vmul.f32 %v7094_v34, %v7048_v12  ;;  %v333_v63 = vld [vmem:[%s7028_s19 + $0xd0] sm:$0xff] }
  0x5a   : > { %v952_v28 = vadd.f32 %v920_v41, %v680_v45  ;;  %v413_v29 = vmul.f32 %v7105_v40, %v7048_v12  ;;  %v477_v8 = vmul.f32 %v7120_v49, %v7052_v15  ;;  %v478_v1 = vmul.f32 %v7337_v54, %v7052_v15  ;;  %366 = vst.msk [vmem:[#allocation2 + $0x130] sm:$0xff] %vm278_vm1, %v333_v63 }
  0x5b   : > { %6575 = vmatmul.msk.bf16.gmra.mxu0 %vm278_vm1, %v1332_v25  ;;  %v1115_v4 = vadd.f32 %v1083_v0, %v1050_v48  ;;  %v7486_v62 = vadd.f32 %v1084_v2, %v1051_v3  ;;  %v575_v45 = vmul.f32 %v7054_v16, %v7365_v24  ;;  %v576_v30 = vmul.f32 %v7054_v16, %v7469_v11 }
  0x5c   : > { %v509_v42 = vadd.f32 %v477_v8, %v412_v5  ;;  %v510_v51 = vadd.f32 %v478_v1, %v413_v29  ;;  %v775_v43 = vmul.f32 %v7056_v17, %v7094_v34  ;;  %v776_v35 = vmul.f32 %v7056_v17, %v7105_v40 }
  0x5d   : > { %v1147_v61 = vrot.slane %v1115_v4, 6  ;;  %v1148_v41 = vrot.slane %v7486_v62, 6  ;;  %v808_v0 = vmul.f32 %v7059_v19, %v7120_v49  ;;  %v809_v2 = vmul.f32 %v7059_v19, %v7337_v54 }
  0x5e   : > { %v607_v26 = vadd.f32 %v575_v45, %v509_v42  ;;  %v7503_v25 = vadd.f32 %v576_v30, %v510_v51  ;;  %v873_v34 = vmul.f32 %v7061_v20, %v7365_v24  ;;  %v874_v48 = vmul.f32 %v7061_v20, %v7469_v11  ;;  %v7523_v51 = vld [vmem:[#allocation2 + $0xa0] sm:$0xff] }
  0x5f   : > { %v1172_v3 = vsel %vm1160_vm3, %v1147_v61, %v1148_v41  ;;  %v1173_v5 = vsel %vm1160_vm3, %v1146_v44, %v1147_v61  ;;  %v840_v52 = vadd.f32 %v808_v0, %v775_v43  ;;  %v841_v10 = vadd.f32 %v809_v2, %v776_v35 }
  0x60   : > { %v1218_v29 = vsel %vm1194_vm4, %v1172_v3, 0.0  ;;  %v1249_v8 = vadd.f32 %v1173_v5, %v951_v57  ;;  %v639_v1 = vrot.slane %v607_v26, 2  ;;  %v640_v63 = vrot.slane %v7503_v25, 2  ;;  %v7544_v26 = vld [vmem:[#allocation2 + $0x118] sm:$0xff] }
  0x61   : > { %v1250_v4 = vadd.f32 %v1218_v29, %v952_v28  ;;  %v905_v45 = vadd.f32 %v873_v34, %v840_v52  ;;  %v906_v30 = vadd.f32 %v874_v48, %v841_v10  ;;  %v971_v42 = vmul.f32 %v7063_v21, %v7105_v40 }
  0x62   : > { %v1285_v18 = vadd.f32 %v7181_v31, %v1249_v8  ;;  %v694_v44 = vsel %vm667_vm2, %v639_v1, %v640_v63  ;;  %v695_v57 = vsel %vm667_vm2, %v638_v55, %v639_v1  ;;  %v972_v28 = vmul.f32 %v7063_v21, %v7120_v49 }
  0x63   : > { %v1286_v43 = vadd.f32 %v7181_v31, %v1250_v4  ;;  %v710_v40 = vsel %vm700_vm5, %v695_v57, 0.0  ;;  %v938_v35 = vadd.f32 %v906_v30, %v694_v44  ;;  %v1004_v61 = vmul.f32 %v7065_v22, %v7337_v54 }
  0x64   : > { %v1317_v0 = vmax.f32 %v1285_v18, 0.0  ;;  %v937_v2 = vadd.f32 %v905_v45, %v710_v40  ;;  %v1005_v39 = vmul.f32 %v7065_v22, %v7365_v24  ;;  %v1069_v55 = vmul.f32 %v7090_v33, %v7469_v11 }
  0x65   : > { %v1318_v34 = vmax.f32 %v1286_v43, 0.0  ;;  %v1036_v48 = vadd.f32 %v1004_v61, %v971_v42  ;;  %v1070_v3 = vmul.f32 %v7090_v33, %v7523_v51  ;;  %v428_v5 = vmul.f32 %v7301_v60, %v7048_v12 }
  0x66   : > { %v1037_v52 = vadd.f32 %v1005_v39, %v972_v28  ;;  %v429_v10 = vmul.f32 %v7311_v6, %v7048_v12  ;;  %v493_v29 = vmul.f32 %v7325_v38, %v7052_v15  ;;  %v494_v8 = vmul.f32 %v7403_v46, %v7052_v15 }
  0x67   : > { %v1340_v1 = vpack.c.bf16 %v1318_v34, %v1317_v0  ;;  %v1101_v4 = vadd.f32 %v1069_v55, %v1036_v48  ;;  %v591_v45 = vmul.f32 %v7054_v16, %v7447_v56  ;;  %v592_v30 = vmul.f32 %v7054_v16, %v7544_v26 }
  0x68   : > { %v7560_v42 = vadd.f32 %v1070_v3, %v1037_v52  ;;  %v525_v18 = vadd.f32 %v493_v29, %v428_v5  ;;  %v526_v44 = vadd.f32 %v494_v8, %v429_v10  ;;  %v791_v57 = vmul.f32 %v7056_v17, %v7301_v60 }
  0x69   : > { %6583 = vmatmul.msk.bf16.gmra.mxu2 %vm278_vm1, %v1340_v1  ;;  %v1133_v28 = vrot.slane %v1101_v4, 6  ;;  %v792_v43 = vmul.f32 %v7056_v17, %v7311_v6  ;;  %v824_v40 = vmul.f32 %v7059_v19, %v7325_v38  ;;  %v825_v61 = vmul.f32 %v7059_v19, %v7403_v46 }
  0x6a   : > { %v1134_v0 = vrot.slane %v7560_v42, 6  ;;  %v623_v39 = vadd.f32 %v591_v45, %v525_v18  ;;  %v7572_v55 = vadd.f32 %v592_v30, %v526_v44  ;;  %v889_v60 = vmul.f32 %v7061_v20, %v7447_v56  ;;  %v7592_v18 = vld [vmem:[#allocation2 + $0x120] sm:$0xff] }
  0x6b   : > { %v1187_v34 = vsel %vm1160_vm3, %v1132_v36, %v1133_v28  ;;  %v856_v48 = vadd.f32 %v824_v40, %v791_v57  ;;  %v857_v3 = vadd.f32 %v825_v61, %v792_v43  ;;  %v890_v5 = vmul.f32 %v7061_v20, %v7544_v26 }
  0x6c   : > { %v1186_v52 = vsel %vm1160_vm3, %v1133_v28, %v1134_v0  ;;  %v1235_v10 = vadd.f32 %v1187_v34, %v937_v2  ;;  %v655_v29 = vrot.slane %v623_v39, 2  ;;  %v656_v8 = vrot.slane %v7572_v55, 2  ;;  %v318_v39 = vld [vmem:[%s7028_s19 + $0x58] sm:$0xff] }
  0x6d   : > { %v1204_v58 = vsel %vm1194_vm4, %v1186_v52, 0.0  ;;  %v921_v1 = vadd.f32 %v889_v60, %v856_v48  ;;  %v922_v4 = vadd.f32 %v890_v5, %v857_v3  ;;  %v987_v36 = vmul.f32 %v7063_v21, %v7311_v6  ;;  %v334_v60 = vld [vmem:[%s7028_s19 + $0xd8] sm:$0xff]  ;;  %v319_v52 = vld [vmem:[%s7028_s19 + $0x60] sm:$0xff]  ;;  %351 = vst.msk [vmem:[#allocation2 + $0xb8] sm:$0xff] %vm278_vm1, %v318_v39 }
  0x6e   : > { %v1236_v45 = vadd.f32 %v1204_v58, %v938_v35  ;;  %v1271_v30 = vadd.f32 %v7181_v31, %v1235_v10  ;;  %v678_v2 = vsel %vm667_vm2, %v655_v29, %v656_v8  ;;  %v679_v44 = vsel %vm667_vm2, %v654_v53, %v655_v29  ;;  %v7611_v53 = vld [vmem:[#allocation2 + $0xa8] sm:$0xff]  ;;  %v335_v10 = vld [vmem:[%s7028_s19 + $0xe0] sm:$0xff]  ;;  %352 = vst.msk [vmem:[#allocation2 + $0xc0] sm:$0xff] %vm278_vm1, %v319_v52 }
  0x6f   : > { %v726_v6 = vsel %vm700_vm5, %v679_v44, 0.0  ;;  %v954_v57 = vadd.f32 %v922_v4, %v678_v2  ;;  %v988_v35 = vmul.f32 %v7063_v21, %v7325_v38  ;;  %v1020_v28 = vmul.f32 %v7065_v22, %v7403_v46  ;;  %367 = vst.msk [vmem:[#allocation2 + $0x138] sm:$0xff] %vm278_vm1, %v334_v60 }
  0x70   : > { %v1272_v43 = vadd.f32 %v7181_v31, %v1236_v45  ;;  %v1303_v40 = vmax.f32 %v1271_v30, 0.0  ;;  %v953_v61 = vadd.f32 %v921_v1, %v726_v6  ;;  %v1021_v47 = vmul.f32 %v7065_v22, %v7447_v56  ;;  %368 = vst.msk [vmem:[#allocation2 + $0x140] sm:$0xff] %vm278_vm1, %v335_v10 }
  0x71   : > { %v1052_v34 = vadd.f32 %v1020_v28, %v987_v36  ;;  %v1085_v48 = vmul.f32 %v7090_v33, %v7544_v26  ;;  %v1086_v3 = vmul.f32 %v7090_v33, %v7592_v18  ;;  %v414_v5 = vmul.f32 %v7120_v49, %v7048_v12 }
  0x72   : > { %v1304_v29 = vmax.f32 %v1272_v43, 0.0  ;;  %v1053_v58 = vadd.f32 %v1021_v47, %v988_v35  ;;  %v415_v1 = vmul.f32 %v7337_v54, %v7048_v12  ;;  %v479_v4 = vmul.f32 %v7365_v24, %v7052_v15 }
  0x73   : > { %v1117_v36 = vadd.f32 %v1085_v48, %v1052_v34  ;;  %v480_v45 = vmul.f32 %v7469_v11, %v7052_v15  ;;  %v577_v30 = vmul.f32 %v7054_v16, %v7523_v51  ;;  %v578_v2 = vmul.f32 %v7054_v16, %v7611_v53 }
  0x74   : > { %v1333_v44 = vpack.c.bf16 %v1304_v29, %v1303_v40  ;;  %v7636_v6 = vadd.f32 %v1086_v3, %v1053_v58  ;;  %v511_v35 = vadd.f32 %v479_v4, %v414_v5  ;;  %v777_v28 = vmul.f32 %v7056_v17, %v7120_v49 }
  0x75   : > { %v1149_v43 = vrot.slane %v1117_v36, 6  ;;  %v512_v47 = vadd.f32 %v480_v45, %v415_v1  ;;  %v778_v39 = vmul.f32 %v7056_v17, %v7337_v54  ;;  %v810_v34 = vmul.f32 %v7059_v19, %v7365_v24 }
  0x76   : > { %6576 = vmatmul.msk.bf16.gmra.mxu0 %vm278_vm1, %v1333_v44  ;;  %v1150_v40 = vrot.slane %v7636_v6, 6  ;;  %v609_v60 = vadd.f32 %v577_v30, %v511_v35  ;;  %v811_v48 = vmul.f32 %v7059_v19, %v7469_v11  ;;  %v875_v49 = vmul.f32 %v7061_v20, %v7523_v51  ;;  %v7669_v44 = vld [vmem:[#allocation2 + $0xb0] sm:$0xff] }
  0x77   : > { %v1171_v3 = vsel %vm1160_vm3, %v1148_v41, %v1149_v43  ;;  %v7655_v5 = vadd.f32 %v578_v2, %v512_v47  ;;  %v842_v52 = vadd.f32 %v810_v34, %v777_v28  ;;  %v876_v10 = vmul.f32 %v7061_v20, %v7611_v53 }
  0x78   : > { %v1170_v29 = vsel %vm1160_vm3, %v1149_v43, %v1150_v40  ;;  %v1251_v58 = vadd.f32 %v1171_v3, %v953_v61  ;;  %v641_v1 = vrot.slane %v609_v60, 2  ;;  %v843_v4 = vadd.f32 %v811_v48, %v778_v39  ;;  %v7692_v3 = vld [vmem:[#allocation2 + $0x128] sm:$0xff] }
  0x79   : > { %v1220_v62 = vsel %vm1194_vm4, %v1170_v29, 0.0  ;;  %v642_v36 = vrot.slane %v7655_v5, 2  ;;  %v907_v41 = vadd.f32 %v875_v49, %v842_v52  ;;  %v973_v45 = vmul.f32 %v7063_v21, %v7337_v54 }
  0x7a   : > { %v1252_v30 = vadd.f32 %v1220_v62, %v954_v57  ;;  %v1287_v2 = vadd.f32 %v7181_v31, %v1251_v58  ;;  %v693_v61 = vsel %vm667_vm2, %v640_v63, %v641_v1  ;;  %v908_v35 = vadd.f32 %v876_v10, %v843_v4 }
  0x7b   : > { %v692_v28 = vsel %vm667_vm2, %v641_v1, %v642_v36  ;;  %v712_v43 = vsel %vm700_vm5, %v693_v61, 0.0  ;;  %v974_v54 = vmul.f32 %v7063_v21, %v7365_v24  ;;  %v1006_v57 = vmul.f32 %v7065_v22, %v7469_v11 }
  0x7c   : > { %v1288_v25 = vadd.f32 %v7181_v31, %v1252_v30  ;;  %v1319_v47 = vmax.f32 %v1287_v2, 0.0  ;;  %v939_v39 = vadd.f32 %v907_v41, %v712_v43  ;;  %v940_v63 = vadd.f32 %v908_v35, %v692_v28 }
  0x7d   : > { %v1007_v34 = vmul.f32 %v7065_v22, %v7523_v51  ;;  %v1038_v60 = vadd.f32 %v1006_v57, %v973_v45  ;;  %v1071_v48 = vmul.f32 %v7090_v33, %v7611_v53  ;;  %v1072_v49 = vmul.f32 %v7090_v33, %v7669_v44 }
  0x7e   : > { %v1320_v52 = vmax.f32 %v1288_v25, 0.0  ;;  %v430_v10 = vmul.f32 %v7325_v38, %v7048_v12  ;;  %v431_v29 = vmul.f32 %v7403_v46, %v7048_v12  ;;  %v495_v58 = vmul.f32 %v7447_v56, %v7052_v15 }
  0x7f   : > { %v1039_v1 = vadd.f32 %v1007_v34, %v974_v54  ;;  %v1103_v4 = vadd.f32 %v1071_v48, %v1038_v60  ;;  %v496_v62 = vmul.f32 %v7544_v26, %v7052_v15  ;;  %v593_v41 = vmul.f32 %v7054_v16, %v7592_v18 }
  0x80   : > { %v1341_v45 = vpack.c.bf16 %v1320_v52, %v1319_v47  ;;  %v527_v30 = vadd.f32 %v495_v58, %v430_v10  ;;  %v594_v2 = vmul.f32 %v7054_v16, %v7692_v3  ;;  %v793_v61 = vmul.f32 %v7056_v17, %v7325_v38 }
  0x81   : > { %v7708_v35 = vadd.f32 %v1072_v49, %v1039_v1  ;;  %v1135_v28 = vrot.slane %v1103_v4, 6  ;;  %v528_v43 = vadd.f32 %v496_v62, %v431_v29  ;;  %v794_v54 = vmul.f32 %v7056_v17, %v7403_v46 }
  0x82   : > { %6584 = vmatmul.msk.bf16.gmra.mxu2 %vm278_vm1, %v1341_v45  ;;  %v625_v57 = vadd.f32 %v593_v41, %v527_v30  ;;  %v826_v25 = vmul.f32 %v7059_v19, %v7447_v56  ;;  %v827_v47 = vmul.f32 %v7059_v19, %v7544_v26  ;;  %v891_v34 = vmul.f32 %v7061_v20, %v7592_v18  ;;  %v7740_v41 = vld [vmem:[#allocation2 + $0x130] sm:$0xff] }
  0x83   : > { %v1136_v38 = vrot.slane %v7708_v35, 6  ;;  %v1185_v60 = vsel %vm1160_vm3, %v1134_v0, %v1135_v28  ;;  %v7724_v48 = vadd.f32 %v594_v2, %v528_v43  ;;  %v892_v49 = vmul.f32 %v7061_v20, %v7692_v3 }
  0x84   : > { %v1237_v52 = vadd.f32 %v1185_v60, %v939_v39  ;;  %v657_v10 = vrot.slane %v625_v57, 2  ;;  %v858_v29 = vadd.f32 %v826_v25, %v793_v61  ;;  %v859_v58 = vadd.f32 %v827_v47, %v794_v54 }
  0x85   : > { %v1184_v1 = vsel %vm1160_vm3, %v1135_v28, %v1136_v38  ;;  %v658_v4 = vrot.slane %v7724_v48, 2  ;;  %v989_v42 = vmul.f32 %v7063_v21, %v7403_v46  ;;  %v990_v0 = vmul.f32 %v7063_v21, %v7447_v56 }
  0x86   : > { %v1206_v62 = vsel %vm1194_vm4, %v1184_v1, 0.0  ;;  %v1273_v39 = vadd.f32 %v7181_v31, %v1237_v52  ;;  %v677_v45 = vsel %vm667_vm2, %v656_v8, %v657_v10  ;;  %v923_v30 = vadd.f32 %v891_v34, %v858_v29  ;;  %v7761_v34 = vld [vmem:[#allocation2 + $0xb8] sm:$0xff]  ;;  %v337_v29 = vld [vmem:[%s7028_s19 + $0xf0] sm:$0xff]  ;;  %s6872_s19 = scalar_lea.hbm %s6871_s17, 256 }
  0x87   : > { %v1238_v2 = vadd.f32 %v1206_v62, %v940_v63  ;;  %v676_v46 = vsel %vm667_vm2, %v657_v10, %v658_v4  ;;  %v728_v61 = vsel %vm700_vm5, %v677_v45, 0.0  ;;  %v924_v28 = vadd.f32 %v892_v49, %v859_v58  ;;  %370 = vst.msk [vmem:[#allocation2 + $0x150] sm:$0xff] %vm278_vm1, %v337_v29  ;;  %p6873_p11 = scmp.ne.s32.totalorder %s6871_s17, %s6872_s19  ;;  %p6878_p1 = scmp.lt.s32.totalorder %s6876_s23, %s6872_s19 }
  0x88   : > { %v1305_v43 = vmax.f32 %v1273_v39, 0.0  ;;  %v955_v54 = vadd.f32 %v923_v30, %v728_v61  ;;  %v1022_v55 = vmul.f32 %v7065_v22, %v7544_v26  ;;  %v1023_v8 = vmul.f32 %v7065_v22, %v7592_v18 }
  0x89   : > { %v1274_v63 = vadd.f32 %v7181_v31, %v1238_v2  ;;  %v956_v57 = vadd.f32 %v924_v28, %v676_v46  ;;  %v1087_v25 = vmul.f32 %v7090_v33, %v7692_v3  ;;  %v1088_v47 = vmul.f32 %v7090_v33, %v7740_v41  ;;  %p6874_p12 = pnand %p6873_p11, %p7001_p5  ;;  %p6879_p2 = por %p6878_p1, %p6877_p0 }
  0x8a   : > { %v1054_v60 = vadd.f32 %v1022_v55, %v989_v42  ;;  %v1055_v49 = vadd.f32 %v1023_v8, %v990_v0  ;;  %v416_v52 = vmul.f32 %v7365_v24, %v7048_v12  ;;  %v417_v10 = vmul.f32 %v7469_v11, %v7048_v12 }
  0x8b   : > { %v1306_v58 = vmax.f32 %v1274_v63, 0.0  ;;  %v481_v1 = vmul.f32 %v7523_v51, %v7052_v15  ;;  %v482_v62 = vmul.f32 %v7611_v53, %v7052_v15  ;;  %v579_v33 = vmul.f32 %v7054_v16, %v7669_v44  ;;  %p6875_p13 = pneg %p6874_p12 }
  0x8c   : > { %v1119_v42 = vadd.f32 %v1087_v25, %v1054_v60  ;;  %v7775_v0 = vadd.f32 %v1088_v47, %v1055_v49  ;;  %v580_v39 = vmul.f32 %v7054_v16, %v7761_v34  ;;  %v779_v45 = vmul.f32 %v7056_v17, %v7365_v24 }
  0x8d   : > { %v1334_v30 = vpack.c.bf16 %v1306_v58, %v1305_v43  ;;  %v513_v2 = vadd.f32 %v481_v1, %v416_v52  ;;  %v514_v46 = vadd.f32 %v482_v62, %v417_v10  ;;  %v780_v61 = vmul.f32 %v7056_v17, %v7469_v11  ;;  %p6880_p3 = pnand %p6879_p2, %p6875_p13 }
  0x8e   : > { %v1151_v28 = vrot.slane %v1119_v42, 6  ;;  %v1152_v55 = vrot.slane %v7775_v0, 6  ;;  %v812_v8 = vmul.f32 %v7059_v19, %v7523_v51  ;;  %v813_v63 = vmul.f32 %v7059_v19, %v7611_v53 }
  0x8f   : > { %6577 = vmatmul.msk.bf16.gmra.mxu0 %vm278_vm1, %v1334_v30  ;;  %v611_v25 = vadd.f32 %v579_v33, %v513_v2  ;;  %v7789_v47 = vadd.f32 %v580_v39, %v514_v46  ;;  %v877_v24 = vmul.f32 %v7061_v20, %v7669_v44  ;;  %v878_v43 = vmul.f32 %v7061_v20, %v7761_v34  ;;  %v7809_v2 = vld [vmem:[#allocation2 + $0xc0] sm:$0xff] }
  0x90   : > { %v1168_v60 = vsel %vm1160_vm3, %v1151_v28, %v1152_v55  ;;  %v1169_v49 = vsel %vm1160_vm3, %v1150_v40, %v1151_v28  ;;  %v844_v52 = vadd.f32 %v812_v8, %v779_v45  ;;  %v845_v10 = vadd.f32 %v813_v63, %v780_v61  ;;  %v7835_v63 = vld [vmem:[#allocation2 + $0x138] sm:$0xff] }
  0x91   : > { %v1222_v29 = vsel %vm1194_vm4, %v1168_v60, 0.0  ;;  %v1253_v58 = vadd.f32 %v1169_v49, %v955_v54  ;;  %v643_v1 = vrot.slane %v611_v25, 2  ;;  %v644_v62 = vrot.slane %v7789_v47, 2 }
  0x92   : > { %v1254_v33 = vadd.f32 %v1222_v29, %v956_v57  ;;  %v909_v42 = vadd.f32 %v877_v24, %v844_v52  ;;  %v910_v39 = vadd.f32 %v878_v43, %v845_v10  ;;  %v975_v30 = vmul.f32 %v7063_v21, %v7469_v11 }
  0x93   : > { %v1289_v6 = vadd.f32 %v7181_v31, %v1253_v58  ;;  %v690_v40 = vsel %vm667_vm2, %v643_v1, %v644_v62  ;;  %v691_v54 = vsel %vm667_vm2, %v642_v36, %v643_v1  ;;  %v976_v57 = vmul.f32 %v7063_v21, %v7523_v51  ;;  %v7831_v36 = vld [vmem:[%s12283_s1 + $0x8] ss:$0 sm:$0xff] }
  0x94   : > { %v1290_v45 = vadd.f32 %v7181_v31, %v1254_v33  ;;  %v714_v11 = vsel %vm700_vm5, %v691_v54, 0.0  ;;  %v942_v46 = vadd.f32 %v910_v39, %v690_v40  ;;  %v1008_v61 = vmul.f32 %v7065_v22, %v7611_v53 }
  0x95   : > { %v1321_v28 = vmax.f32 %v1289_v6, 0.0  ;;  %v941_v8 = vadd.f32 %v909_v42, %v714_v11  ;;  %v1009_v5 = vmul.f32 %v7065_v22, %v7669_v44  ;;  %v1073_v31 = vmul.f32 %v7831_v36, %v7761_v34 }
  0x96   : > { %v1322_v25 = vmax.f32 %v1290_v45, 0.0  ;;  %v1040_v24 = vadd.f32 %v1008_v61, %v975_v30  ;;  %v1074_v43 = vmul.f32 %v7831_v36, %v7809_v2  ;;  %v432_v60 = vmul.f32 %v7447_v56, %v7048_v12 }
  0x97   : > { %v1041_v49 = vadd.f32 %v1009_v5, %v976_v57  ;;  %v433_v52 = vmul.f32 %v7544_v26, %v7048_v12  ;;  %v497_v10 = vmul.f32 %v7592_v18, %v7052_v15  ;;  %v498_v29 = vmul.f32 %v7692_v3, %v7052_v15 }
  0x98   : > { %v1342_v58 = vpack.c.bf16 %v1322_v25, %v1321_v28  ;;  %v1105_v1 = vadd.f32 %v1073_v31, %v1040_v24  ;;  %v595_v33 = vmul.f32 %v7054_v16, %v7740_v41  ;;  %v596_v42 = vmul.f32 %v7054_v16, %v7835_v63 }
  0x99   : > { %v7851_v39 = vadd.f32 %v1074_v43, %v1041_v49  ;;  %v529_v30 = vadd.f32 %v497_v10, %v432_v60  ;;  %v530_v6 = vadd.f32 %v498_v29, %v433_v52  ;;  %v795_v40 = vmul.f32 %v7056_v17, %v7447_v56 }
  0x9a   : > { %6585 = vmatmul.msk.bf16.gmra.mxu2 %vm278_vm1, %v1342_v58  ;;  %v1137_v54 = vrot.slane %v1105_v1, 6  ;;  %v796_v57 = vmul.f32 %v7056_v17, %v7544_v26  ;;  %v828_v45 = vmul.f32 %v7059_v19, %v7592_v18  ;;  %v829_v11 = vmul.f32 %v7059_v19, %v7692_v3 }
  0x9b   : > { %v1138_v61 = vrot.slane %v7851_v39, 6  ;;  %v627_v28 = vadd.f32 %v595_v33, %v529_v30  ;;  %v7863_v5 = vadd.f32 %v596_v42, %v530_v6  ;;  %v893_v56 = vmul.f32 %v7061_v20, %v7740_v41  ;;  %v7885_v33 = vld [vmem:[%s12284_s2] ss:$0 sm:$0xff] }
  0x9c   : > { %v1183_v31 = vsel %vm1160_vm3, %v1136_v38, %v1137_v54  ;;  %v860_v25 = vadd.f32 %v828_v45, %v795_v40  ;;  %v861_v24 = vadd.f32 %v829_v11, %v796_v57  ;;  %v894_v43 = vmul.f32 %v7061_v20, %v7835_v63 }
  0x9d   : > { %v1182_v60 = vsel %vm1160_vm3, %v1137_v54, %v1138_v61  ;;  %v1239_v49 = vadd.f32 %v1183_v31, %v941_v8  ;;  %v659_v52 = vrot.slane %v627_v28, 2  ;;  %v660_v10 = vrot.slane %v7863_v5, 2  ;;  %v7888_v8 = vld [vmem:[#allocation2 + $0x140] sm:$0xff]  ;;  %v7907_v28 = vld [vmem:[#allocation2 + $0xc8] sm:$0xff] }
  0x9e   : > { %v1208_v35 = vsel %vm1194_vm4, %v1182_v60, 0.0  ;;  %v925_v29 = vadd.f32 %v893_v56, %v860_v25  ;;  %v926_v58 = vadd.f32 %v894_v43, %v861_v24  ;;  %v991_v38 = vmul.f32 %v7063_v21, %v7544_v26 }
  0x9f   : > { %v1240_v1 = vadd.f32 %v1208_v35, %v942_v46  ;;  %v1275_v42 = vadd.f32 %v7885_v33, %v1239_v49  ;;  %v674_v30 = vsel %vm667_vm2, %v659_v52, %v660_v10  ;;  %v675_v26 = vsel %vm667_vm2, %v658_v4, %v659_v52 }
  0xa0   : > { %v730_v46 = vsel %vm700_vm5, %v675_v26, 0.0  ;;  %v958_v6 = vadd.f32 %v926_v58, %v674_v30  ;;  %v992_v40 = vmul.f32 %v7063_v21, %v7592_v18  ;;  %v1024_v54 = vmul.f32 %v7065_v22, %v7692_v3 }
  0xa1   : > { %v1276_v57 = vadd.f32 %v7885_v33, %v1240_v1  ;;  %v1307_v45 = vmax.f32 %v1275_v42, 0.0  ;;  %v957_v11 = vadd.f32 %v925_v29, %v730_v46  ;;  %v1025_v48 = vmul.f32 %v7065_v22, %v7740_v41 }
  0xa2   : > { %v1056_v4 = vadd.f32 %v1024_v54, %v991_v38  ;;  %v1089_v56 = vmul.f32 %v7831_v36, %v7835_v63  ;;  %v1090_v31 = vmul.f32 %v7831_v36, %v7888_v8  ;;  %v418_v25 = vmul.f32 %v7523_v51, %v7048_v12 }
  0xa3   : > { %v1308_v24 = vmax.f32 %v1276_v57, 0.0  ;;  %v1057_v43 = vadd.f32 %v1025_v48, %v992_v40  ;;  %v419_v60 = vmul.f32 %v7611_v53, %v7048_v12  ;;  %v483_v49 = vmul.f32 %v7669_v44, %v7052_v15 }
  0xa4   : > { %v1121_v52 = vadd.f32 %v1089_v56, %v1056_v4  ;;  %v484_v35 = vmul.f32 %v7761_v34, %v7052_v15  ;;  %v581_v29 = vmul.f32 %v7054_v16, %v7809_v2  ;;  %v582_v58 = vmul.f32 %v7054_v16, %v7907_v28 }
  0xa5   : > { %v1335_v38 = vpack.c.bf16 %v1308_v24, %v1307_v45  ;;  %v7925_v1 = vadd.f32 %v1090_v31, %v1057_v43  ;;  %v515_v42 = vadd.f32 %v483_v49, %v418_v25  ;;  %v781_v30 = vmul.f32 %v7056_v17, %v7523_v51 }
  0xa6   : > { %v1153_v26 = vrot.slane %v1121_v52, 6  ;;  %v516_v46 = vadd.f32 %v484_v35, %v419_v60  ;;  %v782_v40 = vmul.f32 %v7056_v17, %v7611_v53  ;;  %v814_v54 = vmul.f32 %v7059_v19, %v7669_v44 }
  0xa7   : > { %6578 = vmatmul.msk.bf16.gmra.mxu0 %vm278_vm1, %v1335_v38  ;;  %v1154_v57 = vrot.slane %v7925_v1, 6  ;;  %v613_v48 = vadd.f32 %v581_v29, %v515_v42  ;;  %v815_v45 = vmul.f32 %v7059_v19, %v7761_v34  ;;  %v879_v4 = vmul.f32 %v7061_v20, %v7809_v2  ;;  %v7957_v38 = vld [vmem:[#allocation2 + $0xd0] sm:$0xff] }
  0xa8   : > { %v1167_v51 = vsel %vm1160_vm3, %v1152_v55, %v1153_v26  ;;  %v7943_v56 = vadd.f32 %v582_v58, %v516_v46  ;;  %v846_v31 = vadd.f32 %v814_v54, %v781_v30  ;;  %v880_v25 = vmul.f32 %v7061_v20, %v7907_v28 }
  0xa9   : > { %v1166_v24 = vsel %vm1160_vm3, %v1153_v26, %v1154_v57  ;;  %v1255_v43 = vadd.f32 %v1167_v51, %v957_v11  ;;  %v645_v60 = vrot.slane %v613_v48, 2  ;;  %v847_v49 = vadd.f32 %v815_v45, %v782_v40  ;;  %v7980_v51 = vld [vmem:[#allocation2 + $0x148] sm:$0xff] }
  0xaa   : > { %v1224_v0 = vsel %vm1194_vm4, %v1166_v24, 0.0  ;;  %v646_v52 = vrot.slane %v7943_v56, 2  ;;  %v911_v55 = vadd.f32 %v879_v4, %v846_v31  ;;  %v977_v35 = vmul.f32 %v7063_v21, %v7611_v53 }
  0xab   : > { %v1256_v29 = vadd.f32 %v1224_v0, %v958_v6  ;;  %v1291_v58 = vadd.f32 %v7885_v33, %v1255_v43  ;;  %v689_v11 = vsel %vm667_vm2, %v644_v62, %v645_v60  ;;  %v912_v42 = vadd.f32 %v880_v25, %v847_v49 }
  0xac   : > { %v688_v30 = vsel %vm667_vm2, %v645_v60, %v646_v52  ;;  %v716_v26 = vsel %vm700_vm5, %v689_v11, 0.0  ;;  %v978_v53 = vmul.f32 %v7063_v21, %v7669_v44  ;;  %v1010_v6 = vmul.f32 %v7065_v22, %v7761_v34 }
  0xad   : > { %v1292_v47 = vadd.f32 %v7885_v33, %v1256_v29  ;;  %v1323_v46 = vmax.f32 %v1291_v58, 0.0  ;;  %v943_v40 = vadd.f32 %v911_v55, %v716_v26  ;;  %v944_v62 = vadd.f32 %v912_v42, %v688_v30 }
  0xae   : > { %v1011_v54 = vmul.f32 %v7065_v22, %v7809_v2  ;;  %v1042_v48 = vadd.f32 %v1010_v6, %v977_v35  ;;  %v1075_v45 = vmul.f32 %v7831_v36, %v7907_v28  ;;  %v1076_v4 = vmul.f32 %v7831_v36, %v7957_v38 }
  0xaf   : > { %v1324_v31 = vmax.f32 %v1292_v47, 0.0  ;;  %v434_v25 = vmul.f32 %v7592_v18, %v7048_v12  ;;  %v435_v24 = vmul.f32 %v7692_v3, %v7048_v12  ;;  %v499_v43 = vmul.f32 %v7740_v41, %v7052_v15 }
  0xb0   : > { %v1043_v60 = vadd.f32 %v1011_v54, %v978_v53  ;;  %v1107_v49 = vadd.f32 %v1075_v45, %v1042_v48  ;;  %v500_v0 = vmul.f32 %v7835_v63, %v7052_v15  ;;  %v597_v55 = vmul.f32 %v7054_v16, %v7888_v8 }
  0xb1   : > { %v1343_v35 = vpack.c.bf16 %v1324_v31, %v1323_v46  ;;  %v531_v29 = vadd.f32 %v499_v43, %v434_v25  ;;  %v598_v58 = vmul.f32 %v7054_v16, %v7980_v51  ;;  %v797_v11 = vmul.f32 %v7056_v17, %v7592_v18 }
  0xb2   : > { %v7996_v42 = vadd.f32 %v1076_v4, %v1043_v60  ;;  %v1139_v30 = vrot.slane %v1107_v49, 6  ;;  %v532_v26 = vadd.f32 %v500_v0, %v435_v24  ;;  %v798_v53 = vmul.f32 %v7056_v17, %v7692_v3 }
  0xb3   : > { %6586 = vmatmul.msk.bf16.gmra.mxu2 %vm278_vm1, %v1343_v35  ;;  %v629_v6 = vadd.f32 %v597_v55, %v531_v29  ;;  %v830_v47 = vmul.f32 %v7059_v19, %v7740_v41  ;;  %v831_v46 = vmul.f32 %v7059_v19, %v7835_v63  ;;  %v895_v54 = vmul.f32 %v7061_v20, %v7888_v8  ;;  %v8028_v55 = vld [vmem:[#allocation2 + $0x150] sm:$0xff] }
  0xb4   : > { %v1140_v18 = vrot.slane %v7996_v42, 6  ;;  %v1181_v48 = vsel %vm1160_vm3, %v1138_v61, %v1139_v30  ;;  %v8012_v45 = vadd.f32 %v598_v58, %v532_v26  ;;  %v896_v4 = vmul.f32 %v7061_v20, %v7980_v51 }
  0xb5   : > { %v1241_v31 = vadd.f32 %v1181_v48, %v943_v40  ;;  %v661_v25 = vrot.slane %v629_v6, 2  ;;  %v862_v24 = vadd.f32 %v830_v47, %v797_v11  ;;  %v863_v43 = vadd.f32 %v831_v46, %v798_v53 }
  0xb6   : > { %v1180_v60 = vsel %vm1160_vm3, %v1139_v30, %v1140_v18  ;;  %v662_v49 = vrot.slane %v8012_v45, 2  ;;  %v993_v39 = vmul.f32 %v7063_v21, %v7692_v3  ;;  %v994_v61 = vmul.f32 %v7063_v21, %v7740_v41 }
  0xb7   : > { %v1210_v0 = vsel %vm1194_vm4, %v1180_v60, 0.0  ;;  %v1277_v40 = vadd.f32 %v7885_v33, %v1241_v31  ;;  %v673_v35 = vsel %vm667_vm2, %v660_v10, %v661_v25  ;;  %v927_v29 = vadd.f32 %v895_v54, %v862_v24  ;;  %v551_v54 = vld [vmem:[#allocation2 + $0xd8] sm:$0xff] }
  0xb8   : > { %v1242_v58 = vadd.f32 %v1210_v0, %v944_v62  ;;  %v672_v3 = vsel %vm667_vm2, %v661_v25, %v662_v49  ;;  %v732_v11 = vsel %vm700_vm5, %v673_v35, 0.0  ;;  %v928_v30 = vadd.f32 %v896_v4, %v863_v43 }
  0xb9   : > { %v1309_v26 = vmax.f32 %v1277_v40, 0.0  ;;  %v959_v53 = vadd.f32 %v927_v29, %v732_v11  ;;  %v1026_v6 = vmul.f32 %v7065_v22, %v7835_v63  ;;  %v1027_v5 = vmul.f32 %v7065_v22, %v7888_v8 }
  0xba   : > { %v1278_v10 = vadd.f32 %v7885_v33, %v1242_v58  ;;  %v960_v62 = vadd.f32 %v928_v30, %v672_v3  ;;  %v1091_v47 = vmul.f32 %v7831_v36, %v7980_v51  ;;  %v1092_v46 = vmul.f32 %v7831_v36, %v8028_v55 }
  0xbb   : > { %v1058_v48 = vadd.f32 %v1026_v6, %v993_v39  ;;  %v1059_v4 = vadd.f32 %v1027_v5, %v994_v61  ;;  %v420_v31 = vmul.f32 %v7669_v44, %v7048_v12  ;;  %v421_v25 = vmul.f32 %v7761_v34, %v7048_v12 }
  0xbc   : > { %v1310_v24 = vmax.f32 %v1278_v10, 0.0  ;;  %v485_v43 = vmul.f32 %v7809_v2, %v7052_v15  ;;  %v486_v60 = vmul.f32 %v7907_v28, %v7052_v15  ;;  %v583_v0 = vmul.f32 %v7054_v16, %v7957_v38 }
  0xbd   : > { %v1123_v40 = vadd.f32 %v1091_v47, %v1058_v48  ;;  %v8059_v35 = vadd.f32 %v1092_v46, %v1059_v4  ;;  %v584_v39 = vmul.f32 %v7054_v16, %v551_v54  ;;  %v783_v61 = vmul.f32 %v7056_v17, %v7669_v44 }
  0xbe   : > { %v1336_v29 = vpack.c.bf16 %v1310_v24, %v1309_v26  ;;  %v517_v58 = vadd.f32 %v485_v43, %v420_v31  ;;  %v518_v3 = vadd.f32 %v486_v60, %v421_v25  ;;  %v784_v11 = vmul.f32 %v7056_v17, %v7761_v34 }
  0xbf   : > { %v1155_v30 = vrot.slane %v1123_v40, 6  ;;  %v1156_v6 = vrot.slane %v8059_v35, 6  ;;  %v816_v5 = vmul.f32 %v7059_v19, %v7809_v2  ;;  %v817_v10 = vmul.f32 %v7059_v19, %v7907_v28 }
  0xc0   : > { %6579 = vmatmul.msk.bf16.gmra.mxu0 %vm278_vm1, %v1336_v29  ;;  %v615_v47 = vadd.f32 %v583_v0, %v517_v58  ;;  %v8072_v46 = vadd.f32 %v584_v39, %v518_v3  ;;  %v881_v44 = vmul.f32 %v7061_v20, %v7957_v38  ;;  %v882_v26 = vmul.f32 %v7061_v20, %v551_v54  ;;  %v8091_v3 = vld [vmem:[#allocation2 + $0xe0] sm:$0xff] }
  0xc1   : > { %v1164_v48 = vsel %vm1160_vm3, %v1155_v30, %v1156_v6  ;;  %v1165_v4 = vsel %vm1160_vm3, %v1154_v57, %v1155_v30  ;;  %v848_v31 = vadd.f32 %v816_v5, %v783_v61  ;;  %v849_v25 = vadd.f32 %v817_v10, %v784_v11 }
  0xc2   : > { %v1226_v24 = vsel %vm1194_vm4, %v1164_v48, 0.0  ;;  %v1257_v43 = vadd.f32 %v1165_v4, %v959_v53  ;;  %v647_v60 = vrot.slane %v615_v47, 2  ;;  %v648_v0 = vrot.slane %v8072_v46, 2 }
  0xc3   : > { %v1258_v40 = vadd.f32 %v1226_v24, %v960_v62  ;;  %v913_v39 = vadd.f32 %v881_v44, %v848_v31  ;;  %v914_v29 = vadd.f32 %v882_v26, %v849_v25  ;;  %v979_v58 = vmul.f32 %v7063_v21, %v7761_v34 }
  0xc4   : > { %v1293_v1 = vadd.f32 %v7885_v33, %v1257_v43  ;;  %v686_v57 = vsel %vm667_vm2, %v647_v60, %v648_v0  ;;  %v687_v53 = vsel %vm667_vm2, %v646_v52, %v647_v60  ;;  %v980_v62 = vmul.f32 %v7063_v21, %v7809_v2  ;;  %v567_v52 = vld [vmem:[#allocation2 + $0x158] sm:$0xff] }
  0xc5   : > { %v1294_v61 = vadd.f32 %v7885_v33, %v1258_v40  ;;  %v718_v34 = vsel %vm700_vm5, %v687_v53, 0.0  ;;  %v946_v11 = vadd.f32 %v914_v29, %v686_v57  ;;  %v1012_v30 = vmul.f32 %v7065_v22, %v7907_v28 }
  0xc6   : > { %v1325_v5 = vmax.f32 %v1293_v1, 0.0  ;;  %v945_v10 = vadd.f32 %v913_v39, %v718_v34  ;;  %v1013_v56 = vmul.f32 %v7065_v22, %v7957_v38  ;;  %v1077_v47 = vmul.f32 %v7831_v36, %v551_v54 }
  0xc7   : > { %v1326_v44 = vmax.f32 %v1294_v61, 0.0  ;;  %v1044_v26 = vadd.f32 %v1012_v30, %v979_v58  ;;  %v1078_v48 = vmul.f32 %v7831_v36, %v8091_v3  ;;  %v436_v4 = vmul.f32 %v7740_v41, %v7048_v12 }
  0xc8   : > { %v1045_v31 = vadd.f32 %v1013_v56, %v980_v62  ;;  %v437_v28 = vmul.f32 %v7835_v63, %v7048_v12  ;;  %v501_v25 = vmul.f32 %v7888_v8, %v7052_v15  ;;  %v502_v24 = vmul.f32 %v7980_v51, %v7052_v15 }
  0xc9   : > { %v1344_v54 = vpack.c.bf16 %v1326_v44, %v1325_v5  ;;  %v1109_v43 = vadd.f32 %v1077_v47, %v1044_v26  ;;  %v599_v60 = vmul.f32 %v7054_v16, %v8028_v55  ;;  %v600_v40 = vmul.f32 %v7054_v16, %v567_v52 }
  0xca   : > { %v8124_v39 = vadd.f32 %v1078_v48, %v1045_v31  ;;  %v533_v29 = vadd.f32 %v501_v25, %v436_v4  ;;  %v534_v58 = vadd.f32 %v502_v24, %v437_v28  ;;  %v799_v1 = vmul.f32 %v7056_v17, %v7740_v41 }
  0xcb   : > { %6587 = vmatmul.msk.bf16.gmra.mxu2 %vm278_vm1, %v1344_v54  ;;  %v1141_v57 = vrot.slane %v1109_v43, 6  ;;  %v800_v53 = vmul.f32 %v7056_v17, %v7835_v63  ;;  %v832_v62 = vmul.f32 %v7059_v19, %v7888_v8  ;;  %v833_v61 = vmul.f32 %v7059_v19, %v7980_v51 }
  0xcc   : > { %v1142_v34 = vrot.slane %v8124_v39, 6  ;;  %v631_v30 = vadd.f32 %v599_v60, %v533_v29  ;;  %v8136_v5 = vadd.f32 %v600_v40, %v534_v58  ;;  %v897_v41 = vmul.f32 %v7061_v20, %v8028_v55  ;;  %v8155_v60 = vld [vmem:[#allocation2 + $0x160] sm:$0xff] }
  0xcd   : > { %v1179_v56 = vsel %vm1160_vm3, %v1140_v18, %v1141_v57  ;;  %v864_v47 = vadd.f32 %v832_v62, %v799_v1  ;;  %v865_v44 = vadd.f32 %v833_v61, %v800_v53  ;;  %v898_v26 = vmul.f32 %v7061_v20, %v567_v52  ;;  %v8254_v39 = vld [vmem:[%s12286_s4] ss:$0 sm:$0xff] }
  0xce   : > { %v1178_v48 = vsel %vm1160_vm3, %v1141_v57, %v1142_v34  ;;  %v1243_v4 = vadd.f32 %v1179_v56, %v945_v10  ;;  %v663_v31 = vrot.slane %v631_v30, 2  ;;  %v664_v28 = vrot.slane %v8136_v5, 2 }
  0xcf   : > { %v1212_v25 = vsel %vm1194_vm4, %v1178_v48, 0.0  ;;  %v929_v42 = vadd.f32 %v897_v41, %v864_v47  ;;  %v930_v24 = vadd.f32 %v898_v26, %v865_v44  ;;  %v995_v18 = vmul.f32 %v7063_v21, %v7835_v63  ;;  %v6823_v48 = vld [vmem:[#allocation2 + $0xc8] sm:$0xff] }
  0xd0   : > { %v1244_v54 = vadd.f32 %v1212_v25, %v946_v11  ;;  %v1279_v43 = vadd.f32 %v7885_v33, %v1243_v4  ;;  %v670_v10 = vsel %vm667_vm2, %v663_v31, %v664_v28  ;;  %v671_v40 = vsel %vm667_vm2, %v662_v49, %v663_v31 }
  0xd1   : > { %v734_v29 = vsel %vm700_vm5, %v671_v40, 0.0  ;;  %v962_v58 = vadd.f32 %v930_v24, %v670_v10  ;;  %v996_v63 = vmul.f32 %v7063_v21, %v7888_v8  ;;  %v1028_v11 = vmul.f32 %v7065_v22, %v7980_v51  ;;  %v6824_v24 = vld [vmem:[#allocation2 + $0xd8] sm:$0xff]  ;;  %v6825_v40 = vld [vmem:[#allocation2 + $0xe8] sm:$0xff] }
  0xd2   : > { %v1280_v1 = vadd.f32 %v7885_v33, %v1244_v54  ;;  %v1311_v57 = vmax.f32 %v1279_v43, 0.0  ;;  %v961_v53 = vadd.f32 %v929_v42, %v734_v29  ;;  %v1029_v45 = vmul.f32 %v7065_v22, %v8028_v55  ;;  %v8191_v54 = vpop.f32.mrf.mxu0 }
  0xd3   : > { %v1060_v62 = vadd.f32 %v1028_v11, %v995_v18  ;;  %v1093_v49 = vmul.f32 %v7831_v36, %v567_v52  ;;  %v1094_v61 = vmul.f32 %v7831_v36, %v8155_v60  ;;  %v422_v30 = vmul.f32 %v7809_v2, %v7048_v12 }
  0xd4   : > { %v1312_v41 = vmax.f32 %v1280_v1, 0.0  ;;  %v1061_v56 = vadd.f32 %v1029_v45, %v996_v63  ;;  %v487_v51 = vmul.f32 %v7957_v38, %v7052_v15  ;;  %v585_v47 = vmul.f32 %v7054_v16, %v8091_v3 }
  0xd5   : > { %v1125_v44 = vadd.f32 %v1093_v49, %v1060_v62  ;;  %v785_v26 = vmul.f32 %v7056_v17, %v7809_v2  ;;  %v786_v52 = vmul.f32 %v6823_v48, %v7056_v17  ;;  %v818_v4 = vmul.f32 %v7059_v19, %v7957_v38 }
  0xd6   : > { %v1337_v31 = vpack.c.bf16 %v1312_v41, %v1311_v57  ;;  %v8188_v25 = vadd.f32 %v1094_v61, %v1061_v56  ;;  %v519_v42 = vadd.f32 %v487_v51, %v422_v30  ;;  %v819_v18 = vmul.f32 %v6824_v24, %v7059_v19 }
  0xd7   : > { %v1157_v43 = vrot.slane %v1125_v44, 6  ;;  %v850_v10 = vadd.f32 %v818_v4, %v785_v26  ;;  %v883_v2 = vmul.f32 %v7061_v20, %v8091_v3  ;;  %v884_v29 = vmul.f32 %v6825_v40, %v7061_v20 }
  0xd8   : > { %6580 = vmatmul.msk.bf16.gmra.mxu0 %vm278_vm1, %v1337_v31  ;;  %v1158_v38 = vrot.slane %v8188_v25, 6  ;;  %v617_v63 = vadd.f32 %v585_v47, %v519_v42  ;;  %v851_v11 = vadd.f32 %v819_v18, %v786_v52  ;;  %v981_v1 = vmul.f32 %v6823_v48, %v7063_v21  ;;  %v8199_v57 = vpop.f32.mrf.mxu2  ;;  %v6826_v18 = vld [vmem:[#allocation2 + $0x148] sm:$0xff] }
  0xd9   : > { %v1163_v45 = vsel %vm1160_vm3, %v1156_v6, %v1157_v43  ;;  %v915_v62 = vadd.f32 %v883_v2, %v850_v10  ;;  %v1014_v3 = vmul.f32 %v6824_v24, %v7065_v22  ;;  %v1079_v49 = vmul.f32 %v6825_v40, %v7831_v36  ;;  %v6827_v40 = vld [vmem:[#allocation2 + $0x158] sm:$0xff] }
  0xda   : > { %v1162_v61 = vsel %vm1160_vm3, %v1157_v43, %v1158_v38  ;;  %v1259_v30 = vadd.f32 %v1163_v45, %v961_v53  ;;  %v649_v41 = vrot.slane %v617_v63, 2  ;;  %v916_v56 = vadd.f32 %v884_v29, %v851_v11  ;;  %v1415_v24 = vpop.f32.mrf.mxu0 }
  0xdb   : > { %v1228_v51 = vsel %vm1194_vm4, %v1162_v61, 0.0  ;;  %v1046_v35 = vadd.f32 %v1014_v3, %v981_v1  ;;  %v438_v6 = vmul.f32 %v7888_v8, %v7048_v12  ;;  %v503_v47 = vmul.f32 %v8028_v55, %v7052_v15 }
  0xdc   : > { %v1260_v44 = vadd.f32 %v1228_v51, %v962_v58  ;;  %v1295_v26 = vadd.f32 %v7885_v33, %v1259_v30  ;;  %v684_v53 = vsel %vm667_vm2, %v649_v41, %v650_v50  ;;  %v685_v48 = vsel %vm667_vm2, %v648_v0, %v649_v41 }
  0xdd   : > { %v720_v52 = vsel %vm700_vm5, %v685_v48, 0.0  ;;  %v948_v12 = vadd.f32 %v916_v56, %v684_v53  ;;  %v1111_v4 = vadd.f32 %v1079_v49, %v1046_v35  ;;  %v535_v31 = vadd.f32 %v503_v47, %v438_v6 }
  0xde   : > { %v1296_v15 = vadd.f32 %v7885_v33, %v1260_v44  ;;  %v1327_v58 = vmax.f32 %v1295_v26, 0.0  ;;  %v947_v42 = vadd.f32 %v915_v62, %v720_v52  ;;  %v601_v32 = vmul.f32 %v7054_v16, %v8155_v60 }
  0xdf   : > { %v1143_v50 = vrot.slane %v1111_v4, 6  ;;  %v801_v46 = vmul.f32 %v7056_v17, %v7888_v8  ;;  %v802_v0 = vmul.f32 %v6826_v18, %v7056_v17  ;;  %v834_v43 = vmul.f32 %v7059_v19, %v8028_v55  ;;  %v6828_v55 = vld [vmem:[#allocation2 + $0x168] sm:$0xff] }
  0xe0   : > { %v1328_v10 = vmax.f32 %v1296_v15, 0.0  ;;  %v633_v2 = vadd.f32 %v601_v32, %v535_v31  ;;  %v835_v29 = vmul.f32 %v6827_v40, %v7059_v19  ;;  %v899_v63 = vmul.f32 %v7061_v20, %v8155_v60  ;;  %v1455_v62 = vpop.f32.mrf.mxu2 }
  0xe1   : > { %v1176_v16 = vsel %vm1160_vm3, %v1143_v50, %v1144_v37  ;;  %v1177_v17 = vsel %vm1160_vm3, %v1142_v34, %v1143_v50  ;;  %v866_v8 = vadd.f32 %v834_v43, %v801_v46  ;;  %v900_v11 = vmul.f32 %v6828_v55, %v7061_v20 }
  0xe2   : > { %v1345_v1 = vpack.c.bf16 %v1328_v10, %v1327_v58  ;;  %v1214_v19 = vsel %vm1194_vm4, %v1176_v16, 0.0  ;;  %v1245_v45 = vadd.f32 %v1177_v17, %v947_v42  ;;  %v665_v60 = vrot.slane %v633_v2, 2  ;;  %v1418_v5 = vpop.f32.mrf.mxu0 }
  0xe3   : > { %v1246_v59 = vadd.f32 %v1214_v19, %v948_v12  ;;  %v867_v3 = vadd.f32 %v835_v29, %v802_v0  ;;  %v931_v49 = vadd.f32 %v899_v63, %v866_v8  ;;  %v997_v37 = vmul.f32 %v6826_v18, %v7063_v21 }
  0xe4   : > { %6588 = vmatmul.msk.bf16.gmra.mxu2 %vm278_vm1, %v1345_v1  ;;  %v1281_v20 = vadd.f32 %v7885_v33, %v1245_v45  ;;  %v668_v34 = vsel %vm667_vm2, %v665_v60, %v666_v27  ;;  %v669_v61 = vsel %vm667_vm2, %v664_v28, %v665_v60  ;;  %v1030_v21 = vmul.f32 %v6827_v40, %v7065_v22  ;;  %v1541_v22 = vld [vmem:[%s12287_s5] sm:$0xf] }
  0xe5   : > { %v1282_v30 = vadd.f32 %v7885_v33, %v1246_v59  ;;  %v736_v41 = vsel %vm700_vm5, %v669_v61, 0.0  ;;  %v932_v56 = vadd.f32 %v900_v11, %v867_v3  ;;  %v1095_v51 = vmul.f32 %v6828_v55, %v7831_v36  ;;  %v6609_v36 = vld [vmem:[%s12285_s3 + $0x4] sm:$0xf] }
  0xe6   : > { %v1313_v35 = vmax.f32 %v1281_v20, 0.0  ;;  %v963_v13 = vadd.f32 %v931_v49, %v736_v41  ;;  %v1062_v6 = vadd.f32 %v1030_v21, %v997_v37  ;;  %v8273_v27 = vadd.f32 %v8254_v39, %v8191_v54 }
  0xe7   : > { %v1314_v28 = vmax.f32 %v1282_v30, 0.0  ;;  %v964_v47 = vadd.f32 %v932_v56, %v668_v34  ;;  %v1454_v44 = vadd.f32 %v8254_v39, %v8199_v57  ;;  %v8281_v26 = vadd.f32 %v8254_v39, %v1415_v24 }
  0xe8   : > { %v1127_v53 = vadd.f32 %v1095_v51, %v1062_v6  ;;  %v1493_v54 = vmax.f32 %v8273_v27, 0.0  ;;  %v1456_v48 = vadd.f32 %v8254_v39, %v1455_v62  ;;  %v8289_v52 = vadd.f32 %v8254_v39, %v1418_v5 }
  0xe9   : > { %v1338_v12 = vpack.c.bf16 %v1314_v28, %v1313_v35  ;;  %v1509_v4 = vmax.f32 %v1454_v44, 0.0  ;;  %v1494_v31 = vmax.f32 %v8281_v26, 0.0  ;;  %v1591_v57 = vsel %vm1400_vm0, %v1541_v22, 0 }
  0xea   : > { %v1159_v15 = vrot.slane %v1127_v53, 6  ;;  %1715 = vst.msk [vmem:[#allocation2 + $0x60] sm:$0xff] %vm278_vm1, %v1493_v54  ;;  %v1510_v58 = vmax.f32 %v1456_v48, 0.0  ;;  %v1495_v42 = vmax.f32 %v8289_v52, 0.0  ;;  %6764 = vmatpush.bf16.msra.mxu3 %v1591_v57  ;;  %v2810_v32 = vsel %vm1400_vm0, %v6609_v36, 0  ;;  %1600 = vmatpush.bf16.msra.mxu1 %v1591_v57  ;;  %v1420_v7 = vpop.f32.mrf.mxu0 }
  0xeb   : > { %6581 = vmatmul.msk.bf16.gmra.mxu0 %vm278_vm1, %v1338_v12  ;;  %1731 = vst.msk [vmem:[#allocation2 + $0xe0] sm:$0xff] %vm278_vm1, %v1509_v4  ;;  %2819 = vmatpush.bf16.msrb.mxu2 %v2810_v32  ;;  %v8321_v2 = vadd.f32 %v8254_v39, %v1420_v7 }
  0xec   : > { %v1161_v24 = vsel %vm1160_vm3, %v1158_v38, %v1159_v15  ;;  %v1192_v50 = vsel %vm1160_vm3, %v1159_v15, %v1128_v14  ;;  %1716 = vst.msk [vmem:[#allocation2 + $0x68] sm:$0xff] %vm278_vm1, %v1494_v31  ;;  %v1533_v46 = vpack.c.bf16 %v1510_v58, %v1509_v4  ;;  %v1458_v18 = vpop.f32.mrf.mxu2 }
  0xed   : > { %v1230_v0 = vsel %vm1194_vm4, %v1192_v50, 0.0  ;;  %v1261_v43 = vadd.f32 %v1161_v24, %v963_v13  ;;  %1732 = vst.msk [vmem:[#allocation2 + $0xe8] sm:$0xff] %vm278_vm1, %v1510_v58  ;;  %v1459_v25 = vadd.f32 %v8254_v39, %v1458_v18  ;;  %v1496_v63 = vmax.f32 %v8321_v2, 0.0 }
  0xee   : > { %v1262_v38 = vadd.f32 %v1230_v0, %v964_v47  ;;  %1717 = vst.msk [vmem:[#allocation2 + $0x70] sm:$0xff] %vm278_vm1, %v1495_v42  ;;  %6598 = vmatmul.msk.bf16.vlgmr.msra.gmra.mxu3 %vm278_vm1, %v1533_v46  ;;  %v1525_v50 = vpack.c.bf16 %v1494_v31, %v1493_v54 }
  0xef   : > { %v1297_v14 = vadd.f32 %v7885_v33, %v1261_v43  ;;  %v1511_v10 = vmax.f32 %v1459_v25, 0.0  ;;  %1718 = vst.msk [vmem:[#allocation2 + $0x78] sm:$0xff] %vm278_vm1, %v1496_v63 }
  0xf0   : > { %v1298_v40 = vadd.f32 %v7885_v33, %v1262_v38  ;;  %6590 = vmatmul.msk.bf16.vlgmr.msra.gmra.mxu1 %vm278_vm1, %v1525_v50 }
  0xf1   : > { %v1329_v29 = vmax.f32 %v1297_v14, 0.0  ;;  %1733 = vst.msk [vmem:[#allocation2 + $0xf0] sm:$0xff] %vm278_vm1, %v1511_v10 }
  0xf2   : > { %v1330_v16 = vmax.f32 %v1298_v40, 0.0  ;;  %v1526_v40 = vpack.c.bf16 %v1496_v63, %v1495_v42  ;;  %v3193_v63 = vld [vmem:[#allocation2 + $0x20] sm:$0xff] }
  0xf3   : > { %v1423_v11 = vpop.f32.mrf.mxu0 }
  0xf4   : > { %v1346_v17 = vpack.c.bf16 %v1330_v16, %v1329_v29  ;;  %v1460_v8 = vpop.f32.mrf.mxu2  ;;  %v8332_v33 = vadd.f32 %v8254_v39, %v1423_v11  ;;  %v6644_v29 = vld [vmem:[%s12283_s1 + $0x20] sm:$0xff]  ;;  %v3194_v16 = vld [vmem:[#allocation2 + $0x28] sm:$0xff] }
  0xf5   : > { %v1461_v55 = vadd.f32 %v8254_v39, %v1460_v8  ;;  %v8423_v11 = vperm.slane %v6644_v29, 4 }
  0xf6   : > { %6589 = vmatmul.msk.bf16.gmra.mxu2 %vm278_vm1, %v1346_v17  ;;  %v1497_v19 = vmax.f32 %v8332_v33, 0.0 }
  0xf7   : > { %v1512_v1 = vmax.f32 %v1461_v55, 0.0  ;;  %v8421_v55 = vperm.slane %v6644_v29, 1 }
  0xf8   : > { %1719 = vst.msk [vmem:[#allocation2 + $0x80] sm:$0xff] %vm278_vm1, %v1497_v19 }
  0xf9   : > { %1734 = vst.msk [vmem:[#allocation2 + $0xf8] sm:$0xff] %vm278_vm1, %v1512_v1  ;;  %v1534_v45 = vpack.c.bf16 %v1512_v1, %v1511_v10 }
  0xfa   : > { %12382 = vst [vmem:[#allocation7_spill] sm:$0xff] %v8421_v55 }
  0xfb   : > { %v1425_v60 = vpop.f32.mrf.mxu0 }
  0xfc   : > { %v8341_v62 = vadd.f32 %v8254_v39, %v1425_v60 }
  0xfe   : > { %6599 = vmatmul.msk.bf16.gmra.mxu3 %vm278_vm1, %v1534_v45  ;;  %v1498_v59 = vmax.f32 %v8341_v62, 0.0  ;;  %v3227_v45 = vmul.f32 %v8421_v55, %v3194_v16 }
  0xff   : > { %v8428_v42 = vld [vmem:[#allocation2 + $0x80] sm:$0xff] }
 0x100   : > { %1720 = vst.msk [vmem:[#allocation2 + $0x88] sm:$0xff] %vm278_vm1, %v1498_v59  ;;  %6591 = vmatmul.msk.bf16.gmra.mxu1 %vm278_vm1, %v1526_v40 }
 0x105   : > { %v1463_v3 = vpop.f32.mrf.mxu2 }
 0x106   : > { %v1464_v49 = vadd.f32 %v8254_v39, %v1463_v3 }
 0x107   : > { %v8419_v17 = vld [vmem:[#allocation2 + $0x88] sm:$0xff] }
 0x108   : > { %v1513_v37 = vmax.f32 %v1464_v49, 0.0  ;;  %v3292_v60 = vmul.f32 %v8423_v11, %v8419_v17 }
 0x10a   : > { %1735 = vst.msk [vmem:[#allocation2 + $0x100] sm:$0xff] %vm278_vm1, %v1513_v37 }
 0x10c   : > { %v1428_v20 = vpop.f32.mrf.mxu0 }
 0x10d   : > { %v1465_v34 = vpop.f32.mrf.mxu2  ;;  %v8350_v61 = vadd.f32 %v8254_v39, %v1428_v20 }
 0x10e   : > { %v1466_v21 = vadd.f32 %v8254_v39, %v1465_v34  ;;  %v3226_v34 = vmul.f32 %v8421_v55, %v3193_v63 }
 0x10f   : > { %v12298_v30 = vmax.f32 %v8350_v61, 0.0 }
 0x110   : > { %v1514_v41 = vmax.f32 %v1466_v21, 0.0  ;;  %v3291_v21 = vmul.f32 %v8423_v11, %v8428_v42 }
 0x111   : > { %1721 = vst.msk [vmem:[#allocation2 + $0x90] sm:$0xff] %vm278_vm1, %v12298_v30 }
 0x112   : > { %1736 = vst.msk [vmem:[#allocation2 + $0x108] sm:$0xff] %vm278_vm1, %v1514_v41  ;;  %v1535_v56 = vpack.c.bf16 %v1514_v41, %v1513_v37  ;;  %v3195_v37 = vld [vmem:[#allocation2 + $0x30] sm:$0xff]  ;;  %v3196_v41 = vld [vmem:[#allocation2 + $0x38] sm:$0xff] }
 0x114   : > { %6600 = vmatmul.msk.bf16.gmra.mxu3 %vm278_vm1, %v1535_v56  ;;  %v1430_v51 = vpop.f32.mrf.mxu0 }
 0x115   : > { %v8360_v35 = vadd.f32 %v8254_v39, %v1430_v51  ;;  %v8445_v51 = vperm.slane %v6644_v29, 7 }
 0x117   : > { %v12296_v13 = vmax.f32 %v8360_v35, 0.0  ;;  %12384 = vst [vmem:[#allocation9_spill] sm:$0xff] %v8445_v51 }
 0x118   : > { %v8435_v49 = vld [vmem:[#allocation2 + $0x90] sm:$0xff] }
 0x119   : > { %1722 = vst.msk [vmem:[#allocation2 + $0x98] sm:$0xff] %vm278_vm1, %v12296_v13 }
 0x11d   : > { %v1468_v6 = vpop.f32.mrf.mxu2 }
 0x11e   : > { %v1469_v5 = vadd.f32 %v8254_v39, %v1468_v6  ;;  %v8447_v6 = vld [vmem:[#allocation2 + $0xe8] sm:$0xff] }
 0x11f   : > { %12385 = vst [vmem:[#allocation10_spill] sm:$0xff] %v8447_v6  ;;  %v3390_v50 = vmul.f32 %v8445_v51, %v8447_v6 }
 0x120   : > { %v1515_v22 = vmax.f32 %v1469_v5, 0.0  ;;  %v8440_v56 = vld [vmem:[#allocation2 + $0x98] sm:$0xff] }
 0x122   : > { %1737 = vst.msk [vmem:[#allocation2 + $0x110] sm:$0xff] %vm278_vm1, %v1515_v22 }
 0x124   : > { %v1433_v28 = vpop.f32.mrf.mxu0 }
 0x125   : > { %v1470_v47 = vpop.f32.mrf.mxu2  ;;  %v8369_v44 = vadd.f32 %v8254_v39, %v1433_v28  ;;  %v3228_v28 = vmul.f32 %v8421_v55, %v3195_v37  ;;  %v1527_v37 = vpack.c.bf16 %v1498_v59, %v1497_v19 }
 0x126   : > { %v1471_v36 = vadd.f32 %v8254_v39, %v1470_v47  ;;  %v3293_v47 = vmul.f32 %v8423_v11, %v8435_v49 }
 0x127   : > { %v12295_v53 = vmax.f32 %v8369_v44, 0.0  ;;  %6592 = vmatmul.msk.bf16.gmra.mxu1 %vm278_vm1, %v1527_v37 }
 0x128   : > { %v1516_v48 = vmax.f32 %v1471_v36, 0.0  ;;  %v8453_v36 = vld [vmem:[#allocation2 + $0xe0] sm:$0xff] }
 0x129   : > { %1723 = vst.msk [vmem:[#allocation2 + $0xa0] sm:$0xff] %vm278_vm1, %v12295_v53 }
 0x12a   : > { %1738 = vst.msk [vmem:[#allocation2 + $0x118] sm:$0xff] %vm278_vm1, %v1516_v48  ;;  %v1536_v12 = vpack.c.bf16 %v1516_v48, %v1515_v22  ;;  %v3324_v22 = vadd.f32 %v3292_v60, %v3227_v45  ;;  %v3229_v48 = vmul.f32 %v8421_v55, %v3196_v41  ;;  %v8493_v60 = vld [vmem:[#allocation2 + $0x68] sm:$0xff] }
 0x12b   : > { %12386 = vst [vmem:[#allocation11_spill] sm:$0xff] %v8453_v36 }
 0x12c   : > { %6601 = vmatmul.msk.bf16.gmra.mxu3 %vm278_vm1, %v1536_v12  ;;  %v1435_v4 = vpop.f32.mrf.mxu0  ;;  %v3294_v12 = vmul.f32 %v8423_v11, %v8440_v56  ;;  %12392 = vst [vmem:[#allocation17_spill] sm:$0xff] %v8493_v60 }
 0x12d   : > { %v8379_v57 = vadd.f32 %v8254_v39, %v1435_v4 }
 0x12f   : > { %v12294_v15 = vmax.f32 %v8379_v57, 0.0 }
 0x131   : > { %1724 = vst.msk [vmem:[#allocation2 + $0xa8] sm:$0xff] %vm278_vm1, %v12294_v15  ;;  %v3361_v15 = vld [vmem:[#allocation2 + $0x108] sm:$0xff] }
 0x136   : > { %v1473_v58 = vpop.f32.mrf.mxu2 }
 0x137   : > { %v1474_v32 = vadd.f32 %v8254_v39, %v1473_v58  ;;  %v6646_v58 = vld [vmem:[%s12285_s3 + $0x8] sm:$0xf] }
 0x139   : > { %v1517_v24 = vmax.f32 %v1474_v32, 0.0  ;;  %v3189_v32 = vld [vmem:[#allocation2] sm:$0xff] }
 0x13a   : > { %v3222_v29 = vmul.f32 %v8421_v55, %v3189_v32 }
 0x13b   : > { %1739 = vst.msk [vmem:[#allocation2 + $0x120] sm:$0xff] %vm278_vm1, %v1517_v24 }
 0x13d   : > { %v1438_v46 = vpop.f32.mrf.mxu0 }
 0x13e   : > { %v1475_v18 = vpop.f32.mrf.mxu2  ;;  %v8393_v0 = vadd.f32 %v8254_v39, %v1438_v46 }
 0x13f   : > { %v1476_v43 = vadd.f32 %v8254_v39, %v1475_v18  ;;  %v3622_v18 = vsel %vm1400_vm0, %v6646_v58, 0 }
 0x140   : > { %v12293_v25 = vmax.f32 %v8393_v0, 0.0  ;;  %3631 = vmatpush.bf16.msrb.mxu0 %v3622_v18 }
 0x141   : > { %v1518_v38 = vmax.f32 %v1476_v43, 0.0  ;;  %v6606_v43 = vld [vmem:[%s12283_s1 + $0x10] sm:$0xff] }
 0x142   : > { %1725 = vst.msk [vmem:[#allocation2 + $0xb0] sm:$0xff] %vm278_vm1, %v12293_v25  ;;  %v8486_v63 = vperm.slane %v6606_v43, 0  ;;  %v8512_v62 = vperm.slane %v6606_v43, 1 }
 0x143   : > { %1740 = vst.msk [vmem:[#allocation2 + $0x128] sm:$0xff] %vm278_vm1, %v1518_v38  ;;  %v1537_v27 = vpack.c.bf16 %v1518_v38, %v1517_v24  ;;  %v3323_v24 = vadd.f32 %v3291_v21, %v3226_v34  ;;  %v8471_v38 = vld [vmem:[#allocation2 + $0x60] sm:$0xff]  ;;  %v8501_v34 = vperm.slane %v6606_v43, 6 }
 0x144   : > { %12388 = vst [vmem:[#allocation13_spill] sm:$0xff] %v8471_v38  ;;  %v3287_v16 = vmul.f32 %v8423_v11, %v8471_v38 }
 0x145   : > { %6602 = vmatmul.msk.bf16.gmra.mxu3 %vm278_vm1, %v1537_v27  ;;  %v1440_v26 = vpop.f32.mrf.mxu0  ;;  %v3389_v27 = vmul.f32 %v8445_v51, %v8453_v36  ;;  %12390 = vst [vmem:[#allocation15_spill] sm:$0xff] %v8486_v63 }
 0x146   : > { %v8403_v54 = vadd.f32 %v8254_v39, %v1440_v26  ;;  %v3422_v26 = vadd.f32 %v3390_v50, %v3324_v22  ;;  %v3319_v59 = vadd.f32 %v3287_v16, %v3222_v29  ;;  %v8536_v29 = vld [vmem:[#allocation2 + $0x100] sm:$0xff] }
 0x147   : > { %v3421_v45 = vadd.f32 %v3389_v27, %v3323_v24  ;;  %v8524_v24 = vperm.slane %v6606_v43, 4  ;;  %v3288_v27 = vmul.f32 %v8423_v11, %v8493_v60  ;;  %12398 = vst [vmem:[#allocation23_spill] sm:$0xff] %v8536_v29 }
 0x148   : > { %v12292_v31 = vmax.f32 %v8403_v54, 0.0 }
 0x14a   : > { %1726 = vst.msk [vmem:[#allocation2 + $0xb8] sm:$0xff] %vm278_vm1, %v12292_v31 }
 0x14e   : > { %v1478_v7 = vpop.f32.mrf.mxu2 }
 0x14f   : > { %v1479_v14 = vadd.f32 %v8254_v39, %v1478_v7  ;;  %v3325_v7 = vadd.f32 %v3293_v47, %v3228_v28 }
 0x151   : > { %v1519_v10 = vmax.f32 %v1479_v14, 0.0  ;;  %v8475_v14 = vld [vmem:[#allocation2 + $0xf0] sm:$0xff] }
 0x152   : > { %12389 = vst [vmem:[#allocation14_spill] sm:$0xff] %v8475_v14  ;;  %v3391_v21 = vmul.f32 %v8445_v51, %v8475_v14  ;;  %v3191_v14 = vld [vmem:[#allocation2 + $0x10] sm:$0xff] }
 0x153   : > { %1741 = vst.msk [vmem:[#allocation2 + $0x130] sm:$0xff] %vm278_vm1, %v1519_v10 }
 0x155   : > { %v1443_v8 = vpop.f32.mrf.mxu0 }
 0x156   : > { %v1480_v52 = vpop.f32.mrf.mxu2  ;;  %v8426_v2 = vadd.f32 %v8254_v39, %v1443_v8  ;;  %v3326_v8 = vadd.f32 %v3294_v12, %v3229_v48  ;;  %v8518_v48 = vld [vmem:[#allocation2 + $0x58] sm:$0xff]  ;;  %v3423_v12 = vadd.f32 %v3391_v21, %v3325_v7  ;;  %v8534_v7 = vperm.slane %v6606_v43, 2 }
 0x157   : > { %v1481_v1 = vadd.f32 %v8254_v39, %v1480_v52  ;;  %v8484_v52 = vld [vmem:[%s12284_s2 + $0x2] ss:$0 sm:$0xff]  ;;  %12395 = vst [vmem:[#allocation20_spill] sm:$0xff] %v8518_v48  ;;  %v1816_v58 = vmul.f32 %v8486_v63, %v8518_v48  ;;  %v8542_v21 = vperm.slane %v6606_v43, 5 }
 0x158   : > { %12383 = vst [vmem:[#allocation8_spill] sm:$0xff] %v8426_v2  ;;  %v12291_v3 = vmax.f32 %v8426_v2, 0.0  ;;  %v3491_v19 = vadd.f32 %v8484_v52, %v3422_v26  ;;  %v3490_v50 = vadd.f32 %v8484_v52, %v3421_v45  ;;  %v8530_v26 = vld [vmem:[#allocation2 + $0x70] sm:$0xff]  ;;  %v8548_v31 = vadd.f32 %v8484_v52, %v3423_v12 }
 0x159   : > { %v1520_v20 = vmax.f32 %v1481_v1, 0.0  ;;  %v8488_v1 = vperm.slane %v6606_v43, 3  ;;  %12397 = vst [vmem:[#allocation22_spill] sm:$0xff] %v8534_v7  ;;  %v1977_v45 = vmul.f32 %v8530_v26, %v8501_v34 }
 0x15a   : > { %1727 = vst.msk [vmem:[#allocation2 + $0xc0] sm:$0xff] %vm278_vm1, %v12291_v3  ;;  %v3522_v53 = vmax.f32 %v3490_v50, 0.0 }
 0x15b   : > { %1742 = vst.msk [vmem:[#allocation2 + $0x138] sm:$0xff] %vm278_vm1, %v1520_v20  ;;  %v1538_v5 = vpack.c.bf16 %v1520_v20, %v1519_v10  ;;  %v3359_v10 = vld [vmem:[#allocation2 + $0xf8] sm:$0xff]  ;;  %v8499_v20 = vld [vmem:[#allocation2 + $0x50] sm:$0xff]  ;;  %v1880_v33 = vmul.f32 %v8471_v38, %v8488_v1  ;;  %v1881_v32 = vmul.f32 %v8493_v60, %v8488_v1 }
 0x15c   : > { %12391 = vst [vmem:[#allocation16_spill] sm:$0xff] %v8488_v1  ;;  %v3392_v41 = vmul.f32 %v8445_v51, %v3359_v10  ;;  %v1815_v28 = vmul.f32 %v8486_v63, %v8499_v20  ;;  %v8532_v10 = vperm.slane %v6606_v43, 7 }
 0x15d   : > { %6603 = vmatmul.msk.bf16.gmra.mxu3 %vm278_vm1, %v1538_v5  ;;  %v1445_v4 = vpop.f32.mrf.mxu0  ;;  %12393 = vst [vmem:[#allocation18_spill] sm:$0xff] %v8499_v20  ;;  %v3190_v5 = vld [vmem:[#allocation2 + $0x8] sm:$0xff]  ;;  %v1913_v43 = vadd.f32 %v1881_v32, %v1816_v58  ;;  %v3197_v58 = vld [vmem:[#allocation2 + $0x40] sm:$0xff]  ;;  %v8573_v32 = vmul.f32 %v8445_v51, %v3361_v15  ;;  %v2374_v15 = vmul.f32 %v8471_v38, %v8534_v7 }
 0x15e   : > { %v8465_v46 = vadd.f32 %v8254_v39, %v1445_v4  ;;  %v3424_v4 = vadd.f32 %v3392_v41, %v3326_v8  ;;  %v3223_v18 = vmul.f32 %v8421_v55, %v3190_v5  ;;  %12396 = vst [vmem:[#allocation21_spill] sm:$0xff] %v8532_v10  ;;  %v8538_v8 = vld [vmem:[#allocation2 + $0x78] sm:$0xff]  ;;  %v1912_v37 = vadd.f32 %v1880_v33, %v1815_v28 }
 0x15f   : > { %v3523_v41 = vmax.f32 %v3491_v19, 0.0  ;;  %12399 = vst [vmem:[#allocation24_spill] sm:$0xff] %v8548_v31  ;;  %v8560_v19 = vmul.f32 %v8445_v51, %v8536_v29 }
 0x160   : > { %12387 = vst [vmem:[#allocation12_spill] sm:$0xff] %v8465_v46  ;;  %v12290_v40 = vmax.f32 %v8465_v46, 0.0  ;;  %v8551_v25 = vadd.f32 %v8484_v52, %v3424_v4  ;;  %v1978_v4 = vmul.f32 %v8538_v8, %v8501_v34 }
 0x161   : > { %v8506_v22 = vld [vmem:[#allocation2 + $0xc0] sm:$0xff]  ;;  %12403 = vst [vmem:[#allocation28_spill] sm:$0xff] %v8560_v19  ;;  %v8570_v13 = vpack.c.bf16 %v3523_v41, %v3522_v53  ;;  %v2373_v53 = vmul.f32 %v8534_v7, %v8518_v48 }
 0x162   : > { %1728 = vst.msk [vmem:[#allocation2 + $0xc8] sm:$0xff] %vm278_vm1, %v12290_v40  ;;  %v3385_v47 = vmul.f32 %v8445_v51, %v8506_v22  ;;  %v8591_v41 = vadd.f32 %v1978_v4, %v1913_v43 }
 0x163   : > { %12394 = vst [vmem:[#allocation19_spill] sm:$0xff] %v8506_v22 }
 0x164   : > { %v3417_v3 = vadd.f32 %v3385_v47, %v3319_v59  ;;  %12400 = vst [vmem:[#allocation25_spill] sm:$0xff] %v8551_v25  ;;  %v3320_v47 = vadd.f32 %v3288_v27, %v3223_v18  ;;  %v2211_v27 = vmul.f32 %v8493_v60, %v8524_v24  ;;  %v3224_v25 = vmul.f32 %v8421_v55, %v3191_v14 }
 0x165   : > { %v1817_v14 = vmul.f32 %v8471_v38, %v8486_v63 }
 0x166   : > { %v3486_v18 = vadd.f32 %v8484_v52, %v3417_v3  ;;  %v2407_v3 = vmul.f32 %v8530_v26, %v8542_v21 }
 0x167   : > { %v1483_v16 = vpop.f32.mrf.mxu2 }
 0x168   : > { %v8545_v5 = vadd.f32 %v8254_v39, %v1483_v16  ;;  %v1448_v40 = vpop.f32.mrf.mxu0  ;;  %v8568_v16 = vadd.f32 %v1977_v45, %v1912_v37  ;;  %v2406_v37 = vmul.f32 %v8493_v60, %v8542_v21  ;;  %v3518_v30 = vmax.f32 %v3486_v18, 0.0 }
 0x169   : > { %v8554_v28 = vadd.f32 %v8254_v39, %v1448_v40  ;;  %v8556_v33 = vld [vmem:[#allocation2 + $0xc8] sm:$0xff] }
 0x16a   : > { %12402 = vst [vmem:[#allocation27_spill] sm:$0xff] %v8556_v33  ;;  %v1521_v59 = vmax.f32 %v8545_v5, 0.0  ;;  %v3386_v12 = vmul.f32 %v8445_v51, %v8556_v33  ;;  %v12405_v33 = vmax.f32 %v8360_v35, 0.0  ;;  %v8612_v5 = vld [vmem:[%s12283_s1 + $0x18] ss:$0 sm:$0xff]  ;;  %v2438_v18 = vadd.f32 %v2406_v37, %v2373_v53 }
 0x16b   : > { %12401 = vst [vmem:[#allocation26_spill] sm:$0xff] %v8554_v28  ;;  %v12297_v40 = vmax.f32 %v8554_v28, 0.0  ;;  %v2472_v35 = vmul.f32 %v8612_v5, %v8428_v42  ;;  %v3289_v53 = vmul.f32 %v8423_v11, %v8530_v26  ;;  %v2276_v37 = vmul.f32 %v8538_v8, %v8532_v10 }
 0x16c   : > { %1743 = vst.msk [vmem:[#allocation2 + $0x140] sm:$0xff] %vm278_vm1, %v1521_v59  ;;  %v3418_v50 = vadd.f32 %v3386_v12, %v3320_v47  ;;  %v2178_v47 = vmul.f32 %v8512_v62, %v8518_v48  ;;  %v8596_v12 = vmul.f32 %v8421_v55, %v3197_v58  ;;  %v12404_v58 = vmax.f32 %v8350_v61, 0.0 }
 0x16d   : > { %1729 = vst.msk [vmem:[#allocation2 + $0xd0] sm:$0xff] %vm278_vm1, %v12297_v40  ;;  %v2471_v61 = vmul.f32 %v8612_v5, %v8538_v8 }
 0x16e   : > { %v3487_v45 = vadd.f32 %v8484_v52, %v3418_v50  ;;  %v2372_v50 = vmul.f32 %v8534_v7, %v8499_v20  ;;  %v1528_v6 = vpack.c.bf16 %v12405_v33, %v12404_v58  ;;  %v3198_v33 = vld [vmem:[#allocation2 + $0x48] sm:$0xff] }
 0x16f   : > { %v1485_v40 = vpop.f32.mrf.mxu2  ;;  %v8624_v58 = vld [vmem:[#allocation2 + $0xa8] sm:$0xff] }
 0x170   : > { %v1486_v43 = vadd.f32 %v8254_v39, %v1485_v40  ;;  %v1450_v4 = vpop.f32.mrf.mxu0  ;;  %v3519_v29 = vmax.f32 %v3487_v45, 0.0  ;;  %v2405_v40 = vmul.f32 %v8471_v38, %v8542_v21  ;;  %v2439_v45 = vadd.f32 %v2407_v3, %v2374_v15  ;;  %12407 = vst [vmem:[#allocation30_spill] sm:$0xff] %v8624_v58  ;;  %6593 = vmatmul.msk.bf16.gmra.mxu1 %vm278_vm1, %v1528_v6 }
 0x171   : > { %v8615_v28 = vadd.f32 %v8254_v39, %v1450_v4  ;;  %v1642_v36 = vpop.f32.mrf.mxu3  ;;  %v2243_v15 = vadd.f32 %v2211_v27, %v2178_v47  ;;  %v3296_v6 = vmul.f32 %v8423_v11, %v8624_v58  ;;  %v2470_v3 = vmul.f32 %v8612_v5, %v8530_v26 }
 0x172   : > { %v1522_v22 = vmax.f32 %v1486_v43, 0.0  ;;  %v3550_v19 = vpack.c.bf16 %v3519_v29, %v3518_v30  ;;  %1699 = vst.msk [vmem:[#allocation3 + $0x80] sm:$0xff] %vm1682_vm7, %v1642_v36  ;;  %v2437_v27 = vadd.f32 %v2405_v40, %v2372_v50  ;;  %v8652_v47 = vadd.f32 %v2471_v61, %v2438_v18  ;;  %v8673_v61 = vld [vmem:[#allocation2 + $0xa0] sm:$0xff] }
 0x173   : > { %12406 = vst [vmem:[#allocation29_spill] sm:$0xff] %v8615_v28  ;;  %v12311_v4 = vmax.f32 %v8615_v28, 0.0  ;;  %v8654_v43 = vadd.f32 %v2472_v35, %v2439_v45  ;;  %v1883_v28 = vmul.f32 %v8538_v8, %v8488_v1  ;;  %v12410_v50 = vrot.slane %v8568_v16, 7 }
 0x174   : > { %1744 = vst.msk [vmem:[#allocation2 + $0x148] sm:$0xff] %vm278_vm1, %v1522_v22  ;;  %v1539_v36 = vpack.c.bf16 %v1522_v22, %v1521_v59  ;;  %6648 = vmatmul.msk.bf16.vlgmr.msrb.gmra.mxu0 %vm278_vm1, %v3550_v19  ;;  %v8633_v29 = vld [vmem:[#allocation2 + $0xd0] sm:$0xff]  ;;  %v1882_v22 = vmul.f32 %v8530_v26, %v8488_v1  ;;  %v3231_v19 = vmul.f32 %v8421_v55, %v3198_v33  ;;  %v3192_v59 = vld [vmem:[#allocation2 + $0x18] sm:$0xff] }
 0x175   : > { %12408 = vst [vmem:[#allocation31_spill] sm:$0xff] %v8633_v29  ;;  %v3387_v30 = vmul.f32 %v8445_v51, %v8633_v29  ;;  %v1818_v33 = vmul.f32 %v8493_v60, %v8486_v63  ;;  %v2177_v18 = vmul.f32 %v8512_v62, %v8499_v20  ;;  %v2308_v45 = vadd.f32 %v2276_v37, %v2243_v15 }
 0x176   : > { %1730 = vst.msk [vmem:[#allocation2 + $0xd8] sm:$0xff] %vm278_vm1, %v12311_v4  ;;  %6604 = vmatmul.msk.bf16.gmra.mxu3 %vm278_vm1, %v1539_v36  ;;  %v3321_v4 = vadd.f32 %v3289_v53, %v3224_v25  ;;  %v12409_v36 = vrot.slane %v8591_v41, 7  ;;  %v2210_v25 = vmul.f32 %v8471_v38, %v8524_v24  ;;  %v3225_v53 = vmul.f32 %v8421_v55, %v3192_v59 }
 0x177   : > { %v3290_v29 = vmul.f32 %v8423_v11, %v8538_v8  ;;  %v1914_v31 = vadd.f32 %v1882_v22, %v1817_v14  ;;  %v8681_v20 = vadd.f32 %v2470_v3, %v2437_v27  ;;  %v1915_v2 = vadd.f32 %v1883_v28, %v1818_v33 }
 0x178   : > { %v2104_v40 = vsel %vm2073_vm6, %v12410_v50, %v12409_v36  ;;  %v1979_v36 = vmul.f32 %v8501_v34, %v8428_v42  ;;  %v3419_v46 = vadd.f32 %v3387_v30, %v3321_v4  ;;  %v1980_v59 = vmul.f32 %v8419_v17, %v8501_v34 }
 0x179   : > { %v1488_v35 = vpop.f32.mrf.mxu2  ;;  %12411 = vst [vmem:[#allocation32_spill] sm:$0xff] %v8681_v20  ;;  %v3295_v55 = vmul.f32 %v8423_v11, %v8673_v61  ;;  %v2242_v48 = vadd.f32 %v2210_v25, %v2177_v18  ;;  %v3328_v27 = vadd.f32 %v3296_v6, %v3231_v19  ;;  %v3322_v3 = vadd.f32 %v3290_v29, %v3225_v53 }
 0x17a   : > { %v1489_v50 = vadd.f32 %v8254_v39, %v1488_v35  ;;  %v2275_v35 = vmul.f32 %v8530_v26, %v8532_v10  ;;  %v2340_v58 = vadd.f32 %v2308_v45, %v2104_v40  ;;  %v2011_v37 = vadd.f32 %v1979_v36, %v1914_v31 }
 0x17b   : > { %v12412_v4 = vrot.slane %v8654_v43, 1  ;;  %v12413_v30 = vrot.slane %v8652_v47, 1  ;;  %v2179_v18 = vmul.f32 %v8471_v38, %v8512_v62  ;;  %v2180_v29 = vmul.f32 %v8493_v60, %v8512_v62 }
 0x17c   : > { %v1523_v14 = vmax.f32 %v1489_v50, 0.0  ;;  %v3488_v31 = vadd.f32 %v8484_v52, %v3419_v46  ;;  %v8705_v6 = vadd.f32 %v1980_v59, %v1915_v2  ;;  %v2212_v40 = vmul.f32 %v8530_v26, %v8524_v24 }
 0x17d   : > { %v3355_v22 = vld [vmem:[#allocation2 + $0xd8] sm:$0xff]  ;;  %v2596_v33 = vsel %vm2566_vm8, %v12413_v30, %v12412_v4  ;;  %v2375_v25 = vmul.f32 %v8493_v60, %v8534_v7  ;;  %v2376_v45 = vmul.f32 %v8530_v26, %v8534_v7  ;;  %v2408_v53 = vmul.f32 %v8538_v8, %v8542_v21  ;;  %v1644_v4 = vpop.f32.mrf.mxu3 }
 0x17e   : > { %v3388_v15 = vmul.f32 %v8445_v51, %v3355_v22  ;;  %1745 = vst.msk [vmem:[#allocation2 + $0x150] sm:$0xff] %vm278_vm1, %v1523_v14  ;;  %v2409_v36 = vmul.f32 %v8542_v21, %v8428_v42  ;;  %v2606_v2 = vsel %vm2600_vm9, %v2596_v33, 0.0  ;;  %v2213_v59 = vmul.f32 %v8538_v8, %v8524_v24 }
 0x17f   : > { %v12414_v30 = vmax.f32 %v8369_v44, 0.0  ;;  %v12415_v28 = vmax.f32 %v8379_v57, 0.0  ;;  %v3520_v33 = vmax.f32 %v3488_v31, 0.0  ;;  %1700 = vst.msk [vmem:[#allocation3 + $0x88] sm:$0xff] %vm1682_vm7, %v1644_v4  ;;  %v2638_v51 = vadd.f32 %v2606_v2, %v2340_v58 }
 0x180   : > { %v3420_v19 = vadd.f32 %v3388_v15, %v3322_v3  ;;  %v2043_v15 = vrot.slane %v2011_v37, 7  ;;  %v6683_v3 = vld [vmem:[%s12285_s3 + $0xc] sm:$0xf]  ;;  %v1884_v37 = vmul.f32 %v8428_v42, %v8488_v1  ;;  %v2440_v57 = vadd.f32 %v2408_v53, %v2375_v25 }
 0x181   : > { %v1490_v50 = vpop.f32.mrf.mxu2  ;;  %v1529_v60 = vpack.c.bf16 %v12415_v28, %v12414_v30  ;;  %v2441_v28 = vadd.f32 %v2409_v36, %v2376_v45  ;;  %v2473_v31 = vmul.f32 %v8612_v5, %v8419_v17  ;;  %v1885_v58 = vmul.f32 %v8419_v17, %v8488_v1 }
 0x182   : > { %v3489_v46 = vadd.f32 %v8484_v52, %v3420_v19  ;;  %v1491_v22 = vadd.f32 %v8254_v39, %v1490_v50  ;;  %v1819_v19 = vmul.f32 %v8530_v26, %v8486_v63  ;;  %v4540_v39 = vsel %vm1400_vm0, %v6683_v3, 0 }
 0x183   : > { %v2044_v50 = vrot.slane %v8705_v6, 7  ;;  %4549 = vmatpush.bf16.msra.mxu2 %v4540_v39  ;;  %6594 = vmatmul.msk.bf16.gmra.mxu1 %vm278_vm1, %v1529_v60  ;;  %v1820_v3 = vmul.f32 %v8538_v8, %v8486_v63  ;;  %v1981_v60 = vmul.f32 %v8501_v34, %v8435_v49  ;;  %v12416_v25 = vrot.slane %v8652_v47, 1 }
 0x184   : > { %v3521_v38 = vmax.f32 %v3489_v46, 0.0  ;;  %v1524_v44 = vmax.f32 %v1491_v22, 0.0  ;;  %v2474_v46 = vmul.f32 %v8612_v5, %v8435_v49  ;;  %v1916_v2 = vadd.f32 %v1884_v37, %v1819_v19 }
 0x185   : > { %v12417_v45 = vrot.slane %v8681_v20, 1  ;;  %v8765_v36 = vadd.f32 %v8573_v32, %v3328_v27  ;;  %v2244_v47 = vadd.f32 %v2212_v40, %v2179_v18  ;;  %v2277_v22 = vmul.f32 %v8532_v10, %v8428_v42 }
 0x186   : > { %v3551_v30 = vpack.c.bf16 %v3521_v38, %v3520_v33  ;;  %1746 = vst.msk [vmem:[#allocation2 + $0x158] sm:$0xff] %vm278_vm1, %v1524_v44  ;;  %v1540_v4 = vpack.c.bf16 %v1524_v44, %v1523_v14  ;;  %v8751_v38 = vadd.f32 %v2275_v35, %v2242_v48  ;;  %v8762_v14 = vadd.f32 %v3295_v55, %v8596_v12  ;;  %v8771_v48 = vld [vmem:[%s12284_s2 + $0x1] ss:$0 sm:$0xff]  ;;  %v1813_v44 = vld [vmem:[#allocation2 + $0x148] sm:$0xff] }
 0x187   : > { %v8759_v53 = vsel %vm2566_vm8, %v12417_v45, %v12416_v25  ;;  %v2245_v35 = vadd.f32 %v2213_v59, %v2180_v29  ;;  %v2278_v19 = vmul.f32 %v8419_v17, %v8532_v10  ;;  %v8781_v55 = vsel %vm2073_vm6, %v2043_v15, %v2044_v50  ;;  %v1975_v29 = vld [vmem:[#allocation2 + $0x168] sm:$0xff]  ;;  %v1647_v59 = vpop.f32.mrf.mxu3 }
 0x188   : > { %6649 = vmatmul.msk.bf16.gmra.mxu0 %vm278_vm1, %v3551_v30  ;;  %6605 = vmatmul.msk.bf16.gmra.mxu3 %vm278_vm1, %v1540_v4  ;;  %v12418_v32 = vrot.slane %v8591_v41, 7  ;;  %v8787_v27 = vadd.f32 %v2473_v31, %v2440_v57  ;;  %v8789_v18 = vadd.f32 %v2474_v46, %v2441_v28  ;;  %v8792_v40 = vadd.f32 %v8771_v48, %v2638_v51 }
 0x189   : > { %v1917_v37 = vadd.f32 %v1885_v58, %v1820_v3  ;;  %v1982_v33 = vmul.f32 %v8440_v56, %v8501_v34  ;;  %v2013_v39 = vadd.f32 %v1981_v60, %v1916_v2  ;;  %1701 = vst.msk [vmem:[#allocation3 + $0x90] sm:$0xff] %vm1682_vm7, %v1647_v59  ;;  %v2377_v41 = vmul.f32 %v8538_v8, %v8534_v7 }
 0x18a   : > { %v2103_v12 = vsel %vm2073_vm6, %v12418_v32, %v2043_v15  ;;  %v2378_v15 = vmul.f32 %v8534_v7, %v8428_v42  ;;  %v2410_v57 = vmul.f32 %v8419_v17, %v8542_v21  ;;  %v2411_v51 = vmul.f32 %v8542_v21, %v8435_v49 }
 0x18b   : > { %v2114_v28 = vsel %vm2106_vm10, %v2103_v12, 0.0  ;;  %v2309_v30 = vadd.f32 %v2277_v22, %v2244_v47  ;;  %v8807_v31 = vadd.f32 %v2278_v19, %v2245_v35  ;;  %v2181_v46 = vmul.f32 %v8530_v26, %v8512_v62 }
 0x18c   : > { %v2008_v4 = vmul.f32 %v8501_v34, %v1975_v29  ;;  %v12330_v58 = vrot.slane %v8787_v27, 1  ;;  %v12328_v2 = vrot.slane %v8789_v18, 1  ;;  %v2214_v60 = vmul.f32 %v8524_v24, %v8428_v42 }
 0x18d   : > { %v1878_v3 = vld [vmem:[#allocation2 + $0x158] sm:$0xff]  ;;  %v1846_v25 = vmul.f32 %v8486_v63, %v1813_v44  ;;  %v8818_v47 = vadd.f32 %v1982_v33, %v1917_v37  ;;  %v2045_v35 = vrot.slane %v2013_v39, 7  ;;  %v2442_v22 = vadd.f32 %v2410_v57, %v2377_v41 }
 0x18e   : > { %v1911_v45 = vmul.f32 %v8488_v1, %v1878_v3  ;;  %v2443_v19 = vadd.f32 %v2411_v51, %v2378_v15  ;;  %v2475_v26 = vmul.f32 %v8612_v5, %v8440_v56  ;;  %v2476_v32 = vmul.f32 %v8612_v5, %v8673_v61 }
 0x18f   : > { %v1821_v59 = vmul.f32 %v8428_v42, %v8486_v63  ;;  %v1886_v44 = vmul.f32 %v8435_v49, %v8488_v1  ;;  %v8829_v37 = vadd.f32 %v2309_v30, %v2114_v28  ;;  %v2594_v33 = vsel %vm2566_vm8, %v12330_v58, %v12328_v2  ;;  %v1649_v57 = vpop.f32.mrf.mxu3 }
 0x190   : > { %v1943_v12 = vadd.f32 %v1911_v45, %v1846_v25  ;;  %v2182_v39 = vmul.f32 %v8538_v8, %v8512_v62  ;;  %v2215_v41 = vmul.f32 %v8419_v17, %v8524_v24  ;;  %v12420_v51 = vmax.f32 %v8393_v0, 0.0  ;;  %1702 = vst.msk [vmem:[#allocation3 + $0x98] sm:$0xff] %vm1682_vm7, %v1649_v57 }
 0x191   : > { %v12421_v28 = vmax.f32 %v8403_v54, 0.0  ;;  %v12331_v3 = vrot.slane %v8818_v47, 7  ;;  %v2246_v25 = vadd.f32 %v2214_v60, %v2181_v46  ;;  %v2101_v8 = vsel %vm2073_vm6, %v2044_v50, %v2045_v35 }
 0x192   : > { %v8841_v15 = vadd.f32 %v2008_v4, %v1943_v12  ;;  %v2507_v45 = vadd.f32 %v2475_v26, %v2442_v22  ;;  %v8853_v2 = vadd.f32 %v2476_v32, %v2443_v19  ;;  %v1822_v4 = vmul.f32 %v8419_v17, %v8486_v63 }
 0x193   : > { %v1530_v30 = vpack.c.bf16 %v12421_v28, %v12420_v51  ;;  %v1887_v54 = vmul.f32 %v8440_v56, %v8488_v1  ;;  %v1918_v46 = vadd.f32 %v1886_v44, %v1821_v59  ;;  %v1983_v6 = vmul.f32 %v8501_v34, %v8673_v61 }
 0x194   : > { %12419 = vst [vmem:[#allocation33_spill] sm:$0xff] %v8841_v15  ;;  %v12329_v0 = vrot.slane %v8841_v15, 7  ;;  %v2379_v50 = vmul.f32 %v8419_v17, %v8534_v7  ;;  %v2380_v60 = vmul.f32 %v8534_v7, %v8435_v49  ;;  %v2412_v22 = vmul.f32 %v8440_v56, %v8542_v21 }
 0x195   : > { %6595 = vmatmul.msk.bf16.gmra.mxu1 %vm278_vm1, %v1530_v30  ;;  %v2413_v19 = vmul.f32 %v8542_v21, %v8673_v61  ;;  %v12422_v26 = vrot.slane %v8568_v16, 7  ;;  %v2247_v12 = vadd.f32 %v2215_v41, %v2182_v39  ;;  %v2279_v59 = vmul.f32 %v8532_v10, %v8435_v49  ;;  %v12423_v39 = vld [vmem:[#allocation30_spill] sm:$0xff] }
 0x196   : > { %v2280_v44 = vmul.f32 %v8440_v56, %v8532_v10  ;;  %v2100_v16 = vsel %vm2073_vm6, %v2045_v35, %v12331_v3  ;;  %v2539_v51 = vrot.slane %v2507_v45, 1  ;;  %v1984_v41 = vmul.f32 %v12423_v39, %v8501_v34 }
 0x197   : > { %v2105_v32 = vsel %vm2073_vm6, %v12329_v0, %v12422_v26  ;;  %v1919_v26 = vadd.f32 %v1887_v54, %v1822_v4  ;;  %v8893_v0 = vld [vmem:[#allocation2 + $0xb0] sm:$0xff]  ;;  %v2444_v29 = vadd.f32 %v2412_v22, %v2379_v50  ;;  %v2445_v58 = vadd.f32 %v2413_v19, %v2380_v60  ;;  %v1652_v3 = vpop.f32.mrf.mxu3 }
 0x198   : > { %v2112_v57 = vsel %vm2106_vm10, %v2105_v32, 0.0  ;;  %6650 = vmatmul.msk.bf16.gmra.mxu0 %vm278_vm1, %v8570_v13  ;;  %v2015_v32 = vadd.f32 %v1983_v6, %v1918_v46  ;;  %v2477_v13 = vmul.f32 %v8612_v5, %v12423_v39  ;;  %v2478_v35 = vmul.f32 %v8612_v5, %v8893_v0  ;;  %1703 = vst.msk [vmem:[#allocation3 + $0xa0] sm:$0xff] %vm1682_vm7, %v1652_v3 }
 0x199   : > { %v2339_v28 = vadd.f32 %v8751_v38, %v2112_v57  ;;  %v2116_v38 = vsel %vm2106_vm10, %v2101_v8, 0.0  ;;  %v2311_v57 = vadd.f32 %v2279_v59, %v2246_v25  ;;  %v2312_v30 = vadd.f32 %v2280_v44, %v2247_v12 }
 0x19a   : > { %v2183_v4 = vmul.f32 %v8512_v62, %v8428_v42  ;;  %v2184_v54 = vmul.f32 %v8419_v17, %v8512_v62  ;;  %v2216_v46 = vmul.f32 %v8524_v24, %v8435_v49  ;;  %v2342_v25 = vadd.f32 %v8807_v31, %v8781_v55 }
 0x19b   : > { %v2637_v45 = vadd.f32 %v8759_v53, %v2339_v28  ;;  %v2217_v53 = vmul.f32 %v8440_v56, %v8524_v24  ;;  %v12424_v8 = vrot.slane %v8787_v27, 1  ;;  %v12425_v3 = vrot.slane %v8654_v43, 1 }
 0x19c   : > { %v8920_v50 = vadd.f32 %v1984_v41, %v1919_v26  ;;  %v12426_v17 = vrot.slane %v8853_v2, 1  ;;  %v2047_v22 = vrot.slane %v2015_v32, 7  ;;  %v2509_v19 = vadd.f32 %v2477_v13, %v2444_v29  ;;  %v8934_v26 = vld [vmem:[#allocation2 + $0xb8] sm:$0xff] }
 0x19d   : > { %v2674_v6 = vadd.f32 %v8771_v48, %v2637_v45  ;;  %v2595_v42 = vsel %vm2566_vm8, %v12425_v3, %v12424_v8  ;;  %v8926_v12 = vadd.f32 %v2478_v35, %v2445_v58  ;;  %v2608_v55 = vsel %vm2600_vm9, %v2594_v33, 0.0 }
 0x19e   : > { %v2592_v60 = vsel %vm2566_vm8, %v2539_v51, %v12426_v17  ;;  %v2343_v27 = vadd.f32 %v2311_v57, %v2116_v38  ;;  %v2344_v43 = vadd.f32 %v2312_v30, %v2100_v16  ;;  %v2248_v31 = vadd.f32 %v2216_v46, %v2183_v4  ;;  %v12431_v57 = vld [vmem:[#allocation7_spill] sm:$0xff]  ;;  %v12432_v46 = vld [vmem:[#allocation8_spill] sm:$0xff] }
 0x19f   : > { %v2706_v59 = vmax.f32 %v2674_v6, 0.0  ;;  %v2249_v44 = vadd.f32 %v2217_v53, %v2184_v54  ;;  %v2281_v41 = vmul.f32 %v8532_v10, %v8673_v61  ;;  %v2282_v28 = vmul.f32 %v12423_v39, %v8532_v10  ;;  %v1654_v54 = vpop.f32.mrf.mxu3  ;;  %v12434_v6 = vld [vmem:[#allocation12_spill] sm:$0xff] }
 0x1a0   : > { %v12427_v29 = vmax.f32 %v8792_v40, 0.0  ;;  %v12428_v32 = vrot.slane %v8789_v18, 1  ;;  %v2610_v16 = vsel %vm2600_vm9, %v2592_v60, 0.0  ;;  %v12333_v30 = vrot.slane %v8920_v50, 7  ;;  %v12430_v40 = vld [vmem:[#allocation20_spill] sm:$0xff]  ;;  %1704 = vst.msk [vmem:[#allocation3 + $0xa8] sm:$0xff] %vm1682_vm7, %v1654_v54 }
 0x1a1   : > { %v12429_v13 = vrot.slane %v8818_v47, 7  ;;  %v2541_v45 = vrot.slane %v2509_v19, 1  ;;  %v12332_v38 = vrot.slane %v8926_v12, 1  ;;  %v3233_v4 = vmul.f32 %v12431_v57, %v12430_v40 }
 0x1a2   : > { %v2738_v58 = vpack.c.bf16 %v12427_v29, %v2706_v59  ;;  %v2593_v33 = vsel %vm2566_vm8, %v12428_v32, %v2539_v51  ;;  %v2639_v18 = vadd.f32 %v2595_v42, %v8829_v37  ;;  %v2640_v51 = vadd.f32 %v2608_v55, %v2342_v25  ;;  %v12436_v42 = vld [vmem:[#allocation18_spill] sm:$0xff] }
 0x1a3   : > { %v2099_v35 = vsel %vm2073_vm6, %v12429_v13, %v2047_v22  ;;  %v12433_v53 = vmax.f32 %v12432_v46, 0.0  ;;  %v12435_v8 = vmax.f32 %v12434_v6, 0.0  ;;  %v3298_v3 = vmul.f32 %v8423_v11, %v8934_v26  ;;  %v3363_v32 = vld [vmem:[#allocation2 + $0x118] sm:$0xff] }
 0x1a4   : > { %6611 = vmatmul.msk.bf16.vlgmr.msrb.gmra.mxu2 %vm278_vm1, %v2738_v58  ;;  %v2641_v17 = vadd.f32 %v2593_v33, %v2343_v27  ;;  %v2642_v60 = vadd.f32 %v2610_v16, %v2344_v43  ;;  %v2313_v19 = vadd.f32 %v2281_v41, %v2248_v31  ;;  %v2314_v59 = vadd.f32 %v2282_v28, %v2249_v44  ;;  %v12437_v43 = vld [vmem:[#allocation24_spill] sm:$0xff]  ;;  %v12439_v31 = vld [vmem:[#allocation25_spill] sm:$0xff] }
 0x1a5   : > { %v1531_v47 = vpack.c.bf16 %v12435_v8, %v12433_v53  ;;  %v2098_v37 = vsel %vm2073_vm6, %v2047_v22, %v12333_v30  ;;  %v2118_v25 = vsel %vm2106_vm10, %v2099_v35, 0.0  ;;  %v3232_v55 = vmul.f32 %v12431_v57, %v12436_v42  ;;  %v12441_v28 = vld [vmem:[#allocation28_spill] sm:$0xff]  ;;  %v8989_v53 = vld [vmem:[#allocation2 + $0x110] sm:$0xff] }
 0x1a6   : > { %v3297_v27 = vmul.f32 %v8423_v11, %v8893_v0  ;;  %v12438_v29 = vmax.f32 %v12437_v43, 0.0  ;;  %v12440_v44 = vmax.f32 %v12439_v31, 0.0  ;;  %v3425_v58 = vadd.f32 %v12441_v28, %v8762_v14  ;;  %12442 = vst [vmem:[#allocation30_spill] sm:$0xff] %v8989_v53  ;;  %v3205_v31 = vld [vmem:[#allocation2 + $0x80] sm:$0xff] }
 0x1a7   : > { %6596 = vmatmul.msk.bf16.gmra.mxu1 %vm278_vm1, %v1531_v47  ;;  %v2590_v22 = vsel %vm2566_vm8, %v2541_v45, %v12332_v38  ;;  %v2676_v33 = vadd.f32 %v8771_v48, %v2639_v18  ;;  %v2677_v16 = vadd.f32 %v8771_v48, %v2640_v51  ;;  %v3495_v13 = vadd.f32 %v8484_v52, %v8765_v36 }
 0x1a8   : > { %v3553_v41 = vpack.c.bf16 %v12440_v44, %v12438_v29  ;;  %v3330_v35 = vadd.f32 %v3298_v3, %v3233_v4  ;;  %v2678_v40 = vadd.f32 %v8771_v48, %v2641_v17  ;;  %v2679_v14 = vadd.f32 %v8771_v48, %v2642_v60  ;;  %v12444_v4 = vld [vmem:[#allocation9_spill] sm:$0xff]  ;;  %v3364_v29 = vld [vmem:[#allocation2 + $0x120] sm:$0xff] }
 0x1a9   : > { %v2345_v54 = vadd.f32 %v2313_v19, %v2118_v25  ;;  %v2346_v46 = vadd.f32 %v2314_v59, %v2098_v37  ;;  %v12443_v6 = vrot.slane %v8853_v2, 1  ;;  %v2612_v51 = vsel %vm2600_vm9, %v2590_v22, 0.0  ;;  %v3366_v22 = vld [vmem:[#allocation2 + $0x130] sm:$0xff] }
 0x1aa   : > { %6651 = vmatmul.msk.bf16.gmra.mxu0 %vm278_vm1, %v3553_v41  ;;  %v3329_v36 = vadd.f32 %v3297_v27, %v3232_v55  ;;  %v3396_v8 = vmul.f32 %v12444_v4, %v3363_v32  ;;  %v3494_v47 = vadd.f32 %v8484_v52, %v3425_v58  ;;  %v3527_v3 = vmax.f32 %v3495_v13, 0.0  ;;  %v12445_v27 = vld [vmem:[#allocation13_spill] sm:$0xff]  ;;  %v12446_v41 = vld [vmem:[#allocation19_spill] sm:$0xff]  ;;  %v3365_v58 = vld [vmem:[#allocation2 + $0x128] sm:$0xff] }
 0x1ab   : > { %v2591_v18 = vsel %vm2566_vm8, %v12443_v6, %v2541_v45  ;;  %v3395_v17 = vmul.f32 %v12444_v4, %v8989_v53  ;;  %v2708_v19 = vmax.f32 %v2676_v33, 0.0  ;;  %v2709_v59 = vmax.f32 %v2677_v16, 0.0  ;;  %v12447_v32 = vld [vmem:[#allocation11_spill] sm:$0xff]  ;;  %v3206_v16 = vld [vmem:[#allocation2 + $0x88] sm:$0xff] }
 0x1ac   : > { %v3428_v60 = vadd.f32 %v3396_v8, %v3330_v35  ;;  %v2643_v37 = vadd.f32 %v2591_v18, %v2345_v54  ;;  %v2644_v2 = vadd.f32 %v2612_v51, %v2346_v46  ;;  %v2710_v25 = vmax.f32 %v2678_v40, 0.0  ;;  %v3367_v8 = vld [vmem:[#allocation2 + $0x138] sm:$0xff] }
 0x1ad   : > { %v2711_v42 = vmax.f32 %v2679_v14, 0.0  ;;  %v3427_v45 = vadd.f32 %v3395_v17, %v3329_v36  ;;  %v3526_v43 = vmax.f32 %v3494_v47, 0.0  ;;  %v3234_v44 = vmul.f32 %v12445_v27, %v12431_v57 }
 0x1ae   : > { %v3497_v55 = vadd.f32 %v8484_v52, %v3428_v60  ;;  %v3299_v28 = vmul.f32 %v12446_v41, %v8423_v11  ;;  %v9008_v33 = vmul.f32 %v8612_v5, %v12447_v32  ;;  %v2739_v13 = vpack.c.bf16 %v2709_v59, %v2708_v19  ;;  %v9025_v60 = vld [vmem:[#allocation2 + $0xe8] sm:$0xff]  ;;  %v12448_v59 = vld [vmem:[#allocation26_spill] sm:$0xff] }
 0x1af   : > { %v3554_v35 = vpack.c.bf16 %v3527_v3, %v3526_v43  ;;  %v1657_v40 = vpop.f32.mrf.mxu3  ;;  %v2680_v14 = vadd.f32 %v8771_v48, %v2643_v37  ;;  %v2681_v54 = vadd.f32 %v8771_v48, %v2644_v2  ;;  %v9012_v46 = vpack.c.bf16 %v2711_v42, %v2710_v25  ;;  %v12450_v2 = vld [vmem:[#allocation29_spill] sm:$0xff]  ;;  %v12452_v43 = vld [vmem:[#allocation10_spill] sm:$0xff] }
 0x1b0   : > { %1705 = vst.msk [vmem:[#allocation3 + $0xb0] sm:$0xff] %vm1682_vm7, %v1657_v40  ;;  %v3496_v6 = vadd.f32 %v8484_v52, %v3427_v45  ;;  %v3397_v18 = vmul.f32 %v12444_v4, %v3364_v29  ;;  %v3238_v51 = vmul.f32 %v12431_v57, %v3205_v31  ;;  %v3398_v36 = vmul.f32 %v12444_v4, %v3365_v58  ;;  %v12453_v58 = vld [vmem:[#allocation27_spill] sm:$0xff] }
 0x1b1   : > { %v9020_v47 = vmul.f32 %v12444_v4, %v3366_v22  ;;  %v3239_v3 = vmul.f32 %v12431_v57, %v3206_v16  ;;  %v3303_v17 = vmul.f32 %v12447_v32, %v8423_v11  ;;  %v3529_v19 = vmax.f32 %v3497_v55, 0.0  ;;  %v9036_v16 = vld [vmem:[#allocation2 + $0xe0] sm:$0xff] }
 0x1b2   : > { %v12449_v37 = vmax.f32 %v12448_v59, 0.0  ;;  %v12451_v25 = vmax.f32 %v12450_v2, 0.0  ;;  %v3331_v45 = vadd.f32 %v3299_v28, %v3234_v44  ;;  %v3304_v29 = vmul.f32 %v12452_v43, %v8423_v11 }
 0x1b3   : > { %v2712_v31 = vmax.f32 %v2680_v14, 0.0  ;;  %v2713_v27 = vmax.f32 %v2681_v54, 0.0  ;;  %v3300_v22 = vmul.f32 %v12453_v58, %v8423_v11  ;;  %v3528_v55 = vmax.f32 %v3496_v6, 0.0  ;;  %v9052_v14 = vld [vmem:[#allocation2 + $0xf0] sm:$0xff] }
 0x1b4   : > { %6612 = vmatmul.msk.bf16.gmra.mxu2 %vm278_vm1, %v2739_v13  ;;  %v1532_v42 = vpack.c.bf16 %v12451_v25, %v12449_v37  ;;  %v9040_v13 = vmul.f32 %v12447_v32, %v8501_v34  ;;  %v9044_v40 = vmul.f32 %v12444_v4, %v3367_v8  ;;  %v9046_v44 = vadd.f32 %v3303_v17, %v3238_v51  ;;  %v12457_v54 = vld [vmem:[#allocation17_spill] sm:$0xff]  ;;  %v9066_v51 = vld [vmem:[#allocation2 + $0xf8] sm:$0xff]  ;;  %v9212_v4 = vld [vmem:[#allocation2 + $0xc0] sm:$0xff] }
 0x1b5   : > { %v9050_v28 = vmul.f32 %v8501_v34, %v9025_v60  ;;  %v3235_v59 = vmul.f32 %v12457_v54, %v12431_v57  ;;  %v9056_v37 = vadd.f32 %v3304_v29, %v3239_v3  ;;  %v9060_v6 = vmul.f32 %v12447_v32, %v8532_v10  ;;  %12461 = vst [vmem:[#allocation25_spill] sm:$0xff] %v9066_v51  ;;  %v12464_v29 = vld [vmem:[#allocation14_spill] sm:$0xff]  ;;  %v1602_v54 = vpop.f32.mrf.mxu1 }
 0x1b6   : > { %12454 = vst [vmem:[#allocation20_spill] sm:$0xff] %v9040_v13  ;;  %v9064_v8 = vmul.f32 %v8532_v10, %v9025_v60  ;;  %v9068_v17 = vpack.c.bf16 %v3529_v19, %v3528_v55  ;;  %v3429_v2 = vadd.f32 %v3397_v18, %v3331_v45  ;;  %v9072_v25 = vmul.f32 %v8542_v21, %v9036_v16 }
 0x1b7   : > { %6597 = vmatmul.msk.bf16.gmra.mxu1 %vm278_vm1, %v1532_v42  ;;  %12455 = vst [vmem:[#allocation7_spill] sm:$0xff] %v9046_v44  ;;  %v9076_v3 = vmul.f32 %v8612_v5, %v9025_v60  ;;  %v9079_v32 = vpack.c.bf16 %v2713_v27, %v2712_v31  ;;  %v1659_v42 = vpop.f32.mrf.mxu3  ;;  %v3332_v43 = vadd.f32 %v3300_v22, %v3235_v59 }
 0x1b8   : > { %12456 = vst [vmem:[#allocation8_spill] sm:$0xff] %v9050_v28  ;;  %v9083_v58 = vmul.f32 %v8612_v5, %v12464_v29  ;;  %v9087_v18 = vmul.f32 %v8423_v11, %v9052_v14  ;;  %v1823_v19 = vmul.f32 %v8435_v49, %v8486_v63  ;;  %v9096_v45 = vmul.f32 %v8423_v11, %v9066_v51 }
 0x1b9   : > { %12458 = vst [vmem:[#allocation12_spill] sm:$0xff] %v9056_v37  ;;  %v9100_v31 = vmul.f32 %v8488_v1, %v9036_v16  ;;  %v9104_v27 = vmul.f32 %v9025_v60, %v8488_v1  ;;  %v9108_v22 = vmul.f32 %v12464_v29, %v8501_v34  ;;  %v9112_v49 = vmul.f32 %v9066_v51, %v8501_v34 }
 0x1ba   : > { %12459 = vst [vmem:[#allocation18_spill] sm:$0xff] %v9060_v6  ;;  %6652 = vmatmul.msk.bf16.gmra.mxu0 %vm278_vm1, %v3554_v35  ;;  %v1888_v35 = vmul.f32 %v8673_v61, %v8488_v1  ;;  %v9116_v55 = vmul.f32 %v8524_v24, %v9036_v16  ;;  %v9119_v59 = vadd.f32 %v8484_v52, %v3429_v2  ;;  %v9165_v6 = vld [vmem:[#allocation2 + $0xd0] sm:$0xff] }
 0x1bb   : > { %12460 = vst [vmem:[#allocation24_spill] sm:$0xff] %v9064_v8  ;;  %v9127_v38 = vmul.f32 %v12464_v29, %v8532_v10  ;;  %v2423_v30 = vmul.f32 %v9052_v14, %v8542_v21  ;;  %v3430_v20 = vadd.f32 %v3398_v36, %v3332_v43  ;;  %v9134_v15 = vmul.f32 %v9066_v51, %v8532_v10  ;;  %v9148_v43 = vld [vmem:[#allocation2 + $0x100] sm:$0xff]  ;;  %v3203_v8 = vld [vmem:[#allocation2 + $0x70] sm:$0xff] }
 0x1bc   : > { %12462 = vst [vmem:[#allocation28_spill] sm:$0xff] %v9072_v25  ;;  %v2390_v2 = vmul.f32 %v8534_v7, %v9036_v16  ;;  %v1824_v29 = vmul.f32 %v8440_v56, %v8486_v63  ;;  %v1985_v36 = vmul.f32 %v8501_v34, %v8893_v0  ;;  %v9169_v53 = vmul.f32 %v8423_v11, %v9148_v43 }
 0x1bd   : > { %12463 = vst [vmem:[#allocation13_spill] sm:$0xff] %v9076_v3  ;;  %v1833_v3 = vmul.f32 %v9036_v16, %v8486_v63  ;;  %v3499_v25 = vadd.f32 %v8484_v52, %v3430_v20  ;;  %v2480_v44 = vmul.f32 %v8612_v5, %v12446_v41  ;;  %v1899_v52 = vmul.f32 %v9066_v51, %v8488_v1  ;;  %v6829_v20 = vld [vmem:[#allocation2 + $0x90] sm:$0xff] }
 0x1be   : > { %12465 = vst [vmem:[#allocation19_spill] sm:$0xff] %v9083_v58  ;;  %v3207_v58 = vld [vmem:[#allocation2 + $0x90] sm:$0xff]  ;;  %v2186_v41 = vmul.f32 %v8440_v56, %v8512_v62 }
 0x1bf   : > { %1706 = vst.msk [vmem:[#allocation3 + $0xb8] sm:$0xff] %vm1682_vm7, %v1659_v42  ;;  %v9123_v42 = vmul.f32 %v8524_v24, %v9025_v60  ;;  %v3531_v37 = vmax.f32 %v3499_v25, 0.0  ;;  %v3204_v25 = vld [vmem:[#allocation2 + $0x78] sm:$0xff] }
 0x1c0   : > { %12466 = vst [vmem:[#allocation11_spill] sm:$0xff] %v9096_v45 }
 0x1c1   : > { %12467 = vst [vmem:[#allocation26_spill] sm:$0xff] %v9100_v31 }
 0x1c2   : > { %12468 = vst [vmem:[#allocation29_spill] sm:$0xff] %v9104_v27  ;;  %v12478_v27 = vld [vmem:[#allocation23_spill] sm:$0xff] }
 0x1c3   : > { %12469 = vst [vmem:[#allocation10_spill] sm:$0xff] %v9108_v22  ;;  %v2415_v22 = vmul.f32 %v8542_v21, %v8893_v0  ;;  %v2488_v31 = vmul.f32 %v8612_v5, %v12478_v27 }
 0x1c4   : > { %12470 = vst [vmem:[#allocation27_spill] sm:$0xff] %v9112_v49  ;;  %v2414_v49 = vmul.f32 %v12423_v39, %v8542_v21  ;;  %6613 = vmatmul.msk.bf16.gmra.mxu2 %vm278_vm1, %v9012_v46  ;;  %v2218_v46 = vmul.f32 %v8524_v24, %v8673_v61 }
 0x1c5   : > { %12471 = vst [vmem:[#allocation17_spill] sm:$0xff] %v9116_v55  ;;  %v1920_v55 = vadd.f32 %v1888_v35, %v1823_v19  ;;  %v2455_v19 = vadd.f32 %v2423_v30, %v2390_v2  ;;  %v9161_v35 = vmul.f32 %v8612_v5, %v9066_v51  ;;  %v1834_v30 = vmul.f32 %v9025_v60, %v8486_v63 }
 0x1c6   : > { %12472 = vst [vmem:[#allocation14_spill] sm:$0xff] %v9123_v42  ;;  %v9140_v42 = vmul.f32 %v8542_v21, %v9025_v60 }
 0x1c7   : > { %12473 = vst [vmem:[#allocation34_spill] sm:$0xff] %v9127_v38  ;;  %v1889_v38 = vmul.f32 %v12423_v39, %v8488_v1  ;;  %v2017_v28 = vadd.f32 %v1985_v36, %v1920_v55  ;;  %v3240_v55 = vmul.f32 %v12431_v57, %v3207_v58  ;;  %v9202_v58 = vadd.f32 %v2488_v31, %v2455_v19 }
 0x1c8   : > { %1683 = vst.msk [vmem:[#allocation3] sm:$0xff] %vm1682_vm7, %v1602_v54  ;;  %v2381_v54 = vmul.f32 %v8440_v56, %v8534_v7  ;;  %v9208_v36 = vmul.f32 %v12478_v27, %v8501_v34  ;;  %v2419_v31 = vmul.f32 %v9165_v6, %v8542_v21 }
 0x1c9   : > { %12474 = vst [vmem:[#allocation35_spill] sm:$0xff] %v9134_v15  ;;  %v2382_v15 = vmul.f32 %v8534_v7, %v8673_v61  ;;  %v1921_v2 = vadd.f32 %v1889_v38, %v1824_v29  ;;  %v3236_v38 = vmul.f32 %v12431_v57, %v3203_v8  ;;  %v3301_v29 = vmul.f32 %v8423_v11, %v9165_v6 }
 0x1ca   : > { %12475 = vst [vmem:[#allocation36_spill] sm:$0xff] %v9140_v42  ;;  %v3530_v42 = vmax.f32 %v9119_v59, 0.0  ;;  %v1898_v59 = vmul.f32 %v9052_v14, %v8488_v1  ;;  %v2446_v13 = vadd.f32 %v2414_v49, %v2381_v54  ;;  %v2219_v8 = vmul.f32 %v12423_v39, %v8524_v24  ;;  %6653 = vmatmul.msk.bf16.gmra.mxu0 %vm278_vm1, %v9068_v17 }
 0x1cb   : > { %12476 = vst [vmem:[#allocation37_spill] sm:$0xff] %v9148_v43  ;;  %v2447_v45 = vadd.f32 %v2415_v22, %v2382_v15  ;;  %v2479_v43 = vmul.f32 %v8612_v5, %v8934_v26  ;;  %v2185_v15 = vmul.f32 %v6829_v20, %v8512_v62  ;;  %v2049_v54 = vrot.slane %v2017_v28, 7 }
 0x1cc   : > { %12477 = vst [vmem:[#allocation38_spill] sm:$0xff] %v9161_v35  ;;  %v1986_v35 = vmul.f32 %v8934_v26, %v8501_v34  ;;  %v9204_v49 = vadd.f32 %v1898_v59, %v1833_v3  ;;  %v3333_v51 = vadd.f32 %v3301_v29, %v3236_v38  ;;  %v9218_v3 = vadd.f32 %v1899_v52, %v1834_v30 }
 0x1cd   : > { %12479 = vst [vmem:[#allocation23_spill] sm:$0xff] %v9165_v6  ;;  %v2511_v56 = vadd.f32 %v2479_v43, %v2446_v13  ;;  %v9210_v20 = vadd.f32 %v2480_v44, %v2447_v45  ;;  %v2250_v27 = vadd.f32 %v2218_v46, %v2185_v15  ;;  %v2251_v28 = vadd.f32 %v2219_v8, %v2186_v41  ;;  %v1662_v45 = vpop.f32.mrf.mxu3 }
 0x1ce   : > { %12480 = vst [vmem:[#allocation39_spill] sm:$0xff] %v9169_v53  ;;  %v1604_v53 = vpop.f32.mrf.mxu1  ;;  %v9200_v22 = vadd.f32 %v1986_v35, %v1921_v2  ;;  %v2283_v13 = vmul.f32 %v8532_v10, %v8893_v0  ;;  %v2284_v44 = vmul.f32 %v8934_v26, %v8532_v10  ;;  %v9228_v19 = vadd.f32 %v9087_v18, %v3240_v55  ;;  %v9248_v55 = vld [vmem:[#allocation2 + $0xc8] sm:$0xff] }
 0x1cf   : > { %1684 = vst.msk [vmem:[#allocation3 + $0x8] sm:$0xff] %vm1682_vm7, %v1604_v53  ;;  %v2386_v53 = vmul.f32 %v8534_v7, %v9212_v4  ;;  %v9232_v35 = vmul.f32 %v8512_v62, %v9036_v16  ;;  %v9236_v17 = vmul.f32 %v8512_v62, %v9025_v60  ;;  %v12485_v30 = vrot.slane %v8920_v50, 7 }
 0x1d0   : > { %12481 = vst [vmem:[#allocation40_spill] sm:$0xff] %v9212_v4  ;;  %v12344_v43 = vrot.slane %v9200_v22, 7  ;;  %v2543_v2 = vrot.slane %v2511_v56, 1  ;;  %v12343_v38 = vrot.slane %v9210_v20, 1  ;;  %v3556_v18 = vpack.c.bf16 %v3531_v37, %v3530_v42 }
 0x1d1   : > { %12482 = vst [vmem:[#allocation41_spill] sm:$0xff] %v9228_v19  ;;  %v2097_v59 = vsel %vm2073_vm6, %v12485_v30, %v2049_v54  ;;  %v1825_v29 = vmul.f32 %v8673_v61, %v8486_v63  ;;  %v1890_v16 = vmul.f32 %v8893_v0, %v8488_v1  ;;  %v3237_v52 = vmul.f32 %v12431_v57, %v3204_v25 }
 0x1d2   : > { %12483 = vst [vmem:[#allocation42_spill] sm:$0xff] %v9232_v35  ;;  %v9251_v15 = vadd.f32 %v2419_v31, %v2386_v53  ;;  %v2315_v50 = vadd.f32 %v2283_v13, %v2250_v27  ;;  %v2316_v41 = vadd.f32 %v2284_v44, %v2251_v28  ;;  %v1826_v46 = vmul.f32 %v12423_v39, %v8486_v63  ;;  %v6830_v31 = vld [vmem:[#allocation2 + $0xc0] sm:$0xff] }
 0x1d3   : > { %12484 = vst [vmem:[#allocation43_spill] sm:$0xff] %v9236_v17  ;;  %v9256_v8 = vadd.f32 %v9020_v47, %v3333_v51  ;;  %v2096_v37 = vsel %vm2073_vm6, %v2049_v54, %v12344_v43  ;;  %v2120_v42 = vsel %vm2106_vm10, %v2097_v59, 0.0  ;;  %v1891_v56 = vmul.f32 %v8934_v26, %v8488_v1 }
 0x1d4   : > { %1707 = vst.msk [vmem:[#allocation3 + $0xc0] sm:$0xff] %vm1682_vm7, %v1662_v45  ;;  %v1827_v53 = vmul.f32 %v8893_v0, %v8486_v63  ;;  %v2588_v47 = vsel %vm2566_vm8, %v2543_v2, %v12343_v38  ;;  %v1828_v51 = vmul.f32 %v8934_v26, %v8486_v63  ;;  %v1892_v54 = vmul.f32 %v6830_v31, %v8488_v1  ;;  %v9282_v45 = vld [vmem:[#allocation2 + $0xd8] sm:$0xff] }
 0x1d5   : > { %v1893_v27 = vmul.f32 %v9248_v55, %v8488_v1  ;;  %v1922_v28 = vadd.f32 %v1890_v16, %v1825_v29  ;;  %v1987_v13 = vmul.f32 %v6830_v31, %v8501_v34  ;;  %v2383_v44 = vmul.f32 %v12423_v39, %v8534_v7  ;;  %v1664_v17 = vpop.f32.mrf.mxu3  ;;  %6614 = vmatmul.msk.bf16.gmra.mxu2 %vm278_vm1, %v9079_v32 }
 0x1d6   : > { %v2416_v25 = vmul.f32 %v8934_v26, %v8542_v21  ;;  %v2347_v30 = vadd.f32 %v2315_v50, %v2120_v42  ;;  %v2348_v59 = vadd.f32 %v2316_v41, %v2096_v37  ;;  %v2384_v38 = vmul.f32 %v8534_v7, %v8893_v0  ;;  %1708 = vst.msk [vmem:[#allocation3 + $0xc8] sm:$0xff] %vm1682_vm7, %v1664_v17  ;;  %v1607_v50 = vpop.f32.mrf.mxu1 }
 0x1d7   : > { %v2417_v43 = vmul.f32 %v6830_v31, %v8542_v21  ;;  %v12486_v19 = vrot.slane %v8926_v12, 1  ;;  %v2614_v16 = vsel %vm2600_vm9, %v2588_v47, 0.0  ;;  %v1923_v35 = vadd.f32 %v1891_v56, %v1826_v46  ;;  %1685 = vst.msk [vmem:[#allocation3 + $0x10] sm:$0xff] %vm1682_vm7, %v1607_v50 }
 0x1d8   : > { %v2385_v6 = vmul.f32 %v8934_v26, %v8534_v7  ;;  %v1988_v41 = vmul.f32 %v8501_v34, %v9248_v55  ;;  %v3302_v12 = vmul.f32 %v8423_v11, %v9282_v45  ;;  %v1924_v37 = vadd.f32 %v1892_v54, %v1827_v53 }
 0x1d9   : > { %v2589_v29 = vsel %vm2566_vm8, %v12486_v19, %v2543_v2  ;;  %v12487_v19 = vld [vmem:[#allocation31_spill] sm:$0xff]  ;;  %v2019_v46 = vadd.f32 %v1987_v13, %v1922_v28  ;;  %v2448_v42 = vadd.f32 %v2416_v25, %v2383_v44  ;;  %v2481_v17 = vmul.f32 %v8612_v5, %v9248_v55 }
 0x1da   : > { %v1989_v2 = vmul.f32 %v12487_v19, %v8501_v34  ;;  %v2645_v56 = vadd.f32 %v2589_v29, %v2347_v30  ;;  %v2646_v47 = vadd.f32 %v2614_v16, %v2348_v59  ;;  %v2449_v1 = vadd.f32 %v2417_v43, %v2384_v38  ;;  %6654 = vmatmul.msk.bf16.gmra.mxu0 %vm278_vm1, %v3556_v18 }
 0x1db   : > { %v2482_v63 = vmul.f32 %v8612_v5, %v12487_v19  ;;  %v2187_v53 = vmul.f32 %v8512_v62, %v8673_v61  ;;  %v2188_v54 = vmul.f32 %v12423_v39, %v8512_v62  ;;  %v2220_v32 = vmul.f32 %v8524_v24, %v8893_v0 }
 0x1dc   : > { %v2221_v28 = vmul.f32 %v8934_v26, %v8524_v24  ;;  %v2020_v13 = vadd.f32 %v1988_v41, %v1923_v35  ;;  %v3334_v44 = vadd.f32 %v3302_v12, %v3237_v52  ;;  %v1925_v25 = vadd.f32 %v1893_v27, %v1828_v51 }
 0x1dd   : > { %v2418_v43 = vmul.f32 %v8542_v21, %v9248_v55  ;;  %v2051_v38 = vrot.slane %v2019_v46, 7  ;;  %v2513_v30 = vadd.f32 %v2481_v17, %v2448_v42  ;;  %v1990_v61 = vmul.f32 %v9282_v45, %v8501_v34 }
 0x1de   : > { %v9321_v59 = vadd.f32 %v1989_v2, %v1924_v37  ;;  %v2682_v39 = vadd.f32 %v8771_v48, %v2645_v56  ;;  %v2683_v29 = vadd.f32 %v8771_v48, %v2646_v47  ;;  %v9326_v16 = vadd.f32 %v2482_v63, %v2449_v1  ;;  %v1609_v37 = vpop.f32.mrf.mxu1 }
 0x1df   : > { %v2189_v35 = vmul.f32 %v8512_v62, %v8893_v0  ;;  %v2252_v52 = vadd.f32 %v2220_v32, %v2187_v53  ;;  %v2253_v51 = vadd.f32 %v2221_v28, %v2188_v54  ;;  %v2285_v27 = vmul.f32 %v6830_v31, %v8532_v10  ;;  %1686 = vst.msk [vmem:[#allocation3 + $0x18] sm:$0xff] %vm1682_vm7, %v1609_v37  ;;  %v9357_v32 = vld [vmem:[%s12284_s2 + $0x2] ss:$0 sm:$0xff]  ;;  %v3369_v37 = vld [vmem:[#allocation2 + $0x148] sm:$0xff] }
 0x1e0   : > { %v2286_v50 = vmul.f32 %v8532_v10, %v9248_v55  ;;  %v2052_v41 = vrot.slane %v2020_v13, 7  ;;  %v3432_v12 = vadd.f32 %v9044_v40, %v3334_v44  ;;  %v2450_v2 = vadd.f32 %v2418_v43, %v2385_v6 }
 0x1e1   : > { %v2483_v18 = vmul.f32 %v8612_v5, %v9282_v45  ;;  %v12488_v63 = vrot.slane %v9200_v22, 7  ;;  %v2545_v0 = vrot.slane %v2513_v30, 1  ;;  %v9341_v46 = vadd.f32 %v1990_v61, %v1925_v25 }
 0x1e2   : > { %v2222_v42 = vmul.f32 %v6830_v31, %v8524_v24  ;;  %v2546_v17 = vrot.slane %v9326_v16, 1  ;;  %v2053_v40 = vrot.slane %v9321_v59, 7  ;;  %v2190_v6 = vmul.f32 %v8934_v26, %v8512_v62 }
 0x1e3   : > { %v2095_v1 = vsel %vm2073_vm6, %v12488_v63, %v2051_v38  ;;  %v2223_v5 = vmul.f32 %v8524_v24, %v9248_v55  ;;  %v2714_v22 = vmax.f32 %v2682_v39, 0.0  ;;  %v2715_v56 = vmax.f32 %v2683_v29, 0.0  ;;  %v1667_v29 = vpop.f32.mrf.mxu3 }
 0x1e4   : > { %v2317_v47 = vadd.f32 %v2285_v27, %v2252_v52  ;;  %v2318_v53 = vadd.f32 %v2286_v50, %v2253_v51  ;;  %v2094_v54 = vsel %vm2073_vm6, %v2051_v38, %v2052_v41  ;;  %v2122_v31 = vsel %vm2106_vm10, %v2095_v1, 0.0  ;;  %1709 = vst.msk [vmem:[#allocation3 + $0xd0] sm:$0xff] %vm1682_vm7, %v1667_v29 }
 0x1e5   : > { %v3501_v26 = vadd.f32 %v9357_v32, %v3432_v12  ;;  %v2515_v28 = vadd.f32 %v2483_v18, %v2450_v2  ;;  %v2586_v13 = vsel %vm2566_vm8, %v2545_v0, %v2546_v17  ;;  %v3500_v44 = vadd.f32 %v9357_v32, %v9256_v8  ;;  %v9387_v2 = vld [vmem:[#allocation2 + $0x108] sm:$0xff] }
 0x1e6   : > { %v2254_v25 = vadd.f32 %v2222_v42, %v2189_v35  ;;  %v2287_v43 = vmul.f32 %v12487_v19, %v8532_v10  ;;  %v12354_v38 = vrot.slane %v9341_v46, 7  ;;  %v2255_v30 = vadd.f32 %v2223_v5, %v2190_v6  ;;  %v3209_v6 = vld [vmem:[#allocation2 + $0xa0] sm:$0xff] }
 0x1e7   : > { %v2288_v61 = vmul.f32 %v9282_v45, %v8532_v10  ;;  %v9373_v59 = vadd.f32 %v9008_v33, %v9251_v15  ;;  %v2742_v39 = vpack.c.bf16 %v2715_v56, %v2714_v22  ;;  %v2349_v52 = vadd.f32 %v2317_v47, %v2122_v31  ;;  %v1612_v33 = vpop.f32.mrf.mxu1  ;;  %v3210_v56 = vld [vmem:[#allocation2 + $0xa8] sm:$0xff]  ;;  %v12491_v47 = vld [vmem:[#allocation25_spill] sm:$0xff] }
 0x1e8   : > { %v2350_v51 = vadd.f32 %v2318_v53, %v2094_v54  ;;  %v2093_v8 = vsel %vm2073_vm6, %v2052_v41, %v2053_v40  ;;  %v12489_v19 = vrot.slane %v9210_v20, 1  ;;  %v2616_v27 = vsel %vm2600_vm9, %v2586_v13, 0.0  ;;  %1687 = vst.msk [vmem:[#allocation3 + $0x20] sm:$0xff] %vm1682_vm7, %v1612_v33  ;;  %v3373_v33 = vld [vmem:[#allocation2 + $0x168] sm:$0xff] }
 0x1e9   : > { %v3533_v50 = vmax.f32 %v3501_v26, 0.0  ;;  %v2547_v15 = vrot.slane %v2515_v28, 1  ;;  %6615 = vmatmul.msk.bf16.gmra.mxu2 %vm278_vm1, %v2742_v39  ;;  %v2319_v12 = vadd.f32 %v2287_v43, %v2254_v25  ;;  %v9391_v20 = vadd.f32 %v9208_v36, %v9204_v49  ;;  %v3368_v36 = vld [vmem:[#allocation2 + $0x140] sm:$0xff]  ;;  %v12492_v26 = vld [vmem:[#allocation9_spill] sm:$0xff]  ;;  %v3208_v25 = vld [vmem:[#allocation2 + $0x98] sm:$0xff] }
 0x1ea   : > { %v2587_v35 = vsel %vm2566_vm8, %v12489_v19, %v2545_v0  ;;  %v9395_v18 = vmul.f32 %v9052_v14, %v8524_v24  ;;  %v3532_v63 = vmax.f32 %v3500_v44, 0.0  ;;  %v2124_v1 = vsel %vm2106_vm10, %v2093_v8, 0.0  ;;  %v3372_v8 = vld [vmem:[#allocation2 + $0x160] sm:$0xff] }
 0x1eb   : > { %12490 = vst [vmem:[#allocation31_spill] sm:$0xff] %v9391_v20  ;;  %v2320_v0 = vadd.f32 %v2288_v61, %v2255_v30  ;;  %v12353_v42 = vrot.slane %v9373_v59, 1  ;;  %v2647_v5 = vadd.f32 %v2587_v35, %v2349_v52  ;;  %v2648_v22 = vadd.f32 %v2616_v27, %v2350_v51  ;;  %v6832_v30 = vld [vmem:[#allocation2 + $0x100] sm:$0xff]  ;;  %v1669_v27 = vpop.f32.mrf.mxu3 }
 0x1ec   : > { %v2092_v49 = vsel %vm2073_vm6, %v2053_v40, %v12354_v38  ;;  %v9406_v53 = vmul.f32 %v12491_v47, %v8524_v24  ;;  %v3557_v54 = vpack.c.bf16 %v3533_v50, %v3532_v63  ;;  %v3402_v28 = vmul.f32 %v12492_v26, %v3369_v37  ;;  %1710 = vst.msk [vmem:[#allocation3 + $0xd8] sm:$0xff] %vm1682_vm7, %v1669_v27 }
 0x1ed   : > { %v2584_v31 = vsel %vm2566_vm8, %v2547_v15, %v12353_v42  ;;  %v3308_v13 = vmul.f32 %v8423_v11, %v9387_v2  ;;  %v2351_v44 = vadd.f32 %v2319_v12, %v2124_v1  ;;  %v3242_v40 = vmul.f32 %v12431_v57, %v3209_v6  ;;  %v12494_v6 = vld [vmem:[#allocation39_spill] sm:$0xff] }
 0x1ee   : > { %v1996_v43 = vmul.f32 %v9387_v2, %v8501_v34  ;;  %v9419_v61 = vmul.f32 %v6832_v30, %v8532_v10  ;;  %6655 = vmatmul.msk.bf16.gmra.mxu0 %vm278_vm1, %v3557_v54  ;;  %v2352_v39 = vadd.f32 %v2320_v0, %v2092_v49  ;;  %v2585_v29 = vsel %vm2566_vm8, %v2546_v17, %v2547_v15  ;;  %v12493_v17 = vld [vmem:[#allocation12_spill] sm:$0xff]  ;;  %v12496_v30 = vld [vmem:[#allocation15_spill] sm:$0xff] }
 0x1ef   : > { %v3401_v52 = vmul.f32 %v12492_v26, %v3368_v36  ;;  %v3243_v51 = vmul.f32 %v12431_v57, %v3210_v56  ;;  %v2684_v19 = vadd.f32 %v8771_v48, %v2647_v5  ;;  %v2685_v35 = vadd.f32 %v8771_v48, %v2648_v22  ;;  %v1614_v12 = vpop.f32.mrf.mxu1  ;;  %v12495_v36 = vld [vmem:[#allocation7_spill] sm:$0xff] }
 0x1f0   : > { %v2618_v50 = vsel %vm2600_vm9, %v2584_v31, 0.0  ;;  %v9434_v16 = vmul.f32 %v8534_v7, %v9025_v60  ;;  %v3434_v15 = vadd.f32 %v3402_v28, %v12493_v17  ;;  %v3241_v37 = vmul.f32 %v12431_v57, %v3208_v25  ;;  %1688 = vst.msk [vmem:[#allocation3 + $0x28] sm:$0xff] %vm1682_vm7, %v1614_v12 }
 0x1f1   : > { %v12351_v63 = vrot.slane %v9391_v20, 7  ;;  %v9442_v1 = vmul.f32 %v9052_v14, %v8534_v7  ;;  %v2649_v0 = vadd.f32 %v2585_v29, %v2351_v44  ;;  %v3339_v5 = vadd.f32 %v12494_v6, %v3242_v40  ;;  %v6664_v44 = vld [vmem:[%s12287_s5 + $0x8] sm:$0xf] }
 0x1f2   : > { %v3405_v60 = vmul.f32 %v12492_v26, %v3372_v8  ;;  %v9448_v22 = vadd.f32 %v1996_v43, %v9218_v3  ;;  %v2650_v49 = vadd.f32 %v2618_v50, %v2352_v39  ;;  %v3433_v56 = vadd.f32 %v3401_v52, %v12495_v36  ;;  %v12497_v29 = vld [vmem:[#allocation16_spill] sm:$0xff]  ;;  %v12498_v8 = vld [vmem:[#allocation23_spill] sm:$0xff]  ;;  %v12499_v36 = vld [vmem:[#allocation42_spill] sm:$0xff] }
 0x1f3   : > { %v3340_v54 = vadd.f32 %v3308_v13, %v3243_v51  ;;  %v3406_v31 = vmul.f32 %v12492_v26, %v3373_v33  ;;  %v2716_v28 = vmax.f32 %v2684_v19, 0.0  ;;  %v2717_v25 = vmax.f32 %v2685_v35, 0.0 }
 0x1f4   : > { %v1829_v40 = vmul.f32 %v12496_v30, %v9212_v4  ;;  %v1894_v27 = vmul.f32 %v12498_v8, %v12497_v29  ;;  %v3503_v3 = vadd.f32 %v9357_v32, %v3434_v15  ;;  %v3812_v43 = vsel %vm1400_vm0, %v6664_v44, 0 }
 0x1f5   : > { %v1830_v13 = vmul.f32 %v9248_v55, %v12496_v30  ;;  %v1895_v39 = vmul.f32 %v9282_v45, %v12497_v29  ;;  %v9466_v52 = vadd.f32 %v8771_v48, %v2649_v0  ;;  %3821 = vmatpush.bf16.msrb.mxu1 %v3812_v43  ;;  %v2387_v51 = vmul.f32 %v8534_v7, %v9248_v55  ;;  %v3633_v43 = vpop.f32.mrf.mxu0 }
 0x1f6   : > { %v2420_v19 = vmul.f32 %v9282_v45, %v8542_v21  ;;  %v3437_v35 = vadd.f32 %v3405_v60, %v3339_v5  ;;  %v9473_v50 = vadd.f32 %v8771_v48, %v2650_v49  ;;  %v3502_v33 = vadd.f32 %v9357_v32, %v3433_v56  ;;  %v12500_v48 = vld [vmem:[#allocation43_spill] sm:$0xff] }
 0x1f7   : > { %v3438_v17 = vadd.f32 %v3406_v31, %v3340_v54  ;;  %v12352_v15 = vrot.slane %v9448_v22, 7  ;;  %v2743_v12 = vpack.c.bf16 %v2717_v25, %v2716_v28  ;;  %v1926_v6 = vadd.f32 %v1894_v27, %v1829_v40  ;;  %v1617_v5 = vpop.f32.mrf.mxu1  ;;  %v3371_v25 = vld [vmem:[#allocation2 + $0x158] sm:$0xff] }
 0x1f8   : > { %v2388_v0 = vmul.f32 %v12498_v8, %v8534_v7  ;;  %v9481_v44 = vadd.f32 %v9395_v18, %v12499_v36  ;;  %v3535_v41 = vmax.f32 %v3503_v3, 0.0  ;;  %v1927_v60 = vadd.f32 %v1895_v39, %v1830_v13  ;;  %1689 = vst.msk [vmem:[#allocation3 + $0x30] sm:$0xff] %vm1682_vm7, %v1617_v5  ;;  %v12501_v18 = vld [vmem:[#allocation11_spill] sm:$0xff]  ;;  %v12502_v39 = vld [vmem:[#allocation20_spill] sm:$0xff] }
 0x1f9   : > { %v9485_v49 = vadd.f32 %v9406_v53, %v12500_v48  ;;  %v2424_v56 = vmul.f32 %v12491_v47, %v8542_v21  ;;  %6616 = vmatmul.msk.bf16.gmra.mxu2 %vm278_vm1, %v2743_v12  ;;  %v2452_v31 = vadd.f32 %v2420_v19, %v2387_v51  ;;  %v3338_v28 = vadd.f32 %v12501_v18, %v3241_v37  ;;  %v9511_v37 = vld [vmem:[%s12286_s4 + $0x2] ss:$0 sm:$0xff]  ;;  %v12505_v5 = vld [vmem:[#allocation8_spill] sm:$0xff]  ;;  %v1672_v42 = vpop.f32.mrf.mxu3 }
 0x1fa   : > { %v9494_v40 = vadd.f32 %v9357_v32, %v3437_v35  ;;  %v2719_v27 = vmax.f32 %v9473_v50, 0.0  ;;  %v3534_v53 = vmax.f32 %v3502_v33, 0.0  ;;  %v9498_v3 = vadd.f32 %v9357_v32, %v3438_v17  ;;  %v12503_v35 = vld [vmem:[#allocation28_spill] sm:$0xff]  ;;  %v3370_v33 = vld [vmem:[#allocation2 + $0x150] sm:$0xff]  ;;  %1711 = vst.msk [vmem:[#allocation3 + $0xe0] sm:$0xff] %vm1682_vm7, %v1672_v42 }
 0x1fb   : > { %v9506_v13 = vsel %vm2073_vm6, %v12351_v63, %v12352_v15  ;;  %v2023_v51 = vadd.f32 %v12502_v39, %v1926_v6  ;;  %v2191_v19 = vmul.f32 %v8512_v62, %v9212_v4  ;;  %v2453_v50 = vadd.f32 %v12503_v35, %v2388_v0  ;;  %v12504_v17 = vld [vmem:[#allocation37_spill] sm:$0xff]  ;;  %v12509_v15 = vld [vmem:[#allocation19_spill] sm:$0xff] }
 0x1fc   : > { %v2425_v12 = vmul.f32 %v12504_v17, %v8542_v21  ;;  %v3558_v36 = vpack.c.bf16 %v3535_v41, %v3534_v53  ;;  %v9520_v48 = vadd.f32 %v12505_v5, %v1927_v60  ;;  %v2224_v18 = vmul.f32 %v12498_v8, %v8524_v24  ;;  %v12506_v0 = vld [vmem:[#allocation13_spill] sm:$0xff] }
 0x1fd   : > { %v3404_v63 = vmul.f32 %v12492_v26, %v3371_v25  ;;  %v2192_v6 = vmul.f32 %v8512_v62, %v9248_v55  ;;  %v2225_v39 = vmul.f32 %v9282_v45, %v8524_v24  ;;  %v2517_v35 = vadd.f32 %v12506_v0, %v2452_v31  ;;  %v9539_v55 = vld [vmem:[%s12283_s1 + $0x18] ss:$0 sm:$0xff]  ;;  %v3635_v54 = vpop.f32.mrf.mxu0 }
 0x1fe   : > { %6656 = vmatmul.msk.bf16.gmra.mxu0 %vm278_vm1, %v3558_v36  ;;  %v3403_v41 = vmul.f32 %v12492_v26, %v3370_v33  ;;  %v2294_v60 = vmul.f32 %v9387_v2, %v8532_v10  ;;  %v2456_v53 = vadd.f32 %v2424_v56, %v9434_v16  ;;  %12507 = vst [vmem:[#allocation25_spill] sm:$0xff] %v9539_v55  ;;  %v12508_v25 = vld [vmem:[#allocation30_spill] sm:$0xff]  ;;  %v2055_v0 = vrot.slane %v2023_v51, 7 }
 0x1ff   : > { %v2490_v5 = vmul.f32 %v9539_v55, %v12508_v25  ;;  %v3634_v31 = vadd.f32 %v9511_v37, %v3633_v43  ;;  %v9545_v36 = vadd.f32 %v12509_v15, %v2453_v50  ;;  %v2457_v33 = vadd.f32 %v2425_v12, %v9442_v1  ;;  %v1619_v50 = vpop.f32.mrf.mxu1  ;;  %v12511_v12 = vld [vmem:[#allocation41_spill] sm:$0xff] }
 0x200   : > { %v12361_v16 = vrot.slane %v9520_v48, 7  ;;  %v2256_v56 = vadd.f32 %v2224_v18, %v2191_v19  ;;  %v3436_v38 = vadd.f32 %v3404_v63, %v3338_v28  ;;  %v1831_v4 = vmul.f32 %v12498_v8, %v12496_v30  ;;  %1690 = vst.msk [vmem:[#allocation3 + $0x38] sm:$0xff] %vm1682_vm7, %v1619_v50  ;;  %v12514_v50 = vld [vmem:[#allocation26_spill] sm:$0xff] }
 0x201   : > { %v3636_v20 = vadd.f32 %v9511_v37, %v3635_v54  ;;  %v12510_v43 = vrot.slane %v9341_v46, 7  ;;  %v2257_v51 = vadd.f32 %v2225_v39, %v2192_v6  ;;  %v2549_v1 = vrot.slane %v2517_v35, 1  ;;  %v12512_v35 = vld [vmem:[#allocation18_spill] sm:$0xff] }
 0x202   : > { %v3435_v10 = vadd.f32 %v3403_v41, %v12511_v12  ;;  %v1832_v63 = vmul.f32 %v9282_v45, %v12496_v30  ;;  %v2489_v42 = vmul.f32 %v9539_v55, %v9387_v2  ;;  %v9563_v28 = vadd.f32 %v2490_v5, %v2457_v33 }
 0x203   : > { %v2091_v15 = vsel %vm2073_vm6, %v12510_v43, %v2055_v0  ;;  %v3713_v54 = vmax.f32 %v3634_v31, 0.0  ;;  %v3714_v46 = vmax.f32 %v3636_v20, 0.0  ;;  %v2550_v19 = vrot.slane %v9545_v36, 1  ;;  %v12513_v31 = vld [vmem:[#allocation24_spill] sm:$0xff] }
 0x204   : > { %v2389_v18 = vmul.f32 %v9282_v45, %v8534_v7  ;;  %v2090_v6 = vsel %vm2073_vm6, %v2055_v0, %v12361_v16  ;;  %v2126_v39 = vsel %vm2106_vm10, %v2091_v15, 0.0  ;;  %v2321_v41 = vadd.f32 %v12512_v35, %v2256_v56  ;;  %v12516_v15 = vld [vmem:[#allocation29_spill] sm:$0xff] }
 0x205   : > { %v3505_v5 = vadd.f32 %v9357_v32, %v3436_v38  ;;  %v3745_v33 = vpack.c.bf16 %v3714_v46, %v3713_v54  ;;  %v2322_v20 = vadd.f32 %v12513_v31, %v2257_v51  ;;  %v2582_v43 = vsel %vm2566_vm8, %v2549_v1, %v2550_v19  ;;  %v12517_v54 = vld [vmem:[#allocation36_spill] sm:$0xff]  ;;  %v12521_v31 = vld [vmem:[#allocation38_spill] sm:$0xff] }
 0x206   : > { %v1928_v12 = vadd.f32 %v12514_v50, %v1831_v4  ;;  %v12515_v55 = vmax.f32 %v9466_v52, 0.0  ;;  %v3504_v16 = vadd.f32 %v9357_v32, %v3435_v10  ;;  %v1929_v7 = vadd.f32 %v12516_v15, %v1832_v63  ;;  %v1674_v4 = vpop.f32.mrf.mxu3  ;;  %v12519_v63 = vld [vmem:[#allocation10_spill] sm:$0xff] }
 0x207   : > { %v9588_v38 = vadd.f32 %v9419_v61, %v9481_v44  ;;  %6665 = vmatmul.msk.bf16.vlgmr.msrb.gmra.mxu1 %vm278_vm1, %v3745_v33  ;;  %v2353_v56 = vadd.f32 %v2321_v41, %v2126_v39  ;;  %v2354_v51 = vadd.f32 %v2322_v20, %v2090_v6  ;;  %v2454_v46 = vadd.f32 %v12517_v54, %v2389_v18  ;;  %v1622_v44 = vpop.f32.mrf.mxu1  ;;  %v12520_v6 = vld [vmem:[#allocation27_spill] sm:$0xff]  ;;  %v3212_v15 = vld [vmem:[#allocation2 + $0xb8] sm:$0xff]  ;;  %v12523_v54 = vld [vmem:[#allocation17_spill] sm:$0xff] }
 0x208   : > { %v2744_v0 = vpack.c.bf16 %v2719_v27, %v12515_v55  ;;  %v9592_v35 = vadd.f32 %v2489_v42, %v2456_v53  ;;  %v12518_v52 = vrot.slane %v9373_v59, 1  ;;  %v2620_v27 = vsel %vm2600_vm9, %v2582_v43, 0.0  ;;  %1712 = vst.msk [vmem:[#allocation3 + $0xe8] sm:$0xff] %vm1682_vm7, %v1674_v4  ;;  %v12524_v4 = vld [vmem:[#allocation14_spill] sm:$0xff] }
 0x209   : > { %v3537_v55 = vmax.f32 %v3505_v5, 0.0  ;;  %v3539_v61 = vmax.f32 %v9498_v3, 0.0  ;;  %v2025_v53 = vadd.f32 %v12519_v63, %v1928_v12  ;;  %v2326_v42 = vadd.f32 %v2294_v60, %v9485_v49  ;;  %1691 = vst.msk [vmem:[#allocation3 + $0x40] sm:$0xff] %vm1682_vm7, %v1622_v44  ;;  %v9616_v5 = vld [vmem:[#allocation2 + $0x110] sm:$0xff]  ;;  %v3638_v49 = vpop.f32.mrf.mxu0 }
 0x20a   : > { %v2583_v10 = vsel %vm2566_vm8, %v12518_v52, %v2549_v1  ;;  %6617 = vmatmul.msk.bf16.gmra.mxu2 %vm278_vm1, %v2744_v0  ;;  %v12364_v59 = vrot.slane %v9563_v28, 1  ;;  %v1900_v1 = vmul.f32 %v12504_v17, %v12497_v29  ;;  %v3536_v18 = vmax.f32 %v3504_v16, 0.0 }
 0x20b   : > { %v9610_v39 = vadd.f32 %v12520_v6, %v1929_v7  ;;  %v2193_v3 = vmul.f32 %v12498_v8, %v8512_v62  ;;  %v2194_v41 = vmul.f32 %v9282_v45, %v8512_v62  ;;  %v2651_v60 = vadd.f32 %v2583_v10, %v2353_v56  ;;  %v9635_v56 = vld [vmem:[#allocation2 + $0x118] sm:$0xff]  ;;  %v3211_v10 = vld [vmem:[#allocation2 + $0xb0] sm:$0xff] }
 0x20c   : > { %v2652_v33 = vadd.f32 %v2620_v27, %v2354_v51  ;;  %v9619_v20 = vadd.f32 %v12521_v31, %v2454_v46  ;;  %v12365_v16 = vrot.slane %v9592_v35, 1  ;;  %v3559_v43 = vpack.c.bf16 %v3537_v55, %v3536_v18  ;;  %v9648_v55 = vld [vmem:[%s12284_s2 + $0x1] ss:$0 sm:$0xff] }
 0x20d   : > { %v12522_v7 = vmax.f32 %v9494_v40, 0.0  ;;  %v2358_v8 = vadd.f32 %v2326_v42, %v9506_v13  ;;  %v1835_v45 = vmul.f32 %v9052_v14, %v12496_v30  ;;  %v2057_v12 = vrot.slane %v2025_v53, 7 }
 0x20e   : > { %v2578_v0 = vsel %vm2566_vm8, %v12365_v16, %v12364_v59  ;;  %v3309_v40 = vmul.f32 %v8423_v11, %v9616_v5  ;;  %v1997_v13 = vmul.f32 %v12508_v25, %v8501_v34  ;;  %6657 = vmatmul.msk.bf16.gmra.mxu0 %vm278_vm1, %v3559_v43  ;;  %v2058_v51 = vrot.slane %v9610_v39, 7 }
 0x20f   : > { %v9624_v50 = vpack.c.bf16 %v3539_v61, %v12522_v7  ;;  %v2258_v46 = vadd.f32 %v12523_v54, %v2193_v3  ;;  %v2259_v52 = vadd.f32 %v12524_v4, %v2194_v41  ;;  %v1932_v27 = vadd.f32 %v1900_v1, %v1835_v45  ;;  %v1624_v3 = vpop.f32.mrf.mxu1 }
 0x210   : > { %v2688_v61 = vadd.f32 %v9648_v55, %v2651_v60  ;;  %v2689_v44 = vadd.f32 %v9648_v55, %v2652_v33  ;;  %v12525_v25 = vrot.slane %v9520_v48, 7  ;;  %v2551_v53 = vrot.slane %v9619_v20, 1  ;;  %v3375_v60 = vld [vmem:[#allocation2 + $0x178] sm:$0xff]  ;;  %v1677_v20 = vpop.f32.mrf.mxu3  ;;  %1692 = vst.msk [vmem:[#allocation3 + $0x48] sm:$0xff] %vm1682_vm7, %v1624_v3 }
 0x211   : > { %v3245_v42 = vmul.f32 %v12431_v57, %v3212_v15  ;;  %v3310_v1 = vmul.f32 %v8423_v11, %v9635_v56  ;;  %v1836_v18 = vmul.f32 %v12491_v47, %v12496_v30  ;;  %v1901_v6 = vmul.f32 %v9387_v2, %v12497_v29  ;;  %1713 = vst.msk [vmem:[#allocation3 + $0xf0] sm:$0xff] %vm1682_vm7, %v1677_v20  ;;  %v3640_v4 = vpop.f32.mrf.mxu0 }
 0x212   : > { %v2089_v63 = vsel %vm2073_vm6, %v12525_v25, %v2057_v12  ;;  %v2624_v48 = vsel %vm2600_vm9, %v2578_v0, 0.0  ;;  %v3244_v41 = vmul.f32 %v12431_v57, %v3211_v10  ;;  %v1998_v33 = vmul.f32 %v9635_v56, %v8501_v34  ;;  %v12526_v0 = vld [vmem:[#allocation34_spill] sm:$0xff]  ;;  %v12527_v10 = vld [vmem:[#allocation35_spill] sm:$0xff] }
 0x213   : > { %v9669_v31 = vadd.f32 %v1997_v13, %v1932_v27  ;;  %v3639_v43 = vadd.f32 %v9511_v37, %v3638_v49  ;;  %v2088_v7 = vsel %vm2073_vm6, %v2057_v12, %v2058_v51  ;;  %v2128_v45 = vsel %vm2106_vm10, %v2089_v63, 0.0  ;;  %v3374_v63 = vld [vmem:[#allocation2 + $0x170] sm:$0xff] }
 0x214   : > { %v2323_v15 = vadd.f32 %v12526_v0, %v2258_v46  ;;  %v2720_v54 = vmax.f32 %v2688_v61, 0.0  ;;  %v2721_v13 = vmax.f32 %v2689_v44, 0.0  ;;  %v2324_v27 = vadd.f32 %v12527_v10, %v2259_v52 }
 0x215   : > { %v12528_v49 = vrot.slane %v9202_v58, 1  ;;  %v3641_v12 = vadd.f32 %v9511_v37, %v3640_v4  ;;  %v3342_v59 = vadd.f32 %v3310_v1, %v3245_v42  ;;  %v3408_v46 = vmul.f32 %v12492_v26, %v3375_v60 }
 0x216   : > { %v1933_v0 = vadd.f32 %v1901_v6, %v1836_v18  ;;  %v2355_v3 = vadd.f32 %v2323_v15, %v2128_v45  ;;  %v2356_v16 = vadd.f32 %v2324_v27, %v2088_v7  ;;  %v9688_v20 = vadd.f32 %v2624_v48, %v2358_v8 }
 0x217   : > { %v2580_v25 = vsel %vm2566_vm8, %v2551_v53, %v12528_v49  ;;  %v2061_v61 = vrot.slane %v9669_v31, 7  ;;  %v3715_v44 = vmax.f32 %v3639_v43, 0.0  ;;  %v3716_v52 = vmax.f32 %v3641_v12, 0.0  ;;  %v1627_v43 = vpop.f32.mrf.mxu1 }
 0x218   : > { %v2622_v10 = vsel %vm2600_vm9, %v2580_v25, 0.0  ;;  %v2197_v49 = vmul.f32 %v9052_v14, %v8512_v62  ;;  %v2745_v4 = vpack.c.bf16 %v2721_v13, %v2720_v54  ;;  %v3341_v42 = vadd.f32 %v3309_v40, %v3244_v41  ;;  %v6627_v40 = vld [vmem:[%s12287_s5 + $0x4] sm:$0xf]  ;;  %1693 = vst.msk [vmem:[#allocation3 + $0x50] sm:$0xff] %vm1682_vm7, %v1627_v43 }
 0x219   : > { %v3407_v1 = vmul.f32 %v12492_v26, %v3374_v63  ;;  %v9696_v60 = vadd.f32 %v1998_v33, %v1933_v0  ;;  %v3746_v18 = vpack.c.bf16 %v3716_v52, %v3715_v44  ;;  %v2581_v8 = vsel %vm2566_vm8, %v2550_v19, %v2551_v53  ;;  %v12530_v33 = vld [vmem:[#allocation22_spill] sm:$0xff]  ;;  %v3643_v15 = vpop.f32.mrf.mxu0  ;;  %v6835_v63 = vld [vmem:[#allocation2 + $0x110] sm:$0xff] }
 0x21a   : > { %v3440_v6 = vadd.f32 %v3408_v46, %v3342_v59  ;;  %v2426_v48 = vmul.f32 %v9387_v2, %v8542_v21  ;;  %6618 = vmatmul.msk.bf16.gmra.mxu2 %vm278_vm1, %v2745_v4  ;;  %v2653_v31 = vadd.f32 %v2581_v8, %v2355_v3  ;;  %v2654_v14 = vadd.f32 %v2622_v10, %v2356_v16  ;;  %v1679_v59 = vpop.f32.mrf.mxu3  ;;  %v12532_v46 = vld [vmem:[#allocation21_spill] sm:$0xff]  ;;  %v6836_v4 = vld [vmem:[#allocation2 + $0x120] sm:$0xff] }
 0x21b   : > { %v12529_v41 = vrot.slane %v9448_v22, 7  ;;  %v2198_v19 = vmul.f32 %v12491_v47, %v8512_v62  ;;  %6666 = vmatmul.msk.bf16.gmra.mxu1 %vm278_vm1, %v3746_v18  ;;  %v3000_v16 = vsel %vm1400_vm0, %v6627_v40, 0  ;;  %v2230_v53 = vmul.f32 %v12504_v17, %v8524_v24  ;;  %v12531_v22 = vld [vmem:[#allocation25_spill] sm:$0xff]  ;;  %1714 = vst.msk [vmem:[#allocation3 + $0xf8] sm:$0xff] %vm1682_vm7, %v1679_v59 }
 0x21c   : > { %v2393_v7 = vmul.f32 %v12491_v47, %v12530_v33  ;;  %v2491_v45 = vmul.f32 %v12531_v22, %v9635_v56  ;;  %3009 = vmatpush.bf16.msrb.mxu3 %v3000_v16  ;;  %v3439_v54 = vadd.f32 %v3407_v1, %v3341_v42  ;;  %v2062_v13 = vrot.slane %v9696_v60, 7  ;;  %v12533_v16 = vld [vmem:[#allocation31_spill] sm:$0xff] }
 0x21d   : > { %v2085_v36 = vsel %vm2073_vm6, %v12529_v41, %v2061_v61  ;;  %v2231_v27 = vmul.f32 %v9387_v2, %v8524_v24  ;;  %v2427_v25 = vmul.f32 %v9616_v5, %v8542_v21  ;;  %v3509_v12 = vadd.f32 %v9357_v32, %v3440_v6 }
 0x21e   : > { %v2132_v47 = vsel %vm2106_vm10, %v2085_v36, 0.0  ;;  %v2295_v0 = vmul.f32 %v6835_v63, %v12532_v46  ;;  %v2458_v3 = vadd.f32 %v2426_v48, %v2393_v7  ;;  %v2690_v44 = vadd.f32 %v9648_v55, %v2653_v31  ;;  %6658 = vmatmul.msk.bf16.gmra.mxu0 %vm278_vm1, %v9624_v50 }
 0x21f   : > { %v2691_v52 = vadd.f32 %v9648_v55, %v2654_v14  ;;  %v2394_v10 = vmul.f32 %v12504_v17, %v12530_v33  ;;  %v2492_v42 = vmul.f32 %v6836_v4, %v12531_v22  ;;  %v2262_v1 = vadd.f32 %v2230_v53, %v2197_v49 }
 0x220   : > { %v2296_v18 = vmul.f32 %v9635_v56, %v12532_v46  ;;  %v2523_v8 = vadd.f32 %v2491_v45, %v2458_v3  ;;  %v1902_v6 = vmul.f32 %v9616_v5, %v12497_v29  ;;  %v3508_v48 = vadd.f32 %v9357_v32, %v3439_v54  ;;  %v1629_v45 = vpop.f32.mrf.mxu1 }
 0x221   : > { %v2084_v31 = vsel %vm2073_vm6, %v2061_v61, %v2062_v13  ;;  %v2263_v14 = vadd.f32 %v2231_v27, %v2198_v19  ;;  %v2459_v43 = vadd.f32 %v2427_v25, %v2394_v10  ;;  %v3541_v40 = vmax.f32 %v3509_v12, 0.0  ;;  %1694 = vst.msk [vmem:[#allocation3 + $0x58] sm:$0xff] %vm1682_vm7, %v1629_v45  ;;  %v3645_v12 = vpop.f32.mrf.mxu0 }
 0x222   : > { %v2327_v41 = vadd.f32 %v2295_v0, %v2262_v1  ;;  %v1837_v50 = vmul.f32 %v12504_v17, %v12496_v30  ;;  %v1999_v49 = vmul.f32 %v6836_v4, %v8501_v34  ;;  %v2722_v36 = vmax.f32 %v2690_v44, 0.0 }
 0x223   : > { %v2723_v59 = vmax.f32 %v2691_v52, 0.0  ;;  %v12534_v53 = vrot.slane %v12533_v16, 7  ;;  %v9758_v61 = vadd.f32 %v2492_v42, %v2459_v43  ;;  %v3644_v19 = vadd.f32 %v9511_v37, %v3643_v15  ;;  %v9789_v43 = vld [vmem:[#allocation2 + $0x128] sm:$0xff] }
 0x224   : > { %v2328_v54 = vadd.f32 %v2296_v18, %v2263_v14  ;;  %v2555_v27 = vrot.slane %v2523_v8, 1  ;;  %v1934_v25 = vadd.f32 %v1902_v6, %v1837_v50  ;;  %v12535_v63 = vrot.slane %v9592_v35, 1  ;;  %v9778_v18 = vld [vmem:[#allocation2 + $0x120] sm:$0xff] }
 0x225   : > { %v2087_v7 = vsel %vm2073_vm6, %v2058_v51, %v12534_v53  ;;  %v12536_v0 = vrot.slane %v9202_v58, 1  ;;  %v9770_v51 = vadd.f32 %v9648_v55, %v9688_v20  ;;  %v3540_v3 = vmax.f32 %v3508_v48, 0.0  ;;  %v3214_v53 = vld [vmem:[#allocation2 + $0xc8] sm:$0xff] }
 0x226   : > { %v2359_v44 = vadd.f32 %v2327_v41, %v2132_v47  ;;  %v3646_v15 = vadd.f32 %v9511_v37, %v3645_v12  ;;  %v2130_v52 = vsel %vm2106_vm10, %v2087_v7, 0.0  ;;  %v2360_v10 = vadd.f32 %v2328_v54, %v2084_v31  ;;  %v3377_v7 = vld [vmem:[#allocation2 + $0x188] sm:$0xff] }
 0x227   : > { %v2579_v39 = vsel %vm2566_vm8, %v12536_v0, %v12535_v63  ;;  %v9775_v42 = vadd.f32 %v1999_v49, %v1934_v25  ;;  %v2746_v35 = vpack.c.bf16 %v2723_v59, %v2722_v36  ;;  %v3561_v1 = vpack.c.bf16 %v3541_v40, %v3540_v3  ;;  %v12538_v25 = vld [vmem:[#allocation40_spill] sm:$0xff] }
 0x228   : > { %v2556_v58 = vrot.slane %v9758_v61, 1  ;;  %v1838_v20 = vmul.f32 %v9387_v2, %v12496_v30  ;;  %v3717_v8 = vmax.f32 %v3644_v19, 0.0  ;;  %v3718_v6 = vmax.f32 %v3646_v15, 0.0  ;;  %v1632_v59 = vpop.f32.mrf.mxu1 }
 0x229   : > { %v12537_v47 = vrot.slane %v9563_v28, 1  ;;  %v1903_v31 = vmul.f32 %v9635_v56, %v12497_v29  ;;  %v2357_v14 = vadd.f32 %v9588_v38, %v2130_v52  ;;  %v2199_v40 = vmul.f32 %v12504_v17, %v8512_v62  ;;  %1695 = vst.msk [vmem:[#allocation3 + $0x60] sm:$0xff] %vm1682_vm7, %v1632_v59  ;;  %v3648_v0 = vpop.f32.mrf.mxu0 }
 0x22a   : > { %v2200_v41 = vmul.f32 %v9387_v2, %v8512_v62  ;;  %v2232_v50 = vmul.f32 %v9616_v5, %v8524_v24  ;;  %v3747_v28 = vpack.c.bf16 %v3718_v6, %v3717_v8  ;;  %v3311_v49 = vmul.f32 %v8423_v11, %v9778_v18  ;;  %6619 = vmatmul.msk.bf16.gmra.mxu2 %vm278_vm1, %v2746_v35  ;;  %v2821_v35 = vpop.f32.mrf.mxu2 }
 0x22b   : > { %v2577_v48 = vsel %vm2566_vm8, %v12537_v47, %v2555_v27  ;;  %v2063_v36 = vrot.slane %v9775_v42, 7  ;;  %v2233_v38 = vmul.f32 %v9635_v56, %v8524_v24  ;;  %v2576_v17 = vsel %vm2566_vm8, %v2555_v27, %v2556_v58 }
 0x22c   : > { %v2657_v16 = vadd.f32 %v2577_v48, %v2359_v44  ;;  %v2297_v45 = vmul.f32 %v6836_v4, %v12532_v46  ;;  %v2428_v19 = vmul.f32 %v9635_v56, %v8542_v21  ;;  %6667 = vmatmul.msk.bf16.gmra.mxu1 %vm278_vm1, %v3747_v28  ;;  %v2725_v54 = vmax.f32 %v9770_v51, 0.0  ;;  %v3376_v4 = vld [vmem:[#allocation2 + $0x180] sm:$0xff] }
 0x22d   : > { %v3246_v12 = vmul.f32 %v12431_v57, %v12538_v25  ;;  %v3247_v63 = vmul.f32 %v12431_v57, %v3214_v53  ;;  %v3312_v27 = vmul.f32 %v8423_v11, %v9789_v43  ;;  %v2655_v3 = vadd.f32 %v2579_v39, %v2357_v14 }
 0x22e   : > { %v1935_v44 = vadd.f32 %v1903_v31, %v1838_v20  ;;  %v2264_v15 = vadd.f32 %v2232_v50, %v2199_v40  ;;  %v2429_v52 = vmul.f32 %v9778_v18, %v8542_v21  ;;  %v3410_v6 = vmul.f32 %v12492_v26, %v3377_v7  ;;  %6659 = vmatmul.msk.bf16.gmra.mxu0 %vm278_vm1, %v3561_v1 }
 0x22f   : > { %v3344_v8 = vadd.f32 %v3312_v27, %v3247_v63  ;;  %v2083_v47 = vsel %vm2073_vm6, %v2062_v13, %v2063_v36  ;;  %v2395_v39 = vmul.f32 %v9387_v2, %v12530_v33  ;;  %v2626_v20 = vsel %vm2600_vm9, %v2576_v17, 0.0  ;;  %v9841_v2 = vld [vmem:[%s12286_s4 + $0x1] ss:$0 sm:$0xff]  ;;  %v9848_v17 = vld [vmem:[#allocation2 + $0x130] sm:$0xff] }
 0x230   : > { %v9832_v48 = vadd.f32 %v9648_v55, %v2657_v16  ;;  %v2265_v31 = vadd.f32 %v2233_v38, %v2200_v41  ;;  %v2396_v14 = vmul.f32 %v9616_v5, %v12530_v33  ;;  %v3343_v40 = vadd.f32 %v3311_v49, %v3246_v12 }
 0x231   : > { %v3409_v60 = vmul.f32 %v12492_v26, %v3376_v4  ;;  %v2329_v50 = vadd.f32 %v2297_v45, %v2264_v15  ;;  %v2460_v13 = vadd.f32 %v2428_v19, %v2395_v39  ;;  %v2692_v28 = vadd.f32 %v9648_v55, %v2655_v3  ;;  %v1634_v45 = vpop.f32.mrf.mxu1 }
 0x232   : > { %v2134_v41 = vsel %vm2106_vm10, %v2083_v47, 0.0  ;;  %v2461_v38 = vadd.f32 %v2429_v52, %v2396_v14  ;;  %v1904_v59 = vmul.f32 %v9778_v18, %v12497_v29  ;;  %v2658_v1 = vadd.f32 %v2626_v20, %v2360_v10  ;;  %1696 = vst.msk [vmem:[#allocation3 + $0x68] sm:$0xff] %vm1682_vm7, %v1634_v45  ;;  %v3650_v52 = vpop.f32.mrf.mxu0  ;;  %v2823_v47 = vpop.f32.mrf.mxu2 }
 0x233   : > { %v3442_v49 = vadd.f32 %v3410_v6, %v3344_v8  ;;  %v2000_v16 = vmul.f32 %v9789_v43, %v8501_v34  ;;  %v1839_v53 = vmul.f32 %v9616_v5, %v12496_v30  ;;  %v2726_v7 = vmax.f32 %v9832_v48, 0.0 }
 0x234   : > { %v2298_v19 = vmul.f32 %v9789_v43, %v12532_v46  ;;  %v2493_v25 = vmul.f32 %v12531_v22, %v9789_v43  ;;  %v1840_v10 = vmul.f32 %v9635_v56, %v12496_v30  ;;  %v3649_v12 = vadd.f32 %v9511_v37, %v3648_v0 }
 0x235   : > { %v3441_v63 = vadd.f32 %v3409_v60, %v3343_v40  ;;  %v9863_v27 = vadd.f32 %v2329_v50, %v2134_v41  ;;  %v1905_v3 = vmul.f32 %v9789_v43, %v12497_v29  ;;  %v2822_v4 = vadd.f32 %v9841_v2, %v2821_v35 }
 0x236   : > { %v2724_v15 = vmax.f32 %v2692_v28, 0.0  ;;  %v2494_v8 = vmul.f32 %v12531_v22, %v9848_v17  ;;  %v1936_v6 = vadd.f32 %v1904_v59, %v1839_v53  ;;  %v3651_v39 = vadd.f32 %v9511_v37, %v3650_v52  ;;  %v3215_v53 = vld [vmem:[#allocation2 + $0xd0] sm:$0xff] }
 0x237   : > { %v9872_v0 = vadd.f32 %v9648_v55, %v2658_v1  ;;  %v3511_v20 = vadd.f32 %v9357_v32, %v3442_v49  ;;  %v9875_v14 = vadd.f32 %v2000_v16, %v1935_v44  ;;  %v2824_v40 = vadd.f32 %v9841_v2, %v2823_v47  ;;  %v3378_v47 = vld [vmem:[#allocation2 + $0x190] sm:$0xff] }
 0x238   : > { %v9878_v60 = vadd.f32 %v2298_v19, %v2265_v31  ;;  %v9880_v35 = vadd.f32 %v2493_v25, %v2460_v13  ;;  %v2201_v50 = vmul.f32 %v9616_v5, %v8512_v62  ;;  %v3719_v28 = vmax.f32 %v3649_v12, 0.0  ;;  %v9889_v31 = vld [vmem:[#allocation2 + $0x138] sm:$0xff] }
 0x239   : > { %v3720_v41 = vmax.f32 %v3651_v39, 0.0  ;;  %v3510_v59 = vadd.f32 %v9357_v32, %v3441_v63  ;;  %v1937_v1 = vadd.f32 %v1905_v3, %v1840_v10  ;;  %v2901_v45 = vmax.f32 %v2822_v4, 0.0  ;;  %v1637_v10 = vpop.f32.mrf.mxu1  ;;  %v3216_v63 = vld [vmem:[#allocation2 + $0xd8] sm:$0xff] }
 0x23a   : > { %v2902_v52 = vmax.f32 %v2824_v40, 0.0  ;;  %v2747_v44 = vpack.c.bf16 %v2725_v54, %v2724_v15  ;;  %v9887_v49 = vadd.f32 %v2494_v8, %v2461_v38  ;;  %v2727_v16 = vmax.f32 %v9872_v0, 0.0  ;;  %v3379_v54 = vld [vmem:[#allocation2 + $0x198] sm:$0xff]  ;;  %v9897_v38 = vld [vmem:[#allocation2 + $0x140] sm:$0xff]  ;;  %1697 = vst.msk [vmem:[#allocation3 + $0x70] sm:$0xff] %vm1682_vm7, %v1637_v10  ;;  %v3653_v0 = vpop.f32.mrf.mxu0 }
 0x23b   : > { %v3748_v13 = vpack.c.bf16 %v3720_v41, %v3719_v28  ;;  %v3543_v19 = vmax.f32 %v3511_v20, 0.0  ;;  %v2234_v5 = vmul.f32 %v9778_v18, %v8524_v24  ;;  %v2064_v12 = vrot.slane %v9875_v14, 7 }
 0x23c   : > { %v2933_v25 = vpack.c.bf16 %v2902_v52, %v2901_v45  ;;  %6620 = vmatmul.msk.bf16.gmra.mxu2 %vm278_vm1, %v2747_v44  ;;  %v3248_v51 = vmul.f32 %v12431_v57, %v3215_v53  ;;  %v2001_v3 = vmul.f32 %v8501_v34, %v9848_v17  ;;  %v3542_v4 = vmax.f32 %v3510_v59, 0.0  ;;  %v2826_v59 = vpop.f32.mrf.mxu2 }
 0x23d   : > { %6668 = vmatmul.msk.bf16.gmra.mxu1 %vm278_vm1, %v3748_v13  ;;  %v3249_v15 = vmul.f32 %v12431_v57, %v3216_v63  ;;  %v3314_v8 = vmul.f32 %v8423_v11, %v9889_v31  ;;  %v2431_v39 = vmul.f32 %v8542_v21, %v9848_v17  ;;  %v2558_v20 = vrot.slane %v9887_v49, 1 }
 0x23e   : > { %6628 = vmatmul.msk.bf16.vlgmr.msrb.gmra.mxu3 %vm278_vm1, %v2933_v25  ;;  %v3313_v40 = vmul.f32 %v8423_v11, %v9848_v17  ;;  %v3412_v28 = vmul.f32 %v12492_v26, %v3379_v54  ;;  %v2398_v41 = vmul.f32 %v9778_v18, %v12530_v33  ;;  %v3562_v53 = vpack.c.bf16 %v3543_v19, %v3542_v4 }
 0x23f   : > { %v3346_v45 = vadd.f32 %v3314_v8, %v3249_v15  ;;  %v2430_v52 = vmul.f32 %v9789_v43, %v8542_v21  ;;  %v2496_v44 = vmul.f32 %v12531_v22, %v9897_v38  ;;  %v2557_v13 = vrot.slane %v9880_v35, 1 }
 0x240   : > { %v3345_v25 = vadd.f32 %v3313_v40, %v3248_v51  ;;  %v3411_v10 = vmul.f32 %v12492_v26, %v3378_v47  ;;  %v9921_v63 = vadd.f32 %v2001_v3, %v1936_v6  ;;  %6660 = vmatmul.msk.bf16.gmra.mxu0 %vm278_vm1, %v3562_v53  ;;  %v2002_v54 = vmul.f32 %v9889_v31, %v8501_v34 }
 0x241   : > { %v2397_v19 = vmul.f32 %v9635_v56, %v12530_v33  ;;  %v2463_v4 = vadd.f32 %v2431_v39, %v2398_v41  ;;  %v2495_v15 = vmul.f32 %v12531_v22, %v9889_v31  ;;  %v2574_v35 = vsel %vm2566_vm8, %v2557_v13, %v2558_v20  ;;  %v1639_v53 = vpop.f32.mrf.mxu1 }
 0x242   : > { %v3444_v51 = vadd.f32 %v3412_v28, %v3346_v45  ;;  %v2202_v6 = vmul.f32 %v9635_v56, %v8512_v62  ;;  %v2235_v3 = vmul.f32 %v9789_v43, %v8524_v24  ;;  %v2082_v8 = vsel %vm2073_vm6, %v2063_v36, %v2064_v12  ;;  %1698 = vst.msk [vmem:[#allocation3 + $0x78] sm:$0xff] %vm1682_vm7, %v1639_v53  ;;  %v3655_v61 = vpop.f32.mrf.mxu0  ;;  %v9983_v53 = vld [vmem:[#allocation2 + $0x148] sm:$0xff] }
 0x243   : > { %v2266_v47 = vadd.f32 %v2234_v5, %v2201_v50  ;;  %v2462_v39 = vadd.f32 %v2430_v52, %v2397_v19  ;;  %v9944_v40 = vadd.f32 %v2496_v44, %v2463_v4  ;;  %v2748_v28 = vpack.c.bf16 %v2727_v16, %v2726_v7 }
 0x244   : > { %v2575_v56 = vsel %vm2566_vm8, %v2556_v58, %v2557_v13  ;;  %v3443_v41 = vadd.f32 %v3411_v10, %v3345_v25  ;;  %v2065_v45 = vrot.slane %v9921_v63, 7  ;;  %v3654_v42 = vadd.f32 %v9511_v37, %v3653_v0  ;;  %v2828_v52 = vpop.f32.mrf.mxu2  ;;  %v3217_v63 = vld [vmem:[#allocation2 + $0xe0] sm:$0xff] }
 0x245   : > { %v2628_v36 = vsel %vm2600_vm9, %v2574_v35, 0.0  ;;  %v9957_v50 = vadd.f32 %v2002_v54, %v1937_v1  ;;  %v2527_v48 = vadd.f32 %v2495_v15, %v2462_v39  ;;  %v2827_v7 = vadd.f32 %v9841_v2, %v2826_v59  ;;  %v3218_v15 = vld [vmem:[#allocation2 + $0xe8] sm:$0xff] }
 0x246   : > { %v2362_v16 = vadd.f32 %v9878_v60, %v2082_v8  ;;  %v3513_v58 = vadd.f32 %v9357_v32, %v3444_v51  ;;  %v2267_v5 = vadd.f32 %v2235_v3, %v2202_v6  ;;  %v3656_v44 = vadd.f32 %v9511_v37, %v3655_v61 }
 0x247   : > { %v2659_v0 = vadd.f32 %v2575_v56, %v9863_v27  ;;  %v2299_v13 = vmul.f32 %v12532_v46, %v9848_v17  ;;  %v2560_v1 = vrot.slane %v9944_v40, 1  ;;  %v2829_v25 = vadd.f32 %v9841_v2, %v2828_v52 }
 0x248   : > { %v2660_v10 = vadd.f32 %v2628_v36, %v2362_v16  ;;  %v3512_v59 = vadd.f32 %v9357_v32, %v3443_v41  ;;  %v2081_v60 = vsel %vm2073_vm6, %v2064_v12, %v2065_v45  ;;  %v3721_v54 = vmax.f32 %v3654_v42, 0.0  ;;  %v3380_v36 = vld [vmem:[#allocation2 + $0x1a0] sm:$0xff] }
 0x249   : > { %v3722_v19 = vmax.f32 %v3656_v44, 0.0  ;;  %v2066_v27 = vrot.slane %v9957_v50, 7  ;;  %v2559_v4 = vrot.slane %v2527_v48, 1  ;;  %v2903_v35 = vmax.f32 %v2827_v7, 0.0 }
 0x24a   : > { %v2904_v51 = vmax.f32 %v2829_v25, 0.0  ;;  %v3545_v6 = vmax.f32 %v3513_v58, 0.0  ;;  %v2300_v3 = vmul.f32 %v9889_v31, %v12532_v46  ;;  %v2331_v32 = vadd.f32 %v2299_v13, %v2266_v47  ;;  %v3381_v47 = vld [vmem:[#allocation2 + $0x1a8] sm:$0xff]  ;;  %v3658_v16 = vpop.f32.mrf.mxu0 }
 0x24b   : > { %v3749_v8 = vpack.c.bf16 %v3722_v19, %v3721_v54  ;;  %v2572_v14 = vsel %vm2566_vm8, %v2559_v4, %v2560_v1  ;;  %v3250_v12 = vmul.f32 %v12431_v57, %v3217_v63  ;;  %v3544_v56 = vmax.f32 %v3512_v59, 0.0 }
 0x24c   : > { %6621 = vmatmul.msk.bf16.gmra.mxu2 %vm278_vm1, %v2748_v28  ;;  %v2934_v39 = vpack.c.bf16 %v2904_v51, %v2903_v35  ;;  %v3251_v41 = vmul.f32 %v12431_v57, %v3218_v15  ;;  %v3315_v42 = vmul.f32 %v8423_v11, %v9897_v38  ;;  %v2697_v48 = vadd.f32 %v9648_v55, %v2660_v10 }
 0x24d   : > { %6669 = vmatmul.msk.bf16.gmra.mxu1 %vm278_vm1, %v3749_v8  ;;  %v2080_v28 = vsel %vm2073_vm6, %v2065_v45, %v2066_v27  ;;  %v2136_v7 = vsel %vm2106_vm10, %v2081_v60, 0.0  ;;  %v3316_v61 = vmul.f32 %v8423_v11, %v9983_v53  ;;  %v3563_v58 = vpack.c.bf16 %v3545_v6, %v3544_v56  ;;  %v2831_v45 = vpop.f32.mrf.mxu2 }
 0x24e   : > { %6629 = vmatmul.msk.bf16.gmra.mxu3 %vm278_vm1, %v2934_v39  ;;  %v2332_v52 = vadd.f32 %v2300_v3, %v2267_v5  ;;  %v2573_v44 = vsel %vm2566_vm8, %v2558_v20, %v2559_v4  ;;  %v2630_v13 = vsel %vm2600_vm9, %v2572_v14, 0.0  ;;  %v3347_v25 = vadd.f32 %v3315_v42, %v3250_v12  ;;  %v3219_v20 = vld [vmem:[#allocation2 + $0xf0] sm:$0xff]  ;;  %v3220_v4 = vld [vmem:[#allocation2 + $0xf8] sm:$0xff] }
 0x24f   : > { %v3348_v10 = vadd.f32 %v3316_v61, %v3251_v41  ;;  %v3413_v59 = vmul.f32 %v12492_v26, %v3380_v36  ;;  %v3414_v60 = vmul.f32 %v12492_v26, %v3381_v47  ;;  %v2696_v63 = vadd.f32 %v9648_v55, %v2659_v0  ;;  %v10026_v36 = vld [vmem:[%s12284_s2 + $0x2] ss:$0 sm:$0xff] }
 0x250   : > { %v2363_v54 = vadd.f32 %v2331_v32, %v2136_v7  ;;  %v2364_v19 = vadd.f32 %v2332_v52, %v2080_v28  ;;  %6661 = vmatmul.msk.bf16.gmra.mxu0 %vm278_vm1, %v3563_v58  ;;  %v2729_v49 = vmax.f32 %v2697_v48, 0.0  ;;  %v3659_v3 = vadd.f32 %v9511_v37, %v3658_v16 }
 0x251   : > { %v3445_v35 = vadd.f32 %v3413_v59, %v3347_v25  ;;  %v3446_v51 = vadd.f32 %v3414_v60, %v3348_v10  ;;  %v2728_v6 = vmax.f32 %v2696_v63, 0.0  ;;  %v10010_v8 = vmul.f32 %v12431_v57, %v3219_v20 }
 0x252   : > { %v2661_v5 = vadd.f32 %v2573_v44, %v2363_v54  ;;  %v2662_v15 = vadd.f32 %v2630_v13, %v2364_v19  ;;  %v10013_v14 = vmul.f32 %v12431_v57, %v3220_v4  ;;  %v2832_v0 = vadd.f32 %v9841_v2, %v2831_v45  ;;  %v3660_v12 = vpop.f32.mrf.mxu0 }
 0x253   : > { %v2749_v32 = vpack.c.bf16 %v2729_v49, %v2728_v6  ;;  %v3661_v42 = vadd.f32 %v9511_v37, %v3660_v12  ;;  %v3514_v57 = vadd.f32 %v10026_v36, %v3445_v35  ;;  %v3515_v47 = vadd.f32 %v10026_v36, %v3446_v51 }
 0x254   : > { %v10017_v39 = vadd.f32 %v9648_v55, %v2661_v5  ;;  %v10020_v56 = vadd.f32 %v9648_v55, %v2662_v15  ;;  %v1906_v48 = vmul.f32 %v9848_v17, %v12497_v29  ;;  %v1841_v7 = vmul.f32 %v9778_v18, %v12496_v30  ;;  %v10048_v15 = vld [vmem:[#allocation2 + $0x150] sm:$0xff] }
 0x255   : > { %v2833_v41 = vpop.f32.mrf.mxu2  ;;  %v1842_v61 = vmul.f32 %v9789_v43, %v12496_v30  ;;  %v1907_v16 = vmul.f32 %v9889_v31, %v12497_v29  ;;  %v3723_v58 = vmax.f32 %v3659_v3, 0.0  ;;  %v3724_v52 = vmax.f32 %v3661_v42, 0.0 }
 0x256   : > { %v2834_v28 = vadd.f32 %v9841_v2, %v2833_v41  ;;  %v2399_v44 = vmul.f32 %v9789_v43, %v12530_v33  ;;  %v2432_v13 = vmul.f32 %v9889_v31, %v8542_v21  ;;  %v2905_v45 = vmax.f32 %v2832_v0, 0.0  ;;  %v10061_v0 = vld [vmem:[#allocation2 + $0x158] sm:$0xff] }
 0x257   : > { %v2236_v10 = vmul.f32 %v8524_v24, %v9848_v17  ;;  %v2400_v59 = vmul.f32 %v12530_v33, %v9848_v17  ;;  %v3750_v60 = vpack.c.bf16 %v3724_v52, %v3723_v58  ;;  %v3546_v63 = vmax.f32 %v3514_v57, 0.0 }
 0x258   : > { %v2906_v25 = vmax.f32 %v2834_v28, 0.0  ;;  %v3547_v54 = vmax.f32 %v3515_v47, 0.0  ;;  %v1938_v19 = vadd.f32 %v1906_v48, %v1841_v7  ;;  %v1939_v5 = vadd.f32 %v1907_v16, %v1842_v61 }
 0x259   : > { %v2003_v20 = vmul.f32 %v8501_v34, %v9897_v38  ;;  %v2004_v4 = vmul.f32 %v9983_v53, %v8501_v34  ;;  %v2433_v35 = vmul.f32 %v8542_v21, %v9897_v38  ;;  %v2464_v51 = vadd.f32 %v2432_v13, %v2399_v44 }
 0x25a   : > { %v2935_v49 = vpack.c.bf16 %v2906_v25, %v2905_v45  ;;  %v2497_v6 = vmul.f32 %v12531_v22, %v9983_v53  ;;  %v2498_v3 = vmul.f32 %v12531_v22, %v10048_v15  ;;  %v2203_v42 = vmul.f32 %v9778_v18, %v8512_v62  ;;  %v3382_v25 = vld [vmem:[#allocation2 + $0x1b0] sm:$0xff] }
 0x25b   : > { %v2035_v12 = vadd.f32 %v2003_v20, %v1938_v19  ;;  %v10064_v41 = vadd.f32 %v2004_v4, %v1939_v5  ;;  %v3317_v57 = vmul.f32 %v8423_v11, %v10048_v15  ;;  %v3564_v48 = vpack.c.bf16 %v3547_v54, %v3546_v63 }
 0x25c   : > { %6622 = vmatmul.msk.bf16.gmra.mxu2 %vm278_vm1, %v2749_v32  ;;  %v3663_v32 = vpop.f32.mrf.mxu0  ;;  %v2237_v28 = vmul.f32 %v9889_v31, %v8524_v24  ;;  %v2465_v22 = vadd.f32 %v2433_v35, %v2400_v59  ;;  %v2529_v7 = vadd.f32 %v2497_v6, %v2464_v51  ;;  %v2730_v61 = vmax.f32 %v10017_v39, 0.0  ;;  %v3383_v59 = vld [vmem:[#allocation2 + $0x1b8] sm:$0xff] }
 0x25d   : > { %6670 = vmatmul.msk.bf16.gmra.mxu1 %vm278_vm1, %v3750_v60  ;;  %v2836_v47 = vpop.f32.mrf.mxu2  ;;  %v2731_v16 = vmax.f32 %v10020_v56, 0.0  ;;  %v2067_v58 = vrot.slane %v2035_v12, 7  ;;  %v3318_v52 = vmul.f32 %v8423_v11, %v10061_v0  ;;  %v2068_v18 = vrot.slane %v10064_v41, 7  ;;  %v6841_v41 = vld [vmem:[#allocation2 + $0x158] sm:$0xff] }
 0x25e   : > { %6630 = vmatmul.msk.bf16.gmra.mxu3 %vm278_vm1, %v2935_v49  ;;  %v2204_v44 = vmul.f32 %v9789_v43, %v8512_v62  ;;  %v2268_v13 = vadd.f32 %v2236_v10, %v2203_v42  ;;  %v10080_v45 = vadd.f32 %v2498_v3, %v2465_v22  ;;  %v2301_v39 = vmul.f32 %v12532_v46, %v9897_v38 }
 0x25f   : > { %v2302_v56 = vmul.f32 %v9983_v53, %v12532_v46  ;;  %v3349_v11 = vadd.f32 %v3317_v57, %v10010_v8  ;;  %v3350_v60 = vadd.f32 %v3318_v52, %v10013_v14  ;;  %v3664_v63 = vadd.f32 %v9511_v37, %v3663_v32  ;;  %v10110_v32 = vld [vmem:[%s12286_s4 + $0x2] ss:$0 sm:$0xff] }
 0x260   : > { %6662 = vmatmul.msk.bf16.gmra.mxu0 %vm278_vm1, %v3564_v48  ;;  %v2269_v54 = vadd.f32 %v2237_v28, %v2204_v44  ;;  %v2561_v19 = vrot.slane %v2529_v7, 1  ;;  %v2562_v43 = vrot.slane %v10080_v45, 1  ;;  %v2837_v10 = vadd.f32 %v9841_v2, %v2836_v47 }
 0x261   : > { %v2079_v49 = vsel %vm2073_vm6, %v2066_v27, %v2067_v58  ;;  %v3415_v5 = vmul.f32 %v12492_v26, %v3382_v25  ;;  %v3416_v20 = vmul.f32 %v12492_v26, %v3383_v59  ;;  %v2750_v8 = vpack.c.bf16 %v2731_v16, %v2730_v61 }
 0x262   : > { %v2078_v37 = vsel %vm2073_vm6, %v2067_v58, %v2068_v18  ;;  %v2570_v14 = vsel %vm2566_vm8, %v2561_v19, %v2562_v43  ;;  %v1843_v50 = vmul.f32 %v9848_v17, %v12496_v30  ;;  %v2333_v27 = vadd.f32 %v2301_v39, %v2268_v13 }
 0x263   : > { %v2334_v35 = vadd.f32 %v2302_v56, %v2269_v54  ;;  %v3447_v51 = vadd.f32 %v3415_v5, %v3349_v11  ;;  %v3448_v6 = vadd.f32 %v3416_v20, %v3350_v60  ;;  %v3725_v3 = vmax.f32 %v3664_v63, 0.0 }
 0x264   : > { %v3665_v4 = vpop.f32.mrf.mxu0  ;;  %v2138_v42 = vsel %vm2106_vm10, %v2079_v49, 0.0  ;;  %v2632_v57 = vsel %vm2600_vm9, %v2570_v14, 0.0  ;;  %v2907_v47 = vmax.f32 %v2837_v10, 0.0  ;;  %v2571_v61 = vsel %vm2566_vm8, %v2560_v1, %v2561_v19  ;;  %v6839_v14 = vld [vmem:[%s12283_s1 + $0x18] ss:$0 sm:$0xff] }
 0x265   : > { %v2838_v26 = vpop.f32.mrf.mxu2  ;;  %v3666_v12 = vadd.f32 %v10110_v32, %v3665_v4  ;;  %v2366_v28 = vadd.f32 %v2334_v35, %v2078_v37  ;;  %v3517_v22 = vadd.f32 %v10026_v36, %v3448_v6  ;;  %v3516_v16 = vadd.f32 %v10026_v36, %v3447_v51 }
 0x266   : > { %v2839_v48 = vadd.f32 %v9841_v2, %v2838_v26  ;;  %v1909_v58 = vmul.f32 %v9983_v53, %v12497_v29  ;;  %v2365_v44 = vadd.f32 %v2333_v27, %v2138_v42  ;;  %v1908_v25 = vmul.f32 %v9897_v38, %v12497_v29 }
 0x267   : > { %v3726_v7 = vmax.f32 %v3666_v12, 0.0  ;;  %v2664_v13 = vadd.f32 %v2632_v57, %v2366_v28  ;;  %v3549_v39 = vmax.f32 %v3517_v22, 0.0  ;;  %v1844_v56 = vmul.f32 %v9889_v31, %v12496_v30 }
 0x268   : > { %v2908_v52 = vmax.f32 %v2839_v48, 0.0  ;;  %v2401_v40 = vmul.f32 %v9889_v31, %v12530_v33  ;;  %v2663_v36 = vadd.f32 %v2571_v61, %v2365_v44  ;;  %v2005_v11 = vmul.f32 %v8501_v34, %v10048_v15 }
 0x269   : > { %v3751_v59 = vpack.c.bf16 %v3726_v7, %v3725_v3  ;;  %v2006_v60 = vmul.f32 %v10061_v0, %v8501_v34  ;;  %v3548_v63 = vmax.f32 %v3516_v16, 0.0  ;;  %v1941_v54 = vadd.f32 %v1909_v58, %v1844_v56 }
 0x26a   : > { %v2936_v1 = vpack.c.bf16 %v2908_v52, %v2907_v47  ;;  %v2402_v19 = vmul.f32 %v12530_v33, %v9897_v38  ;;  %v2434_v10 = vmul.f32 %v9983_v53, %v8542_v21  ;;  %v2701_v5 = vadd.f32 %v9648_v55, %v2664_v13 }
 0x26b   : > { %v1940_v20 = vadd.f32 %v1908_v25, %v1843_v50  ;;  %v2435_v37 = vmul.f32 %v8542_v21, %v10048_v15  ;;  %v2499_v4 = vmul.f32 %v6839_v14, %v10061_v0  ;;  %v3565_v35 = vpack.c.bf16 %v3549_v39, %v3548_v63 }
 0x26c   : > { %6623 = vmatmul.msk.bf16.gmra.mxu2 %vm278_vm1, %v2750_v8  ;;  %v3668_v49 = vpop.f32.mrf.mxu0  ;;  %v10144_v8 = vld [vmem:[#allocation2 + $0x160] sm:$0xff]  ;;  %v10152_v51 = vadd.f32 %v2006_v60, %v1941_v54  ;;  %v2466_v6 = vadd.f32 %v2434_v10, %v2401_v40  ;;  %v2700_v26 = vadd.f32 %v9648_v55, %v2663_v36  ;;  %v2239_v12 = vmul.f32 %v9983_v53, %v8524_v24 }
 0x26d   : > { %6671 = vmatmul.msk.bf16.gmra.mxu1 %vm278_vm1, %v3751_v59  ;;  %v2841_v27 = vpop.f32.mrf.mxu2  ;;  %v2037_v3 = vadd.f32 %v2005_v11, %v1940_v20  ;;  %v2467_v50 = vadd.f32 %v2435_v37, %v2402_v19  ;;  %v2500_v42 = vmul.f32 %v6839_v14, %v10144_v8  ;;  %v2733_v47 = vmax.f32 %v2701_v5, 0.0 }
 0x26e   : > { %6631 = vmatmul.msk.bf16.gmra.mxu3 %vm278_vm1, %v2936_v1  ;;  %v2531_v57 = vadd.f32 %v2499_v4, %v2466_v6  ;;  %v2205_v48 = vmul.f32 %v8512_v62, %v9848_v17  ;;  %v2238_v28 = vmul.f32 %v8524_v24, %v9897_v38  ;;  %v2070_v22 = vrot.slane %v10152_v51, 7  ;;  %v6840_v4 = vld [vmem:[#allocation2 + $0x148] sm:$0xff] }
 0x26f   : > { %v2206_v55 = vmul.f32 %v9889_v31, %v8512_v62  ;;  %v2304_v7 = vmul.f32 %v10061_v0, %v12532_v46  ;;  %v10168_v61 = vadd.f32 %v2500_v42, %v2467_v50  ;;  %v3669_v53 = vadd.f32 %v10110_v32, %v3668_v49  ;;  %v6842_v50 = vld [vmem:[#allocation2 + $0x168] sm:$0xff] }
 0x270   : > { %6663 = vmatmul.msk.bf16.gmra.mxu0 %vm278_vm1, %v3565_v35  ;;  %v2732_v16 = vmax.f32 %v2700_v26, 0.0  ;;  %v2069_v58 = vrot.slane %v2037_v3, 7  ;;  %v2563_v52 = vrot.slane %v2531_v57, 1  ;;  %v2842_v17 = vadd.f32 %v9841_v2, %v2841_v27 }
 0x271   : > { %v2271_v44 = vadd.f32 %v2239_v12, %v2206_v55  ;;  %v1910_v13 = vmul.f32 %v10048_v15, %v12497_v29  ;;  %v2270_v39 = vadd.f32 %v2238_v28, %v2205_v48  ;;  %v2564_v31 = vrot.slane %v10168_v61, 1 }
 0x272   : > { %v2751_v25 = vpack.c.bf16 %v2733_v47, %v2732_v16  ;;  %v1845_v56 = vmul.f32 %v9897_v38, %v12496_v30  ;;  %v2076_v36 = vsel %vm2073_vm6, %v2069_v58, %v2070_v22  ;;  %v2303_v11 = vmul.f32 %v12532_v46, %v10048_v15 }
 0x273   : > { %v2336_v60 = vadd.f32 %v2304_v7, %v2271_v44  ;;  %v3727_v63 = vmax.f32 %v3669_v53, 0.0  ;;  %v2077_v54 = vsel %vm2073_vm6, %v2068_v18, %v2069_v58  ;;  %v2568_v30 = vsel %vm2566_vm8, %v2563_v52, %v2564_v31 }
 0x274   : > { %v3670_v59 = vpop.f32.mrf.mxu0  ;;  %v2909_v19 = vmax.f32 %v2842_v17, 0.0  ;;  %v1942_v49 = vadd.f32 %v1910_v13, %v1845_v56  ;;  %v2007_v5 = vmul.f32 %v8501_v34, %v10144_v8  ;;  %v2403_v27 = vmul.f32 %v6840_v4, %v12530_v33 }
 0x275   : > { %v2843_v40 = vpop.f32.mrf.mxu2  ;;  %v3671_v1 = vadd.f32 %v10110_v32, %v3670_v59  ;;  %v2368_v37 = vadd.f32 %v2336_v60, %v2076_v36  ;;  %v2436_v35 = vmul.f32 %v6841_v41, %v8542_v21  ;;  %v2140_v51 = vsel %vm2106_vm10, %v2077_v54, 0.0 }
 0x276   : > { %v2844_v29 = vadd.f32 %v9841_v2, %v2843_v40  ;;  %v2634_v6 = vsel %vm2600_vm9, %v2568_v30, 0.0  ;;  %v2335_v3 = vadd.f32 %v2303_v11, %v2270_v39  ;;  %v2501_v12 = vmul.f32 %v6842_v50, %v6839_v14 }
 0x277   : > { %v3728_v10 = vmax.f32 %v3671_v1, 0.0  ;;  %v2468_v34 = vadd.f32 %v2436_v35, %v2403_v27  ;;  %v2569_v21 = vsel %vm2566_vm8, %v2562_v43, %v2563_v52  ;;  %v2039_v33 = vadd.f32 %v2007_v5, %v1942_v49  ;;  %v6843_v43 = vld [vmem:[%s12284_s2 + $0x1] ss:$0 sm:$0xff]  ;;  %v12539_v1 = vld [vmem:[#allocation33_spill] sm:$0xff] }
 0x278   : > { %v2910_v20 = vmax.f32 %v2844_v29, 0.0  ;;  %v2367_v57 = vadd.f32 %v2335_v3, %v2140_v51  ;;  %v2666_v47 = vadd.f32 %v2634_v6, %v2368_v37  ;;  %v2240_v28 = vmul.f32 %v8524_v24, %v10048_v15  ;;  %v10246_v3 = vld [vmem:[#allocation2 + $0x60] sm:$0xff] }
 0x279   : > { %v3752_v18 = vpack.c.bf16 %v3728_v10, %v3727_v63  ;;  %v2241_v14 = vmul.f32 %v6841_v41, %v8524_v24  ;;  %v2533_v7 = vadd.f32 %v2501_v12, %v2468_v34  ;;  %v2071_v53 = vrot.slane %v2039_v33, 7  ;;  %v12541_v63 = vld [vmem:[#allocation32_spill] sm:$0xff]  ;;  %v10250_v12 = vld [vmem:[#allocation2 + $0x70] sm:$0xff] }
 0x27a   : > { %v2937_v26 = vpack.c.bf16 %v2910_v20, %v2909_v19  ;;  %v2665_v55 = vadd.f32 %v2569_v21, %v2367_v57  ;;  %v2207_v45 = vmul.f32 %v8512_v62, %v9897_v38  ;;  %v2703_v16 = vadd.f32 %v6843_v43, %v2666_v47 }
 0x27b   : > { %v2208_v58 = vmul.f32 %v6840_v4, %v8512_v62  ;;  %v2075_v52 = vsel %vm2073_vm6, %v2070_v22, %v2071_v53  ;;  %v2305_v15 = vmul.f32 %v12532_v46, %v10144_v8  ;;  %v2306_v13 = vmul.f32 %v6842_v50, %v12532_v46 }
 0x27c   : > { %6624 = vmatmul.msk.bf16.gmra.mxu2 %vm278_vm1, %v2751_v25  ;;  %v3673_v42 = vpop.f32.mrf.mxu0  ;;  %v2272_v17 = vadd.f32 %v2240_v28, %v2207_v45  ;;  %v2702_v24 = vadd.f32 %v6843_v43, %v2665_v55  ;;  %v2565_v25 = vrot.slane %v2533_v7, 1  ;;  %v2735_v39 = vmax.f32 %v2703_v16, 0.0 }
 0x27d   : > { %6672 = vmatmul.msk.bf16.gmra.mxu1 %vm278_vm1, %v3752_v18  ;;  %v2846_v48 = vpop.f32.mrf.mxu2  ;;  %v2273_v44 = vadd.f32 %v2241_v14, %v2208_v58  ;;  %v3674_v38 = vadd.f32 %v10110_v32, %v3673_v42  ;;  %v2142_v62 = vsel %vm2106_vm10, %v2075_v52, 0.0  ;;  %v12540_v36 = vrot.slane %v12539_v1, 7  ;;  %v6681_v18 = vld [vmem:[%s12283_s1 + $0x30] sm:$0xff] }
 0x27e   : > { %6632 = vmatmul.msk.bf16.gmra.mxu3 %vm278_vm1, %v2937_v26  ;;  %v2847_v59 = vadd.f32 %v9841_v2, %v2846_v48  ;;  %v2337_v11 = vadd.f32 %v2305_v15, %v2272_v17  ;;  %v2734_v60 = vmax.f32 %v2702_v24, 0.0  ;;  %v12542_v54 = vrot.slane %v12541_v63, 1 }
 0x27f   : > { %v2074_v8 = vsel %vm2073_vm6, %v2071_v53, %v12540_v36  ;;  %v2338_v29 = vadd.f32 %v2306_v13, %v2273_v44  ;;  %v3729_v19 = vmax.f32 %v3674_v38, 0.0  ;;  %v2567_v41 = vsel %vm2566_vm8, %v2564_v31, %v2565_v25  ;;  %v3970_v31 = vld [vmem:[#allocation2 + $0x68] sm:$0xff] }
 0x280   : > { %v2598_v30 = vsel %vm2566_vm8, %v2565_v25, %v12542_v54  ;;  %v2369_v49 = vadd.f32 %v2337_v11, %v2142_v62  ;;  %v2911_v5 = vmax.f32 %v2847_v59, 0.0  ;;  %v2752_v37 = vpack.c.bf16 %v2735_v39, %v2734_v60  ;;  %v3972_v11 = vld [vmem:[#allocation2 + $0x78] sm:$0xff] }
 0x281   : > { %v2370_v4 = vadd.f32 %v2338_v29, %v2074_v8  ;;  %v2636_v35 = vsel %vm2600_vm9, %v2598_v30, 0.0  ;;  %v10248_v34 = vperm.slane %v6681_v18, 3  ;;  %v10252_v21 = vperm.slane %v6681_v18, 5 }
 0x282   : > { %v2667_v26 = vadd.f32 %v2567_v41, %v2369_v49  ;;  %v10268_v25 = vperm.slane %v6681_v18, 4 }
 0x283   : > { %v2668_v61 = vadd.f32 %v2636_v35, %v2370_v4  ;;  %v4033_v33 = vmul.f32 %v10248_v34, %v10061_v0  ;;  %v4002_v42 = vmul.f32 %v10248_v34, %v10246_v3  ;;  %v4235_v57 = vmul.f32 %v10252_v21, %v3970_v31 }
 0x284   : > { %v3675_v56 = vpop.f32.mrf.mxu0  ;;  %v2704_v47 = vadd.f32 %v6843_v43, %v2667_v26  ;;  %v4236_v28 = vmul.f32 %v10252_v21, %v10250_v12  ;;  %v4169_v1 = vmul.f32 %v10268_v25, %v10246_v3  ;;  %v4170_v36 = vmul.f32 %v10268_v25, %v3970_v31 }
 0x285   : > { %v2848_v40 = vpop.f32.mrf.mxu2  ;;  %v3676_v22 = vadd.f32 %v10110_v32, %v3675_v56  ;;  %v2705_v48 = vadd.f32 %v6843_v43, %v2668_v61  ;;  %v4065_v55 = vrot.slane %v4033_v33, 1  ;;  %v4034_v7 = vrot.slane %v4002_v42, 1 }
 0x286   : > { %v2849_v46 = vadd.f32 %v9841_v2, %v2848_v40  ;;  %v4267_v53 = vrot.slane %v4235_v57, 7  ;;  %v2736_v16 = vmax.f32 %v2704_v47, 0.0  ;;  %v4268_v52 = vrot.slane %v4236_v28, 7 }
 0x287   : > { %v3730_v10 = vmax.f32 %v3676_v22, 0.0  ;;  %v2737_v58 = vmax.f32 %v2705_v48, 0.0  ;;  %v4097_v43 = vsel %vm2566_vm8, %v4065_v55, %v4034_v7  ;;  %v4003_v54 = vmul.f32 %v10248_v34, %v3970_v31 }
 0x288   : > { %v2912_v20 = vmax.f32 %v2849_v46, 0.0  ;;  %v4327_v56 = vsel %vm2073_vm6, %v4267_v53, %v4268_v52  ;;  %v4105_v40 = vsel %vm4099_vm11, %v4097_v43, 0.0  ;;  %v10281_v46 = vld [vmem:[#allocation2 + $0x80] sm:$0xff]  ;;  %v4237_v49 = vmul.f32 %v10252_v21, %v3972_v11  ;;  %v3974_v52 = vld [vmem:[#allocation2 + $0x88] sm:$0xff] }
 0x289   : > { %v3753_v27 = vpack.c.bf16 %v3730_v10, %v3729_v19  ;;  %v2753_v39 = vpack.c.bf16 %v2737_v58, %v2736_v16  ;;  %v4335_v8 = vsel %vm2073_vm6, %v4327_v56, 0.0  ;;  %v4202_v29 = vadd.f32 %v4170_v36, %v4105_v40  ;;  %v10288_v19 = vld [vmem:[%s12284_s2 + $0x3] ss:$0 sm:$0xff] }
 0x28a   : > { %v2938_v51 = vpack.c.bf16 %v2912_v20, %v2911_v5  ;;  %v4367_v30 = vadd.f32 %v4335_v8, %v4169_v1  ;;  %v4004_v10 = vmul.f32 %v10248_v34, %v10250_v12  ;;  %v4238_v5 = vmul.f32 %v10252_v21, %v10281_v46 }
 0x28b   : > { %v4405_v20 = vadd.f32 %v10288_v19, %v4202_v29  ;;  %v4269_v41 = vrot.slane %v4237_v49, 7  ;;  %v4171_v28 = vmul.f32 %v10268_v25, %v10250_v12  ;;  %v4172_v53 = vmul.f32 %v10268_v25, %v3972_v11 }
 0x28c   : > { %6625 = vmatmul.msk.bf16.gmra.mxu2 %vm278_vm1, %v2752_v37  ;;  %v3678_v6 = vpop.f32.mrf.mxu0  ;;  %v4035_v37 = vrot.slane %v4003_v54, 1  ;;  %v4404_v4 = vadd.f32 %v10288_v19, %v4367_v30  ;;  %v4270_v35 = vrot.slane %v4238_v5, 7 }
 0x28d   : > { %6673 = vmatmul.msk.bf16.gmra.mxu1 %vm278_vm1, %v3753_v27  ;;  %v2851_v50 = vpop.f32.mrf.mxu2  ;;  %v3679_v14 = vadd.f32 %v10110_v32, %v3678_v6  ;;  %v4036_v27 = vrot.slane %v4004_v10, 1  ;;  %v4437_v6 = vmax.f32 %v4405_v20, 0.0 }
 0x28e   : > { %6633 = vmatmul.msk.bf16.gmra.mxu3 %vm278_vm1, %v2938_v51  ;;  %v2852_v45 = vadd.f32 %v9841_v2, %v2851_v50  ;;  %v4436_v33 = vmax.f32 %v4404_v4, 0.0  ;;  %v4325_v57 = vsel %vm2073_vm6, %v4269_v41, %v4270_v35  ;;  %v4173_v4 = vmul.f32 %v10268_v25, %v10281_v46 }
 0x28f   : > { %v3731_v44 = vmax.f32 %v3679_v14, 0.0  ;;  %v4095_v42 = vsel %vm2566_vm8, %v4035_v37, %v4036_v27  ;;  %v4337_v58 = vsel %vm2073_vm6, %v4325_v57, 0.0 }
 0x290   : > { %v2913_v38 = vmax.f32 %v2852_v45, 0.0  ;;  %v4468_v7 = vpack.c.bf16 %v4437_v6, %v4436_v33  ;;  %v4107_v16 = vsel %vm4099_vm11, %v4095_v42, 0.0 }
 0x294   : > { %v3680_v0 = vpop.f32.mrf.mxu0 }
 0x295   : > { %v2853_v17 = vpop.f32.mrf.mxu2  ;;  %v3681_v15 = vadd.f32 %v10110_v32, %v3680_v0 }
 0x296   : > { %v2854_v24 = vadd.f32 %v9841_v2, %v2853_v17  ;;  %v10314_v17 = vld [vmem:[#allocation2 + $0x90] sm:$0xff] }
 0x297   : > { %v3732_v13 = vmax.f32 %v3681_v15, 0.0  ;;  %v4204_v15 = vadd.f32 %v4172_v53, %v4107_v16  ;;  %v4008_v57 = vmul.f32 %v10248_v34, %v10314_v17 }
 0x298   : > { %v2914_v59 = vmax.f32 %v2854_v24, 0.0  ;;  %v4369_v24 = vadd.f32 %v4337_v58, %v4171_v28 }
 0x299   : > { %v3754_v62 = vpack.c.bf16 %v3732_v13, %v3731_v44  ;;  %v4005_v44 = vmul.f32 %v10248_v34, %v3972_v11  ;;  %v4006_v13 = vmul.f32 %v10248_v34, %v10281_v46  ;;  %v4407_v56 = vadd.f32 %v10288_v19, %v4204_v15 }
 0x29a   : > { %v2939_v22 = vpack.c.bf16 %v2914_v59, %v2913_v38  ;;  %v4239_v38 = vmul.f32 %v10252_v21, %v3974_v52  ;;  %v4240_v59 = vmul.f32 %v10252_v21, %v10314_v17  ;;  %v4007_v46 = vmul.f32 %v10248_v34, %v3974_v52 }
 0x29b   : > { %v4038_v40 = vrot.slane %v4006_v13, 1 }
 0x29c   : > { %6626 = vmatmul.msk.bf16.gmra.mxu2 %vm278_vm1, %v2753_v39  ;;  %v3683_v60 = vpop.f32.mrf.mxu0  ;;  %v4406_v39 = vadd.f32 %v10288_v19, %v4369_v24  ;;  %v4272_v1 = vrot.slane %v4240_v59, 7  ;;  %v4039_v53 = vrot.slane %v4007_v46, 1  ;;  %v10362_v24 = vld [vmem:[%s12286_s4 + $0x1] ss:$0 sm:$0xff] }
 0x29d   : > { %6674 = vmatmul.msk.bf16.gmra.mxu1 %vm278_vm1, %v3754_v62  ;;  %v2856_v63 = vpop.f32.mrf.mxu2  ;;  %v3684_v18 = vadd.f32 %v10110_v32, %v3683_v60  ;;  %v4037_v62 = vrot.slane %v4005_v44, 1  ;;  %v4439_v60 = vmax.f32 %v4407_v56, 0.0 }
 0x29e   : > { %6634 = vmatmul.msk.bf16.gmra.mxu3 %vm278_vm1, %v2939_v22  ;;  %v2857_v51 = vadd.f32 %v9841_v2, %v2856_v63  ;;  %v4271_v22 = vrot.slane %v4239_v38, 7  ;;  %v4438_v11 = vmax.f32 %v4406_v39, 0.0  ;;  %v10327_v63 = vpop.f32.mrf.mxu1 }
 0x29f   : > { %v3733_v47 = vmax.f32 %v3684_v18, 0.0  ;;  %v4093_v49 = vsel %vm2566_vm8, %v4037_v62, %v4038_v40  ;;  %v4174_v18 = vmul.f32 %v10268_v25, %v3974_v52  ;;  %v4175_v40 = vmul.f32 %v10268_v25, %v10314_v17 }
 0x2a0   : > { %v2915_v55 = vmax.f32 %v2857_v51, 0.0  ;;  %v4323_v5 = vsel %vm2073_vm6, %v4271_v22, %v4272_v1  ;;  %v4469_v35 = vpack.c.bf16 %v4439_v60, %v4438_v11  ;;  %v1748_v1 = vld [vmem:[#allocation3 + $0x8] sm:$0xff] }
 0x2a1   : > { %v4339_v6 = vsel %vm2073_vm6, %v4323_v5, 0.0 }
 0x2a2   : > { %v4371_v42 = vadd.f32 %v4339_v6, %v4173_v4  ;;  %v10380_v4 = vld [vmem:[#allocation2 + $0xb0] sm:$0xff] }
 0x2a4   : > { %v3685_v26 = vpop.f32.mrf.mxu0  ;;  %v4408_v16 = vadd.f32 %v10288_v19, %v4371_v42 }
 0x2a5   : > { %v2858_v61 = vpop.f32.mrf.mxu2  ;;  %v3686_v31 = vadd.f32 %v10110_v32, %v3685_v26 }
 0x2a6   : > { %v2859_v50 = vadd.f32 %v9841_v2, %v2858_v61  ;;  %v3976_v61 = vld [vmem:[#allocation2 + $0x98] sm:$0xff]  ;;  %v4440_v44 = vmax.f32 %v4408_v16, 0.0 }
 0x2a7   : > { %v3734_v48 = vmax.f32 %v3686_v31, 0.0  ;;  %v10344_v31 = vld [vmem:[#allocation2 + $0xa0] sm:$0xff] }
 0x2a8   : > { %v2916_v14 = vmax.f32 %v2859_v50, 0.0  ;;  %v4242_v28 = vmul.f32 %v10252_v21, %v10344_v31 }
 0x2a9   : > { %v3755_v45 = vpack.c.bf16 %v3734_v48, %v3733_v47  ;;  %v4241_v48 = vmul.f32 %v10252_v21, %v3976_v61 }
 0x2aa   : > { %v2940_v0 = vpack.c.bf16 %v2916_v14, %v2915_v55  ;;  %v10353_v55 = vpop.f32.mrf.mxu1  ;;  %v1747_v14 = vld [vmem:[#allocation3] sm:$0xff] }
 0x2ab   : > { %v4273_v52 = vrot.slane %v4241_v48, 7 }
 0x2ac   : > { %6685 = vmatmul.msk.bf16.vlgmr.msra.gmra.mxu2 %vm278_vm1, %v4468_v7  ;;  %v3688_v12 = vpop.f32.mrf.mxu0 }
 0x2ad   : > { %6675 = vmatmul.msk.bf16.gmra.mxu1 %vm278_vm1, %v3755_v45  ;;  %v2861_v43 = vpop.f32.mrf.mxu2  ;;  %v3689_v36 = vadd.f32 %v10110_v32, %v3688_v12  ;;  %v4274_v12 = vrot.slane %v4242_v28, 7 }
 0x2ae   : > { %6635 = vmatmul.msk.bf16.gmra.mxu3 %vm278_vm1, %v2940_v0  ;;  %v2862_v8 = vadd.f32 %v9841_v2, %v2861_v43  ;;  %v4040_v0 = vrot.slane %v4008_v57, 1 }
 0x2af   : > { %v3735_v20 = vmax.f32 %v3689_v36, 0.0  ;;  %v4321_v22 = vsel %vm2073_vm6, %v4273_v52, %v4274_v12 }
 0x2b0   : > { %v2917_v27 = vmax.f32 %v2862_v8, 0.0  ;;  %v4091_v59 = vsel %vm2566_vm8, %v4039_v53, %v4040_v0  ;;  %v4341_v17 = vsel %vm2073_vm6, %v4321_v22, 0.0 }
 0x2b1   : > { %v4111_v60 = vsel %vm4099_vm11, %v4091_v59, 0.0  ;;  %v1750_v59 = vld [vmem:[#allocation3 + $0x18] sm:$0xff] }
 0x2b2   : > { %v10376_v5 = vpop.f32.mrf.mxu1 }
 0x2b4   : > { %v3690_v29 = vpop.f32.mrf.mxu0 }
 0x2b5   : > { %v2863_v54 = vpop.f32.mrf.mxu2  ;;  %v3691_v30 = vadd.f32 %v10110_v32, %v3690_v29  ;;  %v4176_v29 = vmul.f32 %v10268_v25, %v3976_v61 }
 0x2b6   : > { %v2864_v10 = vadd.f32 %v9841_v2, %v2863_v54  ;;  %v4109_v2 = vsel %vm4099_vm11, %v4093_v49, 0.0 }
 0x2b7   : > { %v3736_v37 = vmax.f32 %v3691_v30, 0.0  ;;  %v4206_v33 = vadd.f32 %v4174_v18, %v4109_v2  ;;  %v4010_v18 = vmul.f32 %v10248_v34, %v10344_v31  ;;  %v4373_v2 = vadd.f32 %v4341_v17, %v4175_v40 }
 0x2b8   : > { %v2918_v41 = vmax.f32 %v2864_v10, 0.0  ;;  %v4012_v17 = vmul.f32 %v10248_v34, %v10380_v4 }
 0x2b9   : > { %v3756_v51 = vpack.c.bf16 %v3736_v37, %v3735_v20  ;;  %v4409_v58 = vadd.f32 %v10288_v19, %v4206_v33  ;;  %v3978_v37 = vld [vmem:[#allocation2 + $0xa8] sm:$0xff]  ;;  %v4410_v48 = vadd.f32 %v10288_v19, %v4373_v2 }
 0x2ba   : > { %v2941_v26 = vpack.c.bf16 %v2918_v41, %v2917_v27  ;;  %v4208_v41 = vadd.f32 %v4176_v29, %v4111_v60  ;;  %v4243_v6 = vmul.f32 %v10252_v21, %v3978_v37 }
 0x2bb   : > { %v4441_v13 = vmax.f32 %v4409_v58, 0.0  ;;  %v4442_v58 = vmax.f32 %v4410_v48, 0.0 }
 0x2bc   : > { %6686 = vmatmul.msk.bf16.gmra.mxu2 %vm278_vm1, %v4469_v35  ;;  %v4009_v35 = vmul.f32 %v10248_v34, %v3976_v61  ;;  %v4411_v42 = vadd.f32 %v10288_v19, %v4208_v41  ;;  %v4275_v28 = vrot.slane %v4243_v6, 7  ;;  %v1751_v6 = vld [vmem:[#allocation3 + $0x20] sm:$0xff] }
 0x2bd   : > { %6676 = vmatmul.msk.bf16.gmra.mxu1 %vm278_vm1, %v3756_v51  ;;  %v3693_v50 = vpop.f32.mrf.mxu0  ;;  %v4470_v49 = vpack.c.bf16 %v4441_v13, %v4440_v44  ;;  %v4177_v13 = vmul.f32 %v10268_v25, %v10344_v31 }
 0x2be   : > { %6636 = vmatmul.msk.bf16.gmra.mxu3 %vm278_vm1, %v2941_v26  ;;  %v3694_v15 = vadd.f32 %v10110_v32, %v3693_v50  ;;  %v4244_v26 = vmul.f32 %v10252_v21, %v10380_v4  ;;  %v1749_v50 = vld [vmem:[#allocation3 + $0x10] sm:$0xff]  ;;  %v4041_v57 = vrot.slane %v4009_v35, 1 }
 0x2bf   : > { %v2866_v47 = vpop.f32.mrf.mxu2 }
 0x2c0   : > { %v2867_v43 = vadd.f32 %v10362_v24, %v2866_v47  ;;  %v3737_v8 = vmax.f32 %v3694_v15, 0.0  ;;  %v4042_v47 = vrot.slane %v4010_v18, 1 }
 0x2c1   : > { %v3011_v7 = vpop.f32.mrf.mxu3 }
 0x2c2   : > { %v3091_v45 = vadd.f32 %v3011_v7, %v1747_v14  ;;  %v2919_v54 = vmax.f32 %v2867_v43, 0.0  ;;  %v4276_v14 = vrot.slane %v4244_v26, 7  ;;  %v10395_v7 = vpop.f32.mrf.mxu1  ;;  %v4089_v52 = vsel %vm2566_vm8, %v4041_v57, %v4042_v47 }
 0x2c3   : > { %v4113_v40 = vsel %vm4099_vm11, %v4089_v52, 0.0  ;;  %v4179_v52 = vmul.f32 %v10268_v25, %v10380_v4 }
 0x2c4   : > { %3123 = vst.msk [vmem:[#allocation3] sm:$0xff] %vm1682_vm7, %v3091_v45  ;;  %v4443_v45 = vmax.f32 %v4411_v42, 0.0  ;;  %v4319_v12 = vsel %vm2073_vm6, %v4275_v28, %v4276_v14 }
 0x2c5   : > { %v3695_v38 = vpop.f32.mrf.mxu0  ;;  %v4343_v22 = vsel %vm2073_vm6, %v4319_v12, 0.0 }
 0x2c6   : > { %v3696_v56 = vadd.f32 %v10110_v32, %v3695_v38  ;;  %v4178_v38 = vmul.f32 %v10268_v25, %v3978_v37 }
 0x2c7   : > { %v2868_v39 = vpop.f32.mrf.mxu2 }
 0x2c8   : > { %v2869_v62 = vadd.f32 %v10362_v24, %v2868_v39  ;;  %v3738_v11 = vmax.f32 %v3696_v56, 0.0  ;;  %v4210_v31 = vadd.f32 %v4178_v38, %v4113_v40 }
 0x2c9   : > { %v3013_v36 = vpop.f32.mrf.mxu3 }
 0x2ca   : > { %v2920_v30 = vmax.f32 %v2869_v62, 0.0  ;;  %v3092_v10 = vadd.f32 %v3013_v36, %v1748_v1  ;;  %v3757_v20 = vpack.c.bf16 %v3738_v11, %v3737_v8  ;;  %v4471_v11 = vpack.c.bf16 %v4443_v45, %v4442_v58 }
 0x2cb   : > { %v4413_v2 = vadd.f32 %v10288_v19, %v4210_v31 }
 0x2cc   : > { %v2942_v27 = vpack.c.bf16 %v2920_v30, %v2919_v54  ;;  %3124 = vst.msk [vmem:[#allocation3 + $0x8] sm:$0xff] %vm1682_vm7, %v3092_v10  ;;  %6687 = vmatmul.msk.bf16.gmra.mxu2 %vm278_vm1, %v4470_v49  ;;  %v4375_v54 = vadd.f32 %v4343_v22, %v4177_v13  ;;  %v3980_v30 = vld [vmem:[#allocation2 + $0xb8] sm:$0xff]  ;;  %v10414_v10 = vld [vmem:[#allocation2 + $0xc0] sm:$0xff] }
 0x2cd   : > { %6677 = vmatmul.msk.bf16.gmra.mxu1 %vm278_vm1, %v3757_v20  ;;  %v3698_v51 = vpop.f32.mrf.mxu0  ;;  %v4011_v20 = vmul.f32 %v10248_v34, %v3978_v37  ;;  %v4245_v35 = vmul.f32 %v10252_v21, %v3980_v30  ;;  %v4246_v18 = vmul.f32 %v10252_v21, %v10414_v10  ;;  %v4044_v37 = vrot.slane %v4012_v17, 1  ;;  %v1753_v17 = vld [vmem:[#allocation3 + $0x30] sm:$0xff] }
 0x2ce   : > { %6637 = vmatmul.msk.bf16.gmra.mxu3 %vm278_vm1, %v2942_v27  ;;  %v3699_v53 = vadd.f32 %v10110_v32, %v3698_v51  ;;  %v10421_v27 = vpop.f32.mrf.mxu1  ;;  %v4412_v51 = vadd.f32 %v10288_v19, %v4375_v54  ;;  %v4445_v47 = vmax.f32 %v4413_v2, 0.0  ;;  %v4013_v31 = vmul.f32 %v10248_v34, %v3980_v30 }
 0x2cf   : > { %v2871_v46 = vpop.f32.mrf.mxu2  ;;  %v4278_v42 = vrot.slane %v4246_v18, 7  ;;  %v4014_v54 = vmul.f32 %v10248_v34, %v10414_v10 }
 0x2d0   : > { %v2872_v16 = vadd.f32 %v10362_v24, %v2871_v46  ;;  %v3739_v56 = vmax.f32 %v3699_v53, 0.0  ;;  %v4444_v57 = vmax.f32 %v4412_v51, 0.0 }
 0x2d1   : > { %v3016_v33 = vpop.f32.mrf.mxu3 }
 0x2d2   : > { %v3093_v61 = vadd.f32 %v3016_v33, %v1749_v50  ;;  %v2921_v1 = vmax.f32 %v2872_v16, 0.0  ;;  %v4043_v50 = vrot.slane %v4011_v20, 1  ;;  %v4277_v33 = vrot.slane %v4245_v35, 7 }
 0x2d4   : > { %3125 = vst.msk [vmem:[#allocation3 + $0x10] sm:$0xff] %vm1682_vm7, %v3093_v61  ;;  %v4087_v14 = vsel %vm2566_vm8, %v4043_v50, %v4044_v37  ;;  %v4317_v16 = vsel %vm2073_vm6, %v4277_v33, %v4278_v42 }
 0x2d5   : > { %v3700_v0 = vpop.f32.mrf.mxu0  ;;  %v4115_v38 = vsel %vm4099_vm11, %v4087_v14, 0.0  ;;  %v4345_v40 = vsel %vm2073_vm6, %v4317_v16, 0.0 }
 0x2d6   : > { %v3701_v43 = vadd.f32 %v10110_v32, %v3700_v0  ;;  %v4472_v0 = vpack.c.bf16 %v4445_v47, %v4444_v57  ;;  %v10439_v12 = vpop.f32.mrf.mxu1 }
 0x2d7   : > { %v2873_v15 = vpop.f32.mrf.mxu2 }
 0x2d8   : > { %v2874_v44 = vadd.f32 %v10362_v24, %v2873_v15  ;;  %v3740_v62 = vmax.f32 %v3701_v43, 0.0  ;;  %v1752_v15 = vld [vmem:[#allocation3 + $0x28] sm:$0xff] }
 0x2d9   : > { %v3018_v39 = vpop.f32.mrf.mxu3 }
 0x2da   : > { %v2922_v36 = vmax.f32 %v2874_v44, 0.0  ;;  %v3094_v8 = vadd.f32 %v3018_v39, %v1750_v59  ;;  %v3758_v60 = vpack.c.bf16 %v3740_v62, %v3739_v56  ;;  %v4180_v59 = vmul.f32 %v10268_v25, %v3980_v30 }
 0x2db   : > { %v4045_v30 = vrot.slane %v4013_v31, 1 }
 0x2dc   : > { %v2943_v29 = vpack.c.bf16 %v2922_v36, %v2921_v1  ;;  %3126 = vst.msk [vmem:[#allocation3 + $0x18] sm:$0xff] %vm1682_vm7, %v3094_v8  ;;  %6688 = vmatmul.msk.bf16.gmra.mxu2 %vm278_vm1, %v4471_v11  ;;  %v4212_v4 = vadd.f32 %v4180_v59, %v4115_v38  ;;  %v4377_v36 = vadd.f32 %v4345_v40, %v4179_v52 }
 0x2dd   : > { %6678 = vmatmul.msk.bf16.gmra.mxu1 %vm278_vm1, %v3758_v60  ;;  %v3703_v49 = vpop.f32.mrf.mxu0  ;;  %v3982_v60 = vld [vmem:[#allocation2 + $0xc8] sm:$0xff]  ;;  %v4181_v52 = vmul.f32 %v10268_v25, %v10414_v10  ;;  %v3984_v10 = vld [vmem:[#allocation2 + $0xd8] sm:$0xff] }
 0x2de   : > { %6638 = vmatmul.msk.bf16.gmra.mxu3 %vm278_vm1, %v2943_v29  ;;  %v3704_v61 = vadd.f32 %v10110_v32, %v3703_v49  ;;  %v10450_v29 = vld [vmem:[#allocation2 + $0xd0] sm:$0xff]  ;;  %v4247_v49 = vmul.f32 %v10252_v21, %v3982_v60  ;;  %v4414_v35 = vadd.f32 %v10288_v19, %v4377_v36  ;;  %v4415_v18 = vadd.f32 %v10288_v19, %v4212_v4  ;;  %v10460_v2 = vpop.f32.mrf.mxu1 }
 0x2df   : > { %v2876_v41 = vpop.f32.mrf.mxu2  ;;  %v4248_v20 = vmul.f32 %v10252_v21, %v10450_v29  ;;  %v4015_v4 = vmul.f32 %v10248_v34, %v3982_v60  ;;  %v4016_v36 = vmul.f32 %v10248_v34, %v10450_v29 }
 0x2e0   : > { %v2877_v48 = vadd.f32 %v10362_v24, %v2876_v41  ;;  %v3741_v44 = vmax.f32 %v3704_v61, 0.0  ;;  %v4446_v37 = vmax.f32 %v4414_v35, 0.0  ;;  %v4447_v33 = vmax.f32 %v4415_v18, 0.0 }
 0x2e1   : > { %v3021_v26 = vpop.f32.mrf.mxu3  ;;  %v4048_v35 = vrot.slane %v4016_v36, 1 }
 0x2e2   : > { %v3095_v46 = vadd.f32 %v3021_v26, %v1751_v6  ;;  %v2923_v39 = vmax.f32 %v2877_v48, 0.0  ;;  %v4046_v6 = vrot.slane %v4014_v54, 1  ;;  %v4279_v26 = vrot.slane %v4247_v49, 7 }
 0x2e4   : > { %3127 = vst.msk [vmem:[#allocation3 + $0x20] sm:$0xff] %vm1682_vm7, %v3095_v46  ;;  %v4280_v46 = vrot.slane %v4248_v20, 7 }
 0x2e5   : > { %v3705_v28 = vpop.f32.mrf.mxu0 }
 0x2e6   : > { %v3706_v45 = vadd.f32 %v10110_v32, %v3705_v28  ;;  %v4085_v28 = vsel %vm2566_vm8, %v4045_v30, %v4046_v6  ;;  %v4315_v14 = vsel %vm2073_vm6, %v4279_v26, %v4280_v46 }
 0x2e7   : > { %v2878_v53 = vpop.f32.mrf.mxu2  ;;  %v4117_v38 = vsel %vm4099_vm11, %v4085_v28, 0.0  ;;  %v4347_v59 = vsel %vm2073_vm6, %v4315_v14, 0.0 }
 0x2e8   : > { %v2879_v58 = vadd.f32 %v10362_v24, %v2878_v53  ;;  %v3742_v13 = vmax.f32 %v3706_v45, 0.0  ;;  %v1754_v53 = vld [vmem:[#allocation3 + $0x38] sm:$0xff]  ;;  %v4379_v40 = vadd.f32 %v4347_v59, %v4181_v52 }
 0x2e9   : > { %v3023_v43 = vpop.f32.mrf.mxu3 }
 0x2ea   : > { %v2924_v56 = vmax.f32 %v2879_v58, 0.0  ;;  %v3096_v62 = vadd.f32 %v3023_v43, %v1752_v15  ;;  %v3759_v22 = vpack.c.bf16 %v3742_v13, %v3741_v44  ;;  %v4473_v58 = vpack.c.bf16 %v4447_v33, %v4446_v37  ;;  %v1756_v33 = vld [vmem:[#allocation3 + $0x48] sm:$0xff] }
 0x2eb   : > { %v4416_v49 = vadd.f32 %v10288_v19, %v4379_v40 }
 0x2ec   : > { %v2944_v1 = vpack.c.bf16 %v2924_v56, %v2923_v39  ;;  %3128 = vst.msk [vmem:[#allocation3 + $0x28] sm:$0xff] %vm1682_vm7, %v3096_v62  ;;  %6689 = vmatmul.msk.bf16.gmra.mxu2 %vm278_vm1, %v4472_v0  ;;  %v10480_v56 = vpop.f32.mrf.mxu1 }
 0x2ed   : > { %6679 = vmatmul.msk.bf16.gmra.mxu1 %vm278_vm1, %v3759_v22  ;;  %v3708_v8 = vpop.f32.mrf.mxu0 }
 0x2ee   : > { %6639 = vmatmul.msk.bf16.gmra.mxu3 %vm278_vm1, %v2944_v1  ;;  %v3709_v50 = vadd.f32 %v10110_v32, %v3708_v8  ;;  %v10484_v1 = vld [vmem:[#allocation2 + $0xe0] sm:$0xff]  ;;  %v4249_v8 = vmul.f32 %v10252_v21, %v3984_v10 }
 0x2ef   : > { %v2881_v11 = vpop.f32.mrf.mxu2 }
 0x2f0   : > { %v2882_v42 = vadd.f32 %v10362_v24, %v2881_v11  ;;  %v3743_v16 = vmax.f32 %v3709_v50, 0.0  ;;  %v1755_v11 = vld [vmem:[#allocation3 + $0x40] sm:$0xff] }
 0x2f1   : > { %v3026_v41 = vpop.f32.mrf.mxu3 }
 0x2f2   : > { %v3097_v51 = vadd.f32 %v3026_v41, %v1753_v17  ;;  %v2925_v15 = vmax.f32 %v2882_v42, 0.0  ;;  %v4250_v17 = vmul.f32 %v10252_v21, %v10484_v1  ;;  %v4047_v41 = vrot.slane %v4015_v4, 1 }
 0x2f4   : > { %3129 = vst.msk [vmem:[#allocation3 + $0x30] sm:$0xff] %vm1682_vm7, %v3097_v51  ;;  %v4448_v51 = vmax.f32 %v4416_v49, 0.0  ;;  %v4282_v6 = vrot.slane %v4250_v17, 7  ;;  %v4083_v50 = vsel %vm2566_vm8, %v4047_v41, %v4048_v35  ;;  %v1758_v17 = vld [vmem:[#allocation3 + $0x58] sm:$0xff] }
 0x2f5   : > { %v3710_v57 = vpop.f32.mrf.mxu0 }
 0x2f6   : > { %v3711_v61 = vadd.f32 %v10110_v32, %v3710_v57  ;;  %v4182_v32 = vmul.f32 %v10268_v25, %v3982_v60  ;;  %v4281_v60 = vrot.slane %v4249_v8, 7  ;;  %v4183_v57 = vmul.f32 %v10268_v25, %v10450_v29 }
 0x2f7   : > { %v2883_v47 = vpop.f32.mrf.mxu2 }
 0x2f8   : > { %v2884_v48 = vadd.f32 %v10362_v24, %v2883_v47  ;;  %v3744_v0 = vmax.f32 %v3711_v61, 0.0  ;;  %v4214_v62 = vadd.f32 %v4182_v32, %v4117_v38  ;;  %v4313_v37 = vsel %vm2073_vm6, %v4281_v60, %v4282_v6 }
 0x2f9   : > { %v3028_v45 = vpop.f32.mrf.mxu3  ;;  %v4184_v47 = vmul.f32 %v10268_v25, %v3984_v10 }
 0x2fa   : > { %v2926_v43 = vmax.f32 %v2884_v48, 0.0  ;;  %v3098_v44 = vadd.f32 %v3028_v45, %v1754_v53  ;;  %v3760_v13 = vpack.c.bf16 %v3744_v0, %v3743_v16  ;;  %v4417_v20 = vadd.f32 %v10288_v19, %v4214_v62  ;;  %v10511_v0 = vld [vmem:[#allocation2 + $0xf0] sm:$0xff] }
 0x2fb   : > { %v4119_v53 = vsel %vm4099_vm11, %v4083_v50, 0.0  ;;  %v4349_v45 = vsel %vm2073_vm6, %v4313_v37, 0.0  ;;  %v4018_v62 = vmul.f32 %v10248_v34, %v10484_v1  ;;  %v6701_v37 = vld [vmem:[%s12287_s5 + $0xc] sm:$0xf] }
 0x2fc   : > { %v2945_v39 = vpack.c.bf16 %v2926_v43, %v2925_v15  ;;  %3130 = vst.msk [vmem:[#allocation3 + $0x38] sm:$0xff] %vm1682_vm7, %v3098_v44  ;;  %6690 = vmatmul.msk.bf16.gmra.mxu2 %vm278_vm1, %v4473_v58  ;;  %v4449_v30 = vmax.f32 %v4417_v20, 0.0  ;;  %v4216_v29 = vadd.f32 %v4184_v47, %v4119_v53  ;;  %v4381_v58 = vadd.f32 %v4349_v45, %v4183_v57  ;;  %v3986_v15 = vld [vmem:[#allocation2 + $0xe8] sm:$0xff]  ;;  %v1757_v44 = vld [vmem:[#allocation3 + $0x50] sm:$0xff]  ;;  %v1759_v53 = vld [vmem:[#allocation3 + $0x60] sm:$0xff] }
 0x2fd   : > { %6680 = vmatmul.msk.bf16.gmra.mxu1 %vm278_vm1, %v3760_v13  ;;  %v4017_v43 = vmul.f32 %v10248_v34, %v3984_v10  ;;  %v4252_v13 = vmul.f32 %v10252_v21, %v10511_v0  ;;  %v4251_v40 = vmul.f32 %v10252_v21, %v3986_v15  ;;  %v4762_v47 = vsel %vm1400_vm0, %v6701_v37, 0  ;;  %v1761_v37 = vld [vmem:[#allocation3 + $0x70] sm:$0xff] }
 0x2fe   : > { %6640 = vmatmul.msk.bf16.gmra.mxu3 %vm278_vm1, %v2945_v39  ;;  %v4474_v14 = vpack.c.bf16 %v4449_v30, %v4448_v51  ;;  %v4418_v59 = vadd.f32 %v10288_v19, %v4381_v58  ;;  %v4419_v39 = vadd.f32 %v10288_v19, %v4216_v29 }
 0x2ff   : > { %v2886_v22 = vpop.f32.mrf.mxu2  ;;  %v4284_v4 = vrot.slane %v4252_v13, 7  ;;  %4771 = vmatpush.bf16.msra.mxu3 %v4762_v47 }
 0x300   : > { %v2887_v18 = vadd.f32 %v10362_v24, %v2886_v22  ;;  %v4049_v22 = vrot.slane %v4017_v43, 1  ;;  %v4450_v36 = vmax.f32 %v4418_v59, 0.0  ;;  %v4451_v8 = vmax.f32 %v4419_v39, 0.0 }
 0x301   : > { %v3031_v31 = vpop.f32.mrf.mxu3 }
 0x302   : > { %v3099_v54 = vadd.f32 %v3031_v31, %v1755_v11  ;;  %v2927_v61 = vmax.f32 %v2887_v18, 0.0  ;;  %v4050_v11 = vrot.slane %v4018_v62, 1  ;;  %v4475_v30 = vpack.c.bf16 %v4451_v8, %v4450_v36 }
 0x304   : > { %3131 = vst.msk [vmem:[#allocation3 + $0x40] sm:$0xff] %vm1682_vm7, %v3099_v54  ;;  %v4283_v54 = vrot.slane %v4251_v40, 7  ;;  %v4081_v20 = vsel %vm2566_vm8, %v4049_v22, %v4050_v11 }
 0x305   : > { %v4121_v6 = vsel %vm4099_vm11, %v4081_v20, 0.0 }
 0x306   : > { %v4311_v35 = vsel %vm2073_vm6, %v4283_v54, %v4284_v4  ;;  %v1760_v4 = vld [vmem:[#allocation3 + $0x68] sm:$0xff] }
 0x307   : > { %v2888_v26 = vpop.f32.mrf.mxu2  ;;  %v4351_v50 = vsel %vm2073_vm6, %v4311_v35, 0.0 }
 0x308   : > { %v2889_v46 = vadd.f32 %v10362_v24, %v2888_v26 }
 0x309   : > { %v3033_v42 = vpop.f32.mrf.mxu3 }
 0x30a   : > { %v2928_v48 = vmax.f32 %v2889_v46, 0.0  ;;  %v3100_v28 = vadd.f32 %v3033_v42, %v1756_v33  ;;  %v4186_v46 = vmul.f32 %v10268_v25, %v3986_v15  ;;  %v10538_v33 = vld [vmem:[#allocation2 + $0x100] sm:$0xff]  ;;  %v4185_v42 = vmul.f32 %v10268_v25, %v10484_v1 }
 0x30c   : > { %v2946_v16 = vpack.c.bf16 %v2928_v48, %v2927_v61  ;;  %3132 = vst.msk [vmem:[#allocation3 + $0x48] sm:$0xff] %vm1682_vm7, %v3100_v28  ;;  %6691 = vmatmul.msk.bf16.gmra.mxu2 %vm278_vm1, %v4474_v14  ;;  %v4218_v57 = vadd.f32 %v4186_v46, %v4121_v6  ;;  %v3988_v48 = vld [vmem:[#allocation2 + $0xf8] sm:$0xff]  ;;  %v4383_v28 = vadd.f32 %v4351_v50, %v4185_v42  ;;  %v3990_v6 = vld [vmem:[#allocation2 + $0x108] sm:$0xff] }
 0x30d   : > { %v4254_v14 = vmul.f32 %v10252_v21, %v10538_v33  ;;  %v4253_v58 = vmul.f32 %v10252_v21, %v3988_v48 }
 0x30e   : > { %6641 = vmatmul.msk.bf16.gmra.mxu3 %vm278_vm1, %v2946_v16  ;;  %v4421_v29 = vadd.f32 %v10288_v19, %v4218_v57  ;;  %v4420_v1 = vadd.f32 %v10288_v19, %v4383_v28  ;;  %v4255_v28 = vmul.f32 %v10252_v21, %v3990_v6 }
 0x30f   : > { %v2891_v52 = vpop.f32.mrf.mxu2  ;;  %v4286_v43 = vrot.slane %v4254_v14, 7 }
 0x310   : > { %v2892_v10 = vadd.f32 %v10362_v24, %v2891_v52  ;;  %v4020_v52 = vmul.f32 %v10248_v34, %v10511_v0  ;;  %v4453_v13 = vmax.f32 %v4421_v29, 0.0  ;;  %v4452_v62 = vmax.f32 %v4420_v1, 0.0 }
 0x311   : > { %v3036_v32 = vpop.f32.mrf.mxu3  ;;  %v4021_v29 = vmul.f32 %v10248_v34, %v3988_v48 }
 0x312   : > { %v3101_v38 = vadd.f32 %v3036_v32, %v1757_v44  ;;  %v2929_v60 = vmax.f32 %v2892_v10, 0.0  ;;  %v4019_v44 = vmul.f32 %v10248_v34, %v3986_v15  ;;  %v4052_v40 = vrot.slane %v4020_v52, 1 }
 0x313   : > { %v4476_v54 = vpack.c.bf16 %v4453_v13, %v4452_v62  ;;  %v4187_v15 = vmul.f32 %v10268_v25, %v10511_v0  ;;  %v6721_v0 = vld [vmem:[%s12285_s3 + $0x10] sm:$0xf]  ;;  %v1762_v13 = vld [vmem:[#allocation3 + $0x78] sm:$0xff] }
 0x314   : > { %3133 = vst.msk [vmem:[#allocation3 + $0x50] sm:$0xff] %vm1682_vm7, %v3101_v38  ;;  %v4285_v38 = vrot.slane %v4253_v58, 7  ;;  %v4051_v36 = vrot.slane %v4019_v44, 1  ;;  %v6012_v35 = vsel %vm1400_vm0, %v6721_v0, 0  ;;  %v4287_v58 = vrot.slane %v4255_v28, 7 }
 0x315   : > { %6021 = vmatpush.bf16.msra.mxu0 %v6012_v35 }
 0x316   : > { %v4309_v22 = vsel %vm2073_vm6, %v4285_v38, %v4286_v43 }
 0x317   : > { %v2893_v31 = vpop.f32.mrf.mxu2 }
 0x318   : > { %v2894_v49 = vadd.f32 %v10362_v24, %v2893_v31 }
 0x319   : > { %v3038_v41 = vpop.f32.mrf.mxu3 }
 0x31a   : > { %v2930_v18 = vmax.f32 %v2894_v49, 0.0  ;;  %v3102_v51 = vadd.f32 %v3038_v41, %v1758_v17  ;;  %v4353_v49 = vsel %vm2073_vm6, %v4309_v22, 0.0  ;;  %v4079_v17 = vsel %vm2566_vm8, %v4051_v36, %v4052_v40 }
 0x31b   : > { %v4188_v41 = vmul.f32 %v10268_v25, %v3988_v48  ;;  %v4053_v40 = vrot.slane %v4021_v29, 1  ;;  %v4189_v22 = vmul.f32 %v10268_v25, %v10538_v33  ;;  %v4190_v36 = vmul.f32 %v10268_v25, %v3990_v6 }
 0x31c   : > { %v2947_v26 = vpack.c.bf16 %v2930_v18, %v2929_v60  ;;  %3134 = vst.msk [vmem:[#allocation3 + $0x58] sm:$0xff] %vm1682_vm7, %v3102_v51  ;;  %6692 = vmatmul.msk.bf16.gmra.mxu2 %vm278_vm1, %v4475_v30  ;;  %v10575_v60 = vld [vmem:[#allocation2 + $0x110] sm:$0xff]  ;;  %v4385_v18 = vadd.f32 %v4353_v49, %v4187_v15  ;;  %v4123_v30 = vsel %vm4099_vm11, %v4079_v17, 0.0  ;;  %v1763_v17 = vld [vmem:[#allocation3 + $0x80] sm:$0xff] }
 0x31d   : > { %v4220_v46 = vadd.f32 %v4188_v41, %v4123_v30  ;;  %v4256_v50 = vmul.f32 %v10252_v21, %v10575_v60 }
 0x31e   : > { %6642 = vmatmul.msk.bf16.gmra.mxu3 %vm278_vm1, %v2947_v26 }
 0x31f   : > { %v2896_v61 = vpop.f32.mrf.mxu2  ;;  %v4423_v14 = vadd.f32 %v10288_v19, %v4220_v46 }
 0x320   : > { %v2897_v32 = vadd.f32 %v10362_v24, %v2896_v61  ;;  %v4422_v61 = vadd.f32 %v10288_v19, %v4385_v18 }
 0x321   : > { %v3041_v45 = vpop.f32.mrf.mxu3  ;;  %v4455_v43 = vmax.f32 %v4423_v14, 0.0 }
 0x322   : > { %v3103_v16 = vadd.f32 %v3041_v45, %v1759_v53  ;;  %v2931_v8 = vmax.f32 %v2897_v32, 0.0  ;;  %v4022_v53 = vmul.f32 %v10248_v34, %v10538_v33  ;;  %v4288_v45 = vrot.slane %v4256_v50, 7 }
 0x324   : > { %3135 = vst.msk [vmem:[#allocation3 + $0x60] sm:$0xff] %vm1682_vm7, %v3103_v16  ;;  %v4454_v16 = vmax.f32 %v4422_v61, 0.0  ;;  %v4054_v44 = vrot.slane %v4022_v53, 1  ;;  %v4307_v32 = vsel %vm2073_vm6, %v4287_v58, %v4288_v45  ;;  %v1764_v53 = vld [vmem:[#allocation3 + $0x88] sm:$0xff] }
 0x325   : > { %v4355_v48 = vsel %vm2073_vm6, %v4307_v32, 0.0 }
 0x326   : > { %v4477_v62 = vpack.c.bf16 %v4455_v43, %v4454_v16  ;;  %v4387_v33 = vadd.f32 %v4355_v48, %v4189_v22  ;;  %v1765_v48 = vld [vmem:[#allocation3 + $0x90] sm:$0xff] }
 0x327   : > { %v2898_v59 = vpop.f32.mrf.mxu2 }
 0x328   : > { %v2899_v39 = vadd.f32 %v10362_v24, %v2898_v59  ;;  %v10566_v24 = vld [vmem:[%s12286_s4 + $0x3] ss:$0 sm:$0xff]  ;;  %v4424_v18 = vadd.f32 %v10288_v19, %v4387_v33 }
 0x329   : > { %v3043_v10 = vpop.f32.mrf.mxu3 }
 0x32a   : > { %v2932_v11 = vmax.f32 %v2899_v39, 0.0  ;;  %v3104_v31 = vadd.f32 %v3043_v10, %v1760_v4  ;;  %v4077_v10 = vsel %vm2566_vm8, %v4053_v40, %v4054_v44  ;;  %v4456_v50 = vmax.f32 %v4424_v18, 0.0 }
 0x32c   : > { %v2948_v20 = vpack.c.bf16 %v2932_v11, %v2931_v8  ;;  %3136 = vst.msk [vmem:[#allocation3 + $0x68] sm:$0xff] %vm1682_vm7, %v3104_v31  ;;  %6693 = vmatmul.msk.bf16.gmra.mxu2 %vm278_vm1, %v4476_v54  ;;  %v10604_v8 = vld [vmem:[#allocation2 + $0x120] sm:$0xff]  ;;  %v4125_v31 = vsel %vm4099_vm11, %v4077_v10, 0.0  ;;  %v3992_v54 = vld [vmem:[#allocation2 + $0x118] sm:$0xff] }
 0x32d   : > { %v4222_v49 = vadd.f32 %v4190_v36, %v4125_v31  ;;  %v4192_v32 = vmul.f32 %v10268_v25, %v3992_v54  ;;  %v4026_v31 = vmul.f32 %v10248_v34, %v10604_v8 }
 0x32e   : > { %6643 = vmatmul.msk.bf16.gmra.mxu3 %vm278_vm1, %v2948_v20  ;;  %v4258_v20 = vmul.f32 %v10252_v21, %v10604_v8 }
 0x32f   : > { %v4551_v51 = vpop.f32.mrf.mxu2  ;;  %v4425_v30 = vadd.f32 %v10288_v19, %v4222_v49 }
 0x330   : > { %v4552_v26 = vadd.f32 %v10566_v24, %v4551_v51  ;;  %v4257_v51 = vmul.f32 %v10252_v21, %v3992_v54  ;;  %v4290_v46 = vrot.slane %v4258_v20, 7  ;;  %v4025_v20 = vmul.f32 %v10248_v34, %v3992_v54 }
 0x331   : > { %v3046_v42 = vpop.f32.mrf.mxu3  ;;  %v4457_v61 = vmax.f32 %v4425_v30, 0.0 }
 0x332   : > { %v4631_v57 = vmax.f32 %v4552_v26, 0.0  ;;  %v3105_v47 = vadd.f32 %v3046_v42, %v1761_v37  ;;  %v4024_v26 = vmul.f32 %v10248_v34, %v10575_v60  ;;  %v4023_v37 = vmul.f32 %v10248_v34, %v3990_v6 }
 0x333   : > { %v4289_v42 = vrot.slane %v4257_v51, 7  ;;  %v4478_v58 = vpack.c.bf16 %v4457_v61, %v4456_v50  ;;  %v4057_v50 = vrot.slane %v4025_v20, 1  ;;  %v4193_v61 = vmul.f32 %v10268_v25, %v10604_v8 }
 0x334   : > { %4917 = vst.msk [vmem:[#allocation2 + $0x60] sm:$0xff] %vm278_vm1, %v4631_v57  ;;  %v4056_v28 = vrot.slane %v4024_v26, 1  ;;  %v1766_v26 = vld [vmem:[#allocation3 + $0x98] sm:$0xff] }
 0x335   : > { %3137 = vst.msk [vmem:[#allocation3 + $0x70] sm:$0xff] %vm1682_vm7, %v3105_v47  ;;  %v4305_v14 = vsel %vm2073_vm6, %v4289_v42, %v4290_v46 }
 0x336   : > { %v4357_v6 = vsel %vm2073_vm6, %v4305_v14, 0.0  ;;  %v10662_v14 = vld [vmem:[#allocation2 + $0x140] sm:$0xff] }
 0x337   : > { %v4553_v1 = vpop.f32.mrf.mxu2  ;;  %v4262_v8 = vmul.f32 %v10252_v21, %v10662_v14 }
 0x338   : > { %v4554_v52 = vadd.f32 %v10566_v24, %v4553_v1  ;;  %v4055_v1 = vrot.slane %v4023_v37, 1 }
 0x339   : > { %v3048_v38 = vpop.f32.mrf.mxu3 }
 0x33a   : > { %v4632_v59 = vmax.f32 %v4554_v52, 0.0  ;;  %v3106_v39 = vadd.f32 %v3048_v38, %v1762_v13  ;;  %v4191_v52 = vmul.f32 %v10268_v25, %v10575_v60  ;;  %v4075_v44 = vsel %vm2566_vm8, %v4055_v1, %v4056_v28  ;;  %v10633_v13 = vld [vmem:[#allocation2 + $0x130] sm:$0xff] }
 0x33b   : > { %v4260_v22 = vmul.f32 %v10252_v21, %v10633_v13 }
 0x33c   : > { %v4695_v4 = vpack.c.bf16 %v4632_v59, %v4631_v57  ;;  %4918 = vst.msk [vmem:[#allocation2 + $0x68] sm:$0xff] %vm278_vm1, %v4632_v59  ;;  %6694 = vmatmul.msk.bf16.gmra.mxu2 %vm278_vm1, %v4477_v62  ;;  %v4389_v60 = vadd.f32 %v4357_v6, %v4191_v52  ;;  %v4127_v59 = vsel %vm4099_vm11, %v4075_v44, 0.0  ;;  %v1767_v52 = vld [vmem:[#allocation3 + $0xa0] sm:$0xff] }
 0x33d   : > { %3138 = vst.msk [vmem:[#allocation3 + $0x78] sm:$0xff] %vm1682_vm7, %v3106_v39  ;;  %v3994_v39 = vld [vmem:[#allocation2 + $0x128] sm:$0xff]  ;;  %v4224_v40 = vadd.f32 %v4192_v32, %v4127_v59  ;;  %v4292_v49 = vrot.slane %v4260_v22, 7  ;;  %v10673_v32 = vld [vmem:[%s12284_s2 + $0x3] ss:$0 sm:$0xff] }
 0x33e   : > { %6702 = vmatmul.msk.bf16.vlgmr.msra.gmra.mxu3 %vm278_vm1, %v4695_v4  ;;  %v4426_v33 = vadd.f32 %v10288_v19, %v4389_v60  ;;  %v4194_v28 = vmul.f32 %v10268_v25, %v3994_v39 }
 0x33f   : > { %v4556_v11 = vpop.f32.mrf.mxu2 }
 0x340   : > { %v4557_v15 = vadd.f32 %v10566_v24, %v4556_v11  ;;  %v4259_v11 = vmul.f32 %v10252_v21, %v3994_v39 }
 0x341   : > { %v3051_v41 = vpop.f32.mrf.mxu3 }
 0x342   : > { %v4633_v0 = vmax.f32 %v4557_v15, 0.0  ;;  %v3107_v35 = vadd.f32 %v3051_v41, %v1763_v17  ;;  %v4427_v15 = vadd.f32 %v10288_v19, %v4224_v40  ;;  %v4458_v17 = vmax.f32 %v4426_v33, 0.0 }
 0x343   : > { %v4291_v41 = vrot.slane %v4259_v11, 7  ;;  %v4294_v40 = vrot.slane %v4262_v8, 7 }
 0x344   : > { %4919 = vst.msk [vmem:[#allocation2 + $0x70] sm:$0xff] %vm278_vm1, %v4633_v0  ;;  %v4459_v51 = vmax.f32 %v4427_v15, 0.0  ;;  %v1768_v15 = vld [vmem:[#allocation3 + $0xa8] sm:$0xff] }
 0x345   : > { %3139 = vst.msk [vmem:[#allocation3 + $0x80] sm:$0xff] %vm1682_vm7, %v3107_v35  ;;  %v4058_v35 = vrot.slane %v4026_v31, 1  ;;  %v4303_v30 = vsel %vm2073_vm6, %v4291_v41, %v4292_v49 }
 0x346   : > { %v4479_v42 = vpack.c.bf16 %v4459_v51, %v4458_v17  ;;  %v4359_v54 = vsel %vm2073_vm6, %v4303_v30, 0.0 }
 0x347   : > { %v4558_v57 = vpop.f32.mrf.mxu2 }
 0x348   : > { %v4559_v47 = vadd.f32 %v10566_v24, %v4558_v57  ;;  %v4073_v57 = vsel %vm2566_vm8, %v4057_v50, %v4058_v35  ;;  %v4195_v35 = vmul.f32 %v10268_v25, %v10633_v13 }
 0x349   : > { %v3053_v45 = vpop.f32.mrf.mxu3 }
 0x34a   : > { %v4634_v16 = vmax.f32 %v4559_v47, 0.0  ;;  %v3108_v29 = vadd.f32 %v3053_v45, %v1764_v53  ;;  %v4391_v53 = vadd.f32 %v4359_v54, %v4193_v61  ;;  %v1769_v54 = vld [vmem:[#allocation3 + $0xb0] sm:$0xff] }
 0x34c   : > { %v4696_v43 = vpack.c.bf16 %v4634_v16, %v4633_v0  ;;  %4920 = vst.msk [vmem:[#allocation2 + $0x78] sm:$0xff] %vm278_vm1, %v4634_v16  ;;  %6695 = vmatmul.msk.bf16.gmra.mxu2 %vm278_vm1, %v4478_v58  ;;  %v4129_v16 = vsel %vm4099_vm11, %v4073_v57, 0.0  ;;  %v4428_v60 = vadd.f32 %v10673_v32, %v4391_v53 }
 0x34d   : > { %3140 = vst.msk [vmem:[#allocation3 + $0x88] sm:$0xff] %vm1682_vm7, %v3108_v29  ;;  %v3996_v29 = vld [vmem:[#allocation2 + $0x138] sm:$0xff]  ;;  %v4226_v1 = vadd.f32 %v4194_v28, %v4129_v16 }
 0x34e   : > { %6703 = vmatmul.msk.bf16.gmra.mxu3 %vm278_vm1, %v4696_v43  ;;  %v4460_v22 = vmax.f32 %v4428_v60, 0.0  ;;  %v4196_v30 = vmul.f32 %v10268_v25, %v3996_v29 }
 0x34f   : > { %v4561_v38 = vpop.f32.mrf.mxu2  ;;  %v4429_v59 = vadd.f32 %v10673_v32, %v4226_v1 }
 0x350   : > { %v4562_v62 = vadd.f32 %v10566_v24, %v4561_v38  ;;  %v4261_v38 = vmul.f32 %v10252_v21, %v3996_v29 }
 0x351   : > { %v3056_v4 = vpop.f32.mrf.mxu3  ;;  %v4461_v33 = vmax.f32 %v4429_v59, 0.0 }
 0x352   : > { %v4635_v10 = vmax.f32 %v4562_v62, 0.0  ;;  %v3109_v36 = vadd.f32 %v3056_v4, %v1765_v48  ;;  %v4028_v62 = vmul.f32 %v10248_v34, %v10633_v13  ;;  %v4027_v48 = vmul.f32 %v10248_v34, %v3994_v39 }
 0x353   : > { %v4293_v4 = vrot.slane %v4261_v38, 7  ;;  %v4480_v41 = vpack.c.bf16 %v4461_v33, %v4460_v22 }
 0x354   : > { %4921 = vst.msk [vmem:[#allocation2 + $0x80] sm:$0xff] %vm278_vm1, %v4635_v10  ;;  %v4060_v11 = vrot.slane %v4028_v62, 1  ;;  %v1770_v62 = vld [vmem:[#allocation3 + $0xb8] sm:$0xff] }
 0x355   : > { %3141 = vst.msk [vmem:[#allocation3 + $0x90] sm:$0xff] %vm1682_vm7, %v3109_v36  ;;  %v4301_v31 = vsel %vm2073_vm6, %v4293_v4, %v4294_v40 }
 0x356   : > { %v4361_v39 = vsel %vm2073_vm6, %v4301_v31, 0.0 }
 0x357   : > { %v4563_v0 = vpop.f32.mrf.mxu2  ;;  %v4393_v13 = vadd.f32 %v4361_v39, %v4195_v35  ;;  %v1771_v35 = vld [vmem:[#allocation3 + $0xc0] sm:$0xff] }
 0x358   : > { %v4564_v18 = vadd.f32 %v10566_v24, %v4563_v0  ;;  %v4059_v0 = vrot.slane %v4027_v48, 1 }
 0x359   : > { %v3058_v46 = vpop.f32.mrf.mxu3  ;;  %v4430_v53 = vadd.f32 %v10673_v32, %v4393_v13  ;;  %v4234_v13 = vmul.f32 %v10252_v21, %v10246_v3 }
 0x35a   : > { %v4636_v37 = vmax.f32 %v4564_v18, 0.0  ;;  %v3110_v19 = vadd.f32 %v3058_v46, %v1766_v26  ;;  %v4071_v51 = vsel %vm2566_vm8, %v4059_v0, %v4060_v11  ;;  %v10696_v26 = vld [vmem:[#allocation2 + $0x150] sm:$0xff] }
 0x35b   : > { %v4131_v50 = vsel %vm4099_vm11, %v4071_v51, 0.0  ;;  %v4264_v57 = vmul.f32 %v10252_v21, %v10696_v26  ;;  %v4462_v8 = vmax.f32 %v4430_v53, 0.0 }
 0x35c   : > { %v4697_v47 = vpack.c.bf16 %v4636_v37, %v4635_v10  ;;  %4922 = vst.msk [vmem:[#allocation2 + $0x88] sm:$0xff] %vm278_vm1, %v4636_v37  ;;  %6696 = vmatmul.msk.bf16.gmra.mxu2 %vm278_vm1, %v4479_v42  ;;  %v3998_v37 = vld [vmem:[#allocation2 + $0x148] sm:$0xff]  ;;  %v4228_v42 = vadd.f32 %v4196_v30, %v4131_v50  ;;  %v4032_v50 = vmul.f32 %v10248_v34, %v10696_v26 }
 0x35d   : > { %3142 = vst.msk [vmem:[#allocation3 + $0x98] sm:$0xff] %vm1682_vm7, %v3110_v19  ;;  %v4296_v1 = vrot.slane %v4264_v57, 7  ;;  %v4198_v31 = vmul.f32 %v10268_v25, %v3998_v37  ;;  %v4031_v57 = vmul.f32 %v10248_v34, %v3998_v37 }
 0x35e   : > { %6704 = vmatmul.msk.bf16.gmra.mxu3 %vm278_vm1, %v4697_v47  ;;  %v4431_v16 = vadd.f32 %v10673_v32, %v4228_v42  ;;  %v4064_v53 = vrot.slane %v4032_v50, 1 }
 0x35f   : > { %v4566_v45 = vpop.f32.mrf.mxu2 }
 0x360   : > { %v4567_v58 = vadd.f32 %v10566_v24, %v4566_v45  ;;  %v4263_v45 = vmul.f32 %v10252_v21, %v3998_v37  ;;  %v4463_v60 = vmax.f32 %v4431_v16, 0.0 }
 0x361   : > { %v3061_v6 = vpop.f32.mrf.mxu3 }
 0x362   : > { %v4637_v43 = vmax.f32 %v4567_v58, 0.0  ;;  %v3111_v44 = vadd.f32 %v3061_v6, %v1767_v52  ;;  %v4030_v58 = vmul.f32 %v10248_v34, %v10662_v14  ;;  %v4029_v52 = vmul.f32 %v10248_v34, %v3996_v29 }
 0x363   : > { %v4295_v6 = vrot.slane %v4263_v45, 7  ;;  %v4481_v4 = vpack.c.bf16 %v4463_v60, %v4462_v8  ;;  %v4063_v8 = vrot.slane %v4031_v57, 1 }
 0x364   : > { %4923 = vst.msk [vmem:[#allocation2 + $0x90] sm:$0xff] %vm278_vm1, %v4637_v43  ;;  %v4062_v38 = vrot.slane %v4030_v58, 1 }
 0x365   : > { %3143 = vst.msk [vmem:[#allocation3 + $0xa0] sm:$0xff] %vm1682_vm7, %v3111_v44  ;;  %v4299_v59 = vsel %vm2073_vm6, %v4295_v6, %v4296_v1  ;;  %v4067_v6 = vsel %vm2566_vm8, %v4063_v8, %v4064_v53  ;;  %v1777_v53 = vld [vmem:[#allocation3 + $0xf0] sm:$0xff] }
 0x366   : > { %v4363_v29 = vsel %vm2073_vm6, %v4299_v59, 0.0 }
 0x367   : > { %v4568_v10 = vpop.f32.mrf.mxu2 }
 0x368   : > { %v4569_v36 = vadd.f32 %v10566_v24, %v4568_v10  ;;  %v4061_v10 = vrot.slane %v4029_v52, 1  ;;  %v4199_v52 = vmul.f32 %v10268_v25, %v10696_v26  ;;  %v4135_v26 = vsel %vm4099_vm11, %v4067_v6, 0.0 }
 0x369   : > { %v3063_v49 = vpop.f32.mrf.mxu3 }
 0x36a   : > { %v4638_v20 = vmax.f32 %v4569_v36, 0.0  ;;  %v3112_v17 = vadd.f32 %v3063_v49, %v1768_v15  ;;  %v4197_v36 = vmul.f32 %v10268_v25, %v10662_v14  ;;  %v4069_v11 = vsel %vm2566_vm8, %v4061_v10, %v4062_v38 }
 0x36b   : > { %v4133_v14 = vsel %vm4099_vm11, %v4069_v11, 0.0  ;;  %v1774_v11 = vld [vmem:[#allocation3 + $0xd8] sm:$0xff] }
 0x36c   : > { %v4698_v18 = vpack.c.bf16 %v4638_v20, %v4637_v43  ;;  %4924 = vst.msk [vmem:[#allocation2 + $0x98] sm:$0xff] %vm278_vm1, %v4638_v20  ;;  %6697 = vmatmul.msk.bf16.gmra.mxu2 %vm278_vm1, %v4480_v41  ;;  %v4395_v15 = vadd.f32 %v4363_v29, %v4197_v36  ;;  %v6846_v41 = vld [vmem:[#allocation2 + $0x158] sm:$0xff] }
 0x36d   : > { %3144 = vst.msk [vmem:[#allocation3 + $0xa8] sm:$0xff] %vm1682_vm7, %v3112_v17  ;;  %v4230_v17 = vadd.f32 %v4198_v31, %v4133_v14  ;;  %v4265_v0 = vmul.f32 %v6846_v41, %v10252_v21  ;;  %v1772_v21 = vld [vmem:[#allocation3 + $0xc8] sm:$0xff] }
 0x36e   : > { %6705 = vmatmul.msk.bf16.gmra.mxu3 %vm278_vm1, %v4698_v18  ;;  %v4432_v30 = vadd.f32 %v10673_v32, %v4395_v15 }
 0x36f   : > { %v4571_v46 = vpop.f32.mrf.mxu2 }
 0x370   : > { %v4572_v19 = vadd.f32 %v10566_v24, %v4571_v46  ;;  %v4433_v46 = vadd.f32 %v10673_v32, %v4230_v17  ;;  %v4464_v42 = vmax.f32 %v4432_v30, 0.0 }
 0x371   : > { %v3066_v47 = vpop.f32.mrf.mxu3 }
 0x372   : > { %v4639_v61 = vmax.f32 %v4572_v19, 0.0  ;;  %v3113_v28 = vadd.f32 %v3066_v47, %v1769_v54  ;;  %v4297_v19 = vrot.slane %v4265_v0, 7  ;;  %v4266_v54 = vrot.slane %v4234_v13, 7 }
 0x374   : > { %4925 = vst.msk [vmem:[#allocation2 + $0xa0] sm:$0xff] %vm278_vm1, %v4639_v61  ;;  %v4329_v3 = vsel %vm2073_vm6, %v4297_v19, %v4266_v54  ;;  %v3156_v54 = vld [vmem:[#allocation3 + $0x8] sm:$0xff] }
 0x375   : > { %3145 = vst.msk [vmem:[#allocation3 + $0xb0] sm:$0xff] %vm1682_vm7, %v3113_v28  ;;  %v4465_v28 = vmax.f32 %v4433_v46, 0.0  ;;  %v4365_v34 = vsel %vm2073_vm6, %v4329_v3, 0.0  ;;  %v1776_v46 = vld [vmem:[#allocation3 + $0xe8] sm:$0xff] }
 0x377   : > { %v4573_v43 = vpop.f32.mrf.mxu2  ;;  %v4482_v1 = vpack.c.bf16 %v4465_v28, %v4464_v42  ;;  %v10777_v28 = vpop.f32.mrf.mxu1 }
 0x378   : > { %v4574_v44 = vadd.f32 %v10566_v24, %v4573_v43  ;;  %v4200_v43 = vmul.f32 %v6846_v41, %v10268_v25  ;;  %v1775_v41 = vld [vmem:[#allocation3 + $0xe0] sm:$0xff] }
 0x379   : > { %v3068_v40 = vpop.f32.mrf.mxu3 }
 0x37a   : > { %v4640_v22 = vmax.f32 %v4574_v44, 0.0  ;;  %v3114_v48 = vadd.f32 %v3068_v40, %v1770_v62  ;;  %v4397_v44 = vadd.f32 %v4365_v34, %v4199_v52  ;;  %v4232_v59 = vadd.f32 %v4200_v43, %v4135_v26  ;;  %v1773_v62 = vld [vmem:[#allocation3 + $0xd0] sm:$0xff]  ;;  %v1778_v34 = vld [vmem:[#allocation3 + $0xf8] sm:$0xff] }
 0x37c   : > { %v4699_v33 = vpack.c.bf16 %v4640_v22, %v4639_v61  ;;  %4926 = vst.msk [vmem:[#allocation2 + $0xa8] sm:$0xff] %vm278_vm1, %v4640_v22  ;;  %6698 = vmatmul.msk.bf16.gmra.mxu2 %vm278_vm1, %v4481_v4  ;;  %v4434_v4 = vadd.f32 %v10673_v32, %v4397_v44  ;;  %v4435_v25 = vadd.f32 %v10673_v32, %v4232_v59 }
 0x37d   : > { %3146 = vst.msk [vmem:[#allocation3 + $0xb8] sm:$0xff] %vm1682_vm7, %v3114_v48 }
 0x37e   : > { %6706 = vmatmul.msk.bf16.gmra.mxu3 %vm278_vm1, %v4699_v33  ;;  %v4466_v10 = vmax.f32 %v4434_v4, 0.0  ;;  %v4467_v33 = vmax.f32 %v4435_v25, 0.0  ;;  %v3159_v4 = vld [vmem:[#allocation3 + $0x20] sm:$0xff] }
 0x37f   : > { %v4576_v49 = vpop.f32.mrf.mxu2  ;;  %v10788_v44 = vpop.f32.mrf.mxu1 }
 0x380   : > { %v4577_v20 = vadd.f32 %v10566_v24, %v4576_v49  ;;  %v4483_v14 = vpack.c.bf16 %v4467_v33, %v4466_v10 }
 0x381   : > { %v3071_v39 = vpop.f32.mrf.mxu3 }
 0x382   : > { %v4641_v18 = vmax.f32 %v4577_v20, 0.0  ;;  %v3115_v51 = vadd.f32 %v3071_v39, %v1771_v35 }
 0x384   : > { %4927 = vst.msk [vmem:[#allocation2 + $0xb0] sm:$0xff] %vm278_vm1, %v4641_v18 }
 0x385   : > { %3147 = vst.msk [vmem:[#allocation3 + $0xc0] sm:$0xff] %vm1682_vm7, %v3115_v51 }
 0x387   : > { %v4578_v47 = vpop.f32.mrf.mxu2  ;;  %v10797_v25 = vpop.f32.mrf.mxu1 }
 0x388   : > { %v4579_v61 = vadd.f32 %v10566_v24, %v4578_v47  ;;  %v3904_v47 = vadd.f32 %v10353_v55, %v3156_v54 }
 0x389   : > { %v3073_v45 = vpop.f32.mrf.mxu3 }
 0x38a   : > { %v4642_v16 = vmax.f32 %v4579_v61, 0.0  ;;  %v3116_v58 = vadd.f32 %v3073_v45, %v1772_v21  ;;  %3936 = vst.msk [vmem:[#allocation3 + $0x8] sm:$0xff] %vm1682_vm7, %v3904_v47 }
 0x38c   : > { %v4700_v37 = vpack.c.bf16 %v4642_v16, %v4641_v18  ;;  %4928 = vst.msk [vmem:[#allocation2 + $0xb8] sm:$0xff] %vm278_vm1, %v4642_v16  ;;  %6699 = vmatmul.msk.bf16.gmra.mxu2 %vm278_vm1, %v4482_v1  ;;  %v3155_v18 = vld [vmem:[#allocation3] sm:$0xff]  ;;  %v3157_v16 = vld [vmem:[#allocation3 + $0x10] sm:$0xff] }
 0x38d   : > { %3148 = vst.msk [vmem:[#allocation3 + $0xc8] sm:$0xff] %vm1682_vm7, %v3116_v58  ;;  %v3903_v51 = vadd.f32 %v10327_v63, %v3155_v18  ;;  %v3905_v55 = vadd.f32 %v10376_v5, %v3157_v16  ;;  %v6739_v58 = vld [vmem:[%s12287_s5 + $0x10] sm:$0xf]  ;;  %v3158_v5 = vld [vmem:[#allocation3 + $0x18] sm:$0xff] }
 0x38e   : > { %6707 = vmatmul.msk.bf16.gmra.mxu3 %vm278_vm1, %v4700_v37  ;;  %v6202_v1 = vsel %vm1400_vm0, %v6739_v58, 0  ;;  %v3906_v26 = vadd.f32 %v10395_v7, %v3158_v5  ;;  %v3907_v7 = vadd.f32 %v10421_v27, %v3159_v4 }
 0x38f   : > { %v4581_v60 = vpop.f32.mrf.mxu2  ;;  %3935 = vst.msk [vmem:[#allocation3] sm:$0xff] %vm1682_vm7, %v3903_v51  ;;  %6211 = vmatpush.bf16.msra.mxu1 %v6202_v1  ;;  %v10807_v27 = vpop.f32.mrf.mxu1 }
 0x390   : > { %v4582_v38 = vadd.f32 %v10566_v24, %v4581_v60  ;;  %3937 = vst.msk [vmem:[#allocation3 + $0x10] sm:$0xff] %vm1682_vm7, %v3905_v55 }
 0x391   : > { %v3076_v40 = vpop.f32.mrf.mxu3  ;;  %3938 = vst.msk [vmem:[#allocation3 + $0x18] sm:$0xff] %vm1682_vm7, %v3906_v26 }
 0x392   : > { %v4643_v22 = vmax.f32 %v4582_v38, 0.0  ;;  %v3117_v48 = vadd.f32 %v3076_v40, %v1773_v62  ;;  %3939 = vst.msk [vmem:[#allocation3 + $0x20] sm:$0xff] %vm1682_vm7, %v3907_v7 }
 0x394   : > { %4929 = vst.msk [vmem:[#allocation2 + $0xc0] sm:$0xff] %vm278_vm1, %v4643_v22 }
 0x395   : > { %3149 = vst.msk [vmem:[#allocation3 + $0xd0] sm:$0xff] %vm1682_vm7, %v3117_v48 }
 0x396   : > { %v4663_v62 = vld [vmem:[#allocation3] sm:$0xff] }
 0x397   : > { %v4583_v36 = vpop.f32.mrf.mxu2 }
 0x398   : > { %v4584_v29 = vadd.f32 %v10566_v24, %v4583_v36 }
 0x399   : > { %v3078_v31 = vpop.f32.mrf.mxu3 }
 0x39a   : > { %v4644_v15 = vmax.f32 %v4584_v29, 0.0  ;;  %v3118_v49 = vadd.f32 %v3078_v31, %v1774_v11  ;;  %v4664_v29 = vld [vmem:[#allocation3 + $0x8] sm:$0xff] }
 0x39c   : > { %v4701_v20 = vpack.c.bf16 %v4644_v15, %v4643_v22  ;;  %4930 = vst.msk [vmem:[#allocation2 + $0xc8] sm:$0xff] %vm278_vm1, %v4644_v15  ;;  %6700 = vmatmul.msk.bf16.gmra.mxu2 %vm278_vm1, %v4483_v14 }
 0x39d   : > { %3150 = vst.msk [vmem:[#allocation3 + $0xd8] sm:$0xff] %vm1682_vm7, %v3118_v49  ;;  %v3160_v49 = vld [vmem:[#allocation3 + $0x28] sm:$0xff] }
 0x39e   : > { %6708 = vmatmul.msk.bf16.gmra.mxu3 %vm278_vm1, %v4701_v20  ;;  %v3908_v14 = vadd.f32 %v10439_v12, %v3160_v49 }
 0x39f   : > { %v4586_v32 = vpop.f32.mrf.mxu2 }
 0x3a0   : > { %v4587_v17 = vadd.f32 %v10566_v24, %v4586_v32  ;;  %3940 = vst.msk [vmem:[#allocation3 + $0x28] sm:$0xff] %vm1682_vm7, %v3908_v14 }
 0x3a1   : > { %v3081_v0 = vpop.f32.mrf.mxu3 }
 0x3a2   : > { %v4645_v35 = vmax.f32 %v4587_v17, 0.0  ;;  %v3119_v39 = vadd.f32 %v3081_v0, %v1775_v41  ;;  %v4665_v17 = vld [vmem:[#allocation3 + $0x10] sm:$0xff] }
 0x3a4   : > { %4931 = vst.msk [vmem:[#allocation2 + $0xd0] sm:$0xff] %vm278_vm1, %v4645_v35 }
 0x3a5   : > { %3151 = vst.msk [vmem:[#allocation3 + $0xe0] sm:$0xff] %vm1682_vm7, %v3119_v39  ;;  %v3161_v39 = vld [vmem:[#allocation3 + $0x30] sm:$0xff] }
 0x3a6   : > { %v3909_v12 = vadd.f32 %v10460_v2, %v3161_v39 }
 0x3a7   : > { %v4588_v30 = vpop.f32.mrf.mxu2  ;;  %v4668_v58 = vld [vmem:[#allocation3 + $0x28] sm:$0xff] }
 0x3a8   : > { %v4589_v13 = vadd.f32 %v10566_v24, %v4588_v30  ;;  %3941 = vst.msk [vmem:[#allocation3 + $0x30] sm:$0xff] %vm1682_vm7, %v3909_v12  ;;  %v10816_v30 = vpop.f32.mrf.mxu1 }
 0x3a9   : > { %v3083_v50 = vpop.f32.mrf.mxu3 }
 0x3aa   : > { %v4646_v19 = vmax.f32 %v4589_v13, 0.0  ;;  %v3120_v42 = vadd.f32 %v3083_v50, %v1776_v46  ;;  %v4666_v13 = vld [vmem:[#allocation3 + $0x18] sm:$0xff] }
 0x3ac   : > { %v4702_v57 = vpack.c.bf16 %v4646_v19, %v4645_v35  ;;  %4932 = vst.msk [vmem:[#allocation2 + $0xd8] sm:$0xff] %vm278_vm1, %v4646_v19 }
 0x3ad   : > { %3152 = vst.msk [vmem:[#allocation3 + $0xe8] sm:$0xff] %vm1682_vm7, %v3120_v42 }
 0x3ae   : > { %6709 = vmatmul.msk.bf16.gmra.mxu3 %vm278_vm1, %v4702_v57  ;;  %v3162_v57 = vld [vmem:[#allocation3 + $0x38] sm:$0xff] }
 0x3af   : > { %v4591_v63 = vpop.f32.mrf.mxu2  ;;  %v3910_v54 = vadd.f32 %v10480_v56, %v3162_v57  ;;  %v4669_v5 = vld [vmem:[#allocation3 + $0x30] sm:$0xff] }
 0x3b0   : > { %v4592_v61 = vadd.f32 %v10566_v24, %v4591_v63  ;;  %v4667_v63 = vld [vmem:[#allocation3 + $0x20] sm:$0xff] }
 0x3b1   : > { %v3086_v3 = vpop.f32.mrf.mxu3  ;;  %3942 = vst.msk [vmem:[#allocation3 + $0x38] sm:$0xff] %vm1682_vm7, %v3910_v54 }
 0x3b2   : > { %v4647_v21 = vmax.f32 %v4592_v61, 0.0  ;;  %v3121_v45 = vadd.f32 %v3086_v3, %v1777_v53 }
 0x3b4   : > { %4933 = vst.msk [vmem:[#allocation2 + $0xe0] sm:$0xff] %vm278_vm1, %v4647_v21 }
 0x3b5   : > { %3153 = vst.msk [vmem:[#allocation3 + $0xf0] sm:$0xff] %vm1682_vm7, %v3121_v45  ;;  %v3163_v45 = vld [vmem:[#allocation3 + $0x40] sm:$0xff] }
 0x3b6   : > { %v3911_v56 = vadd.f32 %v10777_v28, %v3163_v45 }
 0x3b7   : > { %v4593_v8 = vpop.f32.mrf.mxu2 }
 0x3b8   : > { %v4594_v52 = vadd.f32 %v10566_v24, %v4593_v8  ;;  %3943 = vst.msk [vmem:[#allocation3 + $0x40] sm:$0xff] %vm1682_vm7, %v3911_v56  ;;  %v4670_v4 = vld [vmem:[#allocation3 + $0x38] sm:$0xff] }
 0x3b9   : > { %v3088_v37 = vpop.f32.mrf.mxu3 }
 0x3ba   : > { %v4648_v6 = vmax.f32 %v4594_v52, 0.0  ;;  %v3122_v43 = vadd.f32 %v3088_v37, %v1778_v34  ;;  %v3164_v37 = vld [vmem:[#allocation3 + $0x48] sm:$0xff] }
 0x3bc   : > { %v4703_v60 = vpack.c.bf16 %v4648_v6, %v4647_v21  ;;  %4934 = vst.msk [vmem:[#allocation2 + $0xe8] sm:$0xff] %vm278_vm1, %v4648_v6  ;;  %v10824_v21 = vpop.f32.mrf.mxu1 }
 0x3bd   : > { %3154 = vst.msk [vmem:[#allocation3 + $0xf8] sm:$0xff] %vm1682_vm7, %v3122_v43  ;;  %v3912_v43 = vadd.f32 %v10788_v44, %v3164_v37 }
 0x3be   : > { %6710 = vmatmul.msk.bf16.gmra.mxu3 %vm278_vm1, %v4703_v60 }
 0x3bf   : > { %v4596_v38 = vpop.f32.mrf.mxu2  ;;  %3944 = vst.msk [vmem:[#allocation3 + $0x48] sm:$0xff] %vm1682_vm7, %v3912_v43  ;;  %v4671_v49 = vld [vmem:[#allocation3 + $0x40] sm:$0xff] }
 0x3c0   : > { %v4597_v59 = vadd.f32 %v10566_v24, %v4596_v38 }
 0x3c1   : > { %v4773_v40 = vpop.f32.mrf.mxu3 }
 0x3c2   : > { %v4649_v22 = vmax.f32 %v4597_v59, 0.0  ;;  %v4853_v48 = vadd.f32 %v4773_v40, %v4663_v62  ;;  %v3165_v62 = vld [vmem:[#allocation3 + $0x50] sm:$0xff] }
 0x3c3   : > { %v3913_v40 = vadd.f32 %v10797_v25, %v3165_v62 }
 0x3c4   : > { %4935 = vst.msk [vmem:[#allocation2 + $0xf0] sm:$0xff] %vm278_vm1, %v4649_v22  ;;  %v3858_v6 = vpop.f32.mrf.mxu1 }
 0x3c5   : > { %4885 = vst.msk [vmem:[#allocation3] sm:$0xff] %vm1682_vm7, %v4853_v48 }
 0x3c6   : > { %3945 = vst.msk [vmem:[#allocation3 + $0x50] sm:$0xff] %vm1682_vm7, %v3913_v40  ;;  %v10884_v40 = vld [vmem:[#allocation2 + $0x60] sm:$0xff] }
 0x3c7   : > { %v4598_v10 = vpop.f32.mrf.mxu2 }
 0x3c8   : > { %v4599_v36 = vadd.f32 %v10566_v24, %v4598_v10 }
 0x3c9   : > { %v4775_v33 = vpop.f32.mrf.mxu3 }
 0x3ca   : > { %v4650_v11 = vmax.f32 %v4599_v36, 0.0  ;;  %v4854_v31 = vadd.f32 %v4775_v33, %v4664_v29  ;;  %v3166_v33 = vld [vmem:[#allocation3 + $0x58] sm:$0xff] }
 0x3cc   : > { %v4704_v15 = vpack.c.bf16 %v4650_v11, %v4649_v22  ;;  %4936 = vst.msk [vmem:[#allocation2 + $0xf8] sm:$0xff] %vm278_vm1, %v4650_v11  ;;  %v3860_v22 = vpop.f32.mrf.mxu1  ;;  %v3914_v11 = vadd.f32 %v10807_v27, %v3166_v33  ;;  %v6847_v33 = vld [vmem:[%s12286_s4 + $0x3] ss:$0 sm:$0xff] }
 0x3cd   : > { %4886 = vst.msk [vmem:[#allocation3 + $0x8] sm:$0xff] %vm1682_vm7, %v4854_v31  ;;  %v4673_v54 = vld [vmem:[#allocation3 + $0x50] sm:$0xff] }
 0x3ce   : > { %6711 = vmatmul.msk.bf16.gmra.mxu3 %vm278_vm1, %v4704_v15  ;;  %3946 = vst.msk [vmem:[#allocation3 + $0x58] sm:$0xff] %vm1682_vm7, %v3914_v11 }
 0x3cf   : > { %v4601_v20 = vpop.f32.mrf.mxu2 }
 0x3d0   : > { %v4602_v32 = vadd.f32 %v10566_v24, %v4601_v20 }
 0x3d1   : > { %v4778_v41 = vpop.f32.mrf.mxu3 }
 0x3d2   : > { %v4651_v0 = vmax.f32 %v4602_v32, 0.0  ;;  %v4855_v35 = vadd.f32 %v4778_v41, %v4665_v17  ;;  %v3167_v17 = vld [vmem:[#allocation3 + $0x60] sm:$0xff] }
 0x3d3   : > { %v3915_v41 = vadd.f32 %v10816_v30, %v3167_v17  ;;  %v3169_v30 = vld [vmem:[#allocation3 + $0x70] sm:$0xff] }
 0x3d4   : > { %4937 = vst.msk [vmem:[#allocation2 + $0x100] sm:$0xff] %vm278_vm1, %v4651_v0  ;;  %v3863_v15 = vpop.f32.mrf.mxu1 }
 0x3d5   : > { %4887 = vst.msk [vmem:[#allocation3 + $0x10] sm:$0xff] %vm1682_vm7, %v4855_v35  ;;  %v4672_v35 = vld [vmem:[#allocation3 + $0x48] sm:$0xff]  ;;  %v4674_v56 = vld [vmem:[#allocation3 + $0x58] sm:$0xff] }
 0x3d6   : > { %3947 = vst.msk [vmem:[#allocation3 + $0x60] sm:$0xff] %vm1682_vm7, %v3915_v41 }
 0x3d7   : > { %v4603_v18 = vpop.f32.mrf.mxu2 }
 0x3d8   : > { %v4604_v51 = vadd.f32 %v10566_v24, %v4603_v18 }
 0x3d9   : > { %v4780_v46 = vpop.f32.mrf.mxu3 }
 0x3da   : > { %v4652_v50 = vmax.f32 %v4604_v51, 0.0  ;;  %v4856_v19 = vadd.f32 %v4780_v46, %v4666_v13  ;;  %v3168_v46 = vld [vmem:[#allocation3 + $0x68] sm:$0xff] }
 0x3dc   : > { %v4705_v42 = vpack.c.bf16 %v4652_v50, %v4651_v0  ;;  %4938 = vst.msk [vmem:[#allocation2 + $0x108] sm:$0xff] %vm278_vm1, %v4652_v50  ;;  %v10853_v51 = vpop.f32.mrf.mxu1  ;;  %v3916_v50 = vadd.f32 %v10824_v21, %v3168_v46 }
 0x3dd   : > { %4888 = vst.msk [vmem:[#allocation3 + $0x18] sm:$0xff] %vm1682_vm7, %v4856_v19  ;;  %v4675_v43 = vld [vmem:[#allocation3 + $0x60] sm:$0xff] }
 0x3de   : > { %6712 = vmatmul.msk.bf16.gmra.mxu3 %vm278_vm1, %v4705_v42  ;;  %3948 = vst.msk [vmem:[#allocation3 + $0x68] sm:$0xff] %vm1682_vm7, %v3916_v50  ;;  %v3917_v42 = vadd.f32 %v3858_v6, %v3169_v30 }
 0x3df   : > { %v4606_v2 = vpop.f32.mrf.mxu2 }
 0x3e0   : > { %v4607_v47 = vadd.f32 %v10566_v24, %v4606_v2  ;;  %3949 = vst.msk [vmem:[#allocation3 + $0x70] sm:$0xff] %vm1682_vm7, %v3917_v42  ;;  %v10931_v42 = vld [vmem:[#allocation2 + $0x70] sm:$0xff] }
 0x3e1   : > { %v4783_v61 = vpop.f32.mrf.mxu3 }
 0x3e2   : > { %v4653_v53 = vmax.f32 %v4607_v47, 0.0  ;;  %v4857_v3 = vadd.f32 %v4783_v61, %v4667_v63  ;;  %v3170_v61 = vld [vmem:[#allocation3 + $0x78] sm:$0xff] }
 0x3e4   : > { %4939 = vst.msk [vmem:[#allocation2 + $0x110] sm:$0xff] %vm278_vm1, %v4653_v53 }
 0x3e5   : > { %4889 = vst.msk [vmem:[#allocation3 + $0x20] sm:$0xff] %vm1682_vm7, %v4857_v3  ;;  %v3918_v3 = vadd.f32 %v3860_v22, %v3170_v61  ;;  %v10888_v22 = vld [vmem:[#allocation2 + $0x68] sm:$0xff] }
 0x3e7   : > { %v4608_v16 = vpop.f32.mrf.mxu2  ;;  %3950 = vst.msk [vmem:[#allocation3 + $0x78] sm:$0xff] %vm1682_vm7, %v3918_v3 }
 0x3e8   : > { %v4609_v55 = vadd.f32 %v10566_v24, %v4608_v16 }
 0x3e9   : > { %v4785_v1 = vpop.f32.mrf.mxu3 }
 0x3ea   : > { %v4654_v8 = vmax.f32 %v4609_v55, 0.0  ;;  %v4858_v52 = vadd.f32 %v4785_v1, %v4668_v58 }
 0x3ec   : > { %v4706_v34 = vpack.c.bf16 %v4654_v8, %v4653_v53  ;;  %4940 = vst.msk [vmem:[#allocation2 + $0x118] sm:$0xff] %vm278_vm1, %v4654_v8  ;;  %v10863_v53 = vpop.f32.mrf.mxu1  ;;  %v3171_v8 = vld [vmem:[#allocation3 + $0x80] sm:$0xff] }
 0x3ed   : > { %4890 = vst.msk [vmem:[#allocation3 + $0x28] sm:$0xff] %vm1682_vm7, %v4858_v52  ;;  %v3919_v52 = vadd.f32 %v3863_v15, %v3171_v8 }
 0x3ee   : > { %6713 = vmatmul.msk.bf16.gmra.mxu3 %vm278_vm1, %v4706_v34 }
 0x3ef   : > { %v4611_v28 = vpop.f32.mrf.mxu2  ;;  %3951 = vst.msk [vmem:[#allocation3 + $0x80] sm:$0xff] %vm1682_vm7, %v3919_v52 }
 0x3f0   : > { %v4612_v60 = vadd.f32 %v10566_v24, %v4611_v28 }
 0x3f1   : > { %v4788_v26 = vpop.f32.mrf.mxu3 }
 0x3f2   : > { %v4655_v38 = vmax.f32 %v4612_v60, 0.0  ;;  %v4859_v59 = vadd.f32 %v4788_v26, %v4669_v5  ;;  %v6718_v26 = vld [vmem:[%s12283_s1 + $0x40] sm:$0xff] }
 0x3f3   : > { %v10882_v62 = vperm.slane %v6718_v26, 0  ;;  %v10925_v30 = vperm.slane %v6718_v26, 2 }
 0x3f4   : > { %4941 = vst.msk [vmem:[#allocation2 + $0x120] sm:$0xff] %vm278_vm1, %v4655_v38  ;;  %v10871_v34 = vpop.f32.mrf.mxu1 }
 0x3f5   : > { %4891 = vst.msk [vmem:[#allocation3 + $0x30] sm:$0xff] %vm1682_vm7, %v4859_v59  ;;  %v4985_v59 = vld [vmem:[#allocation2 + $0x8] sm:$0xff] }
 0x3f6   : > { %v5575_v61 = vmul.f32 %v10925_v30, %v4985_v59 }
 0x3f7   : > { %v4613_v44 = vpop.f32.mrf.mxu2 }
 0x3f8   : > { %v4614_v48 = vadd.f32 %v10566_v24, %v4613_v44  ;;  %v10890_v44 = vperm.slane %v6718_v26, 6 }
 0x3f9   : > { %v4790_v7 = vpop.f32.mrf.mxu3 }
 0x3fa   : > { %v4656_v10 = vmax.f32 %v4614_v48, 0.0  ;;  %v4860_v36 = vadd.f32 %v4790_v7, %v4670_v4  ;;  %v5018_v7 = vmul.f32 %v10882_v62, %v4985_v59 }
 0x3fc   : > { %v4707_v29 = vpack.c.bf16 %v4656_v10, %v4655_v38  ;;  %4942 = vst.msk [vmem:[#allocation2 + $0x128] sm:$0xff] %vm278_vm1, %v4656_v10  ;;  %v10879_v38 = vld [vmem:[#allocation2] sm:$0xff] }
 0x3fd   : > { %4892 = vst.msk [vmem:[#allocation3 + $0x38] sm:$0xff] %vm1682_vm7, %v4860_v36  ;;  %v5017_v4 = vmul.f32 %v10882_v62, %v10879_v38  ;;  %v10897_v36 = vld [vmem:[#allocation2 + $0xc0] sm:$0xff] }
 0x3fe   : > { %6714 = vmatmul.msk.bf16.gmra.mxu3 %vm278_vm1, %v4707_v29  ;;  %v10899_v29 = vld [vmem:[#allocation2 + $0xc8] sm:$0xff] }
 0x3ff   : > { %v4616_v25 = vpop.f32.mrf.mxu2  ;;  %v5180_v15 = vmul.f32 %v10890_v44, %v10899_v29 }
 0x400   : > { %v4617_v31 = vadd.f32 %v10566_v24, %v4616_v25 }
 0x401   : > { %v4793_v14 = vpop.f32.mrf.mxu3 }
 0x402   : > { %v4657_v20 = vmax.f32 %v4617_v31, 0.0  ;;  %v4861_v32 = vadd.f32 %v4793_v14, %v4671_v49  ;;  %v5179_v31 = vmul.f32 %v10890_v44, %v10897_v36  ;;  %v10910_v49 = vpop.f32.mrf.mxu1  ;;  %v4676_v14 = vld [vmem:[#allocation3 + $0x68] sm:$0xff] }
 0x404   : > { %4943 = vst.msk [vmem:[#allocation2 + $0x130] sm:$0xff] %vm278_vm1, %v4657_v20 }
 0x405   : > { %4893 = vst.msk [vmem:[#allocation3 + $0x40] sm:$0xff] %vm1682_vm7, %v4861_v32  ;;  %v10912_v32 = vperm.slane %v6718_v26, 1 }
 0x407   : > { %v4618_v27 = vpop.f32.mrf.mxu2 }
 0x408   : > { %v4619_v0 = vadd.f32 %v10566_v24, %v4618_v27  ;;  %v10914_v27 = vld [vmem:[#allocation2 + $0xf8] sm:$0xff] }
 0x409   : > { %v4795_v39 = vpop.f32.mrf.mxu3 }
 0x40a   : > { %v4658_v12 = vmax.f32 %v4619_v0, 0.0  ;;  %v4862_v18 = vadd.f32 %v4795_v39, %v4672_v35  ;;  %v5177_v39 = vld [vmem:[#allocation2 + $0x1b8] sm:$0xff] }
 0x40c   : > { %v4708_v13 = vpack.c.bf16 %v4658_v12, %v4657_v20  ;;  %4944 = vst.msk [vmem:[#allocation2 + $0x138] sm:$0xff] %vm278_vm1, %v4658_v12  ;;  %v10916_v12 = vld [vmem:[#allocation2 + $0x10] sm:$0xff] }
 0x40d   : > { %4894 = vst.msk [vmem:[#allocation3 + $0x48] sm:$0xff] %vm1682_vm7, %v4862_v18  ;;  %v10918_v18 = vperm.slane %v6718_v26, 4  ;;  %v5576_v3 = vmul.f32 %v10925_v30, %v10916_v12 }
 0x40e   : > { %6715 = vmatmul.msk.bf16.gmra.mxu3 %vm278_vm1, %v4708_v13 }
 0x40f   : > { %v4621_v19 = vpop.f32.mrf.mxu2 }
 0x410   : > { %v4622_v57 = vadd.f32 %v10566_v24, %v4621_v19  ;;  %v5048_v19 = vmul.f32 %v10882_v62, %v10914_v27 }
 0x411   : > { %v4798_v2 = vpop.f32.mrf.mxu3 }
 0x412   : > { %v4659_v47 = vmax.f32 %v4622_v57, 0.0  ;;  %v4863_v63 = vadd.f32 %v4798_v2, %v4673_v54  ;;  %v5210_v57 = vmul.f32 %v10890_v44, %v5177_v39  ;;  %v10934_v54 = vperm.slane %v6718_v26, 5  ;;  %v10937_v2 = vld [vmem:[#allocation2 + $0xd0] sm:$0xff] }
 0x414   : > { %4945 = vst.msk [vmem:[#allocation2 + $0x140] sm:$0xff] %vm278_vm1, %v4659_v47 }
 0x415   : > { %4895 = vst.msk [vmem:[#allocation3 + $0x50] sm:$0xff] %vm1682_vm7, %v4863_v63  ;;  %v5380_v63 = vmul.f32 %v10912_v32, %v4985_v59 }
 0x417   : > { %v4623_v21 = vpop.f32.mrf.mxu2 }
 0x418   : > { %v4624_v45 = vadd.f32 %v10566_v24, %v4623_v21  ;;  %v10948_v21 = vld [vmem:[%s12283_s1 + $0x48] ss:$0 sm:$0xff] }
 0x419   : > { %v4800_v16 = vpop.f32.mrf.mxu3  ;;  %v5674_v59 = vmul.f32 %v10948_v21, %v10937_v2 }
 0x41a   : > { %v4660_v55 = vmax.f32 %v4624_v45, 0.0  ;;  %v4864_v58 = vadd.f32 %v4800_v16, %v4674_v56  ;;  %v5412_v45 = vmul.f32 %v10918_v18, %v10884_v40  ;;  %v5413_v56 = vmul.f32 %v10918_v18, %v10888_v22 }
 0x41b   : > { %v10956_v16 = vperm.slane %v6718_v26, 7 }
 0x41c   : > { %v4709_v1 = vpack.c.bf16 %v4660_v55, %v4659_v47  ;;  %4946 = vst.msk [vmem:[#allocation2 + $0x148] sm:$0xff] %vm278_vm1, %v4660_v55  ;;  %v5379_v47 = vmul.f32 %v10912_v32, %v10879_v38  ;;  %v5608_v55 = vmul.f32 %v10934_v54, %v10888_v22 }
 0x41d   : > { %4896 = vst.msk [vmem:[#allocation3 + $0x58] sm:$0xff] %vm1682_vm7, %v4864_v58  ;;  %v3172_v58 = vld [vmem:[#allocation3 + $0x88] sm:$0xff] }
 0x41e   : > { %6716 = vmatmul.msk.bf16.gmra.mxu3 %vm278_vm1, %v4709_v1  ;;  %v3173_v1 = vld [vmem:[#allocation3 + $0x90] sm:$0xff] }
 0x41f   : > { %v4626_v37 = vpop.f32.mrf.mxu2 }
 0x420   : > { %v4627_v6 = vadd.f32 %v10566_v24, %v4626_v37  ;;  %v10886_v24 = vperm.slane %v6718_v26, 3  ;;  %v5609_v37 = vmul.f32 %v10934_v54, %v10931_v42  ;;  %v5640_v26 = vadd.f32 %v5608_v55, %v5575_v61 }
 0x421   : > { %v4803_v28 = vpop.f32.mrf.mxu3  ;;  %v5477_v55 = vmul.f32 %v10956_v16, %v10897_v36 }
 0x422   : > { %v4661_v60 = vmax.f32 %v4627_v6, 0.0  ;;  %v4865_v5 = vadd.f32 %v4803_v28, %v4675_v43  ;;  %v5082_v10 = vmul.f32 %v10886_v24, %v10884_v40  ;;  %v5083_v25 = vmul.f32 %v10886_v24, %v10888_v22  ;;  %v4677_v43 = vld [vmem:[#allocation3 + $0x70] sm:$0xff] }
 0x423   : > { %v5673_v6 = vmul.f32 %v10948_v21, %v10899_v29 }
 0x424   : > { %4947 = vst.msk [vmem:[#allocation2 + $0x150] sm:$0xff] %vm278_vm1, %v4661_v60  ;;  %v5114_v0 = vadd.f32 %v5082_v10, %v5017_v4  ;;  %v5115_v35 = vadd.f32 %v5083_v25, %v5018_v7  ;;  %v5641_v4 = vadd.f32 %v5609_v37, %v5576_v3  ;;  %v3920_v7 = vadd.f32 %v10853_v51, %v3172_v58  ;;  %v4987_v51 = vld [vmem:[#allocation2 + $0x18] sm:$0xff] }
 0x425   : > { %4897 = vst.msk [vmem:[#allocation3 + $0x60] sm:$0xff] %vm1682_vm7, %v4865_v5  ;;  %v5607_v5 = vmul.f32 %v10934_v54, %v10884_v40  ;;  %v3921_v10 = vadd.f32 %v10863_v53, %v3173_v1  ;;  %v5445_v25 = vadd.f32 %v5413_v56, %v5380_v63  ;;  %v5019_v53 = vmul.f32 %v10882_v62, %v10916_v12 }
 0x426   : > { %v10921_v46 = vadd.f32 %v5179_v31, %v5114_v0  ;;  %v10923_v50 = vadd.f32 %v5180_v15, %v5115_v35  ;;  %v5672_v31 = vmul.f32 %v10948_v21, %v10897_v36  ;;  %v5705_v15 = vadd.f32 %v5673_v6, %v5640_v26  ;;  %3952 = vst.msk [vmem:[#allocation3 + $0x88] sm:$0xff] %vm1682_vm7, %v3920_v7 }
 0x427   : > { %v4628_v48 = vpop.f32.mrf.mxu2  ;;  %v5020_v39 = vmul.f32 %v10882_v62, %v4987_v51  ;;  %3953 = vst.msk [vmem:[#allocation3 + $0x90] sm:$0xff] %vm1682_vm7, %v3921_v10  ;;  %v5181_v56 = vmul.f32 %v10890_v44, %v10937_v2  ;;  %v5444_v26 = vadd.f32 %v5412_v45, %v5379_v47 }
 0x428   : > { %v4629_v11 = vadd.f32 %v6847_v33, %v4628_v48  ;;  %v5243_v8 = vrot.slane %v10921_v46, 5  ;;  %v5244_v52 = vrot.slane %v10923_v50, 5  ;;  %v10974_v33 = vpop.f32.mrf.mxu1  ;;  %v10998_v46 = vld [vmem:[#allocation2 + $0xd8] sm:$0xff]  ;;  %v5737_v61 = vrot.slane %v5705_v15, 3  ;;  %v11035_v15 = vld [vmem:[%s12284_s2 + $0x4] ss:$0 sm:$0xff] }
 0x429   : > { %v4805_v20 = vpop.f32.mrf.mxu3  ;;  %v5182_v37 = vmul.f32 %v10890_v44, %v10998_v46  ;;  %v5509_v45 = vadd.f32 %v5477_v55, %v5444_v26  ;;  %v5577_v55 = vmul.f32 %v10925_v30, %v4987_v51  ;;  %v5675_v26 = vmul.f32 %v10948_v21, %v10998_v46 }
 0x42a   : > { %v4662_v17 = vmax.f32 %v4629_v11, 0.0  ;;  %v4866_v41 = vadd.f32 %v4805_v20, %v4676_v14  ;;  %v10982_v20 = vadd.f32 %v5674_v59, %v5641_v4  ;;  %v5306_v0 = vsel %vm5275_vm12, %v5243_v8, %v5244_v52 }
 0x42c   : > { %v4710_v13 = vpack.c.bf16 %v4662_v17, %v4661_v60  ;;  %4948 = vst.msk [vmem:[#allocation2 + $0x158] sm:$0xff] %vm278_vm1, %v4662_v17  ;;  %v5574_v60 = vmul.f32 %v10925_v30, %v10879_v38  ;;  %v5478_v38 = vmul.f32 %v10956_v16, %v10899_v29  ;;  %v10986_v17 = vld [vmem:[#allocation2 + $0x78] sm:$0xff]  ;;  %v5738_v3 = vrot.slane %v10982_v20, 3 }
 0x42d   : > { %4898 = vst.msk [vmem:[#allocation3 + $0x68] sm:$0xff] %vm1682_vm7, %v4866_v41  ;;  %v5084_v41 = vmul.f32 %v10886_v24, %v10931_v42 }
 0x42e   : > { %6717 = vmatmul.msk.bf16.gmra.mxu3 %vm278_vm1, %v4710_v13  ;;  %v5639_v35 = vadd.f32 %v5607_v5, %v5574_v60  ;;  %v5085_v13 = vmul.f32 %v10886_v24, %v10986_v17  ;;  %v5510_v58 = vadd.f32 %v5478_v38, %v5445_v25  ;;  %v4678_v60 = vld [vmem:[#allocation3 + $0x78] sm:$0xff]  ;;  %v5381_v25 = vmul.f32 %v10912_v32, %v10916_v12  ;;  %v11037_v12 = vld [vmem:[#allocation2 + $0x20] sm:$0xff] }
 0x42f   : > { %v5414_v38 = vmul.f32 %v10918_v18, %v10931_v42 }
 0x430   : > { %v11006_v1 = vadd.f32 %v5672_v31, %v5639_v35  ;;  %v5542_v59 = vadd.f32 %v5510_v58, %v5306_v0  ;;  %v11049_v0 = vld [vmem:[#allocation2 + $0xe0] sm:$0xff]  ;;  %v5382_v35 = vmul.f32 %v10912_v32, %v4987_v51  ;;  %v3174_v58 = vld [vmem:[#allocation3 + $0x98] sm:$0xff] }
 0x431   : > { %v4808_v28 = vpop.f32.mrf.mxu3  ;;  %v5676_v51 = vmul.f32 %v10948_v21, %v11049_v0 }
 0x432   : > { %v4867_v48 = vadd.f32 %v4808_v28, %v4677_v43  ;;  %12543 = vst [vmem:[#allocation9_spill] sm:$0xff] %v11006_v1  ;;  %v5116_v43 = vadd.f32 %v5084_v41, %v5019_v53  ;;  %v5117_v28 = vadd.f32 %v5085_v13, %v5020_v39  ;;  %v11041_v53 = vpop.f32.mrf.mxu1  ;;  %v5415_v39 = vmul.f32 %v10918_v18, %v10986_v17 }
 0x433   : > { %v5080_v11 = vld [vmem:[#allocation2 + $0x158] sm:$0xff] }
 0x434   : > { %4899 = vst.msk [vmem:[#allocation3 + $0x70] sm:$0xff] %vm1682_vm7, %v4867_v48  ;;  %v5113_v14 = vmul.f32 %v10886_v24, %v5080_v11  ;;  %v5213_v10 = vadd.f32 %v5181_v56, %v5116_v43  ;;  %v12366_v11 = vrot.slane %v11006_v1, 3  ;;  %v5578_v43 = vmul.f32 %v10925_v30, %v11037_v12 }
 0x436   : > { %v5145_v63 = vadd.f32 %v5113_v14, %v5048_v19  ;;  %v5798_v19 = vsel %vm5768_vm14, %v5737_v61, %v5738_v3  ;;  %v11039_v14 = vld [vmem:[#allocation2 + $0x80] sm:$0xff] }
 0x437   : > { %v5808_v48 = vsel %vm5802_vm13, %v5798_v19, 0.0  ;;  %v5446_v19 = vadd.f32 %v5414_v38, %v5381_v25  ;;  %v3922_v25 = vadd.f32 %v10871_v34, %v3174_v58  ;;  %v4989_v58 = vld [vmem:[#allocation2 + $0x28] sm:$0xff]  ;;  %v5086_v50 = vmul.f32 %v10886_v24, %v11039_v14 }
 0x438   : > { %v11010_v6 = vadd.f32 %v5210_v57, %v5145_v63  ;;  %v11019_v57 = vadd.f32 %v5182_v37, %v5117_v28  ;;  %v5840_v31 = vadd.f32 %v5808_v48, %v5542_v59  ;;  %v5245_v63 = vrot.slane %v5213_v10, 5  ;;  %v3175_v37 = vld [vmem:[#allocation3 + $0xa0] sm:$0xff] }
 0x439   : > { %v4810_v5 = vpop.f32.mrf.mxu3  ;;  %v5611_v28 = vmul.f32 %v10934_v54, %v11039_v14  ;;  %v4679_v59 = vld [vmem:[#allocation3 + $0x80] sm:$0xff]  ;;  %v3923_v38 = vadd.f32 %v10910_v49, %v3175_v37  ;;  %3954 = vst.msk [vmem:[#allocation3 + $0x98] sm:$0xff] %vm1682_vm7, %v3922_v25  ;;  %v5021_v37 = vmul.f32 %v10882_v62, %v11037_v12 }
 0x43a   : > { %12544 = vst [vmem:[#allocation12_spill] sm:$0xff] %v11010_v6  ;;  %v4868_v4 = vadd.f32 %v4810_v5, %v4678_v60  ;;  %v12367_v7 = vrot.slane %v11010_v6, 5  ;;  %v5246_v56 = vrot.slane %v11019_v57, 5  ;;  %v5877_v5 = vadd.f32 %v11035_v15, %v5840_v31  ;;  %v11278_v6 = vld [vmem:[#allocation2 + $0xb0] sm:$0xff] }
 0x43b   : > { %v5643_v10 = vadd.f32 %v5611_v28, %v5578_v43  ;;  %v5479_v31 = vmul.f32 %v10956_v16, %v10937_v2  ;;  %3955 = vst.msk [vmem:[#allocation3 + $0xa0] sm:$0xff] %vm1682_vm7, %v3923_v38  ;;  %v5183_v28 = vmul.f32 %v10890_v44, %v11049_v0  ;;  %v5118_v25 = vadd.f32 %v5086_v50, %v5021_v37  ;;  %v11118_v37 = vld [vmem:[#allocation2 + $0x30] sm:$0xff] }
 0x43c   : > { %4900 = vst.msk [vmem:[#allocation3 + $0x78] sm:$0xff] %vm1682_vm7, %v4868_v4  ;;  %v5307_v47 = vsel %vm5275_vm12, %v12367_v7, %v5243_v8  ;;  %v5799_v8 = vsel %vm5768_vm14, %v12366_v11, %v5737_v61  ;;  %v5610_v61 = vmul.f32 %v10934_v54, %v10986_v17  ;;  %v5909_v49 = vmax.f32 %v5877_v5, 0.0  ;;  %v11120_v50 = vld [vmem:[#allocation2 + $0x90] sm:$0xff] }
 0x43d   : > { %v5314_v41 = vsel %vm5308_vm15, %v5307_v47, 0.0  ;;  %v11078_v43 = vadd.f32 %v5676_v51, %v5643_v10 }
 0x43e   : > { %v5541_v13 = vadd.f32 %v5509_v45, %v5314_v41  ;;  %v5642_v4 = vadd.f32 %v5610_v61, %v5577_v55  ;;  %v5480_v41 = vmul.f32 %v10956_v16, %v10998_v46  ;;  %v11084_v61 = vld [vmem:[#allocation2 + $0x88] sm:$0xff] }
 0x43f   : > { %v5087_v10 = vmul.f32 %v10886_v24, %v11084_v61 }
 0x440   : > { %v5839_v60 = vadd.f32 %v5799_v8, %v5541_v13  ;;  %v5305_v8 = vsel %vm5275_vm12, %v5244_v52, %v5245_v63  ;;  %v5447_v13 = vadd.f32 %v5415_v39, %v5382_v35  ;;  %v5707_v55 = vadd.f32 %v5675_v26, %v5642_v4 }
 0x441   : > { %v4813_v48 = vpop.f32.mrf.mxu3  ;;  %v5304_v52 = vsel %vm5275_vm12, %v5245_v63, %v5246_v56  ;;  %v5740_v39 = vrot.slane %v11078_v43, 3  ;;  %v5316_v5 = vsel %vm5308_vm15, %v5305_v8, 0.0  ;;  %v5511_v26 = vadd.f32 %v5479_v31, %v5446_v19 }
 0x442   : > { %v4869_v47 = vadd.f32 %v4813_v48, %v4679_v59  ;;  %v5876_v45 = vadd.f32 %v11035_v15, %v5839_v60  ;;  %v5739_v35 = vrot.slane %v5707_v55, 3  ;;  %v5512_v51 = vadd.f32 %v5480_v41, %v5447_v13  ;;  %v11098_v59 = vld [vmem:[#allocation2 + $0xe8] sm:$0xff]  ;;  %v11100_v48 = vpop.f32.mrf.mxu1 }
 0x443   : > { %v5022_v4 = vmul.f32 %v10882_v62, %v4989_v58  ;;  %v5543_v41 = vadd.f32 %v5511_v26, %v5316_v5  ;;  %v5184_v8 = vmul.f32 %v10890_v44, %v11098_v59  ;;  %v5215_v13 = vadd.f32 %v5183_v28, %v5118_v25 }
 0x444   : > { %4901 = vst.msk [vmem:[#allocation3 + $0x80] sm:$0xff] %vm1682_vm7, %v4869_v47  ;;  %v5908_v34 = vmax.f32 %v5876_v45, 0.0  ;;  %v5796_v63 = vsel %vm5768_vm14, %v5739_v35, %v5740_v39  ;;  %v5544_v38 = vadd.f32 %v5512_v51, %v5304_v52  ;;  %v5797_v19 = vsel %vm5768_vm14, %v5738_v3, %v5739_v35  ;;  %v4680_v45 = vld [vmem:[#allocation3 + $0x88] sm:$0xff]  ;;  %v11123_v3 = vld [vmem:[#allocation2 + $0xf0] sm:$0xff] }
 0x445   : > { %v5810_v47 = vsel %vm5802_vm13, %v5796_v63, 0.0  ;;  %v5119_v20 = vadd.f32 %v5087_v10, %v5022_v4  ;;  %v5383_v52 = vmul.f32 %v10912_v32, %v11037_v12  ;;  %v5384_v35 = vmul.f32 %v10912_v32, %v4989_v58  ;;  %v3176_v63 = vld [vmem:[#allocation3 + $0xa8] sm:$0xff]  ;;  %v3177_v4 = vld [vmem:[#allocation3 + $0xb0] sm:$0xff] }
 0x446   : > { %v5940_v60 = vpack.c.bf16 %v5909_v49, %v5908_v34  ;;  %v5842_v34 = vadd.f32 %v5810_v47, %v5544_v38  ;;  %v5841_v49 = vadd.f32 %v5797_v19, %v5543_v41  ;;  %v5247_v5 = vrot.slane %v5215_v13, 5 }
 0x447   : > { %v11129_v28 = vadd.f32 %v5184_v8, %v5119_v20  ;;  %v5416_v26 = vmul.f32 %v10918_v18, %v11039_v14  ;;  %v5417_v51 = vmul.f32 %v10918_v18, %v11084_v61  ;;  %v5580_v12 = vmul.f32 %v10925_v30, %v11118_v37 }
 0x448   : > { %6723 = vmatmul.msk.bf16.vlgmr.msra.gmra.mxu0 %vm278_vm1, %v5940_v60  ;;  %v5579_v60 = vmul.f32 %v10925_v30, %v4989_v58  ;;  %v5879_v10 = vadd.f32 %v11035_v15, %v5842_v34  ;;  %v5612_v25 = vmul.f32 %v10934_v54, %v11084_v61  ;;  %v5613_v58 = vmul.f32 %v10934_v54, %v11120_v50  ;;  %v4681_v34 = vld [vmem:[#allocation3 + $0x90] sm:$0xff] }
 0x449   : > { %v4815_v31 = vpop.f32.mrf.mxu3  ;;  %v5878_v38 = vadd.f32 %v11035_v15, %v5841_v49  ;;  %v5481_v19 = vmul.f32 %v10956_v16, %v11049_v0  ;;  %v5677_v47 = vmul.f32 %v10948_v21, %v11098_v59  ;;  %v3924_v8 = vadd.f32 %v10974_v33, %v3176_v63 }
 0x44a   : > { %v4870_v55 = vadd.f32 %v4815_v31, %v4680_v45  ;;  %v5678_v45 = vmul.f32 %v10948_v21, %v11123_v3  ;;  %v5644_v31 = vadd.f32 %v5612_v25, %v5579_v60  ;;  %v5645_v41 = vadd.f32 %v5613_v58, %v5580_v12 }
 0x44b   : > { %v3925_v13 = vadd.f32 %v11041_v53, %v3177_v4  ;;  %v5248_v49 = vrot.slane %v11129_v28, 5  ;;  %v5303_v11 = vsel %vm5275_vm12, %v5246_v56, %v5247_v5  ;;  %v5448_v7 = vadd.f32 %v5416_v26, %v5383_v52  ;;  %3956 = vst.msk [vmem:[#allocation3 + $0xa8] sm:$0xff] %vm1682_vm7, %v3924_v8  ;;  %v4991_v52 = vld [vmem:[#allocation2 + $0x38] sm:$0xff] }
 0x44c   : > { %4902 = vst.msk [vmem:[#allocation3 + $0x88] sm:$0xff] %vm1682_vm7, %v4870_v55  ;;  %v11151_v55 = vpop.f32.mrf.mxu1  ;;  %v5482_v60 = vmul.f32 %v10956_v16, %v11098_v59  ;;  %v5911_v25 = vmax.f32 %v5879_v10, 0.0  ;;  %v5709_v33 = vadd.f32 %v5677_v47, %v5644_v31  ;;  %v11160_v63 = vadd.f32 %v5678_v45, %v5645_v41  ;;  %v11166_v26 = vld [vmem:[#allocation2 + $0x98] sm:$0xff] }
 0x44d   : > { %v5449_v53 = vadd.f32 %v5417_v51, %v5384_v35  ;;  %3957 = vst.msk [vmem:[#allocation3 + $0xb0] sm:$0xff] %vm1682_vm7, %v3925_v13  ;;  %v5910_v57 = vmax.f32 %v5878_v38, 0.0  ;;  %v5513_v4 = vadd.f32 %v5481_v19, %v5448_v7  ;;  %v5302_v10 = vsel %vm5275_vm12, %v5247_v5, %v5248_v49 }
 0x44e   : > { %v5741_v58 = vrot.slane %v5709_v33, 3  ;;  %v12368_v56 = vrot.slane %v11160_v63, 3  ;;  %v5318_v35 = vsel %vm5308_vm15, %v5303_v11, 0.0  ;;  %v5023_v51 = vmul.f32 %v10882_v62, %v11118_v37 }
 0x44f   : > { %v5088_v7 = vmul.f32 %v10886_v24, %v11120_v50  ;;  %v5941_v38 = vpack.c.bf16 %v5911_v25, %v5910_v57  ;;  %v5514_v19 = vadd.f32 %v5482_v60, %v5449_v53  ;;  %v5024_v45 = vmul.f32 %v10882_v62, %v4991_v52  ;;  %v11194_v60 = vld [vmem:[#allocation2 + $0x40] sm:$0xff] }
 0x450   : > { %v5794_v47 = vsel %vm5768_vm14, %v5741_v58, %v12368_v56  ;;  %v5795_v11 = vsel %vm5768_vm14, %v5740_v39, %v5741_v58  ;;  %v5089_v31 = vmul.f32 %v10886_v24, %v11166_v26  ;;  %v5185_v41 = vmul.f32 %v10890_v44, %v11123_v3  ;;  %v11200_v57 = vld [vmem:[#allocation2 + $0xa0] sm:$0xff] }
 0x451   : > { %v4818_v20 = vpop.f32.mrf.mxu3  ;;  %v5812_v5 = vsel %vm5802_vm13, %v5794_v47, 0.0  ;;  %v5545_v8 = vadd.f32 %v5513_v4, %v5318_v35  ;;  %v5546_v13 = vadd.f32 %v5514_v19, %v5302_v10  ;;  %v5120_v43 = vadd.f32 %v5088_v7, %v5023_v51  ;;  %v11204_v10 = vld [vmem:[#allocation2 + $0x100] sm:$0xff]  ;;  %v3178_v51 = vld [vmem:[#allocation3 + $0xb8] sm:$0xff] }
 0x452   : > { %v4871_v12 = vadd.f32 %v4818_v20, %v4681_v34  ;;  %v4682_v34 = vld [vmem:[#allocation3 + $0x98] sm:$0xff]  ;;  %v5186_v39 = vmul.f32 %v10890_v44, %v10914_v27  ;;  %v5121_v58 = vadd.f32 %v5089_v31, %v5024_v45  ;;  %v5581_v4 = vmul.f32 %v10925_v30, %v4991_v52 }
 0x453   : > { %v5843_v25 = vadd.f32 %v5795_v11, %v5545_v8  ;;  %v5844_v33 = vadd.f32 %v5812_v5, %v5546_v13  ;;  %v5217_v47 = vadd.f32 %v5185_v41, %v5120_v43  ;;  %v5582_v35 = vmul.f32 %v10925_v30, %v11194_v60  ;;  %v3179_v11 = vld [vmem:[#allocation3 + $0xc0] sm:$0xff] }
 0x454   : > { %4903 = vst.msk [vmem:[#allocation3 + $0x90] sm:$0xff] %vm1682_vm7, %v4871_v12  ;;  %v11198_v53 = vpop.f32.mrf.mxu1  ;;  %v11208_v7 = vadd.f32 %v5186_v39, %v5121_v58  ;;  %v5419_v19 = vmul.f32 %v10918_v18, %v11166_v26  ;;  %v5614_v45 = vmul.f32 %v10934_v54, %v11166_v26  ;;  %v5615_v41 = vmul.f32 %v10934_v54, %v11200_v57 }
 0x455   : > { %v5880_v5 = vadd.f32 %v11035_v15, %v5843_v25  ;;  %v5881_v31 = vadd.f32 %v11035_v15, %v5844_v33  ;;  %v5679_v8 = vmul.f32 %v10948_v21, %v10914_v27  ;;  %v5249_v13 = vrot.slane %v5217_v47, 5 }
 0x456   : > { %v5647_v43 = vadd.f32 %v5615_v41, %v5582_v35  ;;  %v3927_v39 = vadd.f32 %v11151_v55, %v3179_v11  ;;  %v12370_v33 = vrot.slane %v11208_v7, 5  ;;  %v5385_v58 = vmul.f32 %v10912_v32, %v11118_v37 }
 0x457   : > { %v5418_v56 = vmul.f32 %v10918_v18, %v11120_v50  ;;  %v5912_v55 = vmax.f32 %v5880_v5, 0.0  ;;  %v5301_v37 = vsel %vm5275_vm12, %v5248_v49, %v5249_v13  ;;  %v5483_v11 = vmul.f32 %v10956_v16, %v11123_v3 }
 0x458   : > { %6724 = vmatmul.msk.bf16.gmra.mxu0 %vm278_vm1, %v5941_v38  ;;  %v5386_v38 = vmul.f32 %v10912_v32, %v4991_v52  ;;  %v5680_v52 = vmul.f32 %v10948_v21, %v11204_v10  ;;  %3959 = vst.msk [vmem:[#allocation3 + $0xc0] sm:$0xff] %vm1682_vm7, %v3927_v39  ;;  %v5090_v28 = vmul.f32 %v10886_v24, %v11200_v57 }
 0x459   : > { %v4820_v20 = vpop.f32.mrf.mxu3  ;;  %v5300_v49 = vsel %vm5275_vm12, %v5249_v13, %v12370_v33  ;;  %v5187_v39 = vmul.f32 %v10890_v44, %v11204_v10 }
 0x45a   : > { %v4872_v12 = vadd.f32 %v4820_v20, %v4682_v34  ;;  %v5646_v34 = vadd.f32 %v5614_v45, %v5581_v4  ;;  %v3926_v20 = vadd.f32 %v11100_v48, %v3178_v51  ;;  %v5913_v45 = vmax.f32 %v5881_v31, 0.0 }
 0x45b   : > { %v5484_v48 = vmul.f32 %v10956_v16, %v10914_v27  ;;  %v11233_v35 = vadd.f32 %v5680_v52, %v5647_v43  ;;  %v5451_v51 = vadd.f32 %v5419_v19, %v5386_v38  ;;  %v4993_v27 = vld [vmem:[#allocation2 + $0x48] sm:$0xff]  ;;  %v5450_v38 = vadd.f32 %v5418_v56, %v5385_v58 }
 0x45c   : > { %4904 = vst.msk [vmem:[#allocation3 + $0x98] sm:$0xff] %vm1682_vm7, %v4872_v12  ;;  %v4683_v12 = vld [vmem:[#allocation3 + $0xa0] sm:$0xff]  ;;  %v5711_v47 = vadd.f32 %v5679_v8, %v5646_v34  ;;  %v5025_v8 = vmul.f32 %v10882_v62, %v11194_v60  ;;  %v11246_v34 = vld [vmem:[#allocation2 + $0xa8] sm:$0xff]  ;;  %v3888_v5 = vpop.f32.mrf.mxu1  ;;  %v5942_v19 = vpack.c.bf16 %v5913_v45, %v5912_v55  ;;  %v5026_v56 = vmul.f32 %v10882_v62, %v4993_v27 }
 0x45d   : > { %3958 = vst.msk [vmem:[#allocation3 + $0xb8] sm:$0xff] %vm1682_vm7, %v3926_v20  ;;  %v12369_v41 = vrot.slane %v11233_v35, 3  ;;  %v5516_v52 = vadd.f32 %v5484_v48, %v5451_v51  ;;  %v11258_v43 = vld [vmem:[#allocation2 + $0x108] sm:$0xff]  ;;  %v5091_v13 = vmul.f32 %v10886_v24, %v11246_v34  ;;  %v5515_v58 = vadd.f32 %v5483_v11, %v5450_v38  ;;  %v11274_v51 = vld [vmem:[#allocation2 + $0x50] sm:$0xff] }
 0x45e   : > { %v5743_v31 = vrot.slane %v5711_v47, 3  ;;  %12545 = vst [vmem:[#allocation39_spill] sm:$0xff] %v11246_v34  ;;  %v4684_v45 = vld [vmem:[#allocation3 + $0xa8] sm:$0xff]  ;;  %v12547_v55 = vrot.slane %v11160_v63, 3  ;;  %v5616_v38 = vmul.f32 %v10934_v54, %v11246_v34 }
 0x45f   : > { %12546 = vst [vmem:[#allocation7_spill] sm:$0xff] %v11258_v43  ;;  %v5548_v47 = vadd.f32 %v5516_v52, %v5300_v49  ;;  %v5123_v49 = vadd.f32 %v5091_v13, %v5026_v56 }
 0x460   : > { %v5792_v20 = vsel %vm5768_vm14, %v5743_v31, %v12369_v41 }
 0x461   : > { %v4823_v25 = vpop.f32.mrf.mxu3 }
 0x462   : > { %v4873_v4 = vadd.f32 %v4823_v25, %v4683_v12  ;;  %v5320_v12 = vsel %vm5308_vm15, %v5301_v37, 0.0  ;;  %v5814_v25 = vsel %vm5802_vm13, %v5792_v20, 0.0  ;;  %v5793_v37 = vsel %vm5768_vm14, %v12547_v55, %v5743_v31 }
 0x463   : > { %v5188_v20 = vmul.f32 %v10890_v44, %v11258_v43  ;;  %v5547_v33 = vadd.f32 %v5515_v58, %v5320_v12  ;;  %v5846_v1 = vadd.f32 %v5814_v25, %v5548_v47  ;;  %v5584_v31 = vmul.f32 %v10925_v30, %v11274_v51 }
 0x464   : > { %4905 = vst.msk [vmem:[#allocation3 + $0xa0] sm:$0xff] %vm1682_vm7, %v4873_v4  ;;  %v5122_v4 = vadd.f32 %v5090_v28, %v5025_v8  ;;  %v5583_v8 = vmul.f32 %v10925_v30, %v4993_v27  ;;  %v11282_v28 = vld [vmem:[#allocation2 + $0x110] sm:$0xff]  ;;  %v5388_v12 = vmul.f32 %v10912_v32, %v4993_v27  ;;  %v5681_v58 = vmul.f32 %v10948_v21, %v11258_v43  ;;  %v11298_v47 = vpop.f32.mrf.mxu1 }
 0x465   : > { %v5845_v63 = vadd.f32 %v5793_v37, %v5547_v33  ;;  %v11288_v52 = vadd.f32 %v5188_v20, %v5123_v49  ;;  %v3181_v33 = vld [vmem:[#allocation3 + $0xd0] sm:$0xff]  ;;  %v5883_v25 = vadd.f32 %v11035_v15, %v5846_v1  ;;  %v5420_v1 = vmul.f32 %v10918_v18, %v11200_v57 }
 0x466   : > { %v5219_v11 = vadd.f32 %v5187_v39, %v5122_v4  ;;  %v5387_v39 = vmul.f32 %v10912_v32, %v11194_v60  ;;  %v5648_v13 = vadd.f32 %v5616_v38, %v5583_v8  ;;  %v5421_v4 = vmul.f32 %v10918_v18, %v11246_v34  ;;  %v4685_v20 = vld [vmem:[#allocation3 + $0xb0] sm:$0xff] }
 0x467   : > { %v5682_v60 = vmul.f32 %v10948_v21, %v11282_v28  ;;  %v3929_v37 = vadd.f32 %v3888_v5, %v3181_v33  ;;  %v12374_v49 = vrot.slane %v11288_v52, 5  ;;  %v5486_v8 = vmul.f32 %v10956_v16, %v11258_v43 }
 0x468   : > { %6725 = vmatmul.msk.bf16.gmra.mxu0 %vm278_vm1, %v5942_v19  ;;  %v3180_v19 = vld [vmem:[#allocation3 + $0xc8] sm:$0xff]  ;;  %v5251_v56 = vrot.slane %v5219_v11, 5  ;;  %v5713_v55 = vadd.f32 %v5681_v58, %v5648_v13  ;;  %v5453_v5 = vadd.f32 %v5421_v4, %v5388_v12 }
 0x469   : > { %v4825_v48 = vpop.f32.mrf.mxu3  ;;  %v3928_v27 = vadd.f32 %v11198_v53, %v3180_v19  ;;  %v5915_v53 = vmax.f32 %v5883_v25, 0.0  ;;  %3961 = vst.msk [vmem:[#allocation3 + $0xd0] sm:$0xff] %vm1682_vm7, %v3929_v37  ;;  %v11325_v25 = vld [vmem:[#allocation2 + $0xb8] sm:$0xff] }
 0x46a   : > { %v4874_v41 = vadd.f32 %v4825_v48, %v4684_v45  ;;  %v5882_v48 = vadd.f32 %v11035_v15, %v5845_v63  ;;  %v12548_v63 = vrot.slane %v11208_v7, 5  ;;  %v5745_v33 = vrot.slane %v5713_v55, 3 }
 0x46b   : > { %3960 = vst.msk [vmem:[#allocation3 + $0xc8] sm:$0xff] %vm1682_vm7, %v3928_v27  ;;  %v5027_v7 = vmul.f32 %v10882_v62, %v11274_v51  ;;  %v5092_v27 = vmul.f32 %v10886_v24, %v11278_v6  ;;  %v5298_v12 = vsel %vm5275_vm12, %v5251_v56, %v12374_v49  ;;  %v5518_v55 = vadd.f32 %v5486_v8, %v5453_v5  ;;  %v4686_v5 = vld [vmem:[#allocation3 + $0xb8] sm:$0xff] }
 0x46c   : > { %4906 = vst.msk [vmem:[#allocation3 + $0xa8] sm:$0xff] %vm1682_vm7, %v4874_v41  ;;  %v5617_v41 = vmul.f32 %v10934_v54, %v11278_v6  ;;  %v5299_v19 = vsel %vm5275_vm12, %v12548_v63, %v5251_v56  ;;  %v5914_v58 = vmax.f32 %v5882_v48, 0.0  ;;  %v11339_v48 = vld [vmem:[#allocation2 + $0x118] sm:$0xff]  ;;  %v5189_v56 = vmul.f32 %v10890_v44, %v11282_v28 }
 0x46d   : > { %v5322_v4 = vsel %vm5308_vm15, %v5299_v19, 0.0  ;;  %v5124_v63 = vadd.f32 %v5092_v27, %v5027_v7  ;;  %v5190_v19 = vmul.f32 %v10890_v44, %v11339_v48  ;;  %v12549_v49 = vrot.slane %v11233_v35, 3 }
 0x46e   : > { %v5649_v45 = vadd.f32 %v5617_v41, %v5584_v31  ;;  %v5485_v41 = vmul.f32 %v10956_v16, %v11204_v10  ;;  %v5618_v7 = vmul.f32 %v10934_v54, %v11325_v25  ;;  %v5619_v35 = vmul.f32 %v10934_v54, %v10897_v36 }
 0x46f   : > { %v5791_v34 = vsel %vm5768_vm14, %v12549_v49, %v5745_v33  ;;  %v3182_v49 = vld [vmem:[#allocation3 + $0xd8] sm:$0xff] }
 0x470   : > { %v11311_v31 = vadd.f32 %v5682_v60, %v5649_v45  ;;  %v5452_v45 = vadd.f32 %v5420_v1, %v5387_v39  ;;  %v4995_v60 = vld [vmem:[#allocation2 + $0x58] sm:$0xff]  ;;  %v5943_v1 = vpack.c.bf16 %v5915_v53, %v5914_v58  ;;  %v3893_v53 = vpop.f32.mrf.mxu1 }
 0x471   : > { %v4828_v11 = vpop.f32.mrf.mxu3  ;;  %v5028_v37 = vmul.f32 %v10882_v62, %v4995_v60 }
 0x472   : > { %v4875_v38 = vadd.f32 %v4828_v11, %v4685_v20  ;;  %v12373_v13 = vrot.slane %v11311_v31, 3  ;;  %v5093_v20 = vmul.f32 %v10886_v24, %v11325_v25  ;;  %v5517_v11 = vadd.f32 %v5485_v41, %v5452_v45 }
 0x474   : > { %4907 = vst.msk [vmem:[#allocation3 + $0xb0] sm:$0xff] %vm1682_vm7, %v4875_v38  ;;  %v5790_v39 = vsel %vm5768_vm14, %v5745_v33, %v12373_v13  ;;  %v5550_v38 = vadd.f32 %v5518_v55, %v5298_v12  ;;  %v5549_v13 = vadd.f32 %v5517_v11, %v5322_v4  ;;  %v5125_v43 = vadd.f32 %v5093_v20, %v5028_v37  ;;  %v11359_v12 = vld [vmem:[#allocation2 + $0x120] sm:$0xff] }
 0x475   : > { %v5816_v8 = vsel %vm5802_vm13, %v5790_v39, 0.0  ;;  %v5221_v39 = vadd.f32 %v5189_v56, %v5124_v63  ;;  %v3183_v33 = vld [vmem:[#allocation3 + $0xe0] sm:$0xff]  ;;  %v5390_v55 = vmul.f32 %v10912_v32, %v4995_v60  ;;  %v5423_v37 = vmul.f32 %v10918_v18, %v11325_v25 }
 0x476   : > { %v5848_v45 = vadd.f32 %v5816_v8, %v5550_v38  ;;  %v5847_v27 = vadd.f32 %v5791_v34, %v5549_v13  ;;  %v11361_v4 = vadd.f32 %v5190_v19, %v5125_v43  ;;  %v5586_v20 = vmul.f32 %v10925_v30, %v10884_v40 }
 0x477   : > { %v5253_v34 = vrot.slane %v5221_v39, 5  ;;  %v5683_v43 = vmul.f32 %v10948_v21, %v11339_v48  ;;  %v5684_v8 = vmul.f32 %v10948_v21, %v11359_v12  ;;  %v3930_v38 = vadd.f32 %v11298_v47, %v3182_v49 }
 0x478   : > { %6726 = vmatmul.msk.bf16.gmra.mxu0 %vm278_vm1, %v5943_v1  ;;  %v5585_v1 = vmul.f32 %v10925_v30, %v4995_v60  ;;  %v5885_v56 = vadd.f32 %v11035_v15, %v5848_v45  ;;  %v5651_v11 = vadd.f32 %v5619_v35, %v5586_v20  ;;  %v3931_v60 = vadd.f32 %v3893_v53, %v3183_v33  ;;  %v3895_v35 = vpop.f32.mrf.mxu1 }
 0x479   : > { %v4830_v58 = vpop.f32.mrf.mxu3  ;;  %v5884_v63 = vadd.f32 %v11035_v15, %v5847_v27  ;;  %v5254_v19 = vrot.slane %v11361_v4, 5  ;;  %v5389_v45 = vmul.f32 %v10912_v32, %v11274_v51  ;;  %v5422_v39 = vmul.f32 %v10918_v18, %v11278_v6  ;;  %3962 = vst.msk [vmem:[#allocation3 + $0xd8] sm:$0xff] %vm1682_vm7, %v3930_v38  ;;  %v11408_v38 = vld [vmem:[#allocation2 + $0x128] sm:$0xff] }
 0x47a   : > { %v4876_v41 = vadd.f32 %v4830_v58, %v4686_v5  ;;  %v5650_v13 = vadd.f32 %v5618_v7, %v5585_v1  ;;  %v4687_v58 = vld [vmem:[#allocation3 + $0xc0] sm:$0xff]  ;;  %v5488_v1 = vmul.f32 %v10956_v16, %v11339_v48  ;;  %v11384_v7 = vadd.f32 %v5684_v8, %v5651_v11  ;;  %3963 = vst.msk [vmem:[#allocation3 + $0xe0] sm:$0xff] %vm1682_vm7, %v3931_v60 }
 0x47b   : > { %v5917_v53 = vmax.f32 %v5885_v56, 0.0  ;;  %v5487_v27 = vmul.f32 %v10956_v16, %v11282_v28  ;;  %v12550_v51 = vrot.slane %v11288_v52, 5  ;;  %v5455_v33 = vadd.f32 %v5423_v37, %v5390_v55 }
 0x47c   : > { %4908 = vst.msk [vmem:[#allocation3 + $0xb8] sm:$0xff] %vm1682_vm7, %v4876_v41  ;;  %v5715_v5 = vadd.f32 %v5683_v43, %v5650_v13  ;;  %v12379_v13 = vrot.slane %v11384_v7, 3  ;;  %v5916_v43 = vmax.f32 %v5884_v63, 0.0  ;;  %v5296_v56 = vsel %vm5275_vm12, %v5253_v34, %v5254_v19 }
 0x47d   : > { %v5297_v49 = vsel %vm5275_vm12, %v12550_v51, %v5253_v34  ;;  %v5094_v11 = vmul.f32 %v10897_v36, %v10886_v24  ;;  %v5454_v8 = vadd.f32 %v5422_v39, %v5389_v45  ;;  %v5520_v52 = vadd.f32 %v5488_v1, %v5455_v33 }
 0x47e   : > { %v5747_v20 = vrot.slane %v5715_v5, 3  ;;  %v5029_v37 = vmul.f32 %v10884_v40, %v10882_v62  ;;  %v5944_v60 = vpack.c.bf16 %v5917_v53, %v5916_v43  ;;  %v5324_v63 = vsel %vm5308_vm15, %v5297_v49, 0.0  ;;  %v4688_v49 = vld [vmem:[#allocation3 + $0xc8] sm:$0xff]  ;;  %v11427_v43 = vld [vmem:[#allocation2 + $0x130] sm:$0xff] }
 0x47f   : > { %v5095_v34 = vmul.f32 %v10899_v29, %v10886_v24  ;;  %v5191_v5 = vmul.f32 %v10890_v44, %v11359_v12  ;;  %v12551_v39 = vrot.slane %v11311_v31, 3  ;;  %v5192_v51 = vmul.f32 %v10890_v44, %v11408_v38 }
 0x480   : > { %v5788_v55 = vsel %vm5768_vm14, %v5747_v20, %v12379_v13  ;;  %v5126_v53 = vadd.f32 %v5094_v11, %v5029_v37  ;;  %v5620_v31 = vmul.f32 %v10934_v54, %v10899_v29  ;;  %v5588_v37 = vmul.f32 %v10925_v30, %v10931_v42 }
 0x481   : > { %v4833_v41 = vpop.f32.mrf.mxu3  ;;  %v5818_v45 = vsel %vm5802_vm13, %v5788_v55, 0.0  ;;  %v5789_v1 = vsel %vm5768_vm14, %v12551_v39, %v5747_v20 }
 0x482   : > { %v4877_v47 = vadd.f32 %v4833_v41, %v4687_v58  ;;  %v5519_v58 = vadd.f32 %v5487_v27, %v5454_v8  ;;  %v5552_v41 = vadd.f32 %v5520_v52, %v5296_v56  ;;  %v5587_v56 = vmul.f32 %v10925_v30, %v10888_v22  ;;  %v3184_v8 = vld [vmem:[#allocation3 + $0xe8] sm:$0xff] }
 0x484   : > { %4909 = vst.msk [vmem:[#allocation3 + $0xc0] sm:$0xff] %vm1682_vm7, %v4877_v47  ;;  %v5030_v47 = vmul.f32 %v10888_v22, %v10882_v62  ;;  %v5551_v33 = vadd.f32 %v5519_v58, %v5324_v63  ;;  %v5850_v52 = vadd.f32 %v5818_v45, %v5552_v41  ;;  %v5621_v63 = vmul.f32 %v10934_v54, %v10937_v2  ;;  %v3898_v45 = vpop.f32.mrf.mxu1 }
 0x485   : > { %v5685_v58 = vmul.f32 %v10948_v21, %v11408_v38  ;;  %v5652_v13 = vadd.f32 %v5620_v31, %v5587_v56  ;;  %v5686_v41 = vmul.f32 %v10948_v21, %v11427_v43 }
 0x486   : > { %v5127_v55 = vadd.f32 %v5095_v34, %v5030_v47  ;;  %v5849_v11 = vadd.f32 %v5789_v1, %v5551_v33  ;;  %v3932_v34 = vadd.f32 %v3895_v35, %v3184_v8  ;;  %v5653_v1 = vadd.f32 %v5621_v63, %v5588_v37 }
 0x487   : > { %v5887_v47 = vadd.f32 %v11035_v15, %v5850_v52  ;;  %v5425_v33 = vmul.f32 %v10918_v18, %v10899_v29  ;;  %v5391_v35 = vmul.f32 %v10912_v32, %v10884_v40  ;;  %v5424_v8 = vmul.f32 %v10918_v18, %v10897_v36 }
 0x488   : > { %6727 = vmatmul.msk.bf16.gmra.mxu0 %vm278_vm1, %v5944_v60  ;;  %v5223_v60 = vadd.f32 %v5191_v5, %v5126_v53  ;;  %v11440_v39 = vadd.f32 %v5192_v51, %v5127_v55  ;;  %v3185_v5 = vld [vmem:[#allocation3 + $0xf0] sm:$0xff]  ;;  %3964 = vst.msk [vmem:[#allocation3 + $0xe8] sm:$0xff] %vm1682_vm7, %v3932_v34  ;;  %v11448_v51 = vadd.f32 %v5686_v41, %v5653_v1 }
 0x489   : > { %v4835_v27 = vpop.f32.mrf.mxu3  ;;  %v5886_v56 = vadd.f32 %v11035_v15, %v5849_v11  ;;  %v5392_v52 = vmul.f32 %v10912_v32, %v10888_v22  ;;  %v5489_v29 = vmul.f32 %v10956_v16, %v11359_v12  ;;  %v5490_v55 = vmul.f32 %v10956_v16, %v11408_v38 }
 0x48a   : > { %v4878_v20 = vadd.f32 %v4835_v27, %v4688_v49  ;;  %v5255_v53 = vrot.slane %v5223_v60, 5  ;;  %v5717_v49 = vadd.f32 %v5685_v58, %v5652_v13  ;;  %v3933_v27 = vadd.f32 %v3898_v45, %v3185_v5  ;;  %v4689_v13 = vld [vmem:[#allocation3 + $0xd0] sm:$0xff] }
 0x48b   : > { %v5256_v31 = vrot.slane %v11440_v39, 5  ;;  %v5750_v60 = vrot.slane %v11448_v51, 3  ;;  %v5919_v40 = vmax.f32 %v5887_v47, 0.0  ;;  %v5457_v63 = vadd.f32 %v5425_v33, %v5392_v52 }
 0x48c   : > { %4910 = vst.msk [vmem:[#allocation3 + $0xc8] sm:$0xff] %vm1682_vm7, %v4878_v20  ;;  %v5295_v36 = vsel %vm5275_vm12, %v5254_v19, %v5255_v53  ;;  %v5749_v37 = vrot.slane %v5717_v49, 3  ;;  %v5918_v22 = vmax.f32 %v5886_v56, 0.0  ;;  %v5456_v41 = vadd.f32 %v5424_v8, %v5391_v35  ;;  %v11483_v49 = vld [vmem:[#allocation2 + $0x138] sm:$0xff]  ;;  %v11494_v8 = vld [vmem:[#allocation2 + $0x140] sm:$0xff] }
 0x48d   : > { %3965 = vst.msk [vmem:[#allocation3 + $0xf0] sm:$0xff] %vm1682_vm7, %v3933_v27  ;;  %v5294_v58 = vsel %vm5275_vm12, %v5255_v53, %v5256_v31  ;;  %v5326_v4 = vsel %vm5308_vm15, %v5295_v36, 0.0  ;;  %v5522_v19 = vadd.f32 %v5490_v55, %v5457_v63  ;;  %v5096_v5 = vmul.f32 %v10937_v2, %v10886_v24  ;;  %v3186_v63 = vld [vmem:[#allocation3 + $0xf8] sm:$0xff] }
 0x48e   : > { %v5786_v34 = vsel %vm5768_vm14, %v5749_v37, %v5750_v60  ;;  %v5945_v45 = vpack.c.bf16 %v5919_v40, %v5918_v22  ;;  %v5521_v1 = vadd.f32 %v5489_v29, %v5456_v41  ;;  %v5031_v47 = vmul.f32 %v10931_v42, %v10882_v62 }
 0x48f   : > { %v5554_v53 = vadd.f32 %v5522_v19, %v5294_v58  ;;  %v5820_v27 = vsel %vm5802_vm13, %v5786_v34, 0.0  ;;  %v5097_v33 = vmul.f32 %v10998_v46, %v10886_v24  ;;  %v5193_v56 = vmul.f32 %v10890_v44, %v11427_v43 }
 0x490   : > { %v5553_v2 = vadd.f32 %v5521_v1, %v5326_v4  ;;  %v5032_v35 = vmul.f32 %v10986_v17, %v10882_v62  ;;  %v5590_v42 = vmul.f32 %v10925_v30, %v11039_v14  ;;  %v12552_v29 = vrot.slane %v11384_v7, 3  ;;  %v3900_v7 = vpop.f32.mrf.mxu1 }
 0x491   : > { %v4838_v20 = vpop.f32.mrf.mxu3  ;;  %v5194_v40 = vmul.f32 %v10890_v44, %v11483_v49  ;;  %v5623_v36 = vmul.f32 %v10934_v54, %v11049_v0  ;;  %v5852_v58 = vadd.f32 %v5820_v27, %v5554_v53  ;;  %v5589_v41 = vmul.f32 %v10925_v30, %v10986_v17 }
 0x492   : > { %v4879_v11 = vadd.f32 %v4838_v20, %v4689_v13  ;;  %v5622_v13 = vmul.f32 %v10934_v54, %v10998_v46  ;;  %v4690_v20 = vld [vmem:[#allocation3 + $0xd8] sm:$0xff]  ;;  %v5787_v55 = vsel %vm5768_vm14, %v12552_v29, %v5749_v37  ;;  %v5687_v34 = vmul.f32 %v10948_v21, %v11483_v49 }
 0x493   : > { %v5129_v4 = vadd.f32 %v5097_v33, %v5032_v35  ;;  %v5655_v37 = vadd.f32 %v5623_v36, %v5590_v42  ;;  %v5889_v27 = vadd.f32 %v11035_v15, %v5852_v58  ;;  %v5394_v29 = vmul.f32 %v10912_v32, %v10986_v17  ;;  %v6849_v58 = vld [vmem:[#allocation2 + $0x70] sm:$0xff] }
 0x494   : > { %4911 = vst.msk [vmem:[#allocation3 + $0xd0] sm:$0xff] %vm1682_vm7, %v4879_v11  ;;  %v5128_v11 = vadd.f32 %v5096_v5, %v5031_v47  ;;  %v5688_v5 = vmul.f32 %v10948_v21, %v11494_v8  ;;  %v5654_v1 = vadd.f32 %v5622_v13, %v5589_v41  ;;  %v3934_v47 = vadd.f32 %v3900_v7, %v3186_v63 }
 0x495   : > { %v5427_v21 = vmul.f32 %v10918_v18, %v10998_v46  ;;  %v5921_v36 = vmax.f32 %v5889_v27, 0.0  ;;  %v5492_v63 = vmul.f32 %v10956_v16, %v11483_v49  ;;  %v5393_v41 = vmul.f32 %v6849_v58, %v10912_v32 }
 0x496   : > { %v5225_v19 = vadd.f32 %v5193_v56, %v5128_v11  ;;  %v11517_v53 = vadd.f32 %v5688_v5, %v5655_v37  ;;  %3966 = vst.msk [vmem:[#allocation3 + $0xf8] sm:$0xff] %vm1682_vm7, %v3934_v47  ;;  %v5491_v17 = vmul.f32 %v10956_v16, %v11427_v43  ;;  %v5033_v47 = vmul.f32 %v11039_v14, %v10882_v62 }
 0x497   : > { %v5459_v7 = vadd.f32 %v5427_v21, %v5394_v29  ;;  %v5034_v27 = vmul.f32 %v11084_v61, %v10882_v62  ;;  %v11560_v21 = vld [vmem:[#allocation2 + $0x148] sm:$0xff]  ;;  %v5624_v51 = vmul.f32 %v10934_v54, %v11098_v59 }
 0x498   : > { %6728 = vmatmul.msk.bf16.gmra.mxu0 %vm278_vm1, %v5945_v45  ;;  %v5851_v45 = vadd.f32 %v5787_v55, %v5553_v2  ;;  %v5257_v33 = vrot.slane %v5225_v19, 5  ;;  %v5752_v35 = vrot.slane %v11517_v53, 3  ;;  %v4691_v2 = vld [vmem:[#allocation3 + $0xe0] sm:$0xff]  ;;  %v6848_v55 = vld [vmem:[#allocation2 + $0xd0] sm:$0xff] }
 0x499   : > { %v4840_v52 = vpop.f32.mrf.mxu3  ;;  %v5426_v11 = vmul.f32 %v6848_v55, %v10918_v18  ;;  %v5524_v5 = vadd.f32 %v5492_v63, %v5459_v7 }
 0x49a   : > { %v4880_v22 = vadd.f32 %v4840_v52, %v4690_v20  ;;  %v11515_v20 = vadd.f32 %v5194_v40, %v5129_v4  ;;  %v5719_v52 = vadd.f32 %v5687_v34, %v5654_v1  ;;  %v5888_v56 = vadd.f32 %v11035_v15, %v5851_v45 }
 0x49b   : > { %v5293_v46 = vsel %vm5275_vm12, %v5256_v31, %v5257_v33  ;;  %v5458_v31 = vadd.f32 %v5426_v11, %v5393_v41  ;;  %v11570_v41 = vld [vmem:[#allocation2 + $0x150] sm:$0xff] }
 0x49c   : > { %4912 = vst.msk [vmem:[#allocation3 + $0xd8] sm:$0xff] %vm1682_vm7, %v4880_v22  ;;  %v5258_v13 = vrot.slane %v11515_v20, 5  ;;  %v5751_v22 = vrot.slane %v5719_v52, 3  ;;  %v5920_v34 = vmax.f32 %v5888_v56, 0.0  ;;  %v5328_v37 = vsel %vm5308_vm15, %v5293_v46, 0.0 }
 0x49d   : > { %v5523_v45 = vadd.f32 %v5491_v17, %v5458_v31  ;;  %v5099_v56 = vmul.f32 %v11098_v59, %v10886_v24  ;;  %v5591_v17 = vmul.f32 %v10925_v30, %v11084_v61 }
 0x49e   : > { %v5784_v4 = vsel %vm5768_vm14, %v5751_v22, %v5752_v35  ;;  %v5292_v39 = vsel %vm5275_vm12, %v5257_v33, %v5258_v13  ;;  %v5946_v19 = vpack.c.bf16 %v5921_v36, %v5920_v34  ;;  %v5098_v33 = vmul.f32 %v11049_v0, %v10886_v24 }
 0x49f   : > { %v5822_v1 = vsel %vm5802_vm13, %v5784_v4, 0.0  ;;  %v5556_v52 = vadd.f32 %v5524_v5, %v5292_v39  ;;  %v5555_v55 = vadd.f32 %v5523_v45, %v5328_v37  ;;  %v5785_v11 = vsel %vm5768_vm14, %v5750_v60, %v5751_v22  ;;  %v11586_v39 = vld [vmem:[%s12283_s1 + $0x48] ss:$0 sm:$0xff] }
 0x4a0   : > { %v5130_v46 = vadd.f32 %v5098_v33, %v5033_v47  ;;  %v5131_v58 = vadd.f32 %v5099_v56, %v5034_v27  ;;  %v5592_v34 = vmul.f32 %v10925_v30, %v11120_v50  ;;  %v5625_v60 = vmul.f32 %v10934_v54, %v11123_v3 }
 0x4a1   : > { %v4843_v42 = vpop.f32.mrf.mxu3  ;;  %v5854_v63 = vadd.f32 %v5822_v1, %v5556_v52  ;;  %v5853_v22 = vadd.f32 %v5785_v11, %v5555_v55  ;;  %v5689_v31 = vmul.f32 %v11586_v39, %v11560_v21  ;;  %v5690_v5 = vmul.f32 %v11586_v39, %v11570_v41 }
 0x4a2   : > { %v4881_v40 = vadd.f32 %v4843_v42, %v4691_v2  ;;  %v5195_v2 = vmul.f32 %v10890_v44, %v11494_v8  ;;  %v4692_v42 = vld [vmem:[#allocation3 + $0xe8] sm:$0xff]  ;;  %v5657_v37 = vadd.f32 %v5625_v60, %v5592_v34  ;;  %v5429_v1 = vmul.f32 %v10918_v18, %v11098_v59 }
 0x4a3   : > { %v5891_v45 = vadd.f32 %v11035_v15, %v5854_v63  ;;  %v5890_v56 = vadd.f32 %v11035_v15, %v5853_v22  ;;  %v5428_v11 = vmul.f32 %v10918_v18, %v11049_v0  ;;  %v5493_v0 = vmul.f32 %v10956_v16, %v11494_v8 }
 0x4a4   : > { %4913 = vst.msk [vmem:[#allocation3 + $0xe0] sm:$0xff] %vm1682_vm7, %v4881_v40  ;;  %v5196_v40 = vmul.f32 %v10890_v44, %v11560_v21  ;;  %v5227_v7 = vadd.f32 %v5195_v2, %v5130_v46  ;;  %v11596_v33 = vadd.f32 %v5690_v5, %v5657_v37  ;;  %v5396_v2 = vmul.f32 %v10912_v32, %v11084_v61  ;;  %v5068_v5 = vld [vmem:[#allocation2 + $0xf8] sm:$0xff] }
 0x4a5   : > { %v5923_v63 = vmax.f32 %v5891_v45, 0.0  ;;  %v5395_v46 = vmul.f32 %v10912_v32, %v11039_v14  ;;  %v5922_v14 = vmax.f32 %v5890_v56, 0.0  ;;  %v5100_v45 = vmul.f32 %v11123_v3, %v10886_v24 }
 0x4a6   : > { %v11581_v4 = vadd.f32 %v5196_v40, %v5131_v58  ;;  %v5259_v47 = vrot.slane %v5227_v7, 5  ;;  %v5754_v40 = vrot.slane %v11596_v33, 3  ;;  %v5461_v15 = vadd.f32 %v5429_v1, %v5396_v2  ;;  %v5165_v1 = vld [vmem:[#allocation2 + $0x158] sm:$0xff]  ;;  %v12553_v33 = vld [vmem:[#allocation7_spill] sm:$0xff] }
 0x4a7   : > { %v5947_v20 = vpack.c.bf16 %v5923_v63, %v5922_v14  ;;  %v5101_v53 = vmul.f32 %v10886_v24, %v5068_v5 }
 0x4a8   : > { %6729 = vmatmul.msk.bf16.gmra.mxu0 %vm278_vm1, %v5946_v19  ;;  %v5656_v19 = vadd.f32 %v5624_v51, %v5591_v17  ;;  %v5260_v27 = vrot.slane %v11581_v4, 5  ;;  %v5291_v58 = vsel %vm5275_vm12, %v5258_v13, %v5259_v47  ;;  %v5460_v51 = vadd.f32 %v5428_v11, %v5395_v46  ;;  %v11642_v11 = vld [vmem:[#allocation2 + $0x160] sm:$0xff] }
 0x4a9   : > { %v4845_v29 = vpop.f32.mrf.mxu3  ;;  %v5330_v13 = vsel %vm5308_vm15, %v5291_v58, 0.0  ;;  %v5593_v46 = vmul.f32 %v10925_v30, %v11166_v26 }
 0x4aa   : > { %v4882_v36 = vadd.f32 %v4845_v29, %v4692_v42  ;;  %v5721_v52 = vadd.f32 %v5689_v31, %v5656_v19  ;;  %v5494_v42 = vmul.f32 %v10956_v16, %v11560_v21  ;;  %v4693_v29 = vld [vmem:[#allocation3 + $0xf0] sm:$0xff]  ;;  %v5290_v61 = vsel %vm5275_vm12, %v5259_v47, %v5260_v27 }
 0x4ab   : > { %v5525_v7 = vadd.f32 %v5493_v0, %v5460_v51  ;;  %v5035_v31 = vmul.f32 %v11120_v50, %v10882_v62  ;;  %v5197_v47 = vmul.f32 %v10890_v44, %v11570_v41  ;;  %v5691_v51 = vmul.f32 %v11586_v39, %v5165_v1 }
 0x4ac   : > { %4914 = vst.msk [vmem:[#allocation3 + $0xe8] sm:$0xff] %vm1682_vm7, %v4882_v36  ;;  %v5753_v59 = vrot.slane %v5721_v52, 3  ;;  %v5526_v34 = vadd.f32 %v5494_v42, %v5461_v15  ;;  %v4694_v52 = vld [vmem:[#allocation3 + $0xf8] sm:$0xff]  ;;  %v5036_v42 = vmul.f32 %v11166_v26, %v10882_v62  ;;  %v5594_v15 = vmul.f32 %v10925_v30, %v11200_v57 }
 0x4ad   : > { %v5557_v2 = vadd.f32 %v5525_v7, %v5330_v13  ;;  %v5431_v13 = vmul.f32 %v10918_v18, %v5068_v5 }
 0x4ae   : > { %v5782_v17 = vsel %vm5768_vm14, %v5753_v59, %v5754_v40  ;;  %v5558_v22 = vadd.f32 %v5526_v34, %v5290_v61  ;;  %v5783_v19 = vsel %vm5768_vm14, %v5752_v35, %v5753_v59  ;;  %v5397_v59 = vmul.f32 %v10912_v32, %v11120_v50  ;;  %v11654_v61 = vld [vmem:[%s12284_s2 + $0x4] ss:$0 sm:$0xff] }
 0x4af   : > { %v5824_v60 = vsel %vm5802_vm13, %v5782_v17, 0.0  ;;  %v5133_v63 = vadd.f32 %v5101_v53, %v5036_v42  ;;  %v5626_v50 = vmul.f32 %v10934_v54, %v5068_v5  ;;  %v5627_v17 = vmul.f32 %v10934_v54, %v11204_v10 }
 0x4b0   : > { %v5856_v37 = vadd.f32 %v5824_v60, %v5558_v22  ;;  %v5430_v34 = vmul.f32 %v10918_v18, %v11123_v3  ;;  %v5692_v60 = vmul.f32 %v11586_v39, %v11642_v11  ;;  %v5495_v3 = vmul.f32 %v10956_v16, %v11570_v41 }
 0x4b1   : > { %v4848_v55 = vpop.f32.mrf.mxu3  ;;  %v5658_v22 = vadd.f32 %v5626_v50, %v5593_v46  ;;  %v5659_v7 = vadd.f32 %v5627_v17, %v5594_v15  ;;  %v5037_v17 = vmul.f32 %v11200_v57, %v10882_v62 }
 0x4b2   : > { %v4883_v36 = vadd.f32 %v4848_v55, %v4693_v29  ;;  %v5198_v29 = vmul.f32 %v10890_v44, %v5165_v1  ;;  %v5132_v55 = vadd.f32 %v5100_v45, %v5035_v31  ;;  %v5893_v58 = vadd.f32 %v11654_v61, %v5856_v37 }
 0x4b3   : > { %v5398_v37 = vmul.f32 %v10912_v32, %v11166_v26  ;;  %v5723_v5 = vadd.f32 %v5691_v51, %v5658_v22  ;;  %v5167_v51 = vld [vmem:[#allocation2 + $0x168] sm:$0xff] }
 0x4b4   : > { %4915 = vst.msk [vmem:[#allocation3 + $0xf0] sm:$0xff] %vm1682_vm7, %v4883_v36  ;;  %v5855_v36 = vadd.f32 %v5783_v19, %v5557_v2  ;;  %v5229_v0 = vadd.f32 %v5197_v47, %v5132_v55  ;;  %v11660_v14 = vadd.f32 %v5198_v29, %v5133_v63  ;;  %v5496_v47 = vmul.f32 %v10956_v16, %v5165_v1 }
 0x4b5   : > { %v5462_v2 = vadd.f32 %v5430_v34, %v5397_v59  ;;  %v5463_v42 = vadd.f32 %v5431_v13, %v5398_v37  ;;  %v5755_v53 = vrot.slane %v5723_v5, 3  ;;  %v11693_v59 = vld [vmem:[%s12286_s4 + $0x4] ss:$0 sm:$0xff]  ;;  %v5103_v34 = vmul.f32 %v12553_v33, %v10886_v24 }
 0x4b6   : > { %v5892_v31 = vadd.f32 %v11654_v61, %v5855_v36  ;;  %v5262_v19 = vrot.slane %v11660_v14, 5  ;;  %v5102_v14 = vmul.f32 %v11204_v10, %v10886_v24  ;;  %v5199_v13 = vmul.f32 %v10890_v44, %v11642_v11 }
 0x4b7   : > { %v5527_v55 = vadd.f32 %v5495_v3, %v5462_v2  ;;  %v5781_v63 = vsel %vm5768_vm14, %v5754_v40, %v5755_v53  ;;  %v5200_v3 = vmul.f32 %v10890_v44, %v5167_v51 }
 0x4b8   : > { %6730 = vmatmul.msk.bf16.gmra.mxu0 %vm278_vm1, %v5947_v20  ;;  %v5261_v20 = vrot.slane %v5229_v0, 5 }
 0x4b9   : > { %v4850_v56 = vpop.f32.mrf.mxu3 }
 0x4ba   : > { %v4884_v35 = vadd.f32 %v4850_v56, %v4694_v52  ;;  %v5289_v45 = vsel %vm5275_vm12, %v5260_v27, %v5261_v20  ;;  %v11679_v52 = vadd.f32 %v5692_v60, %v5659_v7  ;;  %v5925_v56 = vmax.f32 %v5893_v58, 0.0  ;;  %v12554_v60 = vld [vmem:[#allocation39_spill] sm:$0xff] }
 0x4bb   : > { %v5288_v26 = vsel %vm5275_vm12, %v5261_v20, %v5262_v19  ;;  %v5332_v4 = vsel %vm5308_vm15, %v5289_v45, 0.0  ;;  %v5528_v27 = vadd.f32 %v5496_v47, %v5463_v42  ;;  %v5038_v20 = vmul.f32 %v12554_v60, %v10882_v62 }
 0x4bc   : > { %4916 = vst.msk [vmem:[#allocation3 + $0xf8] sm:$0xff] %vm1682_vm7, %v4884_v35  ;;  %v5756_v29 = vrot.slane %v11679_v52, 3  ;;  %v5924_v35 = vmax.f32 %v5892_v31, 0.0  ;;  %v5559_v15 = vadd.f32 %v5527_v55, %v5332_v4  ;;  %v5134_v7 = vadd.f32 %v5102_v14, %v5037_v17 }
 0x4bd   : > { %v5560_v58 = vadd.f32 %v5528_v27, %v5288_v26  ;;  %v5595_v31 = vmul.f32 %v10925_v30, %v12554_v60  ;;  %v5135_v37 = vadd.f32 %v5103_v34, %v5038_v20  ;;  %v5432_v45 = vmul.f32 %v10918_v18, %v11204_v10 }
 0x4be   : > { %v5780_v1 = vsel %vm5768_vm14, %v5755_v53, %v5756_v29  ;;  %v5948_v46 = vpack.c.bf16 %v5925_v56, %v5924_v35  ;;  %v5857_v50 = vadd.f32 %v5781_v63, %v5559_v15  ;;  %v5628_v47 = vmul.f32 %v10934_v54, %v12553_v33  ;;  %v11721_v56 = vld [vmem:[#allocation2 + $0x170] sm:$0xff] }
 0x4bf   : > { %v5826_v0 = vsel %vm5802_vm13, %v5780_v1, 0.0  ;;  %v5231_v2 = vadd.f32 %v5199_v13, %v5134_v7  ;;  %v5399_v42 = vmul.f32 %v10912_v32, %v11200_v57  ;;  %v5596_v53 = vmul.f32 %v10925_v30, %v11278_v6 }
 0x4c0   : > { %v5858_v22 = vadd.f32 %v5826_v0, %v5560_v58  ;;  %v5894_v5 = vadd.f32 %v11654_v61, %v5857_v50  ;;  %v5629_v35 = vmul.f32 %v10934_v54, %v11282_v28  ;;  %v5660_v10 = vadd.f32 %v5628_v47, %v5595_v31 }
 0x4c1   : > { %v5693_v55 = vmul.f32 %v11586_v39, %v5167_v51  ;;  %v5433_v63 = vmul.f32 %v10918_v18, %v12553_v33  ;;  %v11734_v57 = vadd.f32 %v5200_v3, %v5135_v37  ;;  %v5694_v58 = vmul.f32 %v11586_v39, %v11721_v56 }
 0x4c2   : > { %v5895_v1 = vadd.f32 %v11654_v61, %v5858_v22  ;;  %v5661_v15 = vadd.f32 %v5629_v35, %v5596_v53  ;;  %v5497_v17 = vmul.f32 %v10956_v16, %v11642_v11  ;;  %v5400_v33 = vmul.f32 %v10912_v32, %v12554_v60  ;;  %v5169_v35 = vld [vmem:[#allocation2 + $0x178] sm:$0xff] }
 0x4c3   : > { %v5725_v14 = vadd.f32 %v5693_v55, %v5660_v10  ;;  %v5926_v13 = vmax.f32 %v5894_v5, 0.0  ;;  %v5264_v22 = vrot.slane %v11734_v57, 5  ;;  %v5498_v11 = vmul.f32 %v10956_v16, %v5167_v51 }
 0x4c4   : > { %v11742_v34 = vadd.f32 %v5694_v58, %v5661_v15  ;;  %v5927_v20 = vmax.f32 %v5895_v1, 0.0  ;;  %v5040_v53 = vmul.f32 %v11325_v25, %v10882_v62  ;;  %v5202_v1 = vmul.f32 %v10890_v44, %v5169_v35 }
 0x4c5   : > { %v6023_v36 = vpop.f32.mrf.mxu0  ;;  %v5757_v3 = vrot.slane %v5725_v14, 3  ;;  %v5597_v52 = vmul.f32 %v10925_v30, %v11325_v25 }
 0x4c6   : > { %v6024_v40 = vadd.f32 %v11693_v59, %v6023_v36  ;;  %v5263_v36 = vrot.slane %v5231_v2, 5  ;;  %v5758_v31 = vrot.slane %v11742_v34, 3  ;;  %v5949_v47 = vpack.c.bf16 %v5927_v20, %v5926_v13 }
 0x4c7   : > { %v5779_v10 = vsel %vm5768_vm14, %v5756_v29, %v5757_v3  ;;  %v5630_v29 = vmul.f32 %v10934_v54, %v11339_v48 }
 0x4c8   : > { %6731 = vmatmul.msk.bf16.gmra.mxu0 %vm278_vm1, %v5948_v46  ;;  %v6103_v26 = vmax.f32 %v6024_v40, 0.0  ;;  %v5464_v46 = vadd.f32 %v5432_v45, %v5399_v42  ;;  %v5287_v50 = vsel %vm5275_vm12, %v5262_v19, %v5263_v36  ;;  %v5465_v19 = vadd.f32 %v5433_v63, %v5400_v33 }
 0x4c9   : > { %v5334_v7 = vsel %vm5308_vm15, %v5287_v50, 0.0  ;;  %v5778_v60 = vsel %vm5768_vm14, %v5757_v3, %v5758_v31  ;;  %v5286_v5 = vsel %vm5275_vm12, %v5263_v36, %v5264_v22  ;;  %v5039_v42 = vmul.f32 %v11278_v6, %v10882_v62 }
 0x4ca   : > { %v5529_v37 = vadd.f32 %v5497_v17, %v5464_v46  ;;  %v5530_v51 = vadd.f32 %v5498_v11, %v5465_v19  ;;  %v5828_v55 = vsel %vm5802_vm13, %v5778_v60, 0.0  ;;  %v11778_v46 = vld [vmem:[#allocation2 + $0xc0] sm:$0xff]  ;;  %v5695_v19 = vmul.f32 %v11586_v39, %v5169_v35 }
 0x4cb   : > { %v11785_v17 = vld [vmem:[#allocation2 + $0x180] sm:$0xff]  ;;  %v5598_v13 = vmul.f32 %v10925_v30, %v11778_v46  ;;  %v5402_v3 = vmul.f32 %v10912_v32, %v11325_v25  ;;  %v5401_v25 = vmul.f32 %v10912_v32, %v11278_v6 }
 0x4cc   : > { %v5561_v2 = vadd.f32 %v5529_v37, %v5334_v7  ;;  %v5562_v36 = vadd.f32 %v5530_v51, %v5286_v5  ;;  %v5662_v7 = vadd.f32 %v5630_v29, %v5597_v52  ;;  %v5696_v60 = vmul.f32 %v11586_v39, %v11785_v17  ;;  %v5009_v29 = vld [vmem:[#allocation2 + $0xc8] sm:$0xff] }
 0x4cd   : > { %v6025_v4 = vpop.f32.mrf.mxu0 }
 0x4ce   : > { %v6026_v27 = vadd.f32 %v11693_v59, %v6025_v4  ;;  %v5105_v4 = vmul.f32 %v11339_v48, %v10886_v24  ;;  %v5859_v63 = vadd.f32 %v5779_v10, %v5561_v2  ;;  %v5860_v50 = vadd.f32 %v5828_v55, %v5562_v36 }
 0x4cf   : > { %v5727_v5 = vadd.f32 %v5695_v19, %v5662_v7  ;;  %v5499_v36 = vmul.f32 %v10956_v16, %v11721_v56  ;;  %v5106_v7 = vmul.f32 %v11359_v12, %v10886_v24  ;;  %v5107_v19 = vmul.f32 %v11408_v38, %v10886_v24 }
 0x4d0   : > { %v6104_v0 = vmax.f32 %v6026_v27, 0.0  ;;  %v5201_v27 = vmul.f32 %v10890_v44, %v11721_v56  ;;  %v5137_v58 = vadd.f32 %v5105_v4, %v5040_v53  ;;  %v5896_v37 = vadd.f32 %v11654_v61, %v5859_v63 }
 0x4d1   : > { %v5897_v53 = vadd.f32 %v11654_v61, %v5860_v50  ;;  %v5759_v63 = vrot.slane %v5727_v5, 3 }
 0x4d2   : > { %v6135_v40 = vpack.c.bf16 %v6104_v0, %v6103_v26  ;;  %v5104_v26 = vmul.f32 %v11282_v28, %v10886_v24  ;;  %v11789_v33 = vadd.f32 %v5202_v1, %v5137_v58  ;;  %v5928_v55 = vmax.f32 %v5896_v37, 0.0 }
 0x4d3   : > { %v5929_v58 = vmax.f32 %v5897_v53, 0.0  ;;  %v5777_v37 = vsel %vm5768_vm14, %v5758_v31, %v5759_v63  ;;  %v5632_v53 = vmul.f32 %v10934_v54, %v11408_v38  ;;  %v11852_v31 = vld [vmem:[#allocation2 + $0x190] sm:$0xff] }
 0x4d4   : > { %6740 = vmatmul.msk.bf16.vlgmr.msra.gmra.mxu1 %vm278_vm1, %v6135_v40  ;;  %v5136_v15 = vadd.f32 %v5104_v26, %v5039_v42  ;;  %v5631_v40 = vmul.f32 %v10934_v54, %v11359_v12  ;;  %v5266_v4 = vrot.slane %v11789_v33, 5 }
 0x4d5   : > { %v6028_v45 = vpop.f32.mrf.mxu0 }
 0x4d6   : > { %v6029_v0 = vadd.f32 %v11693_v59, %v6028_v45  ;;  %v5233_v14 = vadd.f32 %v5201_v27, %v5136_v15  ;;  %v5435_v45 = vmul.f32 %v10918_v18, %v11339_v48  ;;  %v5663_v2 = vadd.f32 %v5631_v40, %v5598_v13 }
 0x4d7   : > { %v5500_v27 = vmul.f32 %v10956_v16, %v5169_v35  ;;  %v5041_v40 = vmul.f32 %v10882_v62, %v11778_v46  ;;  %v5042_v13 = vmul.f32 %v10882_v62, %v5009_v29 }
 0x4d8   : > { %6732 = vmatmul.msk.bf16.gmra.mxu0 %vm278_vm1, %v5949_v47  ;;  %v5434_v47 = vmul.f32 %v10918_v18, %v11282_v28  ;;  %v6105_v42 = vmax.f32 %v6029_v0, 0.0  ;;  %v5265_v26 = vrot.slane %v5233_v14, 5  ;;  %v11808_v10 = vadd.f32 %v5696_v60, %v5663_v2  ;;  %v11846_v60 = vld [vmem:[#allocation2 + $0xd0] sm:$0xff] }
 0x4d9   : > { %v5467_v28 = vadd.f32 %v5435_v45, %v5402_v3  ;;  %v5950_v0 = vpack.c.bf16 %v5929_v58, %v5928_v55  ;;  %v5203_v3 = vmul.f32 %v10890_v44, %v11785_v17  ;;  %v5138_v5 = vadd.f32 %v5106_v7, %v5041_v40 }
 0x4da   : > { %v5466_v1 = vadd.f32 %v5434_v47, %v5401_v25  ;;  %v5760_v15 = vrot.slane %v11808_v10, 3  ;;  %v5285_v6 = vsel %vm5275_vm12, %v5264_v22, %v5265_v26  ;;  %v5284_v35 = vsel %vm5275_vm12, %v5265_v26, %v5266_v4 }
 0x4db   : > { %v5532_v50 = vadd.f32 %v5500_v27, %v5467_v28  ;;  %v5336_v57 = vsel %vm5308_vm15, %v5285_v6, 0.0  ;;  %v5235_v25 = vadd.f32 %v5203_v3, %v5138_v5  ;;  %v5600_v27 = vmul.f32 %v10925_v30, %v11846_v60 }
 0x4dc   : > { %v5776_v56 = vsel %vm5768_vm14, %v5759_v63, %v5760_v15  ;;  %v5531_v14 = vadd.f32 %v5499_v36, %v5466_v1  ;;  %v5404_v6 = vmul.f32 %v10912_v32, %v5009_v29  ;;  %v5501_v3 = vmul.f32 %v10956_v16, %v11785_v17 }
 0x4dd   : > { %v6030_v20 = vpop.f32.mrf.mxu0  ;;  %v5830_v22 = vsel %vm5802_vm13, %v5776_v56, 0.0  ;;  %v5267_v40 = vrot.slane %v5235_v25, 5 }
 0x4de   : > { %v6031_v11 = vadd.f32 %v11693_v59, %v6030_v20  ;;  %v5564_v20 = vadd.f32 %v5532_v50, %v5284_v35  ;;  %v5563_v47 = vadd.f32 %v5531_v14, %v5336_v57  ;;  %v5436_v35 = vmul.f32 %v10918_v18, %v11359_v12 }
 0x4e0   : > { %v6106_v51 = vmax.f32 %v6031_v11, 0.0  ;;  %v5171_v11 = vld [vmem:[#allocation2 + $0x188] sm:$0xff]  ;;  %v5862_v2 = vadd.f32 %v5830_v22, %v5564_v20  ;;  %v5861_v26 = vadd.f32 %v5777_v37, %v5563_v47 }
 0x4e1   : > { %v5204_v45 = vmul.f32 %v10890_v44, %v5171_v11  ;;  %v5697_v36 = vmul.f32 %v11586_v39, %v5171_v11 }
 0x4e2   : > { %v6136_v48 = vpack.c.bf16 %v6106_v51, %v6105_v42  ;;  %v5139_v42 = vadd.f32 %v5107_v19, %v5042_v13  ;;  %v5599_v51 = vmul.f32 %v10925_v30, %v5009_v29  ;;  %v5899_v58 = vadd.f32 %v11654_v61, %v5862_v2 }
 0x4e3   : > { %v5898_v22 = vadd.f32 %v11654_v61, %v5861_v26  ;;  %v5403_v29 = vmul.f32 %v10912_v32, %v11778_v46  ;;  %v5502_v19 = vmul.f32 %v10956_v16, %v5171_v11  ;;  %v5283_v46 = vsel %vm5275_vm12, %v5266_v4, %v5267_v40 }
 0x4e4   : > { %6741 = vmatmul.msk.bf16.gmra.mxu1 %vm278_vm1, %v6136_v48  ;;  %v5633_v48 = vmul.f32 %v10934_v54, %v11427_v43  ;;  %v11856_v28 = vadd.f32 %v5204_v45, %v5139_v42  ;;  %v5664_v1 = vadd.f32 %v5632_v53, %v5599_v51  ;;  %v5931_v7 = vmax.f32 %v5899_v58, 0.0  ;;  %v5011_v42 = vld [vmem:[#allocation2 + $0xd8] sm:$0xff] }
 0x4e5   : > { %v6033_v52 = vpop.f32.mrf.mxu0  ;;  %v5468_v37 = vadd.f32 %v5436_v35, %v5403_v29  ;;  %v5930_v2 = vmax.f32 %v5898_v22, 0.0  ;;  %v5338_v33 = vsel %vm5308_vm15, %v5283_v46, 0.0  ;;  %v5043_v26 = vmul.f32 %v10882_v62, %v11846_v60  ;;  %v11912_v35 = vld [vmem:[#allocation2 + $0xe0] sm:$0xff] }
 0x4e6   : > { %v6034_v34 = vadd.f32 %v11693_v59, %v6033_v52  ;;  %v5437_v52 = vmul.f32 %v10918_v18, %v11408_v38  ;;  %v5665_v56 = vadd.f32 %v5633_v48, %v5600_v27  ;;  %v5729_v50 = vadd.f32 %v5697_v36, %v5664_v1  ;;  %v5173_v1 = vld [vmem:[#allocation2 + $0x198] sm:$0xff] }
 0x4e7   : > { %v5268_v20 = vrot.slane %v11856_v28, 5  ;;  %v5951_v51 = vpack.c.bf16 %v5931_v7, %v5930_v2  ;;  %v5044_v48 = vmul.f32 %v10882_v62, %v5011_v42  ;;  %v5109_v27 = vmul.f32 %v11483_v49, %v10886_v24 }
 0x4e8   : > { %6733 = vmatmul.msk.bf16.gmra.mxu0 %vm278_vm1, %v5950_v0  ;;  %v5698_v0 = vmul.f32 %v11586_v39, %v11852_v31  ;;  %v6107_v57 = vmax.f32 %v6034_v34, 0.0  ;;  %v5469_v12 = vadd.f32 %v5437_v52, %v5404_v6  ;;  %v5761_v45 = vrot.slane %v5729_v50, 3 }
 0x4e9   : > { %v5282_v11 = vsel %vm5275_vm12, %v5267_v40, %v5268_v20  ;;  %v5533_v34 = vadd.f32 %v5501_v3, %v5468_v37  ;;  %v5206_v58 = vmul.f32 %v10890_v44, %v5173_v1  ;;  %v5601_v50 = vmul.f32 %v10925_v30, %v5011_v42 }
 0x4ea   : > { %v11874_v13 = vadd.f32 %v5698_v0, %v5665_v56  ;;  %v5534_v53 = vadd.f32 %v5502_v19, %v5469_v12  ;;  %v5775_v36 = vsel %vm5768_vm14, %v5760_v15, %v5761_v45  ;;  %v5141_v0 = vadd.f32 %v5109_v27, %v5044_v48  ;;  %v11918_v15 = vld [vmem:[#allocation2 + $0x1a0] sm:$0xff] }
 0x4eb   : > { %v5565_v6 = vadd.f32 %v5533_v34, %v5338_v33  ;;  %v5635_v40 = vmul.f32 %v10934_v54, %v11494_v8  ;;  %v5602_v7 = vmul.f32 %v10925_v30, %v11912_v35  ;;  %v5699_v19 = vmul.f32 %v11586_v39, %v5173_v1 }
 0x4ec   : > { %v5762_v47 = vrot.slane %v11874_v13, 3  ;;  %v5566_v25 = vadd.f32 %v5534_v53, %v5282_v11  ;;  %v5439_v2 = vmul.f32 %v10918_v18, %v11483_v49  ;;  %v5438_v46 = vmul.f32 %v10918_v18, %v11427_v43 }
 0x4ed   : > { %v6035_v55 = vpop.f32.mrf.mxu0  ;;  %v5700_v11 = vmul.f32 %v11586_v39, %v11918_v15  ;;  %v5504_v48 = vmul.f32 %v10956_v16, %v5173_v1  ;;  %v5503_v27 = vmul.f32 %v10956_v16, %v11852_v31 }
 0x4ee   : > { %v6036_v63 = vadd.f32 %v11693_v59, %v6035_v55  ;;  %v5774_v17 = vsel %vm5768_vm14, %v5761_v45, %v5762_v47  ;;  %v5108_v55 = vmul.f32 %v11427_v43, %v10886_v24  ;;  %v5406_v45 = vmul.f32 %v10912_v32, %v5011_v42 }
 0x4ef   : > { %v5832_v4 = vsel %vm5802_vm13, %v5774_v17, 0.0  ;;  %v5405_v42 = vmul.f32 %v10912_v32, %v11846_v60 }
 0x4f0   : > { %v6108_v14 = vmax.f32 %v6036_v63, 0.0  ;;  %v5205_v63 = vmul.f32 %v10890_v44, %v11852_v31  ;;  %v5864_v52 = vadd.f32 %v5832_v4, %v5566_v25  ;;  %v5140_v56 = vadd.f32 %v5108_v55, %v5043_v26 }
 0x4f1   : > { %v5471_v43 = vadd.f32 %v5439_v2, %v5406_v45  ;;  %v5470_v55 = vadd.f32 %v5438_v46, %v5405_v42  ;;  %v11978_v45 = vld [vmem:[#allocation2 + $0xf0] sm:$0xff] }
 0x4f2   : > { %v6137_v38 = vpack.c.bf16 %v6108_v14, %v6107_v57  ;;  %v5634_v57 = vmul.f32 %v10934_v54, %v11483_v49  ;;  %v5863_v14 = vadd.f32 %v5775_v36, %v5565_v6  ;;  %v5237_v22 = vadd.f32 %v5205_v63, %v5140_v56 }
 0x4f3   : > { %v5901_v3 = vadd.f32 %v11654_v61, %v5864_v52  ;;  %v5013_v52 = vld [vmem:[#allocation2 + $0xe8] sm:$0xff]  ;;  %v5604_v42 = vmul.f32 %v10925_v30, %v11978_v45 }
 0x4f4   : > { %6742 = vmatmul.msk.bf16.gmra.mxu1 %vm278_vm1, %v6137_v38  ;;  %v11922_v38 = vadd.f32 %v5206_v58, %v5141_v0  ;;  %v5666_v12 = vadd.f32 %v5634_v57, %v5601_v50  ;;  %v5900_v33 = vadd.f32 %v11654_v61, %v5863_v14  ;;  %v5269_v34 = vrot.slane %v5237_v22, 5 }
 0x4f5   : > { %v6038_v5 = vpop.f32.mrf.mxu0  ;;  %v5933_v25 = vmax.f32 %v5901_v3, 0.0  ;;  %v5536_v0 = vadd.f32 %v5504_v48, %v5471_v43  ;;  %v5535_v50 = vadd.f32 %v5503_v27, %v5470_v55  ;;  %v5045_v57 = vmul.f32 %v10882_v62, %v11912_v35 }
 0x4f6   : > { %v6039_v10 = vadd.f32 %v11693_v59, %v6038_v5  ;;  %v5667_v5 = vadd.f32 %v5635_v40, %v5602_v7  ;;  %v5731_v17 = vadd.f32 %v5699_v19, %v5666_v12  ;;  %v5270_v4 = vrot.slane %v11922_v38, 5 }
 0x4f7   : > { %v5932_v58 = vmax.f32 %v5900_v33, 0.0  ;;  %v5281_v60 = vsel %vm5275_vm12, %v5268_v20, %v5269_v34  ;;  %v5046_v14 = vmul.f32 %v10882_v62, %v5013_v52  ;;  %v5110_v22 = vmul.f32 %v11494_v8, %v10886_v24 }
 0x4f8   : > { %6734 = vmatmul.msk.bf16.gmra.mxu0 %vm278_vm1, %v5951_v51  ;;  %v6109_v51 = vmax.f32 %v6039_v10, 0.0  ;;  %v11940_v26 = vadd.f32 %v5700_v11, %v5667_v5  ;;  %v5763_v36 = vrot.slane %v5731_v17, 3  ;;  %v5280_v1 = vsel %vm5275_vm12, %v5269_v34, %v5270_v4 }
 0x4f9   : > { %v5952_v56 = vpack.c.bf16 %v5933_v25, %v5932_v58  ;;  %v5340_v28 = vsel %vm5308_vm15, %v5281_v60, 0.0  ;;  %v5568_v10 = vadd.f32 %v5536_v0, %v5280_v1  ;;  %v5111_v40 = vmul.f32 %v11560_v21, %v10886_v24 }
 0x4fa   : > { %v5764_v63 = vrot.slane %v11940_v26, 3  ;;  %v5773_v7 = vsel %vm5768_vm14, %v5762_v47, %v5763_v36  ;;  %v5207_v12 = vmul.f32 %v10890_v44, %v11918_v15  ;;  %v5142_v2 = vadd.f32 %v5110_v22, %v5045_v57  ;;  %v11984_v47 = vld [vmem:[#allocation2 + $0x1b0] sm:$0xff] }
 0x4fb   : > { %v5143_v46 = vadd.f32 %v5111_v40, %v5046_v14  ;;  %v5603_v5 = vmul.f32 %v10925_v30, %v5013_v52  ;;  %v5636_v11 = vmul.f32 %v10934_v54, %v11560_v21  ;;  %v5440_v55 = vmul.f32 %v10918_v18, %v11494_v8 }
 0x4fc   : > { %v5772_v31 = vsel %vm5768_vm14, %v5763_v36, %v5764_v63  ;;  %v5441_v27 = vmul.f32 %v10918_v18, %v11560_v21  ;;  %v5702_v60 = vmul.f32 %v11586_v39, %v11984_v47  ;;  %v5408_v0 = vmul.f32 %v10912_v32, %v5013_v52 }
 0x4fd   : > { %v6040_v29 = vpop.f32.mrf.mxu0  ;;  %v5834_v20 = vsel %vm5802_vm13, %v5772_v31, 0.0  ;;  %v5407_v8 = vmul.f32 %v10912_v32, %v11912_v35  ;;  %v5505_v21 = vmul.f32 %v10956_v16, %v11918_v15 }
 0x4fe   : > { %v6041_v37 = vadd.f32 %v11693_v59, %v6040_v29  ;;  %v5175_v29 = vld [vmem:[#allocation2 + $0x1a8] sm:$0xff]  ;;  %v5866_v3 = vadd.f32 %v5834_v20, %v5568_v10  ;;  %v5473_v10 = vadd.f32 %v5441_v27, %v5408_v0 }
 0x4ff   : > { %v5208_v19 = vmul.f32 %v10890_v44, %v5175_v29  ;;  %v5701_v25 = vmul.f32 %v11586_v39, %v5175_v29  ;;  %v5506_v14 = vmul.f32 %v10956_v16, %v5175_v29  ;;  %v5472_v22 = vadd.f32 %v5440_v55, %v5407_v8 }
 0x500   : > { %v6110_v53 = vmax.f32 %v6041_v37, 0.0  ;;  %v5567_v37 = vadd.f32 %v5535_v50, %v5340_v28  ;;  %v5903_v48 = vadd.f32 %v11654_v61, %v5866_v3 }
 0x501   : > { %v11988_v34 = vadd.f32 %v5208_v19, %v5143_v46  ;;  %v5538_v19 = vadd.f32 %v5506_v14, %v5473_v10  ;;  %v12555_v10 = vld [vmem:[#allocation12_spill] sm:$0xff] }
 0x502   : > { %v6138_v49 = vpack.c.bf16 %v6110_v53, %v6109_v51  ;;  %v5865_v17 = vadd.f32 %v5773_v7, %v5567_v37  ;;  %v5239_v51 = vadd.f32 %v5207_v12, %v5142_v2  ;;  %v5637_v53 = vmul.f32 %v10934_v54, %v11570_v41 }
 0x503   : > { %v5272_v28 = vrot.slane %v11988_v34, 5  ;;  %v5935_v57 = vmax.f32 %v5903_v48, 0.0  ;;  %v5537_v37 = vadd.f32 %v5505_v21, %v5472_v22  ;;  %v5047_v2 = vmul.f32 %v10882_v62, %v11978_v45 }
 0x504   : > { %6743 = vmatmul.msk.bf16.gmra.mxu1 %vm278_vm1, %v6138_v49  ;;  %v5668_v49 = vadd.f32 %v5636_v11, %v5603_v5  ;;  %v5271_v36 = vrot.slane %v5239_v51, 5  ;;  %v5669_v58 = vadd.f32 %v5637_v53, %v5604_v42  ;;  %v5112_v11 = vmul.f32 %v11570_v41, %v10886_v24  ;;  %v6852_v51 = vld [vmem:[#allocation2 + $0xf8] sm:$0xff] }
 0x505   : > { %v6043_v6 = vpop.f32.mrf.mxu0  ;;  %v5605_v53 = vmul.f32 %v6852_v51, %v10925_v30  ;;  %v6853_v42 = vld [vmem:[#allocation2 + $0x158] sm:$0xff]  ;;  %v12556_v14 = vrot.slane %v12555_v10, 5 }
 0x506   : > { %v6044_v13 = vadd.f32 %v11693_v59, %v6043_v6  ;;  %v5733_v6 = vadd.f32 %v5701_v25, %v5668_v49  ;;  %v12008_v50 = vadd.f32 %v5702_v60, %v5669_v58  ;;  %v5279_v52 = vsel %vm5275_vm12, %v5270_v4, %v5271_v36  ;;  %v6854_v25 = vld [vmem:[#allocation2 + $0x1b8] sm:$0xff] }
 0x507   : > { %v5278_v12 = vsel %vm5275_vm12, %v5271_v36, %v5272_v28  ;;  %v5342_v4 = vsel %vm5308_vm15, %v5279_v52, 0.0  ;;  %v5144_v62 = vadd.f32 %v5112_v11, %v5047_v2  ;;  %v5638_v49 = vmul.f32 %v6853_v42, %v10934_v54 }
 0x508   : > { %6735 = vmatmul.msk.bf16.gmra.mxu0 %vm278_vm1, %v5952_v56  ;;  %v6111_v1 = vmax.f32 %v6044_v13, 0.0  ;;  %v5902_v56 = vadd.f32 %v11654_v61, %v5865_v17  ;;  %v5765_v40 = vrot.slane %v5733_v6, 3  ;;  %v5766_v7 = vrot.slane %v12008_v50, 3 }
 0x509   : > { %v5570_v46 = vadd.f32 %v5538_v19, %v5278_v12  ;;  %v5209_v13 = vmul.f32 %v10890_v44, %v11984_v47  ;;  %v5569_v17 = vadd.f32 %v5537_v37, %v5342_v4  ;;  %v5703_v26 = vmul.f32 %v6854_v25, %v11586_v39 }
 0x50a   : > { %v5934_v35 = vmax.f32 %v5902_v56, 0.0  ;;  %v5770_v38 = vsel %vm5768_vm14, %v5765_v40, %v5766_v7  ;;  %v5771_v5 = vsel %vm5768_vm14, %v5764_v63, %v5765_v40  ;;  %v5443_v24 = vmul.f32 %v6853_v42, %v10918_v18 }
 0x50b   : > { %v5836_v3 = vsel %vm5802_vm13, %v5770_v38, 0.0  ;;  %v5241_v48 = vadd.f32 %v5209_v13, %v5144_v62  ;;  %v5670_v55 = vadd.f32 %v5638_v49, %v5605_v53  ;;  %v5410_v36 = vmul.f32 %v6852_v51, %v10912_v32 }
 0x50c   : > { %v5953_v29 = vpack.c.bf16 %v5935_v57, %v5934_v35  ;;  %v5442_v39 = vmul.f32 %v10918_v18, %v11570_v41  ;;  %v5508_v6 = vmul.f32 %v6854_v25, %v10956_v16  ;;  %v5507_v18 = vmul.f32 %v10956_v16, %v11984_v47  ;;  %v12557_v35 = vld [vmem:[#allocation9_spill] sm:$0xff] }
 0x50d   : > { %v6045_v33 = vpop.f32.mrf.mxu0  ;;  %v5735_v58 = vadd.f32 %v5703_v26, %v5670_v55  ;;  %v5475_v56 = vadd.f32 %v5443_v24, %v5410_v36  ;;  %v4949_v24 = vld [vmem:[#allocation3] sm:$0xff] }
 0x50e   : > { %v6046_v43 = vadd.f32 %v11693_v59, %v6045_v33  ;;  %v5868_v33 = vadd.f32 %v5836_v3, %v5570_v46  ;;  %v12095_v36 = vld [vmem:[%s12288_s6] ss:$0 sm:$0xff] }
 0x50f   : > { %v5767_v0 = vrot.slane %v5735_v58, 3  ;;  %v5540_v40 = vadd.f32 %v5508_v6, %v5475_v56  ;;  %v4950_v58 = vld [vmem:[#allocation3 + $0x8] sm:$0xff] }
 0x510   : > { %v6112_v31 = vmax.f32 %v6046_v43, 0.0  ;;  %v5867_v43 = vadd.f32 %v5771_v5, %v5569_v17  ;;  %v5905_v30 = vadd.f32 %v11654_v61, %v5868_v33 }
 0x512   : > { %v6139_v20 = vpack.c.bf16 %v6112_v31, %v6111_v1  ;;  %v5904_v54 = vadd.f32 %v11654_v61, %v5867_v43  ;;  %v5273_v31 = vrot.slane %v5241_v48, 5  ;;  %v5937_v21 = vmax.f32 %v5905_v30, 0.0 }
 0x514   : > { %6744 = vmatmul.msk.bf16.gmra.mxu1 %vm278_vm1, %v6139_v20  ;;  %v5409_v20 = vmul.f32 %v10912_v32, %v11978_v45  ;;  %v5936_v57 = vmax.f32 %v5904_v54, 0.0  ;;  %v5276_v52 = vsel %vm5275_vm12, %v5273_v31, %v12556_v14  ;;  %v5277_v41 = vsel %vm5275_vm12, %v5272_v28, %v5273_v31 }
 0x515   : > { %v6048_v15 = vpop.f32.mrf.mxu0  ;;  %v12558_v32 = vrot.slane %v12557_v35, 3  ;;  %v5572_v38 = vadd.f32 %v5540_v40, %v5276_v52  ;;  %v5344_v16 = vsel %vm5308_vm15, %v5277_v41, 0.0  ;;  %v5769_v28 = vsel %vm5768_vm14, %v5766_v7, %v5767_v0  ;;  %v4952_v40 = vld [vmem:[#allocation3 + $0x18] sm:$0xff] }
 0x516   : > { %v6049_v63 = vadd.f32 %v11693_v59, %v6048_v15  ;;  %v5474_v22 = vadd.f32 %v5442_v39, %v5409_v20  ;;  %v5954_v12 = vpack.c.bf16 %v5937_v21, %v5936_v57  ;;  %v4951_v20 = vld [vmem:[#allocation3 + $0x10] sm:$0xff] }
 0x517   : > { %v5800_v45 = vsel %vm5768_vm14, %v5767_v0, %v12558_v32 }
 0x518   : > { %6736 = vmatmul.msk.bf16.gmra.mxu0 %vm278_vm1, %v5953_v29  ;;  %v6113_v60 = vmax.f32 %v6049_v63, 0.0  ;;  %v5838_v47 = vsel %vm5802_vm13, %v5800_v45, 0.0  ;;  %v5539_v34 = vadd.f32 %v5507_v18, %v5474_v22 }
 0x519   : > { %v5870_v4 = vadd.f32 %v5838_v47, %v5572_v38 }
 0x51a   : > { %v5571_v29 = vadd.f32 %v5539_v34, %v5344_v16 }
 0x51b   : > { %v5907_v46 = vadd.f32 %v11654_v61, %v5870_v4 }
 0x51c   : > { %v5869_v37 = vadd.f32 %v5769_v28, %v5571_v29  ;;  %v4953_v29 = vld [vmem:[#allocation3 + $0x20] sm:$0xff] }
 0x51d   : > { %v6050_v44 = vpop.f32.mrf.mxu0  ;;  %v5939_v17 = vmax.f32 %v5907_v46, 0.0 }
 0x51e   : > { %v6051_v27 = vadd.f32 %v11693_v59, %v6050_v44  ;;  %v5906_v11 = vadd.f32 %v11654_v61, %v5869_v37 }
 0x520   : > { %v6114_v1 = vmax.f32 %v6051_v27, 0.0  ;;  %v5938_v9 = vmax.f32 %v5906_v11, 0.0 }
 0x522   : > { %v6140_v8 = vpack.c.bf16 %v6114_v1, %v6113_v60  ;;  %v5955_v7 = vpack.c.bf16 %v5939_v17, %v5938_v9 }
 0x524   : > { %6745 = vmatmul.msk.bf16.gmra.mxu1 %vm278_vm1, %v6140_v8 }
 0x525   : > { %v6053_v15 = vpop.f32.mrf.mxu0 }
 0x526   : > { %v6054_v19 = vadd.f32 %v11693_v59, %v6053_v15 }
 0x528   : > { %6737 = vmatmul.msk.bf16.gmra.mxu0 %vm278_vm1, %v5954_v12  ;;  %v6115_v23 = vmax.f32 %v6054_v19, 0.0 }
 0x52d   : > { %v6055_v3 = vpop.f32.mrf.mxu0 }
 0x52e   : > { %v6056_v2 = vadd.f32 %v11693_v59, %v6055_v3 }
 0x530   : > { %v6116_v5 = vmax.f32 %v6056_v2, 0.0 }
 0x532   : > { %v6141_v13 = vpack.c.bf16 %v6116_v5, %v6115_v23  ;;  %v4954_v5 = vld [vmem:[#allocation3 + $0x28] sm:$0xff] }
 0x534   : > { %6746 = vmatmul.msk.bf16.gmra.mxu1 %vm278_vm1, %v6141_v13 }
 0x535   : > { %v6058_v50 = vpop.f32.mrf.mxu0 }
 0x536   : > { %v6059_v51 = vadd.f32 %v11693_v59, %v6058_v50 }
 0x538   : > { %6738 = vmatmul.msk.bf16.gmra.mxu0 %vm278_vm1, %v5955_v7  ;;  %v6117_v62 = vmax.f32 %v6059_v51, 0.0 }
 0x53d   : > { %v6060_v53 = vpop.f32.mrf.mxu0 }
 0x53e   : > { %v6061_v33 = vadd.f32 %v11693_v59, %v6060_v53 }
 0x540   : > { %v6118_v42 = vmax.f32 %v6061_v33, 0.0 }
 0x542   : > { %v6142_v49 = vpack.c.bf16 %v6118_v42, %v6117_v62  ;;  %v4955_v42 = vld [vmem:[#allocation3 + $0x30] sm:$0xff] }
 0x544   : > { %6747 = vmatmul.msk.bf16.gmra.mxu1 %vm278_vm1, %v6142_v49 }
 0x545   : > { %v6063_v61 = vpop.f32.mrf.mxu0 }
 0x546   : > { %v6064_v25 = vadd.f32 %v11693_v59, %v6063_v61 }
 0x548   : > { %v6119_v43 = vmax.f32 %v6064_v25, 0.0 }
 0x54d   : > { %v6065_v26 = vpop.f32.mrf.mxu0 }
 0x54e   : > { %v6066_v63 = vadd.f32 %v11693_v59, %v6065_v26 }
 0x550   : > { %v6120_v48 = vmax.f32 %v6066_v63, 0.0 }
 0x551   : > { %v6213_v55 = vpop.f32.mrf.mxu1 }
 0x552   : > { %v6143_v44 = vpack.c.bf16 %v6120_v48, %v6119_v43  ;;  %v6293_v27 = vadd.f32 %v6213_v55, %v4949_v24  ;;  %v4956_v24 = vld [vmem:[#allocation3 + $0x38] sm:$0xff] }
 0x554   : > { %6325 = vst.msk [vmem:[#allocation3] sm:$0xff] %vm1682_vm7, %v6293_v27  ;;  %6748 = vmatmul.msk.bf16.gmra.mxu1 %vm278_vm1, %v6143_v44 }
 0x555   : > { %v6068_v30 = vpop.f32.mrf.mxu0 }
 0x556   : > { %v6069_v1 = vadd.f32 %v11693_v59, %v6068_v30 }
 0x558   : > { %v6121_v8 = vmax.f32 %v6069_v1, 0.0 }
 0x559   : > { %v6215_v60 = vpop.f32.mrf.mxu1 }
 0x55a   : > { %v6294_v54 = vadd.f32 %v6215_v60, %v4950_v58 }
 0x55b   : > { %v6357_v39 = vld [vmem:[#allocation3] sm:$0xff] }
 0x55c   : > { %v6393_v6 = vadd.f32 %v12095_v36, %v6357_v39  ;;  %6326 = vst.msk [vmem:[#allocation3 + $0x8] sm:$0xff] %vm1682_vm7, %v6294_v54 }
 0x55d   : > { %v6070_v31 = vpop.f32.mrf.mxu0 }
 0x55e   : > { %v6425_v56 = vmax.f32 %v6393_v6, 0.0  ;;  %v6071_v0 = vadd.f32 %v11693_v59, %v6070_v31  ;;  %v4957_v31 = vld [vmem:[#allocation3 + $0x40] sm:$0xff] }
 0x560   : > { %6457 = vst.msk [vmem:[%s12103_s22] sm:$0xff] %vm1682_vm7, %v6425_v56  ;;  %v6122_v21 = vmax.f32 %v6071_v0, 0.0 }
 0x561   : > { %v6218_v57 = vpop.f32.mrf.mxu1 }
 0x562   : > { %v6144_v10 = vpack.c.bf16 %v6122_v21, %v6121_v8  ;;  %v6295_v14 = vadd.f32 %v6218_v57, %v4951_v20 }
 0x563   : > { %v6358_v52 = vld [vmem:[#allocation3 + $0x8] sm:$0xff] }
 0x564   : > { %v6394_v18 = vadd.f32 %v12095_v36, %v6358_v52  ;;  %6327 = vst.msk [vmem:[#allocation3 + $0x10] sm:$0xff] %vm1682_vm7, %v6295_v14  ;;  %6749 = vmatmul.msk.bf16.gmra.mxu1 %vm278_vm1, %v6144_v10  ;;  %v4958_v14 = vld [vmem:[#allocation3 + $0x48] sm:$0xff] }
 0x565   : > { %v6073_v41 = vpop.f32.mrf.mxu0 }
 0x566   : > { %v6426_v22 = vmax.f32 %v6394_v18, 0.0  ;;  %v6074_v12 = vadd.f32 %v11693_v59, %v6073_v41 }
 0x568   : > { %6458 = vst.msk [vmem:[%s12103_s22 + $0x8] sm:$0xff] %vm1682_vm7, %v6426_v22  ;;  %v6123_v34 = vmax.f32 %v6074_v12, 0.0 }
 0x569   : > { %v6220_v35 = vpop.f32.mrf.mxu1 }
 0x56a   : > { %v6296_v32 = vadd.f32 %v6220_v35, %v4952_v40 }
 0x56b   : > { %v6359_v45 = vld [vmem:[#allocation3 + $0x10] sm:$0xff] }
 0x56c   : > { %v6395_v15 = vadd.f32 %v12095_v36, %v6359_v45  ;;  %6328 = vst.msk [vmem:[#allocation3 + $0x18] sm:$0xff] %vm1682_vm7, %v6296_v32 }
 0x56d   : > { %v6075_v38 = vpop.f32.mrf.mxu0 }
 0x56e   : > { %v6427_v16 = vmax.f32 %v6395_v15, 0.0  ;;  %v6076_v47 = vadd.f32 %v11693_v59, %v6075_v38  ;;  %v4959_v38 = vld [vmem:[#allocation3 + $0x50] sm:$0xff] }
 0x570   : > { %6459 = vst.msk [vmem:[%s12103_s22 + $0x10] sm:$0xff] %vm1682_vm7, %v6427_v16  ;;  %v6124_v28 = vmax.f32 %v6076_v47, 0.0 }
 0x571   : > { %v6223_v4 = vpop.f32.mrf.mxu1 }
 0x572   : > { %v6145_v19 = vpack.c.bf16 %v6124_v28, %v6123_v34  ;;  %v6297_v37 = vadd.f32 %v6223_v4, %v4953_v29 }
 0x573   : > { %v6360_v3 = vld [vmem:[#allocation3 + $0x18] sm:$0xff] }
 0x574   : > { %v6396_v2 = vadd.f32 %v12095_v36, %v6360_v3  ;;  %6329 = vst.msk [vmem:[#allocation3 + $0x20] sm:$0xff] %vm1682_vm7, %v6297_v37  ;;  %6750 = vmatmul.msk.bf16.gmra.mxu1 %vm278_vm1, %v6145_v19 }
 0x575   : > { %v6078_v46 = vpop.f32.mrf.mxu0 }
 0x576   : > { %v6428_v23 = vmax.f32 %v6396_v2, 0.0  ;;  %v6079_v50 = vadd.f32 %v11693_v59, %v6078_v46 }
 0x578   : > { %6460 = vst.msk [vmem:[%s12103_s22 + $0x18] sm:$0xff] %vm1682_vm7, %v6428_v23  ;;  %v6125_v33 = vmax.f32 %v6079_v50, 0.0  ;;  %v6855_v23 = vld [vmem:[%s12286_s4 + $0x4] ss:$0 sm:$0xff] }
 0x579   : > { %v6225_v11 = vpop.f32.mrf.mxu1 }
 0x57a   : > { %v6298_v13 = vadd.f32 %v6225_v11, %v4954_v5 }
 0x57b   : > { %v6361_v17 = vld [vmem:[#allocation3 + $0x20] sm:$0xff] }
 0x57c   : > { %v6397_v9 = vadd.f32 %v12095_v36, %v6361_v17  ;;  %6330 = vst.msk [vmem:[#allocation3 + $0x28] sm:$0xff] %vm1682_vm7, %v6298_v13 }
 0x57d   : > { %v6080_v7 = vpop.f32.mrf.mxu0 }
 0x57e   : > { %v6429_v51 = vmax.f32 %v6397_v9, 0.0  ;;  %v6081_v53 = vadd.f32 %v11693_v59, %v6080_v7  ;;  %v4961_v7 = vld [vmem:[#allocation3 + $0x60] sm:$0xff] }
 0x580   : > { %6461 = vst.msk [vmem:[%s12103_s22 + $0x20] sm:$0xff] %vm1682_vm7, %v6429_v51  ;;  %v6126_v62 = vmax.f32 %v6081_v53, 0.0 }
 0x581   : > { %v6228_v49 = vpop.f32.mrf.mxu1 }
 0x582   : > { %v6146_v61 = vpack.c.bf16 %v6126_v62, %v6125_v33  ;;  %v6299_v25 = vadd.f32 %v6228_v49, %v4955_v42 }
 0x583   : > { %v6362_v26 = vld [vmem:[#allocation3 + $0x28] sm:$0xff] }
 0x584   : > { %v6398_v63 = vadd.f32 %v12095_v36, %v6362_v26  ;;  %6331 = vst.msk [vmem:[#allocation3 + $0x30] sm:$0xff] %vm1682_vm7, %v6299_v25  ;;  %6751 = vmatmul.msk.bf16.gmra.mxu1 %vm278_vm1, %v6146_v61  ;;  %v4962_v25 = vld [vmem:[#allocation3 + $0x68] sm:$0xff] }
 0x585   : > { %v6083_v43 = vpop.f32.mrf.mxu0 }
 0x586   : > { %v6430_v48 = vmax.f32 %v6398_v63, 0.0  ;;  %v6084_v58 = vadd.f32 %v11693_v59, %v6083_v43 }
 0x588   : > { %6462 = vst.msk [vmem:[%s12103_s22 + $0x28] sm:$0xff] %vm1682_vm7, %v6430_v48  ;;  %v6127_v6 = vmax.f32 %v6084_v58, 0.0 }
 0x589   : > { %v6230_v55 = vpop.f32.mrf.mxu1 }
 0x58a   : > { %v6300_v44 = vadd.f32 %v6230_v55, %v4956_v24 }
 0x58b   : > { %v6363_v27 = vld [vmem:[#allocation3 + $0x30] sm:$0xff] }
 0x58c   : > { %v6399_v30 = vadd.f32 %v12095_v36, %v6363_v27  ;;  %6332 = vst.msk [vmem:[#allocation3 + $0x38] sm:$0xff] %vm1682_vm7, %v6300_v44 }
 0x58d   : > { %v6085_v60 = vpop.f32.mrf.mxu0 }
 0x58e   : > { %v6431_v54 = vmax.f32 %v6399_v30, 0.0  ;;  %v6086_v39 = vadd.f32 %v11693_v59, %v6085_v60  ;;  %v4963_v60 = vld [vmem:[#allocation3 + $0x70] sm:$0xff] }
 0x590   : > { %6463 = vst.msk [vmem:[%s12103_s22 + $0x30] sm:$0xff] %vm1682_vm7, %v6431_v54  ;;  %v6128_v1 = vmax.f32 %v6086_v39, 0.0 }
 0x591   : > { %v6233_v56 = vpop.f32.mrf.mxu1 }
 0x592   : > { %v6147_v0 = vpack.c.bf16 %v6128_v1, %v6127_v6  ;;  %v6301_v8 = vadd.f32 %v6233_v56, %v4957_v31 }
 0x593   : > { %v6364_v21 = vld [vmem:[#allocation3 + $0x38] sm:$0xff] }
 0x594   : > { %v6400_v20 = vadd.f32 %v12095_v36, %v6364_v21  ;;  %6333 = vst.msk [vmem:[#allocation3 + $0x40] sm:$0xff] %vm1682_vm7, %v6301_v8  ;;  %6752 = vmatmul.msk.bf16.gmra.mxu1 %vm278_vm1, %v6147_v0  ;;  %v4964_v0 = vld [vmem:[#allocation3 + $0x78] sm:$0xff] }
 0x595   : > { %v6088_v57 = vpop.f32.mrf.mxu0 }
 0x596   : > { %v6432_v10 = vmax.f32 %v6400_v20, 0.0  ;;  %v6089_v40 = vadd.f32 %v11693_v59, %v6088_v57 }
 0x598   : > { %6464 = vst.msk [vmem:[%s12103_s22 + $0x38] sm:$0xff] %vm1682_vm7, %v6432_v10  ;;  %v6129_v15 = vmax.f32 %v6089_v40, 0.0 }
 0x599   : > { %v6235_v52 = vpop.f32.mrf.mxu1 }
 0x59a   : > { %v6302_v18 = vadd.f32 %v6235_v52, %v4958_v14  ;;  %v4965_v14 = vld [vmem:[#allocation3 + $0x80] sm:$0xff] }
 0x59b   : > { %v6365_v41 = vld [vmem:[#allocation3 + $0x40] sm:$0xff] }
 0x59c   : > { %v6401_v22 = vadd.f32 %v12095_v36, %v6365_v41  ;;  %6334 = vst.msk [vmem:[#allocation3 + $0x48] sm:$0xff] %vm1682_vm7, %v6302_v18 }
 0x59d   : > { %v6090_v35 = vpop.f32.mrf.mxu0 }
 0x59e   : > { %v6433_v32 = vmax.f32 %v6401_v22, 0.0  ;;  %v6091_v45 = vadd.f32 %v11693_v59, %v6090_v35  ;;  %v4960_v59 = vld [vmem:[#allocation3 + $0x58] sm:$0xff]  ;;  %v4966_v35 = vld [vmem:[#allocation3 + $0x88] sm:$0xff] }
 0x5a0   : > { %6465 = vst.msk [vmem:[%s12103_s22 + $0x40] sm:$0xff] %vm1682_vm7, %v6433_v32  ;;  %v6130_v12 = vmax.f32 %v6091_v45, 0.0 }
 0x5a1   : > { %v6238_v16 = vpop.f32.mrf.mxu1 }
 0x5a2   : > { %v6148_v47 = vpack.c.bf16 %v6130_v12, %v6129_v15  ;;  %v6303_v34 = vadd.f32 %v6238_v16, %v4959_v38  ;;  %v4967_v16 = vld [vmem:[#allocation3 + $0x90] sm:$0xff] }
 0x5a3   : > { %v6366_v28 = vld [vmem:[#allocation3 + $0x48] sm:$0xff] }
 0x5a4   : > { %v6402_v29 = vadd.f32 %v12095_v36, %v6366_v28  ;;  %6335 = vst.msk [vmem:[#allocation3 + $0x50] sm:$0xff] %vm1682_vm7, %v6303_v34  ;;  %6753 = vmatmul.msk.bf16.gmra.mxu1 %vm278_vm1, %v6148_v47 }
 0x5a5   : > { %v6093_v4 = vpop.f32.mrf.mxu0 }
 0x5a6   : > { %v6434_v19 = vmax.f32 %v6402_v29, 0.0  ;;  %v6094_v5 = vadd.f32 %v6855_v23, %v6093_v4 }
 0x5a8   : > { %6466 = vst.msk [vmem:[%s12103_s22 + $0x48] sm:$0xff] %vm1682_vm7, %v6434_v19  ;;  %v6131_v9 = vmax.f32 %v6094_v5, 0.0  ;;  %v4968_v19 = vld [vmem:[#allocation3 + $0x98] sm:$0xff] }
 0x5a9   : > { %v6240_v37 = vpop.f32.mrf.mxu1 }
 0x5aa   : > { %v6304_v3 = vadd.f32 %v6240_v37, %v4960_v59 }
 0x5ab   : > { %v6367_v2 = vld [vmem:[#allocation3 + $0x50] sm:$0xff] }
 0x5ac   : > { %v6403_v46 = vadd.f32 %v12095_v36, %v6367_v2  ;;  %6336 = vst.msk [vmem:[#allocation3 + $0x58] sm:$0xff] %vm1682_vm7, %v6304_v3 }
 0x5ad   : > { %v6095_v11 = vpop.f32.mrf.mxu0 }
 0x5ae   : > { %v6435_v13 = vmax.f32 %v6403_v46, 0.0  ;;  %v6096_v17 = vadd.f32 %v6855_v23, %v6095_v11 }
 0x5b0   : > { %6467 = vst.msk [vmem:[%s12103_s22 + $0x50] sm:$0xff] %vm1682_vm7, %v6435_v13  ;;  %v6132_v50 = vmax.f32 %v6096_v17, 0.0 }
 0x5b1   : > { %v6243_v51 = vpop.f32.mrf.mxu1 }
 0x5b2   : > { %v6149_v53 = vpack.c.bf16 %v6132_v50, %v6131_v9  ;;  %v6305_v33 = vadd.f32 %v6243_v51, %v4961_v7  ;;  %v4970_v50 = vld [vmem:[#allocation3 + $0xa8] sm:$0xff] }
 0x5b3   : > { %v6368_v62 = vld [vmem:[#allocation3 + $0x58] sm:$0xff] }
 0x5b4   : > { %v6404_v42 = vadd.f32 %v12095_v36, %v6368_v62  ;;  %6337 = vst.msk [vmem:[#allocation3 + $0x60] sm:$0xff] %vm1682_vm7, %v6305_v33  ;;  %6754 = vmatmul.msk.bf16.gmra.mxu1 %vm278_vm1, %v6149_v53 }
 0x5b5   : > { %v6098_v49 = vpop.f32.mrf.mxu0 }
 0x5b6   : > { %v6436_v61 = vmax.f32 %v6404_v42, 0.0  ;;  %v6099_v24 = vadd.f32 %v6855_v23, %v6098_v49  ;;  %v4971_v42 = vld [vmem:[#allocation3 + $0xb0] sm:$0xff] }
 0x5b8   : > { %6468 = vst.msk [vmem:[%s12103_s22 + $0x58] sm:$0xff] %vm1682_vm7, %v6436_v61  ;;  %v6133_v30 = vmax.f32 %v6099_v24, 0.0 }
 0x5b9   : > { %v6245_v26 = vpop.f32.mrf.mxu1 }
 0x5ba   : > { %v6306_v63 = vadd.f32 %v6245_v26, %v4962_v25 }
 0x5bb   : > { %v6369_v43 = vld [vmem:[#allocation3 + $0x60] sm:$0xff] }
 0x5bc   : > { %v6405_v48 = vadd.f32 %v12095_v36, %v6369_v43  ;;  %6338 = vst.msk [vmem:[#allocation3 + $0x68] sm:$0xff] %vm1682_vm7, %v6306_v63  ;;  %v4972_v43 = vld [vmem:[#allocation3 + $0xb8] sm:$0xff] }
 0x5bd   : > { %v6100_v55 = vpop.f32.mrf.mxu0 }
 0x5be   : > { %v6437_v44 = vmax.f32 %v6405_v48, 0.0  ;;  %v6101_v27 = vadd.f32 %v6855_v23, %v6100_v55  ;;  %v4969_v23 = vld [vmem:[#allocation3 + $0xa0] sm:$0xff] }
 0x5c0   : > { %6469 = vst.msk [vmem:[%s12103_s22 + $0x60] sm:$0xff] %vm1682_vm7, %v6437_v44  ;;  %v6134_v58 = vmax.f32 %v6101_v27, 0.0 }
 0x5c1   : > { %v6248_v54 = vpop.f32.mrf.mxu1 }
 0x5c2   : > { %v6150_v39 = vpack.c.bf16 %v6134_v58, %v6133_v30  ;;  %v6307_v6 = vadd.f32 %v6248_v54, %v4963_v60  ;;  %v4973_v30 = vld [vmem:[#allocation3 + $0xc0] sm:$0xff] }
 0x5c3   : > { %v6370_v1 = vld [vmem:[#allocation3 + $0x68] sm:$0xff] }
 0x5c4   : > { %v6406_v31 = vadd.f32 %v12095_v36, %v6370_v1  ;;  %6339 = vst.msk [vmem:[#allocation3 + $0x70] sm:$0xff] %vm1682_vm7, %v6307_v6  ;;  %6755 = vmatmul.msk.bf16.gmra.mxu1 %vm278_vm1, %v6150_v39  ;;  %v4974_v1 = vld [vmem:[#allocation3 + $0xc8] sm:$0xff] }
 0x5c6   : > { %v6438_v56 = vmax.f32 %v6406_v31, 0.0 }
 0x5c8   : > { %6470 = vst.msk [vmem:[%s12103_s22 + $0x68] sm:$0xff] %vm1682_vm7, %v6438_v56 }
 0x5c9   : > { %v6250_v8 = vpop.f32.mrf.mxu1 }
 0x5ca   : > { %v6308_v21 = vadd.f32 %v6250_v8, %v4964_v0 }
 0x5cb   : > { %v6371_v20 = vld [vmem:[#allocation3 + $0x70] sm:$0xff] }
 0x5cc   : > { %v6407_v57 = vadd.f32 %v12095_v36, %v6371_v20  ;;  %6340 = vst.msk [vmem:[#allocation3 + $0x78] sm:$0xff] %vm1682_vm7, %v6308_v21  ;;  %v4975_v20 = vld [vmem:[#allocation3 + $0xd0] sm:$0xff] }
 0x5ce   : > { %v6439_v10 = vmax.f32 %v6407_v57, 0.0 }
 0x5d0   : > { %6471 = vst.msk [vmem:[%s12103_s22 + $0x70] sm:$0xff] %vm1682_vm7, %v6439_v10 }
 0x5d1   : > { %v6253_v52 = vpop.f32.mrf.mxu1 }
 0x5d2   : > { %v6309_v18 = vadd.f32 %v6253_v52, %v4965_v14 }
 0x5d3   : > { %v6372_v41 = vld [vmem:[#allocation3 + $0x78] sm:$0xff] }
 0x5d4   : > { %v6408_v22 = vadd.f32 %v12095_v36, %v6372_v41  ;;  %6341 = vst.msk [vmem:[#allocation3 + $0x80] sm:$0xff] %vm1682_vm7, %v6309_v18  ;;  %v4976_v41 = vld [vmem:[#allocation3 + $0xd8] sm:$0xff] }
 0x5d6   : > { %v6440_v40 = vmax.f32 %v6408_v22, 0.0 }
 0x5d8   : > { %6472 = vst.msk [vmem:[%s12103_s22 + $0x78] sm:$0xff] %vm1682_vm7, %v6440_v40 }
 0x5d9   : > { %v6255_v32 = vpop.f32.mrf.mxu1 }
 0x5da   : > { %v6310_v45 = vadd.f32 %v6255_v32, %v4966_v35 }
 0x5db   : > { %v6373_v15 = vld [vmem:[#allocation3 + $0x80] sm:$0xff] }
 0x5dc   : > { %v6409_v12 = vadd.f32 %v12095_v36, %v6373_v15  ;;  %6342 = vst.msk [vmem:[#allocation3 + $0x88] sm:$0xff] %vm1682_vm7, %v6310_v45  ;;  %v4977_v15 = vld [vmem:[#allocation3 + $0xe0] sm:$0xff] }
 0x5de   : > { %v6441_v38 = vmax.f32 %v6409_v12, 0.0 }
 0x5e0   : > { %6473 = vst.msk [vmem:[%s12103_s22 + $0x80] sm:$0xff] %vm1682_vm7, %v6441_v38 }
 0x5e1   : > { %v6258_v47 = vpop.f32.mrf.mxu1 }
 0x5e2   : > { %v6311_v34 = vadd.f32 %v6258_v47, %v4967_v16 }
 0x5e3   : > { %v6374_v28 = vld [vmem:[#allocation3 + $0x88] sm:$0xff] }
 0x5e4   : > { %v6410_v29 = vadd.f32 %v12095_v36, %v6374_v28  ;;  %6343 = vst.msk [vmem:[#allocation3 + $0x90] sm:$0xff] %vm1682_vm7, %v6311_v34  ;;  %v4978_v28 = vld [vmem:[#allocation3 + $0xe8] sm:$0xff] }
 0x5e6   : > { %v6442_v4 = vmax.f32 %v6410_v29, 0.0 }
 0x5e8   : > { %6474 = vst.msk [vmem:[%s12103_s22 + $0x88] sm:$0xff] %vm1682_vm7, %v6442_v4 }
 0x5e9   : > { %v6260_v59 = vpop.f32.mrf.mxu1 }
 0x5ea   : > { %v6312_v37 = vadd.f32 %v6260_v59, %v4968_v19 }
 0x5eb   : > { %v6375_v3 = vld [vmem:[#allocation3 + $0x90] sm:$0xff] }
 0x5ec   : > { %v6411_v2 = vadd.f32 %v12095_v36, %v6375_v3  ;;  %6344 = vst.msk [vmem:[#allocation3 + $0x98] sm:$0xff] %vm1682_vm7, %v6312_v37  ;;  %v4979_v3 = vld [vmem:[#allocation3 + $0xf0] sm:$0xff] }
 0x5ee   : > { %v6443_v46 = vmax.f32 %v6411_v2, 0.0 }
 0x5f0   : > { %6475 = vst.msk [vmem:[%s12103_s22 + $0x90] sm:$0xff] %vm1682_vm7, %v6443_v46 }
 0x5f1   : > { %v6263_v5 = vpop.f32.mrf.mxu1 }
 0x5f2   : > { %v6313_v11 = vadd.f32 %v6263_v5, %v4969_v23 }
 0x5f3   : > { %v6376_v13 = vld [vmem:[#allocation3 + $0x98] sm:$0xff] }
 0x5f4   : > { %v6412_v17 = vadd.f32 %v12095_v36, %v6376_v13  ;;  %6345 = vst.msk [vmem:[#allocation3 + $0xa0] sm:$0xff] %vm1682_vm7, %v6313_v11  ;;  %v4980_v13 = vld [vmem:[#allocation3 + $0xf8] sm:$0xff] }
 0x5f6   : > { %v6444_v9 = vmax.f32 %v6412_v17, 0.0 }
 0x5f8   : > { %6476 = vst.msk [vmem:[%s12103_s22 + $0x98] sm:$0xff] %vm1682_vm7, %v6444_v9 }
 0x5f9   : > { %v6265_v7 = vpop.f32.mrf.mxu1 }
 0x5fa   : > { %v6314_v51 = vadd.f32 %v6265_v7, %v4970_v50 }
 0x5fb   : > { %v6377_v53 = vld [vmem:[#allocation3 + $0xa0] sm:$0xff] }
 0x5fc   : > { %v6413_v33 = vadd.f32 %v12095_v36, %v6377_v53  ;;  %6346 = vst.msk [vmem:[#allocation3 + $0xa8] sm:$0xff] %vm1682_vm7, %v6314_v51 }
 0x5fe   : > { %v6445_v62 = vmax.f32 %v6413_v33, 0.0 }
 0x600   : > { %6477 = vst.msk [vmem:[%s12103_s22 + $0xa0] sm:$0xff] %vm1682_vm7, %v6445_v62 }
 0x601   : > { %v6268_v49 = vpop.f32.mrf.mxu1 }
 0x602   : > { %v6315_v61 = vadd.f32 %v6268_v49, %v4971_v42 }
 0x603   : > { %v6378_v25 = vld [vmem:[#allocation3 + $0xa8] sm:$0xff] }
 0x604   : > { %v6414_v26 = vadd.f32 %v12095_v36, %v6378_v25  ;;  %6347 = vst.msk [vmem:[#allocation3 + $0xb0] sm:$0xff] %vm1682_vm7, %v6315_v61 }
 0x606   : > { %v6446_v63 = vmax.f32 %v6414_v26, 0.0 }
 0x608   : > { %6478 = vst.msk [vmem:[%s12103_s22 + $0xa8] sm:$0xff] %vm1682_vm7, %v6446_v63 }
 0x609   : > { %v6270_v48 = vpop.f32.mrf.mxu1 }
 0x60a   : > { %v6316_v24 = vadd.f32 %v6270_v48, %v4972_v43 }
 0x60b   : > { %v6379_v55 = vld [vmem:[#allocation3 + $0xb0] sm:$0xff] }
 0x60c   : > { %v6415_v44 = vadd.f32 %v12095_v36, %v6379_v55  ;;  %6348 = vst.msk [vmem:[#allocation3 + $0xb8] sm:$0xff] %vm1682_vm7, %v6316_v24 }
 0x60e   : > { %v6447_v27 = vmax.f32 %v6415_v44, 0.0 }
 0x610   : > { %6479 = vst.msk [vmem:[%s12103_s22 + $0xb0] sm:$0xff] %vm1682_vm7, %v6447_v27 }
 0x611   : > { %v6273_v58 = vpop.f32.mrf.mxu1 }
 0x612   : > { %v6317_v60 = vadd.f32 %v6273_v58, %v4973_v30 }
 0x613   : > { %v6380_v54 = vld [vmem:[#allocation3 + $0xb8] sm:$0xff] }
 0x614   : > { %v6416_v39 = vadd.f32 %v12095_v36, %v6380_v54  ;;  %6349 = vst.msk [vmem:[#allocation3 + $0xc0] sm:$0xff] %vm1682_vm7, %v6317_v60 }
 0x616   : > { %v6448_v6 = vmax.f32 %v6416_v39, 0.0 }
 0x618   : > { %6480 = vst.msk [vmem:[%s12103_s22 + $0xb8] sm:$0xff] %vm1682_vm7, %v6448_v6 }
 0x619   : > { %v6275_v31 = vpop.f32.mrf.mxu1 }
 0x61a   : > { %v6318_v56 = vadd.f32 %v6275_v31, %v4974_v1 }
 0x61b   : > { %v6381_v0 = vld [vmem:[#allocation3 + $0xc0] sm:$0xff] }
 0x61c   : > { %v6417_v8 = vadd.f32 %v12095_v36, %v6381_v0  ;;  %6350 = vst.msk [vmem:[#allocation3 + $0xc8] sm:$0xff] %vm1682_vm7, %v6318_v56 }
 0x61e   : > { %v6449_v21 = vmax.f32 %v6417_v8, 0.0 }
 0x620   : > { %6481 = vst.msk [vmem:[%s12103_s22 + $0xc0] sm:$0xff] %vm1682_vm7, %v6449_v21 }
 0x621   : > { %v6278_v57 = vpop.f32.mrf.mxu1 }
 0x622   : > { %v6319_v10 = vadd.f32 %v6278_v57, %v4975_v20 }
 0x623   : > { %v6382_v14 = vld [vmem:[#allocation3 + $0xc8] sm:$0xff] }
 0x624   : > { %v6418_v52 = vadd.f32 %v12095_v36, %v6382_v14  ;;  %6351 = vst.msk [vmem:[#allocation3 + $0xd0] sm:$0xff] %vm1682_vm7, %v6319_v10 }
 0x626   : > { %v6450_v18 = vmax.f32 %v6418_v52, 0.0 }
 0x628   : > { %6482 = vst.msk [vmem:[%s12103_s22 + $0xc8] sm:$0xff] %vm1682_vm7, %v6450_v18 }
 0x629   : > { %v6280_v22 = vpop.f32.mrf.mxu1 }
 0x62a   : > { %v6320_v40 = vadd.f32 %v6280_v22, %v4976_v41 }
 0x62b   : > { %v6383_v35 = vld [vmem:[#allocation3 + $0xd0] sm:$0xff] }
 0x62c   : > { %v6419_v32 = vadd.f32 %v12095_v36, %v6383_v35  ;;  %6352 = vst.msk [vmem:[#allocation3 + $0xd8] sm:$0xff] %vm1682_vm7, %v6320_v40 }
 0x62e   : > { %v6451_v45 = vmax.f32 %v6419_v32, 0.0 }
 0x630   : > { %6483 = vst.msk [vmem:[%s12103_s22 + $0xd0] sm:$0xff] %vm1682_vm7, %v6451_v45 }
 0x631   : > { %v6283_v12 = vpop.f32.mrf.mxu1 }
 0x632   : > { %v6321_v38 = vadd.f32 %v6283_v12, %v4977_v15 }
 0x633   : > { %v6384_v16 = vld [vmem:[#allocation3 + $0xd8] sm:$0xff] }
 0x634   : > { %v6420_v47 = vadd.f32 %v12095_v36, %v6384_v16  ;;  %6353 = vst.msk [vmem:[#allocation3 + $0xe0] sm:$0xff] %vm1682_vm7, %v6321_v38 }
 0x636   : > { %v6452_v34 = vmax.f32 %v6420_v47, 0.0 }
 0x638   : > { %6484 = vst.msk [vmem:[%s12103_s22 + $0xd8] sm:$0xff] %vm1682_vm7, %v6452_v34 }
 0x639   : > { %v6285_v29 = vpop.f32.mrf.mxu1 }
 0x63a   : > { %v6322_v4 = vadd.f32 %v6285_v29, %v4978_v28 }
 0x63b   : > { %v6385_v19 = vld [vmem:[#allocation3 + $0xe0] sm:$0xff] }
 0x63c   : > { %v6421_v59 = vadd.f32 %v12095_v36, %v6385_v19  ;;  %6354 = vst.msk [vmem:[#allocation3 + $0xe8] sm:$0xff] %vm1682_vm7, %v6322_v4 }
 0x63e   : > { %v6453_v37 = vmax.f32 %v6421_v59, 0.0 }
 0x640   : > { %6485 = vst.msk [vmem:[%s12103_s22 + $0xe0] sm:$0xff] %vm1682_vm7, %v6453_v37 }
 0x641   : > { %v6288_v2 = vpop.f32.mrf.mxu1 }
 0x642   : > { %v6323_v46 = vadd.f32 %v6288_v2, %v4979_v3 }
 0x643   : > { %v6386_v23 = vld [vmem:[#allocation3 + $0xe8] sm:$0xff] }
 0x644   : > { %v6422_v5 = vadd.f32 %v12095_v36, %v6386_v23  ;;  %6355 = vst.msk [vmem:[#allocation3 + $0xf0] sm:$0xff] %vm1682_vm7, %v6323_v46 }
 0x646   : > { %v6454_v11 = vmax.f32 %v6422_v5, 0.0 }
 0x648   : > { %6486 = vst.msk [vmem:[%s12103_s22 + $0xe8] sm:$0xff] %vm1682_vm7, %v6454_v11 }
 0x649   : > { %v6290_v17 = vpop.f32.mrf.mxu1 }
 0x64a   : > { %v6324_v9 = vadd.f32 %v6290_v17, %v4980_v13 }
 0x64b   : > { %v6387_v50 = vld [vmem:[#allocation3 + $0xf0] sm:$0xff] }
 0x64c   : > { %v6423_v7 = vadd.f32 %v12095_v36, %v6387_v50  ;;  %6356 = vst.msk [vmem:[#allocation3 + $0xf8] sm:$0xff] %vm1682_vm7, %v6324_v9 }
 0x64e   : > { %v6455_v51 = vmax.f32 %v6423_v7, 0.0 }
 0x650   : > { %6487 = vst.msk [vmem:[%s12103_s22 + $0xf0] sm:$0xff] %vm1682_vm7, %v6455_v51 }
 0x653   : > { %v6388_v53 = vld [vmem:[#allocation3 + $0xf8] sm:$0xff] }
 0x654   : > { %v6424_v33 = vadd.f32 %v12095_v36, %v6388_v53 }
 0x656   : > { %v6456_v62 = vmax.f32 %v6424_v33, 0.0 }
 0x658   : > { %6488 = vst.msk [vmem:[%s12103_s22 + $0xf8] sm:$0xff] %vm1682_vm7, %v6456_v62 }
 0x659   : > { %6883 = shalt.err (!%p6880_p3)
}
 0x65a   : > { %s6921_s18 = smov 128   ;;  %s6922_s22 = smov 8  }
 0x65b   : > { %6765 = dma.vmem_to_hbm [thread:$0]  (%p7001_p5), %s6503_s15, 4096, %s6505_s16, %s6490_s28, %s6921_s18, %s6921_s18, %s6922_s22  }
 0x65c PF: > { %p6771_p4 = scmp.ge.s32.totalorder %s6918_s27, 2  ;;  %s6519_s9 = sand.u32 1, %s6906_s24  }
 0x65d   : > { %s6520_s13 = scalar_lea.sflag [#allocation5], %s6519_s9 }
 0x65e   : > { %p6768_p7 = pnand %p6771_p4, %p7005_p6 }
 0x660   : > { %p6769_p8 = pneg %p6768_p7 }
 0x662   : > { %6901 = dma.done.wait (%p6769_p8), %s6520_s13, 4096  }
 0x663   : > { %6903 = vsyncadd (%p6769_p8), %s6520_s13, 4294963200  ;;  %p17_p9 = scmp.ge.s32.totalorder %s6988_s30, 4   ;;  %s12559_s24 = smov %s6910_s25 }
 0x664   : > { %s12560_s25 = smov %s6914_s26  ;;  %s12561_s26 = smov %s6999_s10 }
 0x665   : > { %s12562_s27 = smov %s6988_s30  ;;  %19 = sbr.rel (!%p17_p9) target bundleno = 3 (0x3), region = 108 }
 0x66a   :  { %6526 = vsyncpa [#allocation5], 1 }
 0x66b   :  { %6528 = vsyncpa [#allocation5 + $0x1], 1 }

</bundles_post_ra>
